<compile_context>
chip_gen: v7x
topology: tpu7x:2x2x1
jax: 0.10.0
libtpu: 0.0.40
codegen_flags: <defaults>
</compile_context>

<pallas_src>
import jax
import jax.numpy as jnp
from jax.experimental import pallas as pl
from jax.experimental.pallas import tpu as pltpu

EMB_DIMS = 512
BN_EPS = 1e-5

_VMEM_LIMIT = 32 * 1024 * 1024      # layers 2-4: small blocks, default scoped cap
_VMEM_LIMIT_L1 = 48 * 1024 * 1024   # layer 1: wide (512ch) input; safe on v7x (64 MiB/TC)

# Max N-tile per layer, chosen so the bf16 activation block stays ~1-2 MiB:
#   layer1 (512->256), layer2 (256->128), layer3 (128->64), layer4 (64->4)
_LAYER_MAX_TILE = (2048, 4096, 8192, 8192)


def _pick_tile(n, max_tile):
    """Largest divisor of n that is <= max_tile and a multiple of 128 (or n itself)."""
    start = (min(max_tile, n) // 128) * 128
    for cand in range(start, 0, -128):
        if n % cand == 0:
            return cand
    # TODO(synk): for very large N with no 128-multiple divisor this full-row fallback
    # can exceed VMEM; such N would need padding + masked BN partial sums.
    return n


def _make_layer_kernel(apply_bn, compute_stats, accum, inv_m):
    """Fused [BN-apply(prev stats) + ReLU] -> Conv1d(k=1) -> [BN partial stats]."""

    def _scale_shift(stats, gb):
        # Reduce per-(b[,tile]) partial sums -> per-channel scale/shift, all f32.
        s = jnp.sum(stats.astype(jnp.float32), axis=tuple(range(stats.ndim - 2)))
        mean = s[:, 0:1] * inv_m                                   # (C_in, 1)
        var = jnp.maximum(s[:, 1:2] * inv_m - mean * mean, 0.0)    # biased (train mode)
        scale = gb[:, 0:1] * jax.lax.rsqrt(var + BN_EPS)
        shift = gb[:, 1:2] - mean * scale
        return scale, shift

    def kernel(*refs):
        i = 0
        if apply_bn:
            stats_ref, gb_ref = refs[0], refs[1]
            i = 2
        a_ref, w_ref, z_ref = refs[i], refs[i + 1], refs[i + 2]
        st_ref = refs[i + 3] if compute_stats else None
        ss_ref = refs[-1] if (apply_bn and accum) else None        # (C_in, 2) scratch

        t = pl.program_id(1)

        a = a_ref[...]                                             # (C_in, TILE_N)
        if apply_bn:
            if accum:
                # Fold previous layer's BatchNorm once per batch row (t == 0);
                # requires the tile axis to be "arbitrary" (serial per b).
                @pl.when(t == 0)
                def _():
                    scale, shift = _scale_shift(stats_ref[...], gb_ref[...])
                    ss_ref[...] = jnp.concatenate([scale, shift], axis=1)
                scale = ss_ref[:, 0:1]
                shift = ss_ref[:, 1:2]
            else:
                # B == 1 path: recompute inline (tiny) so both grid axes stay parallel.
                scale, shift = _scale_shift(stats_ref[...], gb_ref[...])
            a = jnp.maximum(a.astype(jnp.float32) * scale + shift, 0.0)
        a = a.astype(jnp.bfloat16)

        # kernel_size=1 Conv1d == matmul; bf16 operands, f32 MXU accumulation.
        z = jnp.dot(w_ref[...], a, preferred_element_type=jnp.float32)  # (C_out, TILE_N)
        z_ref[...] = z.astype(z_ref.dtype)

        if compute_stats:
            partial = jnp.concatenate(
                [jnp.sum(z, axis=1, keepdims=True),
                 jnp.sum(z * z, axis=1, keepdims=True)], axis=1)        # (C_out, 2) f32
            if accum:
                # Stats block is VMEM-resident across the tile axis; one HBM write per b.
                @pl.when(t == 0)
                def _():
                    st_ref[...] = jnp.zeros_like(st_ref)
                st_ref[...] += partial
            else:
                st_ref[...] = partial.astype(st_ref.dtype)

    return kernel


def _layer_call(a_in, w_bf16, stats_prev, gb, *, compute_stats, accum, tile_n,
                out_dtype, inv_m, vmem_limit):
    """One conv layer over the whole (B, N) extent, tiled along B and N."""
    B, c_in, N = a_in.shape
    c_out = w_bf16.shape[0]
    n_tiles = N // tile_n
    apply_bn = stats_prev is not None

    inputs, in_specs = [], []
    if apply_bn:
        zeros_idx = (0,) * stats_prev.ndim
        inputs += [stats_prev, gb]
        in_specs += [
            pl.BlockSpec(stats_prev.shape, lambda b, t, _z=zeros_idx: _z),  # whole array, resident
            pl.BlockSpec((c_in, 2), lambda b, t: (0, 0)),                   # packed gamma/beta
        ]
    inputs += [a_in, w_bf16]
    in_specs += [pl.BlockSpec((None, c_in, tile_n), lambda b, t: (b, 0, t)),
                 pl.BlockSpec((c_out, c_in), lambda b, t: (0, 0))]

    z_shape = jax.ShapeDtypeStruct((B, c_out, N), out_dtype)
    z_spec = pl.BlockSpec((None, c_out, tile_n), lambda b, t: (b, 0, t))
    if compute_stats:
        if accum:
            st_shape = jax.ShapeDtypeStruct((B, c_out, 2), jnp.float32)
            st_spec = pl.BlockSpec((None, c_out, 2), lambda b, t: (b, 0, 0))
        else:
            st_shape = jax.ShapeDtypeStruct((B, n_tiles, c_out, 2), jnp.float32)
            st_spec = pl.BlockSpec((None, None, c_out, 2), lambda b, t: (b, t, 0, 0))
        out_shape = (z_shape, st_shape)
        out_specs = (z_spec, st_spec)
    else:
        out_shape = z_shape
        out_specs = z_spec

    scratch = [pltpu.VMEM((c_in, 2), jnp.float32)] if (apply_bn and accum) else []

    # accum: stats/scale-shift accumulate across the tile axis -> it must be serial
    # ("arbitrary"); B stays "parallel" (splits evenly across v7x's two TensorCores
    # for B >= 2).  B == 1 path keeps both axes parallel.
    semantics = ("parallel", "arbitrary") if accum else ("parallel", "parallel")

    flops = 2 * B * N * c_in * c_out
    bytes_accessed = (a_in.size * a_in.dtype.itemsize
                      + w_bf16.size * 2
                      + B * c_out * N * jnp.dtype(out_dtype).itemsize)

    return pl.pallas_call(
        _make_layer_kernel(apply_bn, compute_stats, accum, inv_m),
        grid=(B, n_tiles),
        in_specs=in_specs,
        out_specs=out_specs,
        out_shape=out_shape,
        scratch_shapes=scratch,
        compiler_params=pltpu.CompilerParams(
            dimension_semantics=semantics,
            vmem_limit_bytes=vmem_limit),
        cost_estimate=pl.CostEstimate(flops=int(flops), transcendentals=0,
                                      bytes_accessed=int(bytes_accessed)),
    )(*inputs)


def mlp_head_weight_forward(x, params):
    """x: (B, emb_dims, N) float32 or bfloat16 -> (B, 4, N) float32 (PyTorch NCW)."""
    B, C, N = x.shape
    assert C == EMB_DIMS
    w1, g1, b1, w2, g2, b2, w3, g3, b3, w4 = params
    inv_m = 1.0 / float(B * N)
    accum = B >= 2

    # Conv weights used in bf16 on the MXU (accumulation stays f32 in-kernel);
    # gamma/beta packed into a single (C, 2) constant per layer.
    w1b, w2b, w3b, w4b = (w.astype(jnp.bfloat16) for w in (w1, w2, w3, w4))
    gb1 = jnp.concatenate([g1, b1], axis=1)
    gb2 = jnp.concatenate([g2, b2], axis=1)
    gb3 = jnp.concatenate([g3, b3], axis=1)

    t1 = _pick_tile(N, _LAYER_MAX_TILE[0])
    t2 = _pick_tile(N, _LAYER_MAX_TILE[1])
    t3 = _pick_tile(N, _LAYER_MAX_TILE[2])
    t4 = _pick_tile(N, _LAYER_MAX_TILE[3])

    z1, st1 = _layer_call(x, w1b, None, None, compute_stats=True, accum=accum,
                          tile_n=t1, out_dtype=jnp.bfloat16, inv_m=inv_m,
                          vmem_limit=_VMEM_LIMIT_L1)
    z2, st2 = _layer_call(z1, w2b, st1, gb1, compute_stats=True, accum=accum,
                          tile_n=t2, out_dtype=jnp.bfloat16, inv_m=inv_m,
                          vmem_limit=_VMEM_LIMIT)
    z3, st3 = _layer_call(z2, w3b, st2, gb2, compute_stats=True, accum=accum,
                          tile_n=t3, out_dtype=jnp.bfloat16, inv_m=inv_m,
                          vmem_limit=_VMEM_LIMIT)
    out = _layer_call(z3, w4b, st3, gb3, compute_stats=False, accum=accum,
                      tile_n=t4, out_dtype=jnp.float32, inv_m=inv_m,
                      vmem_limit=_VMEM_LIMIT)
    return out  # (B, 4, N)


def init_params(key, emb_dims=EMB_DIMS):
    """Synthetic parameters in the module's shapes.

    Conv1d(k=1) weights are PyTorch (C_out, C_in, 1) squeezed to (C_out, C_in),
    which is exactly the channels-first layout the kernel wants (no transpose).
    BN gamma/beta use PyTorch defaults (ones / zeros), stored as (C_out, 1).
    """
    dims = [emb_dims, emb_dims // 2, emb_dims // 4, emb_dims // 8]  # 512,256,128,64
    keys = jax.random.split(key, 4)
    params = []
    for i in range(3):
        c_in, c_out = dims[i], dims[i + 1]
        w = jax.random.normal(keys[i], (c_out, c_in), jnp.float32) / jnp.sqrt(c_in)
        params += [w,
                   jnp.ones((c_out, 1), jnp.float32),
                   jnp.zeros((c_out, 1), jnp.float32)]
    w4 = jax.random.normal(keys[3], (4, dims[-1]), jnp.float32) / jnp.sqrt(dims[-1])
    params.append(w4)
    return tuple(params)


def _reference_forward(x, params):
    """Pure-JAX f32 reference of the PyTorch forward (train-mode BatchNorm)."""
    w1, g1, b1, w2, g2, b2, w3, g3, b3, w4 = params
    h = x
    for w, g, b in ((w1, g1, b1), (w2, g2, b2), (w3, g3, b3)):
        z = jnp.einsum('oc,bcn->bon', w, h)
        mean = jnp.mean(z, axis=(0, 2), keepdims=True)
        var = jnp.mean((z - mean) ** 2, axis=(0, 2), keepdims=True)  # biased
        zn = (z - mean) * jax.lax.rsqrt(var + BN_EPS)
        h = jnp.maximum(zn * g[None] + b[None], 0.0)
    return jnp.einsum('oc,bcn->bon', w4, h)


if __name__ == "__main__":
    key = jax.random.PRNGKey(0)
    k_x, k_p = jax.random.split(key)

    B, N = 2, 384  # small point count (N=384 -> one full-width tile per layer)
    # Per perf review: accept x already in bf16 (cast belongs to the upstream
    # producer, not a separate XLA op here); halves the layer-1 HBM read.
    x = jax.random.normal(k_x, (B, EMB_DIMS, N), jnp.float32).astype(jnp.bfloat16)
    params = init_params(k_p)

    fwd = jax.jit(mlp_head_weight_forward)
    out = jax.block_until_ready(fwd(x, params))
    assert out.shape == (B, 4, N), out.shape

    ref = _reference_forward(x.astype(jnp.float32), params)
    # bf16 MXU matmuls (f32 accumulation) vs. the pure-f32 reference on the same data.
    assert jnp.allclose(out, ref, atol=5e-2, rtol=5e-2), \
        float(jnp.max(jnp.abs(out - ref)))

    print("KERNEL_OK")
</pallas_src>

<mosaic_0001>
module attributes {stable_mosaic.version = 11 : i64} {
  func.func @kernel(%arg0: i32, %arg1: i32, %arg2: memref<1x512x384xbf16, #tpu.memory_space<vmem>>, %arg3: memref<256x512xbf16, #tpu.memory_space<vmem>>, %arg4: memref<1x256x384xbf16, #tpu.memory_space<vmem>>, %arg5: memref<1x256x2xf32, #tpu.memory_space<vmem>>) attributes {dimension_semantics = [#tpu.dimension_semantics<parallel>, #tpu.dimension_semantics<arbitrary>], iteration_bounds = array<i64: 2, 1>, scalar_prefetch = 0 : i64, scratch_operands = 0 : i64, tpu.core_type = #tpu.core_type<tc>, window_params = [{transform_indices = @transform_0, window_bounds = array<i64: 1, 512, 384>}, {pipeline_mode = #tpu.pipeline_mode<synchronous>, transform_indices = @transform_1, window_bounds = array<i64: 256, 512>}, {transform_indices = @transform_2, window_bounds = array<i64: 1, 256, 384>}, {transform_indices = @transform_3, window_bounds = array<i64: 1, 256, 2>}]} {
    %c0 = arith.constant 0 : index
    %c0_0 = arith.constant 0 : index
    %c0_1 = arith.constant 0 : index
    %0 = vector.load %arg2[%c0, %c0_0, %c0_1] : memref<1x512x384xbf16, #tpu.memory_space<vmem>>, vector<1x512x384xbf16>
    %1 = vector.shape_cast %0 : vector<1x512x384xbf16> to vector<512x384xbf16>
    %c0_2 = arith.constant 0 : index
    %c0_3 = arith.constant 0 : index
    %2 = vector.load %arg3[%c0_2, %c0_3] : memref<256x512xbf16, #tpu.memory_space<vmem>>, vector<256x512xbf16>
    %cst = arith.constant dense<0.000000e+00> : vector<256x384xf32>
    %3 = tpu.matmul %2, %1, %cst {dimension_numbers = #tpu.dot_dimension_numbers<[1], [0], [0], [1], [0, 0, 1, 1], [], []>} : vector<256x512xbf16>, vector<512x384xbf16>, vector<256x384xf32> -> vector<256x384xf32>
    %4 = arith.truncf %3 : vector<256x384xf32> to vector<256x384xbf16>
    %c0_4 = arith.constant 0 : index
    %c0_5 = arith.constant 0 : index
    %c0_6 = arith.constant 0 : index
    %5 = vector.load %arg4[%c0_4, %c0_5, %c0_6] : memref<1x256x384xbf16, #tpu.memory_space<vmem>>, vector<1x256x384xbf16>
    %6 = vector.shape_cast %5 : vector<1x256x384xbf16> to vector<256x384xbf16>
    %7 = vector.shape_cast %4 : vector<256x384xbf16> to vector<1x256x384xbf16>
    tpu.vector_store %arg4[%c0_4, %c0_5, %c0_6], %7 {strides = array<i32>} : memref<1x256x384xbf16, #tpu.memory_space<vmem>>, vector<1x256x384xbf16>,
    %cst_7 = arith.constant dense<0.000000e+00> : vector<256xf32>
    %8 = vector.multi_reduction <add>, %3, %cst_7 [1] : vector<256x384xf32> to vector<256xf32>
    %9 = vector.shape_cast %8 : vector<256xf32> to vector<256x1xf32>
    %10 = arith.mulf %3, %3 : vector<256x384xf32>
    %cst_8 = arith.constant dense<0.000000e+00> : vector<256xf32>
    %11 = vector.multi_reduction <add>, %10, %cst_8 [1] : vector<256x384xf32> to vector<256xf32>
    %12 = vector.shape_cast %11 : vector<256xf32> to vector<256x1xf32>
    %13 = tpu.concatenate %9, %12 in 1 : vector<256x1xf32>, vector<256x1xf32> -> vector<256x2xf32>
    %c0_i32 = arith.constant 0 : i32
    %14 = arith.cmpi eq, %arg1, %c0_i32 : i32
    %15 = arith.extui %14 : i1 to i32
    %c0_i32_9 = arith.constant 0 : i32
    %16 = arith.cmpi ne, %15, %c0_i32_9 : i32
    scf.if %16 {
      %cst_16 = arith.constant 0.000000e+00 : f32
      %23 = vector.broadcast %cst_16 : f32 to vector<256x2xf32>
      %c0_17 = arith.constant 0 : index
      %c0_18 = arith.constant 0 : index
      %c0_19 = arith.constant 0 : index
      %24 = vector.load %arg5[%c0_17, %c0_18, %c0_19] : memref<1x256x2xf32, #tpu.memory_space<vmem>>, vector<1x256x2xf32>
      %25 = vector.shape_cast %24 : vector<1x256x2xf32> to vector<256x2xf32>
      %26 = vector.shape_cast %23 : vector<256x2xf32> to vector<1x256x2xf32>
      tpu.vector_store %arg5[%c0_17, %c0_18, %c0_19], %26 {strides = array<i32>} : memref<1x256x2xf32, #tpu.memory_space<vmem>>, vector<1x256x2xf32>,
    } else {
    }
    %c0_10 = arith.constant 0 : index
    %c0_11 = arith.constant 0 : index
    %c0_12 = arith.constant 0 : index
    %17 = vector.load %arg5[%c0_10, %c0_11, %c0_12] : memref<1x256x2xf32, #tpu.memory_space<vmem>>, vector<1x256x2xf32>
    %18 = vector.shape_cast %17 : vector<1x256x2xf32> to vector<256x2xf32>
    %19 = arith.addf %18, %13 : vector<256x2xf32>
    %c0_13 = arith.constant 0 : index
    %c0_14 = arith.constant 0 : index
    %c0_15 = arith.constant 0 : index
    %20 = vector.load %arg5[%c0_13, %c0_14, %c0_15] : memref<1x256x2xf32, #tpu.memory_space<vmem>>, vector<1x256x2xf32>
    %21 = vector.shape_cast %20 : vector<1x256x2xf32> to vector<256x2xf32>
    %22 = vector.shape_cast %19 : vector<256x2xf32> to vector<1x256x2xf32>
    tpu.vector_store %arg5[%c0_13, %c0_14, %c0_15], %22 {strides = array<i32>} : memref<1x256x2xf32, #tpu.memory_space<vmem>>, vector<1x256x2xf32>,
    return
  }
  func.func @transform_0(%arg0: i32, %arg1: i32) -> (i32, i32, i32) {
    %c0_i32 = arith.constant 0 : i32
    %c0_i32_0 = arith.constant 0 : i32
    return %arg0, %c0_i32, %arg1 : i32, i32, i32
  }
  func.func @transform_1(%arg0: i32, %arg1: i32) -> (i32, i32) {
    %c0_i32 = arith.constant 0 : i32
    %c0_i32_0 = arith.constant 0 : i32
    %c0_i32_1 = arith.constant 0 : i32
    return %c0_i32, %c0_i32_0 : i32, i32
  }
  func.func @transform_2(%arg0: i32, %arg1: i32) -> (i32, i32, i32) {
    %c0_i32 = arith.constant 0 : i32
    %c0_i32_0 = arith.constant 0 : i32
    return %arg0, %c0_i32, %arg1 : i32, i32, i32
  }
  func.func @transform_3(%arg0: i32, %arg1: i32) -> (i32, i32, i32) {
    %c0_i32 = arith.constant 0 : i32
    %c0_i32_0 = arith.constant 0 : i32
    %c0_i32_1 = arith.constant 0 : i32
    return %arg0, %c0_i32, %c0_i32_0 : i32, i32, i32
  }
}

module attributes {stable_mosaic.version = 11 : i64} {
  func.func @kernel(%arg0: i32, %arg1: i32, %arg2: memref<2x256x2xf32, #tpu.memory_space<vmem>>, %arg3: memref<256x2xf32, #tpu.memory_space<vmem>>, %arg4: memref<1x256x384xbf16, #tpu.memory_space<vmem>>, %arg5: memref<128x256xbf16, #tpu.memory_space<vmem>>, %arg6: memref<1x128x384xbf16, #tpu.memory_space<vmem>>, %arg7: memref<1x128x2xf32, #tpu.memory_space<vmem>>, %arg8: memref<256x2xf32, #tpu.memory_space<vmem>>) attributes {dimension_semantics = [#tpu.dimension_semantics<parallel>, #tpu.dimension_semantics<arbitrary>], iteration_bounds = array<i64: 2, 1>, scalar_prefetch = 0 : i64, scratch_operands = 1 : i64, tpu.core_type = #tpu.core_type<tc>, window_params = [{pipeline_mode = #tpu.pipeline_mode<synchronous>, transform_indices = @transform_0, window_bounds = array<i64: 2, 256, 2>}, {pipeline_mode = #tpu.pipeline_mode<synchronous>, transform_indices = @transform_1, window_bounds = array<i64: 256, 2>}, {transform_indices = @transform_2, window_bounds = array<i64: 1, 256, 384>}, {pipeline_mode = #tpu.pipeline_mode<synchronous>, transform_indices = @transform_3, window_bounds = array<i64: 128, 256>}, {transform_indices = @transform_4, window_bounds = array<i64: 1, 128, 384>}, {transform_indices = @transform_5, window_bounds = array<i64: 1, 128, 2>}]} {
    %c0 = arith.constant 0 : index
    %c0_0 = arith.constant 0 : index
    %c0_1 = arith.constant 0 : index
    %0 = vector.load %arg4[%c0, %c0_0, %c0_1] : memref<1x256x384xbf16, #tpu.memory_space<vmem>>, vector<1x256x384xbf16>
    %1 = vector.shape_cast %0 : vector<1x256x384xbf16> to vector<256x384xbf16>
    %c0_i32 = arith.constant 0 : i32
    %2 = arith.cmpi eq, %arg1, %c0_i32 : i32
    %3 = arith.extui %2 : i1 to i32
    %c0_i32_2 = arith.constant 0 : i32
    %4 = arith.cmpi ne, %3, %c0_i32_2 : i32
    scf.if %4 {
      %c0_22 = arith.constant 0 : index
      %c0_23 = arith.constant 0 : index
      %c0_24 = arith.constant 0 : index
      %36 = vector.load %arg2[%c0_22, %c0_23, %c0_24] : memref<2x256x2xf32, #tpu.memory_space<vmem>>, vector<2x256x2xf32>
      %c0_25 = arith.constant 0 : index
      %c0_26 = arith.constant 0 : index
      %37 = vector.load %arg3[%c0_25, %c0_26] : memref<256x2xf32, #tpu.memory_space<vmem>>, vector<256x2xf32>
      %cst_27 = arith.constant dense<0.000000e+00> : vector<256x2xf32>
      %38 = vector.multi_reduction <add>, %36, %cst_27 [0] : vector<2x256x2xf32> to vector<256x2xf32>
      %39 = vector.extract_strided_slice %38 {offsets = [0, 0], sizes = [256, 1], strides = [1, 1]} : vector<256x2xf32> to vector<256x1xf32>
      %cst_28 = arith.constant 0.00130208337 : f32
      %40 = vector.broadcast %cst_28 : f32 to vector<256x1xf32>
      %41 = arith.mulf %39, %40 : vector<256x1xf32>
      %42 = vector.extract_strided_slice %38 {offsets = [0, 1], sizes = [256, 1], strides = [1, 1]} : vector<256x2xf32> to vector<256x1xf32>
      %cst_29 = arith.constant 0.00130208337 : f32
      %43 = vector.broadcast %cst_29 : f32 to vector<256x1xf32>
      %44 = arith.mulf %42, %43 : vector<256x1xf32>
      %45 = arith.mulf %41, %41 : vector<256x1xf32>
      %46 = arith.subf %44, %45 : vector<256x1xf32>
      %cst_30 = arith.constant 0.000000e+00 : f32
      %47 = vector.broadcast %cst_30 : f32 to vector<256x1xf32>
      %48 = arith.maximumf %46, %47 : vector<256x1xf32>
      %49 = vector.extract_strided_slice %37 {offsets = [0, 0], sizes = [256, 1], strides = [1, 1]} : vector<256x2xf32> to vector<256x1xf32>
      %cst_31 = arith.constant 9.99999974E-6 : f32
      %50 = vector.broadcast %cst_31 : f32 to vector<256x1xf32>
      %51 = arith.addf %48, %50 : vector<256x1xf32>
      %52 = math.rsqrt %51 : vector<256x1xf32>
      %53 = arith.mulf %49, %52 : vector<256x1xf32>
      %54 = vector.extract_strided_slice %37 {offsets = [0, 1], sizes = [256, 1], strides = [1, 1]} : vector<256x2xf32> to vector<256x1xf32>
      %55 = arith.mulf %41, %53 : vector<256x1xf32>
      %56 = arith.subf %54, %55 : vector<256x1xf32>
      %57 = tpu.concatenate %53, %56 in 1 : vector<256x1xf32>, vector<256x1xf32> -> vector<256x2xf32>
      %c0_32 = arith.constant 0 : index
      %c0_33 = arith.constant 0 : index
      %58 = vector.load %arg8[%c0_32, %c0_33] : memref<256x2xf32, #tpu.memory_space<vmem>>, vector<256x2xf32>
      tpu.vector_store %arg8[%c0_32, %c0_33], %57 {strides = array<i32>} : memref<256x2xf32, #tpu.memory_space<vmem>>, vector<256x2xf32>,
    } else {
    }
    %c0_3 = arith.constant 0 : index
    %c0_4 = arith.constant 0 : index
    %5 = vector.load %arg8[%c0_3, %c0_4] : memref<256x2xf32, #tpu.memory_space<vmem>>, vector<256x1xf32>
    %c0_5 = arith.constant 0 : index
    %c1 = arith.constant 1 : index
    %6 = vector.load %arg8[%c0_5, %c1] : memref<256x2xf32, #tpu.memory_space<vmem>>, vector<256x1xf32>
    %7 = arith.extf %1 : vector<256x384xbf16> to vector<256x384xf32>
    %8 = vector.broadcast %5 : vector<256x1xf32> to vector<256x384xf32>
    %9 = arith.mulf %7, %8 : vector<256x384xf32>
    %10 = vector.broadcast %6 : vector<256x1xf32> to vector<256x384xf32>
    %11 = arith.addf %9, %10 : vector<256x384xf32>
    %cst = arith.constant 0.000000e+00 : f32
    %12 = vector.broadcast %cst : f32 to vector<256x384xf32>
    %13 = arith.maximumf %11, %12 : vector<256x384xf32>
    %14 = arith.truncf %13 : vector<256x384xf32> to vector<256x384xbf16>
    %c0_6 = arith.constant 0 : index
    %c0_7 = arith.constant 0 : index
    %15 = vector.load %arg5[%c0_6, %c0_7] : memref<128x256xbf16, #tpu.memory_space<vmem>>, vector<128x256xbf16>
    %cst_8 = arith.constant dense<0.000000e+00> : vector<128x384xf32>
    %16 = tpu.matmul %15, %14, %cst_8 {dimension_numbers = #tpu.dot_dimension_numbers<[1], [0], [0], [1], [0, 0, 1, 1], [], []>} : vector<128x256xbf16>, vector<256x384xbf16>, vector<128x384xf32> -> vector<128x384xf32>
    %17 = arith.truncf %16 : vector<128x384xf32> to vector<128x384xbf16>
    %c0_9 = arith.constant 0 : index
    %c0_10 = arith.constant 0 : index
    %c0_11 = arith.constant 0 : index
    %18 = vector.load %arg6[%c0_9, %c0_10, %c0_11] : memref<1x128x384xbf16, #tpu.memory_space<vmem>>, vector<1x128x384xbf16>
    %19 = vector.shape_cast %18 : vector<1x128x384xbf16> to vector<128x384xbf16>
    %20 = vector.shape_cast %17 : vector<128x384xbf16> to vector<1x128x384xbf16>
    tpu.vector_store %arg6[%c0_9, %c0_10, %c0_11], %20 {strides = array<i32>} : memref<1x128x384xbf16, #tpu.memory_space<vmem>>, vector<1x128x384xbf16>,
    %cst_12 = arith.constant dense<0.000000e+00> : vector<128xf32>
    %21 = vector.multi_reduction <add>, %16, %cst_12 [1] : vector<128x384xf32> to vector<128xf32>
    %22 = vector.shape_cast %21 : vector<128xf32> to vector<128x1xf32>
    %23 = arith.mulf %16, %16 : vector<128x384xf32>
    %cst_13 = arith.constant dense<0.000000e+00> : vector<128xf32>
    %24 = vector.multi_reduction <add>, %23, %cst_13 [1] : vector<128x384xf32> to vector<128xf32>
    %25 = vector.shape_cast %24 : vector<128xf32> to vector<128x1xf32>
    %26 = tpu.concatenate %22, %25 in 1 : vector<128x1xf32>, vector<128x1xf32> -> vector<128x2xf32>
    %c0_i32_14 = arith.constant 0 : i32
    %27 = arith.cmpi eq, %arg1, %c0_i32_14 : i32
    %28 = arith.extui %27 : i1 to i32
    %c0_i32_15 = arith.constant 0 : i32
    %29 = arith.cmpi ne, %28, %c0_i32_15 : i32
    scf.if %29 {
      %cst_22 = arith.constant 0.000000e+00 : f32
      %36 = vector.broadcast %cst_22 : f32 to vector<128x2xf32>
      %c0_23 = arith.constant 0 : index
      %c0_24 = arith.constant 0 : index
      %c0_25 = arith.constant 0 : index
      %37 = vector.load %arg7[%c0_23, %c0_24, %c0_25] : memref<1x128x2xf32, #tpu.memory_space<vmem>>, vector<1x128x2xf32>
      %38 = vector.shape_cast %37 : vector<1x128x2xf32> to vector<128x2xf32>
      %39 = vector.shape_cast %36 : vector<128x2xf32> to vector<1x128x2xf32>
      tpu.vector_store %arg7[%c0_23, %c0_24, %c0_25], %39 {strides = array<i32>} : memref<1x128x2xf32, #tpu.memory_space<vmem>>, vector<1x128x2xf32>,
    } else {
    }
    %c0_16 = arith.constant 0 : index
    %c0_17 = arith.constant 0 : index
    %c0_18 = arith.constant 0 : index
    %30 = vector.load %arg7[%c0_16, %c0_17, %c0_18] : memref<1x128x2xf32, #tpu.memory_space<vmem>>, vector<1x128x2xf32>
    %31 = vector.shape_cast %30 : vector<1x128x2xf32> to vector<128x2xf32>
    %32 = arith.addf %31, %26 : vector<128x2xf32>
    %c0_19 = arith.constant 0 : index
    %c0_20 = arith.constant 0 : index
    %c0_21 = arith.constant 0 : index
    %33 = vector.load %arg7[%c0_19, %c0_20, %c0_21] : memref<1x128x2xf32, #tpu.memory_space<vmem>>, vector<1x128x2xf32>
    %34 = vector.shape_cast %33 : vector<1x128x2xf32> to vector<128x2xf32>
    %35 = vector.shape_cast %32 : vector<128x2xf32> to vector<1x128x2xf32>
    tpu.vector_store %arg7[%c0_19, %c0_20, %c0_21], %35 {strides = array<i32>} : memref<1x128x2xf32, #tpu.memory_space<vmem>>, vector<1x128x2xf32>,
    return
  }
  func.func @transform_0(%arg0: i32, %arg1: i32) -> (i32, i32, i32) {
    %c0_i32 = arith.constant 0 : i32
    %c0_i32_0 = arith.constant 0 : i32
    %c0_i32_1 = arith.constant 0 : i32
    %c0_i32_2 = arith.constant 0 : i32
    return %c0_i32, %c0_i32_0, %c0_i32_1 : i32, i32, i32
  }
  func.func @transform_1(%arg0: i32, %arg1: i32) -> (i32, i32) {
    %c0_i32 = arith.constant 0 : i32
    %c0_i32_0 = arith.constant 0 : i32
    %c0_i32_1 = arith.constant 0 : i32
    return %c0_i32, %c0_i32_0 : i32, i32
  }
  func.func @transform_2(%arg0: i32, %arg1: i32) -> (i32, i32, i32) {
    %c0_i32 = arith.constant 0 : i32
    %c0_i32_0 = arith.constant 0 : i32
    return %arg0, %c0_i32, %arg1 : i32, i32, i32
  }
  func.func @transform_3(%arg0: i32, %arg1: i32) -> (i32, i32) {
    %c0_i32 = arith.constant 0 : i32
    %c0_i32_0 = arith.constant 0 : i32
    %c0_i32_1 = arith.constant 0 : i32
    return %c0_i32, %c0_i32_0 : i32, i32
  }
  func.func @transform_4(%arg0: i32, %arg1: i32) -> (i32, i32, i32) {
    %c0_i32 = arith.constant 0 : i32
    %c0_i32_0 = arith.constant 0 : i32
    return %arg0, %c0_i32, %arg1 : i32, i32, i32
  }
  func.func @transform_5(%arg0: i32, %arg1: i32) -> (i32, i32, i32) {
    %c0_i32 = arith.constant 0 : i32
    %c0_i32_0 = arith.constant 0 : i32
    %c0_i32_1 = arith.constant 0 : i32
    return %arg0, %c0_i32, %c0_i32_0 : i32, i32, i32
  }
}

module attributes {stable_mosaic.version = 11 : i64} {
  func.func @kernel(%arg0: i32, %arg1: i32, %arg2: memref<2x128x2xf32, #tpu.memory_space<vmem>>, %arg3: memref<128x2xf32, #tpu.memory_space<vmem>>, %arg4: memref<1x128x384xbf16, #tpu.memory_space<vmem>>, %arg5: memref<64x128xbf16, #tpu.memory_space<vmem>>, %arg6: memref<1x64x384xbf16, #tpu.memory_space<vmem>>, %arg7: memref<1x64x2xf32, #tpu.memory_space<vmem>>, %arg8: memref<128x2xf32, #tpu.memory_space<vmem>>) attributes {dimension_semantics = [#tpu.dimension_semantics<parallel>, #tpu.dimension_semantics<arbitrary>], iteration_bounds = array<i64: 2, 1>, scalar_prefetch = 0 : i64, scratch_operands = 1 : i64, tpu.core_type = #tpu.core_type<tc>, window_params = [{pipeline_mode = #tpu.pipeline_mode<synchronous>, transform_indices = @transform_0, window_bounds = array<i64: 2, 128, 2>}, {pipeline_mode = #tpu.pipeline_mode<synchronous>, transform_indices = @transform_1, window_bounds = array<i64: 128, 2>}, {transform_indices = @transform_2, window_bounds = array<i64: 1, 128, 384>}, {pipeline_mode = #tpu.pipeline_mode<synchronous>, transform_indices = @transform_3, window_bounds = array<i64: 64, 128>}, {transform_indices = @transform_4, window_bounds = array<i64: 1, 64, 384>}, {transform_indices = @transform_5, window_bounds = array<i64: 1, 64, 2>}]} {
    %c0 = arith.constant 0 : index
    %c0_0 = arith.constant 0 : index
    %c0_1 = arith.constant 0 : index
    %0 = vector.load %arg4[%c0, %c0_0, %c0_1] : memref<1x128x384xbf16, #tpu.memory_space<vmem>>, vector<1x128x384xbf16>
    %1 = vector.shape_cast %0 : vector<1x128x384xbf16> to vector<128x384xbf16>
    %c0_i32 = arith.constant 0 : i32
    %2 = arith.cmpi eq, %arg1, %c0_i32 : i32
    %3 = arith.extui %2 : i1 to i32
    %c0_i32_2 = arith.constant 0 : i32
    %4 = arith.cmpi ne, %3, %c0_i32_2 : i32
    scf.if %4 {
      %c0_22 = arith.constant 0 : index
      %c0_23 = arith.constant 0 : index
      %c0_24 = arith.constant 0 : index
      %36 = vector.load %arg2[%c0_22, %c0_23, %c0_24] : memref<2x128x2xf32, #tpu.memory_space<vmem>>, vector<2x128x2xf32>
      %c0_25 = arith.constant 0 : index
      %c0_26 = arith.constant 0 : index
      %37 = vector.load %arg3[%c0_25, %c0_26] : memref<128x2xf32, #tpu.memory_space<vmem>>, vector<128x2xf32>
      %cst_27 = arith.constant dense<0.000000e+00> : vector<128x2xf32>
      %38 = vector.multi_reduction <add>, %36, %cst_27 [0] : vector<2x128x2xf32> to vector<128x2xf32>
      %39 = vector.extract_strided_slice %38 {offsets = [0, 0], sizes = [128, 1], strides = [1, 1]} : vector<128x2xf32> to vector<128x1xf32>
      %cst_28 = arith.constant 0.00130208337 : f32
      %40 = vector.broadcast %cst_28 : f32 to vector<128x1xf32>
      %41 = arith.mulf %39, %40 : vector<128x1xf32>
      %42 = vector.extract_strided_slice %38 {offsets = [0, 1], sizes = [128, 1], strides = [1, 1]} : vector<128x2xf32> to vector<128x1xf32>
      %cst_29 = arith.constant 0.00130208337 : f32
      %43 = vector.broadcast %cst_29 : f32 to vector<128x1xf32>
      %44 = arith.mulf %42, %43 : vector<128x1xf32>
      %45 = arith.mulf %41, %41 : vector<128x1xf32>
      %46 = arith.subf %44, %45 : vector<128x1xf32>
      %cst_30 = arith.constant 0.000000e+00 : f32
      %47 = vector.broadcast %cst_30 : f32 to vector<128x1xf32>
      %48 = arith.maximumf %46, %47 : vector<128x1xf32>
      %49 = vector.extract_strided_slice %37 {offsets = [0, 0], sizes = [128, 1], strides = [1, 1]} : vector<128x2xf32> to vector<128x1xf32>
      %cst_31 = arith.constant 9.99999974E-6 : f32
      %50 = vector.broadcast %cst_31 : f32 to vector<128x1xf32>
      %51 = arith.addf %48, %50 : vector<128x1xf32>
      %52 = math.rsqrt %51 : vector<128x1xf32>
      %53 = arith.mulf %49, %52 : vector<128x1xf32>
      %54 = vector.extract_strided_slice %37 {offsets = [0, 1], sizes = [128, 1], strides = [1, 1]} : vector<128x2xf32> to vector<128x1xf32>
      %55 = arith.mulf %41, %53 : vector<128x1xf32>
      %56 = arith.subf %54, %55 : vector<128x1xf32>
      %57 = tpu.concatenate %53, %56 in 1 : vector<128x1xf32>, vector<128x1xf32> -> vector<128x2xf32>
      %c0_32 = arith.constant 0 : index
      %c0_33 = arith.constant 0 : index
      %58 = vector.load %arg8[%c0_32, %c0_33] : memref<128x2xf32, #tpu.memory_space<vmem>>, vector<128x2xf32>
      tpu.vector_store %arg8[%c0_32, %c0_33], %57 {strides = array<i32>} : memref<128x2xf32, #tpu.memory_space<vmem>>, vector<128x2xf32>,
    } else {
    }
    %c0_3 = arith.constant 0 : index
    %c0_4 = arith.constant 0 : index
    %5 = vector.load %arg8[%c0_3, %c0_4] : memref<128x2xf32, #tpu.memory_space<vmem>>, vector<128x1xf32>
    %c0_5 = arith.constant 0 : index
    %c1 = arith.constant 1 : index
    %6 = vector.load %arg8[%c0_5, %c1] : memref<128x2xf32, #tpu.memory_space<vmem>>, vector<128x1xf32>
    %7 = arith.extf %1 : vector<128x384xbf16> to vector<128x384xf32>
    %8 = vector.broadcast %5 : vector<128x1xf32> to vector<128x384xf32>
    %9 = arith.mulf %7, %8 : vector<128x384xf32>
    %10 = vector.broadcast %6 : vector<128x1xf32> to vector<128x384xf32>
    %11 = arith.addf %9, %10 : vector<128x384xf32>
    %cst = arith.constant 0.000000e+00 : f32
    %12 = vector.broadcast %cst : f32 to vector<128x384xf32>
    %13 = arith.maximumf %11, %12 : vector<128x384xf32>
    %14 = arith.truncf %13 : vector<128x384xf32> to vector<128x384xbf16>
    %c0_6 = arith.constant 0 : index
    %c0_7 = arith.constant 0 : index
    %15 = vector.load %arg5[%c0_6, %c0_7] : memref<64x128xbf16, #tpu.memory_space<vmem>>, vector<64x128xbf16>
    %cst_8 = arith.constant dense<0.000000e+00> : vector<64x384xf32>
    %16 = tpu.matmul %15, %14, %cst_8 {dimension_numbers = #tpu.dot_dimension_numbers<[1], [0], [0], [1], [0, 0, 1, 1], [], []>} : vector<64x128xbf16>, vector<128x384xbf16>, vector<64x384xf32> -> vector<64x384xf32>
    %17 = arith.truncf %16 : vector<64x384xf32> to vector<64x384xbf16>
    %c0_9 = arith.constant 0 : index
    %c0_10 = arith.constant 0 : index
    %c0_11 = arith.constant 0 : index
    %18 = vector.load %arg6[%c0_9, %c0_10, %c0_11] : memref<1x64x384xbf16, #tpu.memory_space<vmem>>, vector<1x64x384xbf16>
    %19 = vector.shape_cast %18 : vector<1x64x384xbf16> to vector<64x384xbf16>
    %20 = vector.shape_cast %17 : vector<64x384xbf16> to vector<1x64x384xbf16>
    tpu.vector_store %arg6[%c0_9, %c0_10, %c0_11], %20 {strides = array<i32>} : memref<1x64x384xbf16, #tpu.memory_space<vmem>>, vector<1x64x384xbf16>,
    %cst_12 = arith.constant dense<0.000000e+00> : vector<64xf32>
    %21 = vector.multi_reduction <add>, %16, %cst_12 [1] : vector<64x384xf32> to vector<64xf32>
    %22 = vector.shape_cast %21 : vector<64xf32> to vector<64x1xf32>
    %23 = arith.mulf %16, %16 : vector<64x384xf32>
    %cst_13 = arith.constant dense<0.000000e+00> : vector<64xf32>
    %24 = vector.multi_reduction <add>, %23, %cst_13 [1] : vector<64x384xf32> to vector<64xf32>
    %25 = vector.shape_cast %24 : vector<64xf32> to vector<64x1xf32>
    %26 = tpu.concatenate %22, %25 in 1 : vector<64x1xf32>, vector<64x1xf32> -> vector<64x2xf32>
    %c0_i32_14 = arith.constant 0 : i32
    %27 = arith.cmpi eq, %arg1, %c0_i32_14 : i32
    %28 = arith.extui %27 : i1 to i32
    %c0_i32_15 = arith.constant 0 : i32
    %29 = arith.cmpi ne, %28, %c0_i32_15 : i32
    scf.if %29 {
      %cst_22 = arith.constant 0.000000e+00 : f32
      %36 = vector.broadcast %cst_22 : f32 to vector<64x2xf32>
      %c0_23 = arith.constant 0 : index
      %c0_24 = arith.constant 0 : index
      %c0_25 = arith.constant 0 : index
      %37 = vector.load %arg7[%c0_23, %c0_24, %c0_25] : memref<1x64x2xf32, #tpu.memory_space<vmem>>, vector<1x64x2xf32>
      %38 = vector.shape_cast %37 : vector<1x64x2xf32> to vector<64x2xf32>
      %39 = vector.shape_cast %36 : vector<64x2xf32> to vector<1x64x2xf32>
      tpu.vector_store %arg7[%c0_23, %c0_24, %c0_25], %39 {strides = array<i32>} : memref<1x64x2xf32, #tpu.memory_space<vmem>>, vector<1x64x2xf32>,
    } else {
    }
    %c0_16 = arith.constant 0 : index
    %c0_17 = arith.constant 0 : index
    %c0_18 = arith.constant 0 : index
    %30 = vector.load %arg7[%c0_16, %c0_17, %c0_18] : memref<1x64x2xf32, #tpu.memory_space<vmem>>, vector<1x64x2xf32>
    %31 = vector.shape_cast %30 : vector<1x64x2xf32> to vector<64x2xf32>
    %32 = arith.addf %31, %26 : vector<64x2xf32>
    %c0_19 = arith.constant 0 : index
    %c0_20 = arith.constant 0 : index
    %c0_21 = arith.constant 0 : index
    %33 = vector.load %arg7[%c0_19, %c0_20, %c0_21] : memref<1x64x2xf32, #tpu.memory_space<vmem>>, vector<1x64x2xf32>
    %34 = vector.shape_cast %33 : vector<1x64x2xf32> to vector<64x2xf32>
    %35 = vector.shape_cast %32 : vector<64x2xf32> to vector<1x64x2xf32>
    tpu.vector_store %arg7[%c0_19, %c0_20, %c0_21], %35 {strides = array<i32>} : memref<1x64x2xf32, #tpu.memory_space<vmem>>, vector<1x64x2xf32>,
    return
  }
  func.func @transform_0(%arg0: i32, %arg1: i32) -> (i32, i32, i32) {
    %c0_i32 = arith.constant 0 : i32
    %c0_i32_0 = arith.constant 0 : i32
    %c0_i32_1 = arith.constant 0 : i32
    %c0_i32_2 = arith.constant 0 : i32
    return %c0_i32, %c0_i32_0, %c0_i32_1 : i32, i32, i32
  }
  func.func @transform_1(%arg0: i32, %arg1: i32) -> (i32, i32) {
    %c0_i32 = arith.constant 0 : i32
    %c0_i32_0 = arith.constant 0 : i32
    %c0_i32_1 = arith.constant 0 : i32
    return %c0_i32, %c0_i32_0 : i32, i32
  }
  func.func @transform_2(%arg0: i32, %arg1: i32) -> (i32, i32, i32) {
    %c0_i32 = arith.constant 0 : i32
    %c0_i32_0 = arith.constant 0 : i32
    return %arg0, %c0_i32, %arg1 : i32, i32, i32
  }
  func.func @transform_3(%arg0: i32, %arg1: i32) -> (i32, i32) {
    %c0_i32 = arith.constant 0 : i32
    %c0_i32_0 = arith.constant 0 : i32
    %c0_i32_1 = arith.constant 0 : i32
    return %c0_i32, %c0_i32_0 : i32, i32
  }
  func.func @transform_4(%arg0: i32, %arg1: i32) -> (i32, i32, i32) {
    %c0_i32 = arith.constant 0 : i32
    %c0_i32_0 = arith.constant 0 : i32
    return %arg0, %c0_i32, %arg1 : i32, i32, i32
  }
  func.func @transform_5(%arg0: i32, %arg1: i32) -> (i32, i32, i32) {
    %c0_i32 = arith.constant 0 : i32
    %c0_i32_0 = arith.constant 0 : i32
    %c0_i32_1 = arith.constant 0 : i32
    return %arg0, %c0_i32, %c0_i32_0 : i32, i32, i32
  }
}

module attributes {stable_mosaic.version = 11 : i64} {
  func.func @kernel(%arg0: i32, %arg1: i32, %arg2: memref<2x64x2xf32, #tpu.memory_space<vmem>>, %arg3: memref<64x2xf32, #tpu.memory_space<vmem>>, %arg4: memref<1x64x384xbf16, #tpu.memory_space<vmem>>, %arg5: memref<4x64xbf16, #tpu.memory_space<vmem>>, %arg6: memref<1x4x384xf32, #tpu.memory_space<vmem>>, %arg7: memref<64x2xf32, #tpu.memory_space<vmem>>) attributes {dimension_semantics = [#tpu.dimension_semantics<parallel>, #tpu.dimension_semantics<arbitrary>], iteration_bounds = array<i64: 2, 1>, scalar_prefetch = 0 : i64, scratch_operands = 1 : i64, tpu.core_type = #tpu.core_type<tc>, window_params = [{pipeline_mode = #tpu.pipeline_mode<synchronous>, transform_indices = @transform_0, window_bounds = array<i64: 2, 64, 2>}, {pipeline_mode = #tpu.pipeline_mode<synchronous>, transform_indices = @transform_1, window_bounds = array<i64: 64, 2>}, {transform_indices = @transform_2, window_bounds = array<i64: 1, 64, 384>}, {pipeline_mode = #tpu.pipeline_mode<synchronous>, transform_indices = @transform_3, window_bounds = array<i64: 4, 64>}, {transform_indices = @transform_4, window_bounds = array<i64: 1, 4, 384>}]} {
    %c0 = arith.constant 0 : index
    %c0_0 = arith.constant 0 : index
    %c0_1 = arith.constant 0 : index
    %0 = vector.load %arg4[%c0, %c0_0, %c0_1] : memref<1x64x384xbf16, #tpu.memory_space<vmem>>, vector<1x64x384xbf16>
    %1 = vector.shape_cast %0 : vector<1x64x384xbf16> to vector<64x384xbf16>
    %c0_i32 = arith.constant 0 : i32
    %2 = arith.cmpi eq, %arg1, %c0_i32 : i32
    %3 = arith.extui %2 : i1 to i32
    %c0_i32_2 = arith.constant 0 : i32
    %4 = arith.cmpi ne, %3, %c0_i32_2 : i32
    scf.if %4 {
      %c0_12 = arith.constant 0 : index
      %c0_13 = arith.constant 0 : index
      %c0_14 = arith.constant 0 : index
      %20 = vector.load %arg2[%c0_12, %c0_13, %c0_14] : memref<2x64x2xf32, #tpu.memory_space<vmem>>, vector<2x64x2xf32>
      %c0_15 = arith.constant 0 : index
      %c0_16 = arith.constant 0 : index
      %21 = vector.load %arg3[%c0_15, %c0_16] : memref<64x2xf32, #tpu.memory_space<vmem>>, vector<64x2xf32>
      %cst_17 = arith.constant dense<0.000000e+00> : vector<64x2xf32>
      %22 = vector.multi_reduction <add>, %20, %cst_17 [0] : vector<2x64x2xf32> to vector<64x2xf32>
      %23 = vector.extract_strided_slice %22 {offsets = [0, 0], sizes = [64, 1], strides = [1, 1]} : vector<64x2xf32> to vector<64x1xf32>
      %cst_18 = arith.constant 0.00130208337 : f32
      %24 = vector.broadcast %cst_18 : f32 to vector<64x1xf32>
      %25 = arith.mulf %23, %24 : vector<64x1xf32>
      %26 = vector.extract_strided_slice %22 {offsets = [0, 1], sizes = [64, 1], strides = [1, 1]} : vector<64x2xf32> to vector<64x1xf32>
      %cst_19 = arith.constant 0.00130208337 : f32
      %27 = vector.broadcast %cst_19 : f32 to vector<64x1xf32>
      %28 = arith.mulf %26, %27 : vector<64x1xf32>
      %29 = arith.mulf %25, %25 : vector<64x1xf32>
      %30 = arith.subf %28, %29 : vector<64x1xf32>
      %cst_20 = arith.constant 0.000000e+00 : f32
      %31 = vector.broadcast %cst_20 : f32 to vector<64x1xf32>
      %32 = arith.maximumf %30, %31 : vector<64x1xf32>
      %33 = vector.extract_strided_slice %21 {offsets = [0, 0], sizes = [64, 1], strides = [1, 1]} : vector<64x2xf32> to vector<64x1xf32>
      %cst_21 = arith.constant 9.99999974E-6 : f32
      %34 = vector.broadcast %cst_21 : f32 to vector<64x1xf32>
      %35 = arith.addf %32, %34 : vector<64x1xf32>
      %36 = math.rsqrt %35 : vector<64x1xf32>
      %37 = arith.mulf %33, %36 : vector<64x1xf32>
      %38 = vector.extract_strided_slice %21 {offsets = [0, 1], sizes = [64, 1], strides = [1, 1]} : vector<64x2xf32> to vector<64x1xf32>
      %39 = arith.mulf %25, %37 : vector<64x1xf32>
      %40 = arith.subf %38, %39 : vector<64x1xf32>
      %41 = tpu.concatenate %37, %40 in 1 : vector<64x1xf32>, vector<64x1xf32> -> vector<64x2xf32>
      %c0_22 = arith.constant 0 : index
      %c0_23 = arith.constant 0 : index
      %42 = vector.load %arg7[%c0_22, %c0_23] : memref<64x2xf32, #tpu.memory_space<vmem>>, vector<64x2xf32>
      tpu.vector_store %arg7[%c0_22, %c0_23], %41 {strides = array<i32>} : memref<64x2xf32, #tpu.memory_space<vmem>>, vector<64x2xf32>,
    } else {
    }
    %c0_3 = arith.constant 0 : index
    %c0_4 = arith.constant 0 : index
    %5 = vector.load %arg7[%c0_3, %c0_4] : memref<64x2xf32, #tpu.memory_space<vmem>>, vector<64x1xf32>
    %c0_5 = arith.constant 0 : index
    %c1 = arith.constant 1 : index
    %6 = vector.load %arg7[%c0_5, %c1] : memref<64x2xf32, #tpu.memory_space<vmem>>, vector<64x1xf32>
    %7 = arith.extf %1 : vector<64x384xbf16> to vector<64x384xf32>
    %8 = vector.broadcast %5 : vector<64x1xf32> to vector<64x384xf32>
    %9 = arith.mulf %7, %8 : vector<64x384xf32>
    %10 = vector.broadcast %6 : vector<64x1xf32> to vector<64x384xf32>
    %11 = arith.addf %9, %10 : vector<64x384xf32>
    %cst = arith.constant 0.000000e+00 : f32
    %12 = vector.broadcast %cst : f32 to vector<64x384xf32>
    %13 = arith.maximumf %11, %12 : vector<64x384xf32>
    %14 = arith.truncf %13 : vector<64x384xf32> to vector<64x384xbf16>
    %c0_6 = arith.constant 0 : index
    %c0_7 = arith.constant 0 : index
    %15 = vector.load %arg5[%c0_6, %c0_7] : memref<4x64xbf16, #tpu.memory_space<vmem>>, vector<4x64xbf16>
    %cst_8 = arith.constant dense<0.000000e+00> : vector<4x384xf32>
    %16 = tpu.matmul %15, %14, %cst_8 {dimension_numbers = #tpu.dot_dimension_numbers<[1], [0], [0], [1], [0, 0, 1, 1], [], []>} : vector<4x64xbf16>, vector<64x384xbf16>, vector<4x384xf32> -> vector<4x384xf32>
    %c0_9 = arith.constant 0 : index
    %c0_10 = arith.constant 0 : index
    %c0_11 = arith.constant 0 : index
    %17 = vector.load %arg6[%c0_9, %c0_10, %c0_11] : memref<1x4x384xf32, #tpu.memory_space<vmem>>, vector<1x4x384xf32>
    %18 = vector.shape_cast %17 : vector<1x4x384xf32> to vector<4x384xf32>
    %19 = vector.shape_cast %16 : vector<4x384xf32> to vector<1x4x384xf32>
    tpu.vector_store %arg6[%c0_9, %c0_10, %c0_11], %19 {strides = array<i32>} : memref<1x4x384xf32, #tpu.memory_space<vmem>>, vector<1x4x384xf32>,
    return
  }
  func.func @transform_0(%arg0: i32, %arg1: i32) -> (i32, i32, i32) {
    %c0_i32 = arith.constant 0 : i32
    %c0_i32_0 = arith.constant 0 : i32
    %c0_i32_1 = arith.constant 0 : i32
    %c0_i32_2 = arith.constant 0 : i32
    return %c0_i32, %c0_i32_0, %c0_i32_1 : i32, i32, i32
  }
  func.func @transform_1(%arg0: i32, %arg1: i32) -> (i32, i32) {
    %c0_i32 = arith.constant 0 : i32
    %c0_i32_0 = arith.constant 0 : i32
    %c0_i32_1 = arith.constant 0 : i32
    return %c0_i32, %c0_i32_0 : i32, i32
  }
  func.func @transform_2(%arg0: i32, %arg1: i32) -> (i32, i32, i32) {
    %c0_i32 = arith.constant 0 : i32
    %c0_i32_0 = arith.constant 0 : i32
    return %arg0, %c0_i32, %arg1 : i32, i32, i32
  }
  func.func @transform_3(%arg0: i32, %arg1: i32) -> (i32, i32) {
    %c0_i32 = arith.constant 0 : i32
    %c0_i32_0 = arith.constant 0 : i32
    %c0_i32_1 = arith.constant 0 : i32
    return %c0_i32, %c0_i32_0 : i32, i32
  }
  func.func @transform_4(%arg0: i32, %arg1: i32) -> (i32, i32, i32) {
    %c0_i32 = arith.constant 0 : i32
    %c0_i32_0 = arith.constant 0 : i32
    return %arg0, %c0_i32, %arg1 : i32, i32, i32
  }
}

</mosaic_0001>

<bundles_post_ra>
// kernel: mlp_head_weight_forward.7
= control target key start
LH: loop header
LB: loop body
LE: loop exit
PB: predicated region body
PF: predicated region fallthrough
CT: control target
= control target key end

     0   :  { %9 = vsyncpa [#allocation4], 0  ;;  %s1400_s0 = inlined_call_operand.vmem [shape: f32[2,64,2], index: 0, kind: input, shape index: {}]   ;;  %s1401_s1 = inlined_call_operand.vmem [shape: f32[64,2], index: 1, kind: input, shape index: {}]   ;;  %s1402_s2 = inlined_call_operand.vmem [shape: bf16[2,64,384], index: 2, kind: input, shape index: {}]   ;;  %s1403_s3 = inlined_call_operand.vmem [shape: bf16[4,64], index: 3, kind: input, shape index: {}]   ;;  %s1404_s4 = inlined_call_operand.hbm [shape: f32[2,4,384], index: 4, kind: output, shape index: {}]  }
   0x1   :  { %11 = vsyncpa [#allocation4 + $0x1], 0  ;;  %s1087_s15 = smov 0   ;;  %s1089_s16 = smov 0  }
   0x2   :  { %s1091_s17 = smov 0   ;;  %s1093_s18 = smov 0  }
   0x3   :  { %s1095_s19 = smov 0   ;;  %s1097_s20 = smov 0  }
   0x4 LB: > { %s855_s21 = sadd.s32 4294967295, %s1053_s20   ;;  %s856_s22 = sadd.s32 4294967294, %s1053_s20   ;;  %s1053_s20 = sphi %s1097_s20, %s17_s20   ;;  %s1049_s19 = sphi %s1095_s19, %s1411_s19   ;;  %s1045_s18 = sphi %s1093_s18, %s1410_s18   ;;  %s1041_s17 = sphi %s1091_s17, %s1409_s17   ;;  %s1037_s16 = sphi %s1089_s16, %s1408_s16   ;;  %s1033_s15 = sphi %s1087_s15, %s1407_s15  }
   0x5   : > { %s29_s23 = sadd.s32 1, %s1049_s19  ;;  %s129_s24 = sadd.s32 1, %s1041_s17 }
   0x6   : > { %p31_p0 = scmp.ge.s32.totalorder %s29_s23, 2  ;;  %p139_p1 = scmp.ne.s32.totalorder %s1041_s17, %s1037_s16 }
   0x7   : > { %p140_p2 = scmp.eq.s32.totalorder %s855_s21, 1  ;;  %p145_p3 = scmp.ne.s32.totalorder %s1037_s16, %s1033_s15 }
   0x8   : > { %s1413_s23 = smov (%p31_p0, %s29_s23), 0  ;;  %p146_p5 = scmp.eq.s32.totalorder %s856_s22, 1 }
   0x9   : > { %p1127_p4 = por %p140_p2, %p139_p1  ;;  %s124_s26 = ssub.s32 %s1049_s19, %s1413_s23 }
   0xa   : > { %p859_p6 = scmp.ge.s32.totalorder %s1053_s20, 1  ;;  %p127_p7 = scmp.eq.s32.totalorder %s124_s26, 0 }
   0xb   : > { %p1134_p8 = por %p146_p5, %p145_p3  ;;  %p186_p9 = scmp.lt.s32.totalorder %s1053_s20, 3 }
   0xc   : > { %s1140_s28 = scalar_select %p127_p7, %s1041_s17, %s129_s24  }
   0xd   : > { %p187_p10 = pnand %p859_p6, %p186_p9 }
   0xe   : > { %v248_v0 = vld [vmem:[%s1400_s0] sm:$0xff] (!%p187_p10)  ;;  %vm272_vm0 = vcmask (!%p187_p10), 15360   ;;  %v250_v2 = vld [vmem:[%s1400_s0 + $0x10] sm:$0xff] (!%p187_p10)  ;;  %v249_v7 = vld [vmem:[%s1400_s0 + $0x8] sm:$0xff] (!%p187_p10)  ;;  %s1055_s29 = smov (!%p187_p10), 1   ;;  %s1056_s30 = smov (!%p187_p10), 127  }
   0xf   : > { %190 = sbr.rel (%p187_p10) target bundleno = 814 (0x32e), region = 36  ;;  %v256_v1 = vld [vmem:[%s1400_s0 + $0x40] sm:$0xff] (!%p187_p10)  ;;  %v273_v3 = vsel (!%p187_p10), %vm272_vm0, %v248_v0, 0.0  ;;  %v258_v5 = vld [vmem:[%s1400_s0 + $0x50] sm:$0xff] (!%p187_p10)  ;;  %v279_v6 = vsel (!%p187_p10), %vm272_vm0, %v250_v2, 0.0  ;;  %v257_v8 = vld [vmem:[%s1400_s0 + $0x48] sm:$0xff] (!%p187_p10) }
  0x10   : > { %v274_v4 = vsel (!%p187_p10), %vm272_vm0, %v256_v1, 0.0  ;;  %v280_v10 = vsel (!%p187_p10), %vm272_vm0, %v258_v5, 0.0  ;;  %v276_v11 = vsel (!%p187_p10), %vm272_vm0, %v249_v7, 0.0  ;;  %v277_v12 = vsel (!%p187_p10), %vm272_vm0, %v257_v8, 0.0  ;;  %v251_v13 = vld [vmem:[%s1400_s0 + $0x18] sm:$0xff] (!%p187_p10)  ;;  %v252_v15 = vld [vmem:[%s1400_s0 + $0x20] sm:$0xff] (!%p187_p10) }
  0x11   : > { %v275_v9 = vadd.f32 (!%p187_p10), %v274_v4, %v273_v3  ;;  %v259_v14 = vld [vmem:[%s1400_s0 + $0x58] sm:$0xff] (!%p187_p10)  ;;  %v281_v16 = vadd.f32 (!%p187_p10), %v280_v10, %v279_v6  ;;  %v278_v17 = vadd.f32 (!%p187_p10), %v277_v12, %v276_v11  ;;  %v282_v18 = vsel (!%p187_p10), %vm272_vm0, %v251_v13, 0.0  ;;  %v260_v20 = vld [vmem:[%s1400_s0 + $0x60] sm:$0xff] (!%p187_p10)  ;;  %v253_v21 = vld [vmem:[%s1400_s0 + $0x28] sm:$0xff] (!%p187_p10)  ;;  %p217_p11 = scmp.lt.s32.totalorder (!%p187_p10), %s1045_s18, 1  ;;  %s213_s12 = sand.u32 (!%p187_p10), 1, %s1037_s16  }
  0x12   : > { %v283_v19 = vsel (!%p187_p10), %vm272_vm0, %v259_v14, 0.0  ;;  %v261_v22 = vld [vmem:[%s1400_s0 + $0x68] sm:$0xff] (!%p187_p10)  ;;  %v285_v25 = vsel (!%p187_p10), %vm272_vm0, %v252_v15, 0.0  ;;  %v286_v26 = vsel (!%p187_p10), %vm272_vm0, %v260_v20, 0.0  ;;  %v254_v27 = vld [vmem:[%s1400_s0 + $0x30] sm:$0xff] (!%p187_p10)  ;;  %v288_v32 = vsel (!%p187_p10), %vm272_vm0, %v253_v21, 0.0 }
  0x13   : > { %v1186_v23 = vmul.f32 (!%p187_p10), 0.0013020834, %v275_v9  ;;  %v284_v24 = vadd.f32 (!%p187_p10), %v283_v19, %v282_v18  ;;  %v262_v28 = vld [vmem:[%s1400_s0 + $0x70] sm:$0xff] (!%p187_p10)  ;;  %v1196_v29 = vmul.f32 (!%p187_p10), 0.0013020834, %v281_v16  ;;  %v287_v31 = vadd.f32 (!%p187_p10), %v286_v26, %v285_v25  ;;  %v255_v33 = vld [vmem:[%s1400_s0 + $0x38] sm:$0xff] (!%p187_p10) }
  0x14   : > { %v1198_v30 = vmul.f32 (!%p187_p10), 0.0013020834, %v278_v17  ;;  %v289_v36 = vsel (!%p187_p10), %vm272_vm0, %v261_v22, 0.0  ;;  %v291_v37 = vsel (!%p187_p10), %vm272_vm0, %v254_v27, 0.0  ;;  %v263_v38 = vld [vmem:[%s1400_s0 + $0x78] sm:$0xff] (!%p187_p10)  ;;  %v292_v43 = vsel (!%p187_p10), %vm272_vm0, %v262_v28, 0.0 }
  0x15   : > { %v305_v34 = vmul.f32 (!%p187_p10), %v1186_v23, %v1186_v23  ;;  %v1206_v35 = vmul.f32 (!%p187_p10), 0.0013020834, %v284_v24  ;;  %v307_v39 = vmul.f32 (!%p187_p10), %v1196_v29, %v1196_v29  ;;  %v290_v41 = vadd.f32 (!%p187_p10), %v289_v36, %v288_v32  ;;  %v264_v36 = vld [vmem:[%s1401_s1] sm:$0xff] (!%p187_p10)  ;;  %s883_s13 = smul.u32 (!%p187_p10), 12, %s213_s12 }
  0x16   : > { %v306_v40 = vmul.f32 %v1198_v30, %v1198_v30  ;;  %v1218_v42 = vmul.f32 0.0013020834, %v287_v31  ;;  %v294_v44 = vsel %vm272_vm0, %v255_v33, 0.0  ;;  %v295_v45 = vsel %vm272_vm0, %v263_v38, 0.0  ;;  %s885_s14 = smul.u32 192, %s1045_s18 }
  0x17   : > { %321 = vrot.lane.b32.xlu0 %v305_v34, %s1055_s29  ;;  %325 = vrot.lane.b32.xlu1 %v307_v39, %s1055_s29  ;;  %v308_v46 = vmul.f32 %v1206_v35, %v1206_v35  ;;  %v1226_v47 = vmul.f32 0.0013020834, %v290_v41  ;;  %v293_v48 = vadd.f32 %v292_v43, %v291_v37  ;;  %v296_v49 = vadd.f32 %v295_v45, %v294_v44  ;;  %v265_v39 = vld [vmem:[%s1401_s1 + $0x8] sm:$0xff]  ;;  %s215_s21 = scalar_lea.vmem [#allocation3], %s883_s13 }
  0x18   : > { %v309_v50 = vmul.f32 %v1218_v42, %v1218_v42  ;;  %v1057_v41 = vmov 0   ;;  %vm465_vm1 = vcmask 7168   ;;  %vm1060_vm2 = vmmov 0   ;;  %s779_s22 = sshll.u32 %s215_s21, 4  ;;  %s1350_s22 = int_to_ptr.vmem [resolvable:$true] %s779_s22 }
  0x19   : > { %v1231_v51 = vmul.f32 0.0013020834, %v293_v48  ;;  %v310_v52 = vmul.f32 %v1226_v47, %v1226_v47  ;;  %v1236_v53 = vmul.f32 0.0013020834, %v296_v49  ;;  %947 = vset.pattern.permute.xlu0 %v1057_v41  ;;  %948 = vset.pattern.permute.xlu1 %v1057_v41  ;;  %v267_v49 = vld [vmem:[%s1401_s1 + $0x18] sm:$0xff]  ;;  %vm671_vm3 = vcmask 523264  }
  0x1a   : > { %707 = vmatprep.mubr.bf16.mxu0 %v1057_v41  ;;  %s975_s5 = scalar_lea.vmem %s1350_s22, 192 }
  0x1b   : > { %323 = vrot.lane.b32.xlu0 %v306_v40, %s1055_s29  ;;  %327 = vrot.lane.b32.xlu1 %v308_v46, %s1055_s29  ;;  %v311_v54 = vmul.f32 %v1231_v51, %v1231_v51  ;;  %v312_v55 = vmul.f32 %v1236_v53, %v1236_v53  ;;  %v266_v40 = vld [vmem:[%s1401_s1 + $0x10] sm:$0xff]  ;;  %p976_p12 = scmp.ne.s32.totalorder %s1350_s22, %s975_s5 }
  0x1d   : > { %p977_p13 = pnand %p976_p12, %p1127_p4 }
  0x1f   : > { %329 = vrot.lane.b32.xlu0 %v309_v50, %s1055_s29  ;;  %331 = vrot.lane.b32.xlu1 %v310_v52, %s1055_s29  ;;  %v268_v50 = vld [vmem:[%s1401_s1 + $0x20] sm:$0xff]  ;;  %p978_p0 = pneg %p977_p13 }
  0x23   : > { %333 = vrot.lane.b32.xlu0 %v311_v54, %s1055_s29  ;;  %335 = vrot.lane.b32.xlu1 %v312_v55, %s1055_s29 }
  0x89   : > { %v322_v56 = vpop.permute.xlu0 %321  ;;  %v326_v58 = vpop.permute.xlu1 %325 }
  0x8a   : > { %v345_v57 = vsub.f32 %v1186_v23, %v322_v56  ;;  %v347_v59 = vsub.f32 %v1196_v29, %v326_v58  ;;  %v269_v58 = vld [vmem:[%s1401_s1 + $0x28] sm:$0xff] }
  0x8c   : > { %v353_v60 = vmax.f32 %v345_v57, 0.0  ;;  %v355_v61 = vmax.f32 %v347_v59, 0.0  ;;  %v270_v59 = vld [vmem:[%s1401_s1 + $0x30] sm:$0xff] }
  0x8d   : > { %v324_v62 = vpop.permute.xlu0 %323  ;;  %v328_v1 = vpop.permute.xlu1 %327 }
  0x8e   : > { %v361_v63 = vadd.f32 1e-05, %v353_v60  ;;  %v346_v0 = vsub.f32 %v1198_v30, %v324_v62  ;;  %v363_v2 = vadd.f32 1e-05, %v355_v61  ;;  %v348_v3 = vsub.f32 %v1206_v35, %v328_v1 }
  0x90   : > { %959 = vrsqrt.f32 %v361_v63  ;;  %v354_v4 = vmax.f32 %v346_v0, 0.0  ;;  %v356_v5 = vmax.f32 %v348_v3, 0.0  ;;  %v271_v0 = vld [vmem:[%s1401_s1 + $0x38] sm:$0xff] }
  0x91   : > { %v330_v6 = vpop.permute.xlu0 %329  ;;  %961 = vrsqrt.f32 %v363_v2  ;;  %v332_v9 = vpop.permute.xlu1 %331 }
  0x92   : > { %v362_v7 = vadd.f32 1e-05, %v354_v4  ;;  %v349_v8 = vsub.f32 %v1218_v42, %v330_v6  ;;  %v364_v10 = vadd.f32 1e-05, %v356_v5  ;;  %v350_v11 = vsub.f32 %v1226_v47, %v332_v9 }
  0x94   : > { %963 = vrsqrt.f32 %v362_v7  ;;  %v357_v12 = vmax.f32 %v349_v8, 0.0  ;;  %v358_v13 = vmax.f32 %v350_v11, 0.0 }
  0x95   : > { %v334_v14 = vpop.permute.xlu0 %333  ;;  %965 = vrsqrt.f32 %v364_v10  ;;  %v336_v17 = vpop.permute.xlu1 %335 }
  0x96   : > { %v365_v15 = vadd.f32 1e-05, %v357_v12  ;;  %v351_v16 = vsub.f32 %v1231_v51, %v334_v14  ;;  %v366_v18 = vadd.f32 1e-05, %v358_v13  ;;  %v352_v19 = vsub.f32 %v1236_v53, %v336_v17 }
  0x98   : > { %967 = vrsqrt.f32 %v365_v15  ;;  %v359_v20 = vmax.f32 %v351_v16, 0.0  ;;  %v360_v21 = vmax.f32 %v352_v19, 0.0 }
  0x99   : > { %969 = vrsqrt.f32 %v366_v18 }
  0x9a   : > { %v960_v22 = vpop.eup %959  ;;  %v367_v24 = vadd.f32 1e-05, %v359_v20  ;;  %v368_v25 = vadd.f32 1e-05, %v360_v21 }
  0x9b   : > { %385 = vrot.lane.b32.xlu0 %v960_v22, %s1056_s30  ;;  %v962_v26 = vpop.eup %961 }
  0x9c   : > { %971 = vrsqrt.f32 %v367_v24 }
  0x9d   : > { %973 = vrsqrt.f32 %v368_v25 }
  0x9e   : > { %v964_v27 = vpop.eup %963 }
  0x9f   : > { %389 = vrot.lane.b32.xlu0 %v962_v26, %s1056_s30  ;;  %387 = vrot.lane.b32.xlu1 %v964_v27, %s1056_s30  ;;  %v966_v28 = vpop.eup %965  ;;  %v1058_v26 = vmov 1  }
  0xa2   : > { %v968_v31 = vpop.eup %967 }
  0xa3   : > { %391 = vrot.lane.b32.xlu1 %v966_v28, %s1056_s30  ;;  %393 = vrot.lane.b32.xlu0 %v968_v31, %s1056_s30  ;;  %v970_v32 = vpop.eup %969 }
  0xa6   : > { %v972_v33 = vpop.eup %971 }
  0xa7   : > { %395 = vrot.lane.b32.xlu1 %v970_v32, %s1056_s30  ;;  %397 = vrot.lane.b32.xlu0 %v972_v33, %s1056_s30  ;;  %v974_v34 = vpop.eup %973  ;;  %v1059_v33 = vmov 0.0  }
  0xa8   : > { %871 = vmatprep.subr.bf16.mxu1 %v1059_v33  ;;  %879 = vmatprep.mubr.msk.bf16.mxu1 %vm1060_vm2, %v1059_v33 }
  0xab   : > { %399 = vrot.lane.b32.xlu1 %v974_v34, %s1056_s30  ;;  %s763_s30 = scalar_lea.sflag [#allocation4], %s213_s12 }
 0x10d   : > { %v386_v37 = vpop.permute.xlu0 %385 }
 0x10e   : > { %v409_v38 = vmul.f32 %v386_v37, %v264_v36 }
 0x110   : > { %v417_v43 = vmul.f32 %v409_v38, %v1186_v23 }
 0x111   : > { %v388_v44 = vpop.permute.xlu1 %387  ;;  %v390_v45 = vpop.permute.xlu0 %389 }
 0x112   : > { %v410_v46 = vmul.f32 %v388_v44, %v265_v39  ;;  %v411_v48 = vmul.f32 %v390_v45, %v266_v40  ;;  %433 = vrot.lane.b32.xlu0 %v417_v43, %s1055_s29 }
 0x114   : > { %v418_v52 = vmul.f32 %v410_v46, %v1198_v30  ;;  %v419_v23 = vmul.f32 %v411_v48, %v1196_v29 }
 0x115   : > { %v392_v54 = vpop.permute.xlu1 %391  ;;  %v394_v55 = vpop.permute.xlu0 %393 }
 0x116   : > { %v412_v56 = vmul.f32 %v392_v54, %v267_v49  ;;  %v413_v57 = vmul.f32 %v394_v55, %v268_v50  ;;  %435 = vrot.lane.b32.xlu1 %v418_v52, %s1055_s29  ;;  %437 = vrot.lane.b32.xlu0 %v419_v23, %s1055_s29 }
 0x118   : > { %v420_v30 = vmul.f32 %v412_v56, %v1206_v35  ;;  %v421_v29 = vmul.f32 %v413_v57, %v1218_v42 }
 0x119   : > { %v396_v60 = vpop.permute.xlu1 %395  ;;  %v398_v61 = vpop.permute.xlu0 %397 }
 0x11a   : > { %v414_v62 = vmul.f32 %v396_v60, %v269_v58  ;;  %v415_v63 = vmul.f32 %v398_v61, %v270_v59  ;;  %439 = vrot.lane.b32.xlu1 %v420_v30, %s1055_s29  ;;  %441 = vrot.lane.b32.xlu0 %v421_v29, %s1055_s29 }
 0x11c   : > { %v422_v1 = vmul.f32 %v414_v62, %v1226_v47  ;;  %v423_v2 = vmul.f32 %v415_v63, %v1231_v51 }
 0x11d   : > { %v400_v3 = vpop.permute.xlu1 %399 }
 0x11e   : > { %v416_v35 = vmul.f32 %v400_v3, %v271_v0  ;;  %443 = vrot.lane.b32.xlu1 %v422_v1, %s1055_s29  ;;  %445 = vrot.lane.b32.xlu0 %v423_v2, %s1055_s29 }
 0x120   : > { %v424_v42 = vmul.f32 %v416_v35, %v1236_v53 }
 0x122   : > { %447 = vrot.lane.b32.xlu1 %v424_v42, %s1055_s29  ;;  %s218_s29 = scalar_select %p217_p11, %s1045_s18, 1 }
 0x123   : > { %s1355_s18 = scalar_lea.hbm %s1404_s4, %s885_s14 }
 0x124   : > { %s884_s6 = smul.u32 96, %s218_s29  ;;  %s1061_s29 = smov [#allocation3]  }
 0x126   : > { %s1324_s9 = scalar_lea.vmem %s1402_s2, %s884_s6  ;;  %s979_s6 = sshll.u32 %s1061_s29, 4  ;;  %s980_s6 = int_to_ptr.vmem [resolvable:$false] %s979_s6 }
 0x127   : > { %v228_v43 = vld [vmem:[%s1324_s9] sm:$0xff]  ;;  %s981_s7 = scalar_lea.vmem %s980_s6, 384  ;;  %p982_p1 = scmp.lt.s32.totalorder %s1350_s22, %s980_s6 }
 0x128   : > { %v1331_v1 = vld [vmem:[%s1324_s9 + $0x20] ss:$24 sps:$4 sm:$0xff]   ;;  %p983_p2 = scmp.lt.s32.totalorder %s981_s7, %s975_s5 }
 0x12a   : > { %p984_p3 = por %p983_p2, %p982_p1 }
 0x12c   : > { %p985_p5 = pnand %p984_p3, %p978_p0 }
 0x184   : > { %v434_v4 = vpop.permute.xlu0 %433 }
 0x185   : > { %v457_v5 = vsub.f32 %v264_v36, %v434_v4 }
 0x187   : > { %v466_v6 = vsel %vm465_vm1, %v409_v38, %v457_v5 }
 0x188   : > { %474 = vst.msk [vmem:[#allocation2] sm:$0xff] %vm272_vm0, %v466_v6  ;;  %v436_v47 = vpop.permute.xlu1 %435  ;;  %v438_v7 = vpop.permute.xlu0 %437 }
 0x189   : > { %v458_v51 = vsub.f32 %v265_v39, %v436_v47  ;;  %v459_v8 = vsub.f32 %v266_v40, %v438_v7  ;;  %v230_v39 = vld [vmem:[%s1324_s9 + $0xc] sm:$0xff]  ;;  %v498_v7 = vunpack.c.l.bf16 %v1331_v1 }
 0x18a   : > { %v493_v44 = vunpack.c.l.bf16 %v230_v39  ;;  %v494_v45 = vunpack.c.h.bf16 %v230_v39 }
 0x18b   : > { %v467_v9 = vsel %vm465_vm1, %v410_v46, %v458_v51  ;;  %v468_v10 = vsel %vm465_vm1, %v411_v48, %v459_v8  ;;  %v490_v48 = vunpack.c.l.bf16 %v228_v43 }
 0x18c   : > { %475 = vst.msk [vmem:[#allocation2 + $0x8] sm:$0xff] %vm272_vm0, %v467_v9  ;;  %476 = vst.msk [vmem:[#allocation2 + $0x10] sm:$0xff] %vm272_vm0, %v468_v10  ;;  %v440_v53 = vpop.permute.xlu1 %439  ;;  %v442_v11 = vpop.permute.xlu0 %441 }
 0x18d   : > { %v460_v12 = vsub.f32 %v267_v49, %v440_v53  ;;  %v461_v13 = vsub.f32 %v268_v50, %v442_v11  ;;  %v491_v49 = vunpack.c.h.bf16 %v228_v43  ;;  %v234_v11 = vld [vmem:[%s1324_s9 + $0x24] sm:$0xff] }
 0x18f   : > { %v469_v14 = vsel %vm465_vm1, %v412_v56, %v460_v12  ;;  %v470_v15 = vsel %vm465_vm1, %v413_v57, %v461_v13  ;;  %v482_v16 = vld [vmem:[#allocation2] sm:$0xff] }
 0x190   : > { %477 = vst.msk [vmem:[#allocation2 + $0x18] sm:$0xff] %vm272_vm0, %v469_v14  ;;  %478 = vst.msk [vmem:[#allocation2 + $0x20] sm:$0xff] %vm272_vm0, %v470_v15  ;;  %v444_v17 = vpop.permute.xlu1 %443  ;;  %516 = vperm.xlu0 %947, %v482_v16   ;;  %v446_v18 = vpop.permute.xlu0 %445  ;;  %v235_v12 = vld [vmem:[%s1324_s9 + $0x2c] ss:$24 sps:$4 sm:$0xff]  }
 0x191   : > { %v462_v19 = vsub.f32 %v269_v58, %v444_v17  ;;  %v463_v20 = vsub.f32 %v270_v59, %v446_v18  ;;  %v499_v18 = vunpack.c.l.bf16 %v234_v11 }
 0x193   : > { %v471_v21 = vsel %vm465_vm1, %v414_v62, %v462_v19  ;;  %v472_v22 = vsel %vm465_vm1, %v415_v63, %v463_v20  ;;  %v483_v24 = vld [vmem:[#allocation2 + $0x8] sm:$0xff]  ;;  %v484_v31 = vld [vmem:[#allocation2 + $0x10] sm:$0xff]  ;;  %v500_v19 = vunpack.c.h.bf16 %v234_v11  ;;  %v501_v20 = vunpack.c.l.bf16 %v235_v12 }
 0x194   : > { %479 = vst.msk [vmem:[#allocation2 + $0x28] sm:$0xff] %vm272_vm0, %v471_v21  ;;  %480 = vst.msk [vmem:[#allocation2 + $0x30] sm:$0xff] %vm272_vm0, %v472_v22  ;;  %521 = vperm.xlu1 %948, %v483_v24   ;;  %v448_v25 = vpop.permute.xlu1 %447  ;;  %950 = vset.pattern.permute.xlu0 %v1058_v26 }
 0x195   : > { %v464_v27 = vsub.f32 %v271_v0, %v448_v25  ;;  %583 = vperm.xlu0 %950, %v483_v24   ;;  %v232_v0 = vld [vmem:[%s1324_s9 + $0x18] sm:$0xff] }
 0x196   : > { %v497_v47 = vunpack.c.h.bf16 %v232_v0  ;;  %v496_v8 = vunpack.c.l.bf16 %v232_v0  ;;  %v238_v24 = vld [vmem:[%s1324_s9 + $0x3c] sm:$0xff] }
 0x197   : > { %v473_v28 = vsel %vm465_vm1, %v416_v35, %v464_v27  ;;  %v486_v32 = vld [vmem:[#allocation2 + $0x20] sm:$0xff]  ;;  %v485_v34 = vld [vmem:[#allocation2 + $0x18] sm:$0xff]  ;;  %v505_v39 = vunpack.c.l.bf16 %v238_v24 }
 0x198   : > { %481 = vst.msk [vmem:[#allocation2 + $0x38] sm:$0xff] %vm272_vm0, %v473_v28  ;;  %949 = vset.pattern.permute.xlu1 %v1058_v26 }
 0x199   : > { %579 = vperm.xlu1 %949, %v482_v16   ;;  %587 = vperm.xlu0 %950, %v484_v31  }
 0x19b   : > { %v487_v36 = vld [vmem:[#allocation2 + $0x28] sm:$0xff]  ;;  %v488_v37 = vld [vmem:[#allocation2 + $0x30] sm:$0xff] }
 0x19d   : > { %951 = vset.pattern.permute.xlu1 %v1057_v41  ;;  %953 = vset.pattern.permute.xlu0 %v1057_v41 }
 0x19e   : > { %526 = vperm.xlu1 %951, %v484_v31   ;;  %536 = vperm.xlu0 %953, %v486_v32  }
 0x19f   : > { %v489_v38 = vld [vmem:[#allocation2 + $0x38] sm:$0xff] }
 0x1a2   : > { %531 = vperm.xlu1 %951, %v485_v34   ;;  %956 = vset.pattern.permute.xlu0 %v1058_v26 }
 0x1a3   : > { %599 = vperm.xlu0 %956, %v487_v36  }
 0x1a6   : > { %952 = vset.pattern.permute.xlu1 %v1058_v26 }
 0x1a7   : > { %591 = vperm.xlu1 %952, %v485_v34   ;;  %603 = vperm.xlu0 %956, %v488_v37   ;;  %v236_v34 = vld [vmem:[%s1324_s9 + $0x30] sm:$0xff] }
 0x1ab   : > { %954 = vset.pattern.permute.xlu1 %v1057_v41 }
 0x1ac   : > { %541 = vperm.xlu1 %954, %v487_v36  }
 0x1b0   : > { %955 = vset.pattern.permute.xlu1 %v1058_v26 }
 0x1b1   : > { %595 = vperm.xlu1 %955, %v486_v32  }
 0x1b5   : > { %957 = vset.pattern.permute.xlu1 %v1057_v41  ;;  %v229_v41 = vld [vmem:[%s1324_s9 + $0x8] ss:$12 sps:$4 sm:$0xff]  }
 0x1b6   : > { %546 = vperm.xlu1 %957, %v488_v37   ;;  %v495_v46 = vunpack.c.h.bf16 %v229_v41  ;;  %v492_v50 = vunpack.c.l.bf16 %v229_v41  ;;  %v507_v41 = vunpack.c.h.bf16 %v235_v12 }
 0x1ba   : > { %551 = vperm.xlu1 %957, %v489_v38  }
 0x1be   : > { %958 = vset.pattern.permute.xlu1 %v1058_v26 }
 0x1bf   : > { %607 = vperm.xlu1 %958, %v489_v38  }
 0x20f   : > { %v517_v40 = vpop.permute.xlu0 %516 }
 0x210   : > { %v554_v59 = vmul.f32 %v517_v40, %v490_v48  ;;  %v555_v30 = vmul.f32 %v517_v40, %v491_v49  ;;  %v556_v29 = vmul.f32 %v517_v40, %v492_v50  ;;  %v506_v40 = vunpack.c.h.bf16 %v238_v24 }
 0x211   : > { %v502_v50 = vunpack.c.l.bf16 %v236_v34 }
 0x213   : > { %v522_v52 = vpop.permute.xlu1 %521 }
 0x214   : > { %v557_v23 = vmul.f32 %v522_v52, %v493_v44  ;;  %v558_v54 = vmul.f32 %v522_v52, %v494_v45  ;;  %v559_v55 = vmul.f32 %v522_v52, %v495_v46  ;;  %v584_v56 = vpop.permute.xlu0 %583  ;;  %v503_v52 = vunpack.c.h.bf16 %v236_v34 }
 0x216   : > { %v615_v57 = vadd.f32 %v584_v56, %v559_v55  ;;  %v614_v58 = vadd.f32 %v584_v56, %v558_v54  ;;  %v613_v60 = vadd.f32 %v584_v56, %v557_v23  ;;  %v504_v23 = vunpack.c.h.bf16 %v1331_v1 }
 0x218   : > { %v580_v61 = vpop.permute.xlu1 %579  ;;  %v638_v3 = vmax.f32 %v614_v58, 0.0  ;;  %v639_v35 = vmax.f32 %v615_v57, 0.0  ;;  %v637_v6 = vmax.f32 %v613_v60, 0.0  ;;  %v588_v15 = vpop.permute.xlu0 %587 }
 0x219   : > { %v610_v62 = vadd.f32 %v580_v61, %v554_v59  ;;  %v612_v63 = vadd.f32 %v580_v61, %v556_v29  ;;  %v611_v2 = vadd.f32 %v580_v61, %v555_v30 }
 0x21b   : > { %v635_v42 = vmax.f32 %v611_v2, 0.0  ;;  %v636_v4 = vmax.f32 %v612_v63, 0.0  ;;  %v634_v5 = vmax.f32 %v610_v62, 0.0 }
 0x21d   : > { %v527_v51 = vpop.permute.xlu1 %526  ;;  %v659_v9 = vpack.c.bf16 %v638_v3, %v635_v42  ;;  %v660_v10 = vpack.c.bf16 %v639_v35, %v636_v4  ;;  %v658_v53 = vpack.c.bf16 %v637_v6, %v634_v5  ;;  %v537_v32 = vpop.permute.xlu0 %536  ;;  %v240_v4 = vld [vmem:[%s1324_s9 + $0x48] sm:$0xff]  ;;  %v241_v5 = vld [vmem:[%s1324_s9 + $0x50] ss:$12 sps:$4 sm:$0xff]  }
 0x21e   : > { %v561_v13 = vmul.f32 %v527_v51, %v497_v47  ;;  %v562_v14 = vmul.f32 %v527_v51, %v498_v7  ;;  %v560_v16 = vmul.f32 %v527_v51, %v496_v8  ;;  %v566_v62 = vmul.f32 %v537_v32, %v502_v50  ;;  %v670_v50 = vld [vmem:[%s1403_s3] sm:$0x3] }
 0x21f   : > { %675 = vmatprep.subr.bf16.mxu0 %v659_v9  ;;  %872 = vmatpush3.bf16.msra.mxu1 %v660_v10  ;;  %v567_v63 = vmul.f32 %v537_v32, %v503_v52  ;;  %v568_v0 = vmul.f32 %v537_v32, %v504_v23  ;;  %v509_v10 = vunpack.c.h.bf16 %v240_v4  ;;  %v508_v12 = vunpack.c.l.bf16 %v240_v4 }
 0x220   : > { %676 = vmatpush1.bf16.msra.mxu0 %v658_v53  ;;  %873 = vmatprep.subr.bf16.mxu1 %v1059_v33  ;;  %v617_v21 = vadd.f32 %v588_v15, %v561_v13  ;;  %v618_v22 = vadd.f32 %v588_v15, %v562_v14  ;;  %v616_v25 = vadd.f32 %v588_v15, %v560_v16  ;;  %v510_v53 = vunpack.c.l.bf16 %v241_v5  ;;  %v242_v16 = vld [vmem:[%s1324_s9 + $0x54] sm:$0xff] }
 0x221   : > { %v532_v17 = vpop.permute.xlu1 %531  ;;  %v513_v24 = vunpack.c.h.bf16 %v241_v5 }
 0x222   : > { %v563_v26 = vmul.f32 %v532_v17, %v499_v18  ;;  %v564_v27 = vmul.f32 %v532_v17, %v500_v19  ;;  %v565_v28 = vmul.f32 %v532_v17, %v501_v20  ;;  %v641_v43 = vmax.f32 %v617_v21, 0.0  ;;  %v600_v29 = vpop.permute.xlu0 %599 }
 0x223   : > { %v642_v44 = vmax.f32 %v618_v22, 0.0  ;;  %v640_v49 = vmax.f32 %v616_v25, 0.0  ;;  %v511_v21 = vunpack.c.l.bf16 %v242_v16  ;;  %v512_v22 = vunpack.c.h.bf16 %v242_v16 }
 0x226   : > { %v592_v31 = vpop.permute.xlu1 %591  ;;  %v604_v25 = vpop.permute.xlu0 %603 }
 0x227   : > { %v619_v36 = vadd.f32 %v592_v31, %v563_v26  ;;  %v620_v37 = vadd.f32 %v592_v31, %v564_v27  ;;  %v621_v38 = vadd.f32 %v592_v31, %v565_v28 }
 0x229   : > { %v643_v45 = vmax.f32 %v619_v36, 0.0  ;;  %v644_v46 = vmax.f32 %v620_v37, 0.0  ;;  %v645_v48 = vmax.f32 %v621_v38, 0.0 }
 0x22b   : > { %v542_v54 = vpop.permute.xlu1 %541  ;;  %v662_v55 = vpack.c.bf16 %v644_v46, %v641_v43  ;;  %v663_v56 = vpack.c.bf16 %v645_v48, %v642_v44  ;;  %v661_v57 = vpack.c.bf16 %v643_v45, %v640_v49 }
 0x22c   : > { %v569_v58 = vmul.f32 %v542_v54, %v505_v39  ;;  %v570_v59 = vmul.f32 %v542_v54, %v506_v40  ;;  %v571_v30 = vmul.f32 %v542_v54, %v507_v41 }
 0x22d   : > { %677 = vmatprep.subr.bf16.mxu0 %v662_v55  ;;  %874 = vmatpush3.bf16.msra.mxu1 %v663_v56 }
 0x22e   : > { %v626_v60 = vadd.f32 %v600_v29, %v570_v59  ;;  %v627_v61 = vadd.f32 %v600_v29, %v571_v30  ;;  %678 = vmatpush1.bf16.msra.mxu0 %v661_v57  ;;  %875 = vmatprep.subr.bf16.mxu1 %v1059_v33  ;;  %v625_v1 = vadd.f32 %v600_v29, %v569_v58 }
 0x230   : > { %v596_v2 = vpop.permute.xlu1 %595  ;;  %v650_v6 = vmax.f32 %v626_v60, 0.0  ;;  %v651_v47 = vmax.f32 %v627_v61, 0.0  ;;  %v649_v9 = vmax.f32 %v625_v1, 0.0 }
 0x231   : > { %v622_v3 = vadd.f32 %v596_v2, %v566_v62  ;;  %v623_v35 = vadd.f32 %v596_v2, %v567_v63  ;;  %v624_v42 = vadd.f32 %v596_v2, %v568_v0 }
 0x233   : > { %v646_v7 = vmax.f32 %v622_v3, 0.0  ;;  %v647_v51 = vmax.f32 %v623_v35, 0.0  ;;  %v648_v8 = vmax.f32 %v624_v42, 0.0 }
 0x235   : > { %v547_v11 = vpop.permute.xlu1 %546  ;;  %v665_v13 = vpack.c.bf16 %v650_v6, %v647_v51  ;;  %v666_v14 = vpack.c.bf16 %v651_v47, %v648_v8  ;;  %v664_v15 = vpack.c.bf16 %v649_v9, %v646_v7 }
 0x236   : > { %v573_v17 = vmul.f32 %v547_v11, %v509_v10  ;;  %v574_v18 = vmul.f32 %v547_v11, %v510_v53  ;;  %v572_v19 = vmul.f32 %v547_v11, %v508_v12 }
 0x237   : > { %679 = vmatprep.subr.bf16.mxu0 %v665_v13  ;;  %876 = vmatpush3.bf16.msra.mxu1 %v666_v14 }
 0x238   : > { %680 = vmatpush1.bf16.msra.mxu0 %v664_v15  ;;  %877 = vmatprep.subr.bf16.mxu1 %v1059_v33  ;;  %v629_v26 = vadd.f32 %v604_v25, %v573_v17  ;;  %v630_v27 = vadd.f32 %v604_v25, %v574_v18  ;;  %v628_v28 = vadd.f32 %v604_v25, %v572_v19 }
 0x239   : > { %v552_v20 = vpop.permute.xlu1 %551 }
 0x23a   : > { %v575_v31 = vmul.f32 %v552_v20, %v511_v21  ;;  %v576_v32 = vmul.f32 %v552_v20, %v512_v22  ;;  %v577_v34 = vmul.f32 %v552_v20, %v513_v24  ;;  %v653_v40 = vmax.f32 %v629_v26, 0.0 }
 0x23b   : > { %v654_v41 = vmax.f32 %v630_v27, 0.0  ;;  %v652_v45 = vmax.f32 %v628_v28, 0.0 }
 0x23e   : > { %v608_v36 = vpop.permute.xlu1 %607 }
 0x23f   : > { %v631_v37 = vadd.f32 %v608_v36, %v575_v31  ;;  %v632_v38 = vadd.f32 %v608_v36, %v576_v32  ;;  %v633_v39 = vadd.f32 %v608_v36, %v577_v34 }
 0x241   : > { %v655_v33 = vmax.f32 %v631_v37, 0.0  ;;  %v656_v43 = vmax.f32 %v632_v38, 0.0  ;;  %v657_v44 = vmax.f32 %v633_v39, 0.0 }
 0x243   : > { %v668_v46 = vpack.c.bf16 %v656_v43, %v653_v40  ;;  %v669_v48 = vpack.c.bf16 %v657_v44, %v654_v41  ;;  %v667_v49 = vpack.c.bf16 %v655_v33, %v652_v45 }
 0x245   : > { %681 = vmatprep.subr.bf16.mxu0 %v668_v46  ;;  %878 = vmatpush3.bf16.msra.mxu1 %v669_v48 }
 0x246   : > { %682 = vmatpush1.bf16.msra.mxu0 %v667_v49 }
 0x248   : > { %880 = vmatmul.mubr.msk.bf16.vlgmr.msra.gmra.mrb[0].mxu1 %vm671_vm3, %v670_v50 }
 0x249   : > { %861 = vmatmul.mubr.msk.bf16.vlgmr.msra.gmra.mrb[0].mxu0 %vm671_vm3, %v670_v50 }
 0x31b   : > { %v750_v52 = vpop.f32.mrb[0].mxu1 }
 0x31c   : > { %761 = vst [vmem:[%s215_s21 + $0x8] sm:$0xf] %v750_v52  ;;  %v709_v23 = vpop.f32.mrb[0].mxu0  ;;  %v881_v54 = vpop.f32.mrb[1].mxu1 }
 0x31d   : > { %v711_v55 = vpop.f32.mrb[1].mxu0  ;;  %v753_v56 = vpop.f32.mrb[2].mxu1 }
 0x31e   : > { %v758_v57 = vcombine.low %v709_v23, %v711_v55  ;;  %v713_v58 = vpop.f32.mrb[2].mxu0  ;;  %v882_v59 = vpop.f32.mrb[3].mxu1 }
 0x31f   : > { %v714_v30 = vpop.f32.mrb[3].mxu0 }
 0x320   : > { %760 = vst [vmem:[%s215_s21] sm:$0xff] %v758_v57 }
 0x321   : > { %988 = shalt.err (!%p985_p5)
}
 0x322   : > { %s989_s8 = scalar_lea.hbm %s1355_s18, 192  ;;  %s993_s11 = scalar_lea.hbm %s1404_s4, 384 }
 0x323   : > { %p990_p6 = scmp.ne.s32.totalorder %s1355_s18, %s989_s8  ;;  %p994_p10 = scmp.lt.u32.totalorder %s1355_s18, %s1404_s4 }
 0x324   : > { %p995_p11 = scmp.lt.u32.totalorder %s993_s11, %s989_s8  ;;  %p997_p13 = scmp.lt.u32.totalorder %s989_s8, %s1355_s18 }
 0x325   : > { %p991_p7 = pnand %p990_p6, %p1127_p4 }
 0x326   : > { %p996_p12 = por %p995_p11, %p994_p10 }
 0x327   : > { %p992_p9 = pneg %p991_p7 }
 0x328   : > { %p998_p0 = por %p997_p13, %p996_p12 }
 0x32a   : > { %p999_p1 = pnand %p998_p0, %p992_p9 }
 0x32c   : > { %1002 = shalt.err (!%p999_p1)
}
 0x32d   : > { %886 = dma.vmem_to_hbm [thread:$0]  (%p1127_p4), %s1350_s22, 192, %s1355_s18, %s763_s30  }
 0x32e PF: > { %p892_p2 = scmp.ge.s32.totalorder %s1053_s20, 2  ;;  %s791_s14 = sand.u32 1, %s1033_s15  }
 0x32f   : > { %s792_s21 = scalar_lea.sflag [#allocation4], %s791_s14 }
 0x330   : > { %p889_p3 = pnand %p892_p2, %p1134_p8 }
 0x332   : > { %1028 = dma.done.wait (!%p889_p3), %s792_s21, 192  }
 0x333   : > { %1030 = vsyncadd (!%p889_p3), %s792_s21, 4294967104  ;;  %s17_s20 = sadd.s32 1, %s1053_s20   ;;  %s1407_s15 = smov %s1037_s16 }
 0x334   : > { %p14_p5 = scmp.ge.s32.totalorder %s17_s20, 4   ;;  %s1408_s16 = smov %s1041_s17 }
 0x335   : > { %s1409_s17 = smov %s1140_s28  ;;  %s1410_s18 = smov %s1049_s19 }
 0x336   : > { %s1411_s19 = smov %s1413_s23  ;;  %16 = sbr.rel (!%p14_p5) target bundleno = 4 (0x4), region = 75 }
 0x33d   :  { %797 = vsyncpa [#allocation4], 1 }
 0x33e   :  { %799 = vsyncpa [#allocation4 + $0x1], 1 }

// kernel: mlp_head_weight_forward.6
= control target key start
LH: loop header
LB: loop body
LE: loop exit
PB: predicated region body
PF: predicated region fallthrough
CT: control target
= control target key end

     0   :  { %s1910_s18 = smov 0   ;;  %s1912_s19 = smov 0   ;;  %s2599_s0 = inlined_call_operand.vmem [shape: f32[2,128,2], index: 0, kind: input, shape index: {}]   ;;  %s2600_s1 = inlined_call_operand.vmem [shape: f32[128,2], index: 1, kind: input, shape index: {}]   ;;  %s2601_s2 = inlined_call_operand.vmem [shape: bf16[2,128,384], index: 2, kind: input, shape index: {}]   ;;  %s2602_s3 = inlined_call_operand.vmem [shape: bf16[64,128], index: 3, kind: input, shape index: {}]   ;;  %s2603_s4 = inlined_call_operand.vmem [shape: bf16[2,64,384], index: 4, kind: output, shape index: {0}]   ;;  %s2604_s5 = inlined_call_operand.vmem [shape: f32[2,64,2], index: 5, kind: output, shape index: {1}]  }
   0x1   :  { %s1914_s20 = smov 0  }
   0x2 LB: > { %s28_s21 = sadd.s32 1, %s1869_s19  ;;  %p1680_p0 = scmp.ge.s32.totalorder %s1873_s20, 1  ;;  %s1873_s20 = sphi %s1914_s20, %s16_s20   ;;  %s1869_s19 = sphi %s1912_s19, %s2606_s19   ;;  %s1865_s18 = sphi %s1910_s18, %s2605_s18  }
   0x3   : > { %p30_p1 = scmp.ge.s32.totalorder %s28_s21, 2  ;;  %p211_p2 = scmp.lt.s32.totalorder %s1873_s20, 3 }
   0x5   : > { %s2608_s21 = smov (%p30_p1, %s28_s21), 0  ;;  %p212_p3 = pnand %p1680_p0, %p211_p2 }
   0x6   : > { %v314_v0 = vld [vmem:[%s2599_s0] sm:$0xff] (!%p212_p3)  ;;  %vm362_vm0 = vcmask (!%p212_p3), 15360   ;;  %v316_v2 = vld [vmem:[%s2599_s0 + $0x10] sm:$0xff] (!%p212_p3)  ;;  %v315_v7 = vld [vmem:[%s2599_s0 + $0x8] sm:$0xff] (!%p212_p3)  ;;  %s1875_s16 = smov (!%p212_p3), 1   ;;  %s1876_s25 = smov (!%p212_p3), 127  }
   0x7   : > { %215 = sbr.rel (%p212_p3) target bundleno = 1021 (0x3fd), region = 36  ;;  %v330_v1 = vld [vmem:[%s2599_s0 + $0x80] sm:$0xff] (!%p212_p3)  ;;  %v363_v3 = vsel (!%p212_p3), %vm362_vm0, %v314_v0, 0.0  ;;  %v332_v5 = vld [vmem:[%s2599_s0 + $0x90] sm:$0xff] (!%p212_p3)  ;;  %v369_v6 = vsel (!%p212_p3), %vm362_vm0, %v316_v2, 0.0  ;;  %v331_v8 = vld [vmem:[%s2599_s0 + $0x88] sm:$0xff] (!%p212_p3) }
   0x8   : > { %v364_v4 = vsel (!%p212_p3), %vm362_vm0, %v330_v1, 0.0  ;;  %v370_v10 = vsel (!%p212_p3), %vm362_vm0, %v332_v5, 0.0  ;;  %v366_v11 = vsel (!%p212_p3), %vm362_vm0, %v315_v7, 0.0  ;;  %v367_v12 = vsel (!%p212_p3), %vm362_vm0, %v331_v8, 0.0  ;;  %v317_v13 = vld [vmem:[%s2599_s0 + $0x18] sm:$0xff] (!%p212_p3)  ;;  %v318_v15 = vld [vmem:[%s2599_s0 + $0x20] sm:$0xff] (!%p212_p3) }
   0x9   : > { %v365_v9 = vadd.f32 (!%p212_p3), %v364_v4, %v363_v3  ;;  %v333_v14 = vld [vmem:[%s2599_s0 + $0x98] sm:$0xff] (!%p212_p3)  ;;  %v371_v16 = vadd.f32 (!%p212_p3), %v370_v10, %v369_v6  ;;  %v368_v17 = vadd.f32 (!%p212_p3), %v367_v12, %v366_v11  ;;  %v372_v18 = vsel (!%p212_p3), %vm362_vm0, %v317_v13, 0.0  ;;  %v334_v20 = vld [vmem:[%s2599_s0 + $0xa0] sm:$0xff] (!%p212_p3)  ;;  %v319_v21 = vld [vmem:[%s2599_s0 + $0x28] sm:$0xff] (!%p212_p3)  ;;  %p253_p4 = scmp.lt.s32.totalorder (!%p212_p3), %s1865_s18, 1 }
   0xa   : > { %v373_v19 = vsel (!%p212_p3), %vm362_vm0, %v333_v14, 0.0  ;;  %v335_v22 = vld [vmem:[%s2599_s0 + $0xa8] sm:$0xff] (!%p212_p3)  ;;  %v375_v25 = vsel (!%p212_p3), %vm362_vm0, %v318_v15, 0.0  ;;  %v376_v26 = vsel (!%p212_p3), %vm362_vm0, %v334_v20, 0.0  ;;  %v320_v27 = vld [vmem:[%s2599_s0 + $0x30] sm:$0xff] (!%p212_p3)  ;;  %v378_v32 = vsel (!%p212_p3), %vm362_vm0, %v319_v21, 0.0 }
   0xb   : > { %v1974_v23 = vmul.f32 (!%p212_p3), 0.0013020834, %v365_v9  ;;  %v374_v24 = vadd.f32 (!%p212_p3), %v373_v19, %v372_v18  ;;  %v336_v28 = vld [vmem:[%s2599_s0 + $0xb0] sm:$0xff] (!%p212_p3)  ;;  %v1984_v29 = vmul.f32 (!%p212_p3), 0.0013020834, %v371_v16  ;;  %v377_v31 = vadd.f32 (!%p212_p3), %v376_v26, %v375_v25  ;;  %v321_v33 = vld [vmem:[%s2599_s0 + $0x38] sm:$0xff] (!%p212_p3) }
   0xc   : > { %v1986_v30 = vmul.f32 (!%p212_p3), 0.0013020834, %v368_v17  ;;  %v379_v36 = vsel (!%p212_p3), %vm362_vm0, %v335_v22, 0.0  ;;  %v381_v37 = vsel (!%p212_p3), %vm362_vm0, %v320_v27, 0.0  ;;  %v337_v38 = vld [vmem:[%s2599_s0 + $0xb8] sm:$0xff] (!%p212_p3)  ;;  %v322_v39 = vld [vmem:[%s2599_s0 + $0x40] sm:$0xff] (!%p212_p3) }
   0xd   : > { %v427_v34 = vmul.f32 (!%p212_p3), %v1974_v23, %v1974_v23  ;;  %v1994_v35 = vmul.f32 (!%p212_p3), 0.0013020834, %v374_v24  ;;  %v429_v40 = vmul.f32 (!%p212_p3), %v1984_v29, %v1984_v29  ;;  %v2006_v41 = vmul.f32 (!%p212_p3), 0.0013020834, %v377_v31  ;;  %v338_v43 = vld [vmem:[%s2599_s0 + $0xc0] sm:$0xff] (!%p212_p3)  ;;  %v323_v44 = vld [vmem:[%s2599_s0 + $0x48] sm:$0xff] (!%p212_p3) }
   0xe   : > { %v380_v42 = vadd.f32 %v379_v36, %v378_v32  ;;  %v339_v45 = vld [vmem:[%s2599_s0 + $0xc8] sm:$0xff]  ;;  %v428_v46 = vmul.f32 %v1986_v30, %v1986_v30  ;;  %v382_v47 = vsel %vm362_vm0, %v336_v28, 0.0  ;;  %v384_v48 = vsel %vm362_vm0, %v321_v33, 0.0  ;;  %v324_v58 = vld [vmem:[%s2599_s0 + $0x50] sm:$0xff]  ;;  %v325_v61 = vld [vmem:[%s2599_s0 + $0x58] sm:$0xff]  ;;  %s2610_s18 = smov (!%p253_p4, %s1865_s18), 1 }
   0xf   : > { %459 = vrot.lane.b32.xlu0 %v427_v34, %s1875_s16  ;;  %v385_v49 = vsel %vm362_vm0, %v337_v38, 0.0  ;;  %463 = vrot.lane.b32.xlu1 %v429_v40, %s1875_s16  ;;  %v430_v50 = vmul.f32 %v1994_v35, %v1994_v35  ;;  %v383_v52 = vadd.f32 %v382_v47, %v381_v37  ;;  %v387_v54 = vsel %vm362_vm0, %v322_v39, 0.0  ;;  %v340_v59 = vld [vmem:[%s2599_s0 + $0xd0] sm:$0xff]  ;;  %v341_v62 = vld [vmem:[%s2599_s0 + $0xd8] sm:$0xff]  ;;  %s1760_s14 = smul.u32 192, %s2610_s18  ;;  %s1707_s8 = sshll.u32 %s2610_s18, 6 }
  0x10   : > { %v2026_v51 = vmul.f32 0.0013020834, %v380_v42  ;;  %v386_v53 = vadd.f32 %v385_v49, %v384_v48  ;;  %v388_v55 = vsel %vm362_vm0, %v338_v43, 0.0  ;;  %v390_v56 = vsel %vm362_vm0, %v323_v44, 0.0  ;;  %v326_v8 = vld [vmem:[%s2599_s0 + $0x60] sm:$0xff]  ;;  %v327_v10 = vld [vmem:[%s2599_s0 + $0x68] sm:$0xff]  ;;  %s2530_s11 = scalar_lea.vmem %s2604_s5, %s1707_s8 }
  0x11   : > { %v391_v57 = vsel %vm362_vm0, %v339_v45, 0.0  ;;  %v431_v60 = vmul.f32 %v2006_v41, %v2006_v41  ;;  %v2047_v63 = vmul.f32 0.0013020834, %v383_v52  ;;  %v389_v1 = vadd.f32 %v388_v55, %v387_v54  ;;  %v342_v9 = vld [vmem:[%s2599_s0 + $0xe0] sm:$0xff]  ;;  %v343_v11 = vld [vmem:[%s2599_s0 + $0xe8] sm:$0xff]  ;;  %v328_v22 = vld [vmem:[%s2599_s0 + $0x70] sm:$0xff]  ;;  %s2449_s22 = scalar_lea.vmem %s2601_s2, %s1760_s14 }
  0x12   : > { %v2049_v0 = vmul.f32 0.0013020834, %v386_v53  ;;  %v392_v2 = vadd.f32 %v391_v57, %v390_v56  ;;  %v432_v3 = vmul.f32 %v2026_v51, %v2026_v51  ;;  %v393_v4 = vsel %vm362_vm0, %v324_v58, 0.0  ;;  %v344_v24 = vld [vmem:[%s2599_s0 + $0xf0] sm:$0xff]  ;;  %v329_v25 = vld [vmem:[%s2599_s0 + $0x78] sm:$0xff]  ;;  %s1761_s29 = smul.u32 96, %s2610_s18 }
  0x13   : > { %461 = vrot.lane.b32.xlu0 %v428_v46, %s1875_s16  ;;  %465 = vrot.lane.b32.xlu1 %v430_v50, %s1875_s16  ;;  %v394_v5 = vsel %vm362_vm0, %v340_v59, 0.0  ;;  %v396_v6 = vsel %vm362_vm0, %v325_v61, 0.0  ;;  %v397_v7 = vsel %vm362_vm0, %v341_v62, 0.0  ;;  %v433_v12 = vmul.f32 %v2047_v63, %v2047_v63  ;;  %v345_v26 = vld [vmem:[%s2599_s0 + $0xf8] sm:$0xff] }
  0x14   : > { %v2073_v13 = vmul.f32 0.0013020834, %v389_v1  ;;  %v2075_v14 = vmul.f32 0.0013020834, %v392_v2  ;;  %v395_v15 = vadd.f32 %v394_v5, %v393_v4  ;;  %v434_v16 = vmul.f32 %v2049_v0, %v2049_v0  ;;  %s2504_s7 = scalar_lea.vmem %s2603_s4, %s1761_s29 }
  0x15   : > { %v398_v17 = vadd.f32 %v397_v7, %v396_v6  ;;  %v399_v18 = vsel %vm362_vm0, %v326_v8, 0.0  ;;  %v400_v19 = vsel %vm362_vm0, %v342_v9, 0.0  ;;  %v402_v20 = vsel %vm362_vm0, %v327_v10, 0.0 }
  0x16   : > { %v403_v21 = vsel %vm362_vm0, %v343_v11, 0.0  ;;  %v435_v27 = vmul.f32 %v2073_v13, %v2073_v13  ;;  %v436_v28 = vmul.f32 %v2075_v14, %v2075_v14  ;;  %v2101_v31 = vmul.f32 0.0013020834, %v395_v15 }
  0x17   : > { %467 = vrot.lane.b32.xlu0 %v431_v60, %s1875_s16  ;;  %469 = vrot.lane.b32.xlu1 %v432_v3, %s1875_s16  ;;  %v401_v32 = vadd.f32 %v400_v19, %v399_v18  ;;  %v2104_v33 = vmul.f32 0.0013020834, %v398_v17  ;;  %v404_v34 = vadd.f32 %v403_v21, %v402_v20  ;;  %v405_v36 = vsel %vm362_vm0, %v328_v22, 0.0 }
  0x18   : > { %v406_v37 = vsel %vm362_vm0, %v344_v24, 0.0  ;;  %v408_v38 = vsel %vm362_vm0, %v329_v25, 0.0  ;;  %v409_v39 = vsel %vm362_vm0, %v345_v26, 0.0  ;;  %v437_v40 = vmul.f32 %v2101_v31, %v2101_v31 }
  0x19   : > { %v2113_v42 = vmul.f32 0.0013020834, %v401_v32  ;;  %v407_v43 = vadd.f32 %v406_v37, %v405_v36  ;;  %v438_v44 = vmul.f32 %v2104_v33, %v2104_v33  ;;  %v2118_v45 = vmul.f32 0.0013020834, %v404_v34 }
  0x1a   : > { %v410_v46 = vadd.f32 %v409_v39, %v408_v38  ;;  %vm747_vm1 = vcmask 7168  }
  0x1b   : > { %471 = vrot.lane.b32.xlu0 %v433_v12, %s1875_s16  ;;  %473 = vrot.lane.b32.xlu1 %v434_v16, %s1875_s16  ;;  %v439_v47 = vmul.f32 %v2113_v42, %v2113_v42  ;;  %v2123_v48 = vmul.f32 0.0013020834, %v407_v43  ;;  %v440_v49 = vmul.f32 %v2118_v45, %v2118_v45 }
  0x1c   : > { %v2128_v50 = vmul.f32 0.0013020834, %v410_v46 }
  0x1d   : > { %v441_v52 = vmul.f32 %v2123_v48, %v2123_v48 }
  0x1e   : > { %v442_v53 = vmul.f32 %v2128_v50, %v2128_v50 }
  0x1f   : > { %475 = vrot.lane.b32.xlu0 %v435_v27, %s1875_s16  ;;  %477 = vrot.lane.b32.xlu1 %v436_v28, %s1875_s16 }
  0x23   : > { %479 = vrot.lane.b32.xlu0 %v437_v40, %s1875_s16  ;;  %481 = vrot.lane.b32.xlu1 %v438_v44, %s1875_s16 }
  0x27   : > { %483 = vrot.lane.b32.xlu0 %v439_v47, %s1875_s16  ;;  %485 = vrot.lane.b32.xlu1 %v440_v49, %s1875_s16 }
  0x2b   : > { %487 = vrot.lane.b32.xlu0 %v441_v52, %s1875_s16  ;;  %489 = vrot.lane.b32.xlu1 %v442_v53, %s1875_s16 }
  0x81   : > { %v460_v54 = vpop.permute.xlu0 %459  ;;  %v464_v56 = vpop.permute.xlu1 %463 }
  0x82   : > { %v507_v55 = vsub.f32 %v1974_v23, %v460_v54  ;;  %v509_v57 = vsub.f32 %v1984_v29, %v464_v56 }
  0x84   : > { %v523_v58 = vmax.f32 %v507_v55, 0.0  ;;  %v525_v59 = vmax.f32 %v509_v57, 0.0 }
  0x85   : > { %v462_v60 = vpop.permute.xlu0 %461  ;;  %v466_v1 = vpop.permute.xlu1 %465 }
  0x86   : > { %v539_v61 = vadd.f32 1e-05, %v523_v58  ;;  %v508_v62 = vsub.f32 %v1986_v30, %v462_v60  ;;  %v541_v2 = vadd.f32 1e-05, %v525_v59  ;;  %v510_v3 = vsub.f32 %v1994_v35, %v466_v1 }
  0x88   : > { %1819 = vrsqrt.f32 %v539_v61  ;;  %v524_v4 = vmax.f32 %v508_v62, 0.0  ;;  %v526_v5 = vmax.f32 %v510_v3, 0.0 }
  0x89   : > { %v468_v6 = vpop.permute.xlu0 %467  ;;  %1821 = vrsqrt.f32 %v541_v2  ;;  %v470_v9 = vpop.permute.xlu1 %469 }
  0x8a   : > { %v540_v7 = vadd.f32 1e-05, %v524_v4  ;;  %v511_v8 = vsub.f32 %v2006_v41, %v468_v6  ;;  %v542_v10 = vadd.f32 1e-05, %v526_v5  ;;  %v512_v11 = vsub.f32 %v2026_v51, %v470_v9 }
  0x8c   : > { %1823 = vrsqrt.f32 %v540_v7  ;;  %v527_v12 = vmax.f32 %v511_v8, 0.0  ;;  %v528_v15 = vmax.f32 %v512_v11, 0.0 }
  0x8d   : > { %v472_v16 = vpop.permute.xlu0 %471  ;;  %1825 = vrsqrt.f32 %v542_v10  ;;  %v474_v19 = vpop.permute.xlu1 %473 }
  0x8e   : > { %v543_v17 = vadd.f32 1e-05, %v527_v12  ;;  %v513_v18 = vsub.f32 %v2047_v63, %v472_v16  ;;  %v544_v20 = vadd.f32 1e-05, %v528_v15  ;;  %v514_v21 = vsub.f32 %v2049_v0, %v474_v19 }
  0x90   : > { %1827 = vrsqrt.f32 %v543_v17  ;;  %v529_v22 = vmax.f32 %v513_v18, 0.0  ;;  %v530_v24 = vmax.f32 %v514_v21, 0.0 }
  0x91   : > { %v476_v25 = vpop.permute.xlu0 %475  ;;  %1829 = vrsqrt.f32 %v544_v20  ;;  %v478_v32 = vpop.permute.xlu1 %477 }
  0x92   : > { %v1820_v26 = vpop.eup %1819  ;;  %v545_v27 = vadd.f32 1e-05, %v529_v22  ;;  %v515_v28 = vsub.f32 %v2073_v13, %v476_v25  ;;  %v546_v34 = vadd.f32 1e-05, %v530_v24  ;;  %v516_v36 = vsub.f32 %v2075_v14, %v478_v32 }
  0x93   : > { %587 = vrot.lane.b32.xlu0 %v1820_v26, %s1876_s25  ;;  %v1822_v37 = vpop.eup %1821 }
  0x94   : > { %1831 = vrsqrt.f32 %v545_v27  ;;  %v531_v38 = vmax.f32 %v515_v28, 0.0  ;;  %v532_v39 = vmax.f32 %v516_v36, 0.0  ;;  %v2173_v27 = vld [vmem:[%s2600_s1] sm:$0xff]  ;;  %v2186_v36 = vld [vmem:[%s2600_s1 + $0x10] sm:$0xff] }
  0x95   : > { %v480_v40 = vpop.permute.xlu0 %479  ;;  %1833 = vrsqrt.f32 %v546_v34  ;;  %v482_v47 = vpop.permute.xlu1 %481  ;;  %v2181_v34 = vld [vmem:[%s2600_s1 + $0x8] sm:$0xff] }
  0x96   : > { %v1824_v43 = vpop.eup %1823  ;;  %v547_v44 = vadd.f32 1e-05, %v531_v38  ;;  %v517_v46 = vsub.f32 %v2101_v31, %v480_v40  ;;  %v548_v49 = vadd.f32 1e-05, %v532_v39  ;;  %v518_v52 = vsub.f32 %v2104_v33, %v482_v47 }
  0x97   : > { %591 = vrot.lane.b32.xlu0 %v1822_v37, %s1876_s25  ;;  %589 = vrot.lane.b32.xlu1 %v1824_v43, %s1876_s25  ;;  %v1826_v53 = vpop.eup %1825  ;;  %v1877_v37 = vmov 0  }
  0x98   : > { %1835 = vrsqrt.f32 %v547_v44  ;;  %v533_v54 = vmax.f32 %v517_v46, 0.0  ;;  %v534_v55 = vmax.f32 %v518_v52, 0.0  ;;  %1791 = vset.pattern.permute.xlu0 %v1877_v37  ;;  %1792 = vset.pattern.permute.xlu1 %v1877_v37  ;;  %v2203_v46 = vld [vmem:[%s2600_s1 + $0x18] sm:$0xff] }
  0x99   : > { %v484_v56 = vpop.permute.xlu0 %483  ;;  %1837 = vrsqrt.f32 %v548_v49  ;;  %v486_v60 = vpop.permute.xlu1 %485  ;;  %1220 = vmatprep.mubr.bf16.mxu0 %v1877_v37 }
  0x9a   : > { %v1828_v57 = vpop.eup %1827  ;;  %v549_v58 = vadd.f32 1e-05, %v533_v54  ;;  %v519_v59 = vsub.f32 %v2113_v42, %v484_v56  ;;  %v550_v61 = vadd.f32 1e-05, %v534_v55  ;;  %v520_v62 = vsub.f32 %v2118_v45, %v486_v60  ;;  %v2225_v56 = vld [vmem:[%s2600_s1 + $0x28] sm:$0xff] }
  0x9b   : > { %593 = vrot.lane.b32.xlu1 %v1826_v53, %s1876_s25  ;;  %595 = vrot.lane.b32.xlu0 %v1828_v57, %s1876_s25  ;;  %v1830_v1 = vpop.eup %1829 }
  0x9c   : > { %1839 = vrsqrt.f32 %v549_v58  ;;  %v535_v2 = vmax.f32 %v519_v59, 0.0  ;;  %v536_v3 = vmax.f32 %v520_v62, 0.0  ;;  %v2247_v62 = vld [vmem:[%s2600_s1 + $0x38] sm:$0xff] }
  0x9d   : > { %v488_v4 = vpop.permute.xlu0 %487  ;;  %1841 = vrsqrt.f32 %v550_v61  ;;  %v490_v8 = vpop.permute.xlu1 %489 }
  0x9e   : > { %v1832_v5 = vpop.eup %1831  ;;  %v551_v6 = vadd.f32 1e-05, %v535_v2  ;;  %v521_v7 = vsub.f32 %v2123_v48, %v488_v4  ;;  %v552_v9 = vadd.f32 1e-05, %v536_v3  ;;  %v522_v10 = vsub.f32 %v2128_v50, %v490_v8 }
  0x9f   : > { %597 = vrot.lane.b32.xlu1 %v1830_v1, %s1876_s25  ;;  %599 = vrot.lane.b32.xlu0 %v1832_v5, %s1876_s25  ;;  %v1834_v11 = vpop.eup %1833 }
  0xa0   : > { %1843 = vrsqrt.f32 %v551_v6  ;;  %v537_v12 = vmax.f32 %v521_v7, 0.0  ;;  %v538_v15 = vmax.f32 %v522_v10, 0.0  ;;  %v2269_v6 = vld [vmem:[%s2600_s1 + $0x48] sm:$0xff] }
  0xa1   : > { %1845 = vrsqrt.f32 %v552_v9 }
  0xa2   : > { %v1836_v16 = vpop.eup %1835  ;;  %v553_v17 = vadd.f32 1e-05, %v537_v12  ;;  %v554_v18 = vadd.f32 1e-05, %v538_v15  ;;  %v2291_v12 = vld [vmem:[%s2600_s1 + $0x58] sm:$0xff] }
  0xa3   : > { %601 = vrot.lane.b32.xlu1 %v1834_v11, %s1876_s25  ;;  %603 = vrot.lane.b32.xlu0 %v1836_v16, %s1876_s25  ;;  %v1838_v19 = vpop.eup %1837 }
  0xa4   : > { %1847 = vrsqrt.f32 %v553_v17 }
  0xa5   : > { %1849 = vrsqrt.f32 %v554_v18 }
  0xa6   : > { %v1840_v20 = vpop.eup %1839 }
  0xa7   : > { %605 = vrot.lane.b32.xlu1 %v1838_v19, %s1876_s25  ;;  %607 = vrot.lane.b32.xlu0 %v1840_v20, %s1876_s25  ;;  %v1842_v21 = vpop.eup %1841  ;;  %v2313_v20 = vld [vmem:[%s2600_s1 + $0x68] sm:$0xff] }
  0xaa   : > { %v1844_v22 = vpop.eup %1843 }
  0xab   : > { %609 = vrot.lane.b32.xlu1 %v1842_v21, %s1876_s25  ;;  %611 = vrot.lane.b32.xlu0 %v1844_v22, %s1876_s25  ;;  %v1846_v24 = vpop.eup %1845 }
  0xae   : > { %v1848_v25 = vpop.eup %1847 }
  0xaf   : > { %613 = vrot.lane.b32.xlu1 %v1846_v24, %s1876_s25  ;;  %615 = vrot.lane.b32.xlu0 %v1848_v25, %s1876_s25  ;;  %v1850_v26 = vpop.eup %1849 }
  0xb3   : > { %617 = vrot.lane.b32.xlu1 %v1850_v26, %s1876_s25 }
 0x105   : > { %v588_v28 = vpop.permute.xlu0 %587 }
 0x106   : > { %v2176_v32 = vmul.f32 %v588_v28, %v2173_v27  ;;  %v2335_v28 = vld [vmem:[%s2600_s1 + $0x78] sm:$0xff] }
 0x108   : > { %v651_v38 = vmul.f32 %v2176_v32, %v1974_v23  ;;  %v2208_v23 = vld [vmem:[%s2600_s1 + $0x20] sm:$0xff] }
 0x109   : > { %v590_v39 = vpop.permute.xlu1 %589  ;;  %v592_v40 = vpop.permute.xlu0 %591 }
 0x10a   : > { %v2194_v43 = vmul.f32 %v590_v39, %v2181_v34  ;;  %v2197_v44 = vmul.f32 %v592_v40, %v2186_v36  ;;  %683 = vrot.lane.b32.xlu0 %v651_v38, %s1875_s16 }
 0x10c   : > { %v652_v47 = vmul.f32 %v2194_v43, %v1986_v30  ;;  %v653_v49 = vmul.f32 %v2197_v44, %v1984_v29  ;;  %v2230_v29 = vld [vmem:[%s2600_s1 + $0x30] sm:$0xff] }
 0x10d   : > { %v594_v52 = vpop.permute.xlu1 %593  ;;  %v596_v53 = vpop.permute.xlu0 %595 }
 0x10e   : > { %v2215_v54 = vmul.f32 %v594_v52, %v2203_v46  ;;  %v2218_v55 = vmul.f32 %v596_v53, %v2208_v23  ;;  %685 = vrot.lane.b32.xlu1 %v652_v47, %s1875_s16  ;;  %687 = vrot.lane.b32.xlu0 %v653_v49, %s1875_s16 }
 0x110   : > { %v654_v30 = vmul.f32 %v2215_v54, %v1994_v35  ;;  %v655_v57 = vmul.f32 %v2218_v55, %v2006_v41  ;;  %v2252_v35 = vld [vmem:[%s2600_s1 + $0x40] sm:$0xff] }
 0x111   : > { %v598_v58 = vpop.permute.xlu1 %597  ;;  %v600_v59 = vpop.permute.xlu0 %599 }
 0x112   : > { %v2237_v60 = vmul.f32 %v598_v58, %v2225_v56  ;;  %v2240_v61 = vmul.f32 %v600_v59, %v2230_v29  ;;  %689 = vrot.lane.b32.xlu1 %v654_v30, %s1875_s16  ;;  %691 = vrot.lane.b32.xlu0 %v655_v57, %s1875_s16 }
 0x114   : > { %v656_v41 = vmul.f32 %v2237_v60, %v2026_v51  ;;  %v657_v1 = vmul.f32 %v2240_v61, %v2047_v63  ;;  %v2274_v51 = vld [vmem:[%s2600_s1 + $0x50] sm:$0xff] }
 0x115   : > { %v602_v2 = vpop.permute.xlu1 %601  ;;  %v604_v3 = vpop.permute.xlu0 %603 }
 0x116   : > { %v2259_v4 = vmul.f32 %v602_v2, %v2247_v62  ;;  %v2262_v5 = vmul.f32 %v604_v3, %v2252_v35  ;;  %693 = vrot.lane.b32.xlu1 %v656_v41, %s1875_s16  ;;  %695 = vrot.lane.b32.xlu0 %v657_v1, %s1875_s16  ;;  %v1878_v3 = vmov 1  }
 0x118   : > { %v658_v63 = vmul.f32 %v2259_v4, %v2049_v0  ;;  %v659_v7 = vmul.f32 %v2262_v5, %v2073_v13  ;;  %v2296_v0 = vld [vmem:[%s2600_s1 + $0x60] sm:$0xff] }
 0x119   : > { %v606_v8 = vpop.permute.xlu1 %605  ;;  %v608_v9 = vpop.permute.xlu0 %607 }
 0x11a   : > { %v2281_v10 = vmul.f32 %v606_v8, %v2269_v6  ;;  %v2284_v11 = vmul.f32 %v608_v9, %v2274_v51  ;;  %697 = vrot.lane.b32.xlu1 %v658_v63, %s1875_s16  ;;  %699 = vrot.lane.b32.xlu0 %v659_v7, %s1875_s16 }
 0x11c   : > { %v660_v13 = vmul.f32 %v2281_v10, %v2075_v14  ;;  %v661_v15 = vmul.f32 %v2284_v11, %v2101_v31  ;;  %v2318_v14 = vld [vmem:[%s2600_s1 + $0x70] sm:$0xff] }
 0x11d   : > { %v610_v16 = vpop.permute.xlu1 %609  ;;  %v612_v17 = vpop.permute.xlu0 %611 }
 0x11e   : > { %v2303_v18 = vmul.f32 %v610_v16, %v2291_v12  ;;  %v2306_v19 = vmul.f32 %v612_v17, %v2296_v0  ;;  %701 = vrot.lane.b32.xlu1 %v660_v13, %s1875_s16  ;;  %703 = vrot.lane.b32.xlu0 %v661_v15, %s1875_s16 }
 0x120   : > { %v662_v31 = vmul.f32 %v2303_v18, %v2104_v33  ;;  %v663_v21 = vmul.f32 %v2306_v19, %v2113_v42 }
 0x121   : > { %v614_v22 = vpop.permute.xlu1 %613  ;;  %v616_v24 = vpop.permute.xlu0 %615 }
 0x122   : > { %v2325_v25 = vmul.f32 %v614_v22, %v2313_v20  ;;  %v2328_v26 = vmul.f32 %v616_v24, %v2318_v14  ;;  %705 = vrot.lane.b32.xlu1 %v662_v31, %s1875_s16  ;;  %707 = vrot.lane.b32.xlu0 %v663_v21, %s1875_s16 }
 0x124   : > { %v664_v33 = vmul.f32 %v2325_v25, %v2118_v45  ;;  %v665_v42 = vmul.f32 %v2328_v26, %v2123_v48 }
 0x125   : > { %v618_v38 = vpop.permute.xlu1 %617 }
 0x126   : > { %v2342_v39 = vmul.f32 %v618_v38, %v2335_v28  ;;  %709 = vrot.lane.b32.xlu1 %v664_v33, %s1875_s16  ;;  %711 = vrot.lane.b32.xlu0 %v665_v42, %s1875_s16 }
 0x128   : > { %v666_v40 = vmul.f32 %v2342_v39, %v2128_v50 }
 0x12a   : > { %713 = vrot.lane.b32.xlu1 %v666_v40, %s1875_s16 }
 0x17c   : > { %v684_v47 = vpop.permute.xlu0 %683 }
 0x17d   : > { %v731_v45 = vsub.f32 %v2173_v27, %v684_v47 }
 0x17f   : > { %v748_v48 = vsel %vm747_vm1, %v2176_v32, %v731_v45 }
 0x180   : > { %764 = vst.msk [vmem:[#allocation2] sm:$0xff] %vm362_vm0, %v748_v48  ;;  %v686_v49 = vpop.permute.xlu1 %685  ;;  %v688_v52 = vpop.permute.xlu0 %687  ;;  %v2438_v48 = vld [vmem:[%s2602_s3] sm:$0xff]  }
 0x181   : > { %v732_v53 = vsub.f32 %v2181_v34, %v686_v49  ;;  %v733_v30 = vsub.f32 %v2186_v36, %v688_v52  ;;  %1752 = vmatprep.mubr.bf16.mxu1 %v2438_v48  ;;  %v280_v49 = vld [vmem:[%s2449_s22 + $0xc] sm:$0xff] }
 0x183   : > { %v749_v50 = vsel %vm747_vm1, %v2194_v43, %v732_v53  ;;  %v750_v57 = vsel %vm747_vm1, %v2197_v44, %v733_v30  ;;  %v279_v53 = vld [vmem:[%s2449_s22 + $0x8] ss:$12 sps:$4 sm:$0xff]   ;;  %v278_v30 = vld [vmem:[%s2449_s22] sm:$0xff] }
 0x184   : > { %765 = vst.msk [vmem:[#allocation2 + $0x8] sm:$0xff] %vm362_vm0, %v749_v50  ;;  %766 = vst.msk [vmem:[#allocation2 + $0x10] sm:$0xff] %vm362_vm0, %v750_v57  ;;  %v690_v27 = vpop.permute.xlu1 %689  ;;  %v692_v32 = vpop.permute.xlu0 %691  ;;  %v799_v50 = vunpack.c.l.bf16 %v280_v49  ;;  %v800_v57 = vunpack.c.h.bf16 %v280_v49 }
 0x185   : > { %v734_v58 = vsub.f32 %v2203_v46, %v690_v27  ;;  %v735_v59 = vsub.f32 %v2208_v23, %v692_v32  ;;  %v801_v27 = vunpack.c.h.bf16 %v279_v53  ;;  %v796_v32 = vunpack.c.l.bf16 %v278_v30 }
 0x187   : > { %v751_v34 = vsel %vm747_vm1, %v2215_v54, %v734_v58  ;;  %v752_v36 = vsel %vm747_vm1, %v2218_v55, %v735_v59  ;;  %v780_v43 = vld [vmem:[#allocation2] sm:$0xff]  ;;  %v797_v58 = vunpack.c.h.bf16 %v278_v30  ;;  %v798_v59 = vunpack.c.l.bf16 %v279_v53 }
 0x188   : > { %767 = vst.msk [vmem:[#allocation2 + $0x18] sm:$0xff] %vm362_vm0, %v751_v34  ;;  %768 = vst.msk [vmem:[#allocation2 + $0x20] sm:$0xff] %vm362_vm0, %v752_v36  ;;  %v694_v44 = vpop.permute.xlu1 %693  ;;  %846 = vperm.xlu0 %1791, %v780_v43   ;;  %v696_v41 = vpop.permute.xlu0 %695 }
 0x189   : > { %v736_v1 = vsub.f32 %v2225_v56, %v694_v44  ;;  %v737_v46 = vsub.f32 %v2230_v29, %v696_v41 }
 0x18b   : > { %v753_v23 = vsel %vm747_vm1, %v2237_v60, %v736_v1  ;;  %v754_v54 = vsel %vm747_vm1, %v2240_v61, %v737_v46  ;;  %v781_v2 = vld [vmem:[#allocation2 + $0x8] sm:$0xff]  ;;  %v782_v9 = vld [vmem:[#allocation2 + $0x10] sm:$0xff] }
 0x18c   : > { %769 = vst.msk [vmem:[#allocation2 + $0x28] sm:$0xff] %vm362_vm0, %v753_v23  ;;  %770 = vst.msk [vmem:[#allocation2 + $0x30] sm:$0xff] %vm362_vm0, %v754_v54  ;;  %851 = vperm.xlu1 %1792, %v781_v2   ;;  %v698_v55 = vpop.permute.xlu1 %697  ;;  %1794 = vset.pattern.permute.xlu0 %v1878_v3  ;;  %v700_v63 = vpop.permute.xlu0 %699 }
 0x18d   : > { %v738_v56 = vsub.f32 %v2247_v62, %v698_v55  ;;  %v739_v29 = vsub.f32 %v2252_v35, %v700_v63  ;;  %977 = vperm.xlu0 %1794, %v781_v2  }
 0x18f   : > { %v755_v60 = vsel %vm747_vm1, %v2259_v4, %v738_v56  ;;  %v756_v61 = vsel %vm747_vm1, %v2262_v5, %v739_v29  ;;  %v783_v21 = vld [vmem:[#allocation2 + $0x18] sm:$0xff] }
 0x190   : > { %771 = vst.msk [vmem:[#allocation2 + $0x38] sm:$0xff] %vm362_vm0, %v755_v60  ;;  %772 = vst.msk [vmem:[#allocation2 + $0x40] sm:$0xff] %vm362_vm0, %v756_v61  ;;  %1793 = vset.pattern.permute.xlu1 %v1878_v3  ;;  %v702_v7 = vpop.permute.xlu1 %701  ;;  %v704_v8 = vpop.permute.xlu0 %703  ;;  %v282_v29 = vld [vmem:[%s2449_s22 + $0x18] sm:$0xff] }
 0x191   : > { %v740_v62 = vsub.f32 %v2269_v6, %v702_v7  ;;  %v741_v35 = vsub.f32 %v2274_v51, %v704_v8  ;;  %973 = vperm.xlu1 %1793, %v780_v43   ;;  %981 = vperm.xlu0 %1794, %v782_v9   ;;  %v784_v51 = vld [vmem:[#allocation2 + $0x20] sm:$0xff] }
 0x192   : > { %v2456_v60 = vld [vmem:[%s2449_s22 + $0x20] ss:$24 sps:$4 sm:$0xff]  }
 0x193   : > { %v757_v4 = vsel %vm747_vm1, %v2281_v10, %v740_v62  ;;  %v758_v5 = vsel %vm747_vm1, %v2284_v11, %v741_v35  ;;  %v785_v22 = vld [vmem:[#allocation2 + $0x28] sm:$0xff] }
 0x194   : > { %773 = vst.msk [vmem:[#allocation2 + $0x48] sm:$0xff] %vm362_vm0, %v757_v4  ;;  %774 = vst.msk [vmem:[#allocation2 + $0x50] sm:$0xff] %vm362_vm0, %v758_v5  ;;  %v706_v13 = vpop.permute.xlu1 %705  ;;  %v708_v15 = vpop.permute.xlu0 %707  ;;  %v803_v5 = vunpack.c.h.bf16 %v282_v29 }
 0x195   : > { %v742_v16 = vsub.f32 %v2291_v12, %v706_v13  ;;  %v743_v6 = vsub.f32 %v2296_v0, %v708_v15  ;;  %1795 = vset.pattern.permute.xlu1 %v1877_v37  ;;  %1797 = vset.pattern.permute.xlu0 %v1877_v37  ;;  %v804_v13 = vunpack.c.l.bf16 %v2456_v60 }
 0x196   : > { %856 = vperm.xlu1 %1795, %v782_v9   ;;  %866 = vperm.xlu0 %1797, %v784_v51  }
 0x197   : > { %v759_v10 = vsel %vm747_vm1, %v2303_v18, %v742_v16  ;;  %v760_v11 = vsel %vm747_vm1, %v2306_v19, %v743_v6  ;;  %v787_v42 = vld [vmem:[#allocation2 + $0x38] sm:$0xff]  ;;  %v802_v16 = vunpack.c.l.bf16 %v282_v29 }
 0x198   : > { %775 = vst.msk [vmem:[#allocation2 + $0x58] sm:$0xff] %vm362_vm0, %v759_v10  ;;  %776 = vst.msk [vmem:[#allocation2 + $0x60] sm:$0xff] %vm362_vm0, %v760_v11  ;;  %v710_v12 = vpop.permute.xlu1 %709  ;;  %v712_v17 = vpop.permute.xlu0 %711  ;;  %v284_v11 = vld [vmem:[%s2449_s22 + $0x24] sm:$0xff] }
 0x199   : > { %v744_v0 = vsub.f32 %v2313_v20, %v710_v12  ;;  %v745_v31 = vsub.f32 %v2318_v14, %v712_v17  ;;  %v786_v14 = vld [vmem:[#allocation2 + $0x30] sm:$0xff]  ;;  %v285_v12 = vld [vmem:[%s2449_s22 + $0x2c] ss:$24 sps:$4 sm:$0xff]  }
 0x19a   : > { %861 = vperm.xlu1 %1795, %v783_v21   ;;  %1800 = vset.pattern.permute.xlu0 %v1878_v3  ;;  %v813_v30 = vunpack.c.h.bf16 %v285_v12 }
 0x19b   : > { %v761_v18 = vsel %vm747_vm1, %v2325_v25, %v744_v0  ;;  %v762_v19 = vsel %vm747_vm1, %v2328_v26, %v745_v31  ;;  %993 = vperm.xlu0 %1800, %v785_v22   ;;  %v788_v25 = vld [vmem:[#allocation2 + $0x40] sm:$0xff]  ;;  %v789_v26 = vld [vmem:[#allocation2 + $0x48] sm:$0xff] }
 0x19c   : > { %777 = vst.msk [vmem:[#allocation2 + $0x68] sm:$0xff] %vm362_vm0, %v761_v18  ;;  %778 = vst.msk [vmem:[#allocation2 + $0x70] sm:$0xff] %vm362_vm0, %v762_v19  ;;  %v714_v24 = vpop.permute.xlu1 %713  ;;  %v805_v18 = vunpack.c.l.bf16 %v284_v11  ;;  %v806_v19 = vunpack.c.h.bf16 %v284_v11 }
 0x19d   : > { %v746_v20 = vsub.f32 %v2335_v28, %v714_v24  ;;  %v790_v28 = vld [vmem:[#allocation2 + $0x50] sm:$0xff]  ;;  %v807_v24 = vunpack.c.l.bf16 %v285_v12 }
 0x19e   : > { %1796 = vset.pattern.permute.xlu1 %v1878_v3 }
 0x19f   : > { %v763_v33 = vsel %vm747_vm1, %v2342_v39, %v746_v20  ;;  %985 = vperm.xlu1 %1796, %v783_v21   ;;  %997 = vperm.xlu0 %1800, %v786_v14   ;;  %v792_v38 = vld [vmem:[#allocation2 + $0x60] sm:$0xff]  ;;  %v791_v47 = vld [vmem:[#allocation2 + $0x58] sm:$0xff] }
 0x1a0   : > { %779 = vst.msk [vmem:[#allocation2 + $0x78] sm:$0xff] %vm362_vm0, %v763_v33  ;;  %v288_v33 = vld [vmem:[%s2449_s22 + $0x3c] sm:$0xff] }
 0x1a1   : > { %v812_v53 = vunpack.c.h.bf16 %v288_v33 }
 0x1a3   : > { %1798 = vset.pattern.permute.xlu1 %v1877_v37  ;;  %1803 = vset.pattern.permute.xlu0 %v1877_v37  ;;  %v793_v39 = vld [vmem:[#allocation2 + $0x68] sm:$0xff]  ;;  %v794_v40 = vld [vmem:[#allocation2 + $0x70] sm:$0xff] }
 0x1a4   : > { %871 = vperm.xlu1 %1798, %v785_v22   ;;  %886 = vperm.xlu0 %1803, %v788_v25  }
 0x1a7   : > { %v795_v45 = vld [vmem:[#allocation2 + $0x78] sm:$0xff] }
 0x1a8   : > { %1799 = vset.pattern.permute.xlu1 %v1878_v3  ;;  %1806 = vset.pattern.permute.xlu0 %v1878_v3 }
 0x1a9   : > { %989 = vperm.xlu1 %1799, %v784_v51   ;;  %1009 = vperm.xlu0 %1806, %v789_v26  }
 0x1ad   : > { %1801 = vset.pattern.permute.xlu1 %v1877_v37  ;;  %1013 = vperm.xlu0 %1806, %v790_v28  }
 0x1ae   : > { %876 = vperm.xlu1 %1801, %v786_v14  }
 0x1b1   : > { %1809 = vset.pattern.permute.xlu0 %v1877_v37 }
 0x1b2   : > { %881 = vperm.xlu1 %1801, %v787_v42   ;;  %906 = vperm.xlu0 %1809, %v792_v38  }
 0x1b6   : > { %1802 = vset.pattern.permute.xlu1 %v1878_v3  ;;  %1812 = vset.pattern.permute.xlu0 %v1878_v3 }
 0x1b7   : > { %1001 = vperm.xlu1 %1802, %v787_v42   ;;  %1025 = vperm.xlu0 %1812, %v793_v39  }
 0x1bb   : > { %1804 = vset.pattern.permute.xlu1 %v1877_v37  ;;  %1029 = vperm.xlu0 %1812, %v794_v40  }
 0x1bc   : > { %891 = vperm.xlu1 %1804, %v789_v26  }
 0x1c0   : > { %1805 = vset.pattern.permute.xlu1 %v1878_v3 }
 0x1c1   : > { %1005 = vperm.xlu1 %1805, %v788_v25  }
 0x1c5   : > { %1807 = vset.pattern.permute.xlu1 %v1877_v37 }
 0x1c6   : > { %896 = vperm.xlu1 %1807, %v790_v28  }
 0x1ca   : > { %901 = vperm.xlu1 %1807, %v791_v47  }
 0x1ce   : > { %1808 = vset.pattern.permute.xlu1 %v1878_v3 }
 0x1cf   : > { %1017 = vperm.xlu1 %1808, %v791_v47  }
 0x1d3   : > { %1810 = vset.pattern.permute.xlu1 %v1877_v37 }
 0x1d4   : > { %911 = vperm.xlu1 %1810, %v793_v39  }
 0x1d8   : > { %1811 = vset.pattern.permute.xlu1 %v1878_v3 }
 0x1d9   : > { %1021 = vperm.xlu1 %1811, %v792_v38  }
 0x1dd   : > { %1813 = vset.pattern.permute.xlu1 %v1877_v37 }
 0x1de   : > { %916 = vperm.xlu1 %1813, %v794_v40   ;;  %v286_v40 = vld [vmem:[%s2449_s22 + $0x30] sm:$0xff] }
 0x1e2   : > { %921 = vperm.xlu1 %1813, %v795_v45  }
 0x1e6   : > { %1814 = vset.pattern.permute.xlu1 %v1878_v3 }
 0x1e7   : > { %1033 = vperm.xlu1 %1814, %v795_v45  }
 0x207   : > { %v847_v52 = vpop.permute.xlu0 %846 }
 0x208   : > { %v924_v23 = vmul.f32 %v847_v52, %v796_v32  ;;  %v925_v54 = vmul.f32 %v847_v52, %v797_v58  ;;  %v926_v2 = vmul.f32 %v847_v52, %v798_v59  ;;  %v811_v52 = vunpack.c.l.bf16 %v288_v33 }
 0x20b   : > { %v852_v34 = vpop.permute.xlu1 %851 }
 0x20c   : > { %v927_v36 = vmul.f32 %v852_v34, %v799_v50  ;;  %v928_v43 = vmul.f32 %v852_v34, %v800_v57  ;;  %v929_v44 = vmul.f32 %v852_v34, %v801_v27  ;;  %v978_v41 = vpop.permute.xlu0 %977  ;;  %v808_v34 = vunpack.c.l.bf16 %v286_v40 }
 0x20e   : > { %v1041_v1 = vadd.f32 %v978_v41, %v929_v44  ;;  %v1040_v46 = vadd.f32 %v978_v41, %v928_v43  ;;  %v1039_v55 = vadd.f32 %v978_v41, %v927_v36  ;;  %v809_v36 = vunpack.c.h.bf16 %v286_v40 }
 0x20f   : > { %v810_v43 = vunpack.c.h.bf16 %v2456_v60 }
 0x210   : > { %v974_v3 = vpop.permute.xlu1 %973  ;;  %v1088_v7 = vmax.f32 %v1040_v46, 0.0  ;;  %v1089_v8 = vmax.f32 %v1041_v1, 0.0  ;;  %v1087_v4 = vmax.f32 %v1039_v55, 0.0  ;;  %v982_v31 = vpop.permute.xlu0 %981 }
 0x211   : > { %v1036_v63 = vadd.f32 %v974_v3, %v924_v23  ;;  %v1038_v56 = vadd.f32 %v974_v3, %v926_v2  ;;  %v1037_v61 = vadd.f32 %v974_v3, %v925_v54 }
 0x213   : > { %v1085_v9 = vmax.f32 %v1037_v61, 0.0  ;;  %v1086_v62 = vmax.f32 %v1038_v56, 0.0  ;;  %v1084_v35 = vmax.f32 %v1036_v63, 0.0 }
 0x215   : > { %v857_v15 = vpop.permute.xlu1 %856  ;;  %v1133_v6 = vpack.c.bf16 %v1088_v7, %v1085_v9  ;;  %v1134_v51 = vpack.c.bf16 %v1089_v8, %v1086_v62  ;;  %v1132_v10 = vpack.c.bf16 %v1087_v4, %v1084_v35  ;;  %v867_v39 = vpop.permute.xlu0 %866  ;;  %v290_v35 = vld [vmem:[%s2449_s22 + $0x48] sm:$0xff] }
 0x216   : > { %v931_v17 = vmul.f32 %v857_v15, %v803_v5  ;;  %v932_v0 = vmul.f32 %v857_v15, %v804_v13  ;;  %v930_v21 = vmul.f32 %v857_v15, %v802_v16  ;;  %v936_v56 = vmul.f32 %v867_v39, %v808_v34  ;;  %v2466_v13 = vld [vmem:[%s2449_s22 + $0x50] ss:$24 sps:$4 sm:$0xff]  }
 0x217   : > { %1188 = vmatprep.subr.bf16.mxu0 %v1133_v6  ;;  %1736 = vmatprep.subr.bf16.mxu1 %v1134_v51  ;;  %v937_v29 = vmul.f32 %v867_v39, %v809_v36  ;;  %v938_v61 = vmul.f32 %v867_v39, %v810_v43  ;;  %v816_v11 = vunpack.c.l.bf16 %v2466_v13  ;;  %v296_v39 = vld [vmem:[%s2449_s22 + $0x6c] sm:$0xff] }
 0x218   : > { %1189 = vmatpush1.bf16.msra.mxu0 %v1132_v10  ;;  %1737 = vmatpush3.bf16.msra.mxu1 %v1134_v51  ;;  %v1043_v20 = vadd.f32 %v982_v31, %v931_v17  ;;  %v1044_v14 = vadd.f32 %v982_v31, %v932_v0  ;;  %v1042_v25 = vadd.f32 %v982_v31, %v930_v21  ;;  %v815_v10 = vunpack.c.h.bf16 %v290_v35 }
 0x219   : > { %v862_v22 = vpop.permute.xlu1 %861  ;;  %v814_v17 = vunpack.c.l.bf16 %v290_v35 }
 0x21a   : > { %v933_v26 = vmul.f32 %v862_v22, %v805_v18  ;;  %v934_v28 = vmul.f32 %v862_v22, %v806_v19  ;;  %v935_v42 = vmul.f32 %v862_v22, %v807_v24  ;;  %v1091_v50 = vmax.f32 %v1043_v20, 0.0  ;;  %v994_v55 = vpop.permute.xlu0 %993  ;;  %v292_v22 = vld [vmem:[%s2449_s22 + $0x54] sm:$0xff] }
 0x21b   : > { %v1092_v57 = vmax.f32 %v1044_v14, 0.0  ;;  %v1090_v59 = vmax.f32 %v1042_v25, 0.0  ;;  %v2471_v18 = vld [vmem:[%s2449_s22 + $0x5c] ss:$60 sps:$4 sm:$0xff]   ;;  %v817_v25 = vunpack.c.l.bf16 %v292_v22 }
 0x21e   : > { %v986_v38 = vpop.permute.xlu1 %985  ;;  %v998_v20 = vpop.permute.xlu0 %997 }
 0x21f   : > { %v1045_v47 = vadd.f32 %v986_v38, %v933_v26  ;;  %v1046_v45 = vadd.f32 %v986_v38, %v934_v28  ;;  %v1047_v49 = vadd.f32 %v986_v38, %v935_v42  ;;  %v818_v26 = vunpack.c.h.bf16 %v292_v22 }
 0x220   : > { %v819_v28 = vunpack.c.l.bf16 %v2471_v18 }
 0x221   : > { %v1093_v27 = vmax.f32 %v1045_v47, 0.0  ;;  %v1094_v32 = vmax.f32 %v1046_v45, 0.0  ;;  %v1095_v58 = vmax.f32 %v1047_v49, 0.0 }
 0x223   : > { %v872_v44 = vpop.permute.xlu1 %871  ;;  %v1136_v41 = vpack.c.bf16 %v1094_v32, %v1091_v50  ;;  %v1137_v1 = vpack.c.bf16 %v1095_v58, %v1092_v57  ;;  %v1135_v46 = vpack.c.bf16 %v1093_v27, %v1090_v59  ;;  %v294_v50 = vld [vmem:[%s2449_s22 + $0x60] sm:$0xff]  ;;  %v823_v58 = vunpack.c.l.bf16 %v296_v39 }
 0x224   : > { %v939_v23 = vmul.f32 %v872_v44, %v811_v52  ;;  %v940_v54 = vmul.f32 %v872_v44, %v812_v53  ;;  %v941_v2 = vmul.f32 %v872_v44, %v813_v30  ;;  %v297_v52 = vld [vmem:[%s2449_s22 + $0x74] ss:$12 sps:$4 sm:$0xff]   ;;  %v887_v30 = vpop.permute.xlu0 %886  ;;  %v824_v59 = vunpack.c.h.bf16 %v296_v39 }
 0x225   : > { %1190 = vmatprep.subr.bf16.mxu0 %v1136_v41  ;;  %1738 = vmatprep.subr.bf16.mxu1 %v1137_v1  ;;  %v825_v34 = vunpack.c.l.bf16 %v297_v52  ;;  %v828_v22 = vunpack.c.h.bf16 %v297_v52 }
 0x226   : > { %v1052_v3 = vadd.f32 %v994_v55, %v940_v54  ;;  %v1053_v63 = vadd.f32 %v994_v55, %v941_v2  ;;  %1191 = vmatpush1.bf16.msra.mxu0 %v1135_v46  ;;  %1739 = vmatpush3.bf16.msra.mxu1 %v1137_v1  ;;  %v1051_v60 = vadd.f32 %v994_v55, %v939_v23  ;;  %v820_v23 = vunpack.c.l.bf16 %v294_v50 }
 0x227   : > { %v821_v54 = vunpack.c.h.bf16 %v294_v50  ;;  %v822_v2 = vunpack.c.h.bf16 %v2466_v13 }
 0x228   : > { %v990_v7 = vpop.permute.xlu1 %989  ;;  %v1100_v4 = vmax.f32 %v1052_v3, 0.0  ;;  %v1101_v5 = vmax.f32 %v1053_v63, 0.0  ;;  %v1099_v51 = vmax.f32 %v1051_v60, 0.0 }
 0x229   : > { %v1048_v8 = vadd.f32 %v990_v7, %v936_v56  ;;  %v1049_v9 = vadd.f32 %v990_v7, %v937_v29  ;;  %v1050_v62 = vadd.f32 %v990_v7, %v938_v61  ;;  %v1010_v7 = vpop.permute.xlu0 %1009  ;;  %v949_v35 = vmul.f32 %v887_v30, %v821_v54 }
 0x22b   : > { %v1096_v15 = vmax.f32 %v1048_v8, 0.0  ;;  %v1097_v16 = vmax.f32 %v1049_v9, 0.0  ;;  %v1098_v6 = vmax.f32 %v1050_v62, 0.0  ;;  %v948_v62 = vmul.f32 %v887_v30, %v820_v23 }
 0x22d   : > { %v877_v12 = vpop.permute.xlu1 %876  ;;  %v1139_v0 = vpack.c.bf16 %v1100_v4, %v1097_v16  ;;  %v1140_v31 = vpack.c.bf16 %v1101_v5, %v1098_v6  ;;  %v1138_v21 = vpack.c.bf16 %v1099_v51, %v1096_v15  ;;  %v950_v4 = vmul.f32 %v887_v30, %v822_v2  ;;  %v298_v51 = vld [vmem:[%s2449_s22 + $0x78] sm:$0xff] }
 0x22e   : > { %v943_v19 = vmul.f32 %v877_v12, %v815_v10  ;;  %v944_v24 = vmul.f32 %v877_v12, %v816_v11  ;;  %v942_v14 = vmul.f32 %v877_v12, %v814_v17 }
 0x22f   : > { %1192 = vmatprep.subr.bf16.mxu0 %v1139_v0  ;;  %1740 = vmatprep.subr.bf16.mxu1 %v1140_v31 }
 0x230   : > { %1193 = vmatpush1.bf16.msra.mxu0 %v1138_v21  ;;  %1741 = vmatpush3.bf16.msra.mxu1 %v1140_v31  ;;  %v1055_v42 = vadd.f32 %v998_v20, %v943_v19  ;;  %v1056_v38 = vadd.f32 %v998_v20, %v944_v24  ;;  %v1054_v40 = vadd.f32 %v998_v20, %v942_v14  ;;  %v827_v21 = vunpack.c.h.bf16 %v298_v51 }
 0x231   : > { %v882_v33 = vpop.permute.xlu1 %881  ;;  %v826_v24 = vunpack.c.l.bf16 %v298_v51 }
 0x232   : > { %v945_v47 = vmul.f32 %v882_v33, %v817_v25  ;;  %v946_v45 = vmul.f32 %v882_v33, %v818_v26  ;;  %v947_v49 = vmul.f32 %v882_v33, %v819_v28  ;;  %v1103_v36 = vmax.f32 %v1055_v42, 0.0  ;;  %v300_v25 = vld [vmem:[%s2449_s22 + $0x84] sm:$0xff] }
 0x233   : > { %v1104_v43 = vmax.f32 %v1056_v38, 0.0  ;;  %v1102_v46 = vmax.f32 %v1054_v40, 0.0  ;;  %v301_v26 = vld [vmem:[%s2449_s22 + $0x8c] ss:$24 sps:$4 sm:$0xff]   ;;  %v1014_v38 = vpop.permute.xlu0 %1013 }
 0x236   : > { %v1002_v53 = vpop.permute.xlu1 %1001 }
 0x237   : > { %v1057_v57 = vadd.f32 %v1002_v53, %v945_v47  ;;  %v1058_v27 = vadd.f32 %v1002_v53, %v946_v45  ;;  %v1059_v32 = vadd.f32 %v1002_v53, %v947_v49  ;;  %v829_v47 = vunpack.c.l.bf16 %v300_v25 }
 0x238   : > { %v830_v45 = vunpack.c.h.bf16 %v300_v25  ;;  %v831_v49 = vunpack.c.l.bf16 %v301_v26 }
 0x239   : > { %v1105_v44 = vmax.f32 %v1057_v57, 0.0  ;;  %v1106_v41 = vmax.f32 %v1058_v27, 0.0  ;;  %v1107_v1 = vmax.f32 %v1059_v32, 0.0  ;;  %v304_v32 = vld [vmem:[%s2449_s22 + $0x9c] sm:$0xff] }
 0x23b   : > { %v892_v55 = vpop.permute.xlu1 %891  ;;  %v1142_v3 = vpack.c.bf16 %v1106_v41, %v1103_v36  ;;  %v1143_v63 = vpack.c.bf16 %v1107_v1, %v1104_v43  ;;  %v1141_v56 = vpack.c.bf16 %v1105_v44, %v1102_v46  ;;  %v837_v41 = vunpack.c.h.bf16 %v301_v26 }
 0x23c   : > { %v951_v29 = vmul.f32 %v892_v55, %v823_v58  ;;  %v952_v61 = vmul.f32 %v892_v55, %v824_v59  ;;  %v953_v60 = vmul.f32 %v892_v55, %v825_v34  ;;  %v907_v59 = vpop.permute.xlu0 %906  ;;  %v302_v34 = vld [vmem:[%s2449_s22 + $0x90] sm:$0xff]  ;;  %v835_v1 = vunpack.c.l.bf16 %v304_v32 }
 0x23d   : > { %1194 = vmatprep.subr.bf16.mxu0 %v1142_v3  ;;  %1742 = vmatprep.subr.bf16.mxu1 %v1143_v63  ;;  %v836_v46 = vunpack.c.h.bf16 %v304_v32 }
 0x23e   : > { %v1064_v8 = vadd.f32 %v1010_v7, %v952_v61  ;;  %v1065_v9 = vadd.f32 %v1010_v7, %v953_v60  ;;  %1195 = vmatpush1.bf16.msra.mxu0 %v1141_v56  ;;  %1743 = vmatpush3.bf16.msra.mxu1 %v1143_v63  ;;  %v1063_v5 = vadd.f32 %v1010_v7, %v951_v29  ;;  %v832_v56 = vunpack.c.l.bf16 %v302_v34 }
 0x23f   : > { %v833_v29 = vunpack.c.h.bf16 %v302_v34  ;;  %v834_v61 = vunpack.c.h.bf16 %v2471_v18 }
 0x240   : > { %v1006_v13 = vpop.permute.xlu1 %1005  ;;  %v1112_v10 = vmax.f32 %v1064_v8, 0.0  ;;  %v1113_v11 = vmax.f32 %v1065_v9, 0.0  ;;  %v1111_v31 = vmax.f32 %v1063_v5, 0.0  ;;  %v1026_v5 = vpop.permute.xlu0 %1025 }
 0x241   : > { %v1060_v15 = vadd.f32 %v1006_v13, %v948_v62  ;;  %v1061_v16 = vadd.f32 %v1006_v13, %v949_v35  ;;  %v1062_v6 = vadd.f32 %v1006_v13, %v950_v4  ;;  %v962_v51 = vmul.f32 %v907_v59, %v834_v61  ;;  %v1816_v61 = vld [vmem:[%s2602_s3 + $0x8] sm:$0xff]  }
 0x243   : > { %v1108_v12 = vmax.f32 %v1060_v15, 0.0  ;;  %v1109_v17 = vmax.f32 %v1061_v16, 0.0  ;;  %v1110_v0 = vmax.f32 %v1062_v6, 0.0  ;;  %v960_v16 = vmul.f32 %v907_v59, %v832_v56 }
 0x244   : > { %v961_v6 = vmul.f32 %v907_v59, %v833_v29 }
 0x245   : > { %v897_v19 = vpop.permute.xlu1 %896  ;;  %v1145_v20 = vpack.c.bf16 %v1112_v10, %v1109_v17  ;;  %v1146_v14 = vpack.c.bf16 %v1113_v11, %v1110_v0  ;;  %v1144_v33 = vpack.c.bf16 %v1111_v31, %v1108_v12  ;;  %v306_v0 = vld [vmem:[%s2449_s22 + $0xa8] sm:$0xff]  ;;  %v307_v31 = vld [vmem:[%s2449_s22 + $0xb0] ss:$12 sps:$4 sm:$0xff]  }
 0x246   : > { %v955_v28 = vmul.f32 %v897_v19, %v827_v21  ;;  %v956_v42 = vmul.f32 %v897_v19, %v828_v22  ;;  %v954_v39 = vmul.f32 %v897_v19, %v826_v24  ;;  %v840_v25 = vunpack.c.l.bf16 %v307_v31 }
 0x247   : > { %1196 = vmatprep.subr.bf16.mxu0 %v1145_v20  ;;  %1744 = vmatprep.subr.bf16.mxu1 %v1146_v14 }
 0x248   : > { %1197 = vmatpush1.bf16.msra.mxu0 %v1144_v33  ;;  %1745 = vmatpush3.bf16.msra.mxu1 %v1146_v14  ;;  %v1067_v52 = vadd.f32 %v1014_v38, %v955_v28  ;;  %v1068_v53 = vadd.f32 %v1014_v38, %v956_v42  ;;  %v1066_v30 = vadd.f32 %v1014_v38, %v954_v39  ;;  %v839_v33 = vunpack.c.h.bf16 %v306_v0 }
 0x249   : > { %v902_v40 = vpop.permute.xlu1 %901  ;;  %v838_v28 = vunpack.c.l.bf16 %v306_v0 }
 0x24a   : > { %v957_v50 = vmul.f32 %v902_v40, %v829_v47  ;;  %v958_v57 = vmul.f32 %v902_v40, %v830_v45  ;;  %v959_v27 = vmul.f32 %v902_v40, %v831_v49  ;;  %v1115_v23 = vmax.f32 %v1067_v52, 0.0  ;;  %v308_v40 = vld [vmem:[%s2449_s22 + $0xb4] sm:$0xff] }
 0x24b   : > { %v1116_v54 = vmax.f32 %v1068_v53, 0.0  ;;  %v1114_v63 = vmax.f32 %v1066_v30, 0.0  ;;  %v841_v53 = vunpack.c.l.bf16 %v308_v40  ;;  %v842_v30 = vunpack.c.h.bf16 %v308_v40 }
 0x24e   : > { %v1018_v58 = vpop.permute.xlu1 %1017 }
 0x24f   : > { %v1069_v36 = vadd.f32 %v1018_v58, %v957_v50  ;;  %v1070_v43 = vadd.f32 %v1018_v58, %v958_v57  ;;  %v1071_v44 = vadd.f32 %v1018_v58, %v959_v27  ;;  %v843_v50 = vunpack.c.h.bf16 %v307_v31  ;;  %v1030_v57 = vpop.permute.xlu0 %1029 }
 0x251   : > { %v1117_v2 = vmax.f32 %v1069_v36, 0.0  ;;  %v1118_v55 = vmax.f32 %v1070_v43, 0.0  ;;  %v1119_v3 = vmax.f32 %v1071_v44, 0.0 }
 0x253   : > { %v912_v60 = vpop.permute.xlu1 %911  ;;  %v1148_v7 = vpack.c.bf16 %v1118_v55, %v1115_v23  ;;  %v1149_v8 = vpack.c.bf16 %v1119_v3, %v1116_v54  ;;  %v1147_v9 = vpack.c.bf16 %v1117_v2, %v1114_v63 }
 0x254   : > { %v963_v62 = vmul.f32 %v912_v60, %v835_v1  ;;  %v964_v35 = vmul.f32 %v912_v60, %v836_v46  ;;  %v965_v4 = vmul.f32 %v912_v60, %v837_v41  ;;  %v1817_v60 = vld [vmem:[%s2602_s3 + $0x10] sm:$0xff]  }
 0x255   : > { %1198 = vmatprep.subr.bf16.mxu0 %v1148_v7  ;;  %1746 = vmatprep.subr.bf16.mxu1 %v1149_v8  ;;  %v1818_v7 = vld [vmem:[%s2602_s3 + $0x18] sm:$0xff]  }
 0x256   : > { %v1076_v13 = vadd.f32 %v1026_v5, %v964_v35  ;;  %v1077_v15 = vadd.f32 %v1026_v5, %v965_v4  ;;  %1199 = vmatpush1.bf16.msra.mxu0 %v1147_v9  ;;  %1747 = vmatpush3.bf16.msra.mxu1 %v1149_v8  ;;  %v1075_v18 = vadd.f32 %v1026_v5, %v963_v62 }
 0x258   : > { %v1022_v10 = vpop.permute.xlu1 %1021  ;;  %v1124_v21 = vmax.f32 %v1076_v13, 0.0  ;;  %v1125_v22 = vmax.f32 %v1077_v15, 0.0  ;;  %v1123_v14 = vmax.f32 %v1075_v18, 0.0 }
 0x259   : > { %v1072_v11 = vadd.f32 %v1022_v10, %v960_v16  ;;  %v1073_v12 = vadd.f32 %v1022_v10, %v961_v6  ;;  %v1074_v17 = vadd.f32 %v1022_v10, %v962_v51 }
 0x25b   : > { %v1120_v19 = vmax.f32 %v1072_v11, 0.0  ;;  %v1121_v24 = vmax.f32 %v1073_v12, 0.0  ;;  %v1122_v20 = vmax.f32 %v1074_v17, 0.0 }
 0x25d   : > { %v917_v26 = vpop.permute.xlu1 %916  ;;  %v1151_v42 = vpack.c.bf16 %v1124_v21, %v1121_v24  ;;  %v1152_v38 = vpack.c.bf16 %v1125_v22, %v1122_v20  ;;  %v1150_v39 = vpack.c.bf16 %v1123_v14, %v1120_v19 }
 0x25e   : > { %v967_v47 = vmul.f32 %v917_v26, %v839_v33  ;;  %v968_v45 = vmul.f32 %v917_v26, %v840_v25  ;;  %v966_v49 = vmul.f32 %v917_v26, %v838_v28 }
 0x25f   : > { %1200 = vmatprep.subr.bf16.mxu0 %v1151_v42  ;;  %1748 = vmatprep.subr.bf16.mxu1 %v1152_v38 }
 0x260   : > { %1201 = vmatpush1.bf16.msra.mxu0 %v1150_v39  ;;  %1749 = vmatpush3.bf16.msra.mxu1 %v1152_v38  ;;  %v1079_v27 = vadd.f32 %v1030_v57, %v967_v47  ;;  %v1080_v32 = vadd.f32 %v1030_v57, %v968_v45  ;;  %v1078_v58 = vadd.f32 %v1030_v57, %v966_v49 }
 0x261   : > { %v922_v52 = vpop.permute.xlu1 %921 }
 0x262   : > { %v969_v59 = vmul.f32 %v922_v52, %v841_v53  ;;  %v970_v34 = vmul.f32 %v922_v52, %v842_v30  ;;  %v971_v36 = vmul.f32 %v922_v52, %v843_v50  ;;  %v1127_v46 = vmax.f32 %v1079_v27, 0.0 }
 0x263   : > { %v1128_v23 = vmax.f32 %v1080_v32, 0.0  ;;  %v1126_v3 = vmax.f32 %v1078_v58, 0.0 }
 0x266   : > { %v1034_v43 = vpop.permute.xlu1 %1033 }
 0x267   : > { %v1081_v44 = vadd.f32 %v1034_v43, %v969_v59  ;;  %v1082_v41 = vadd.f32 %v1034_v43, %v970_v34  ;;  %v1083_v1 = vadd.f32 %v1034_v43, %v971_v36 }
 0x269   : > { %v1129_v54 = vmax.f32 %v1081_v44, 0.0  ;;  %v1130_v2 = vmax.f32 %v1082_v41, 0.0  ;;  %v1131_v55 = vmax.f32 %v1083_v1, 0.0 }
 0x26b   : > { %v1154_v63 = vpack.c.bf16 %v1130_v2, %v1127_v46  ;;  %v1155_v56 = vpack.c.bf16 %v1131_v55, %v1128_v23  ;;  %v1153_v29 = vpack.c.bf16 %v1129_v54, %v1126_v3 }
 0x26d   : > { %1202 = vmatprep.subr.bf16.mxu0 %v1154_v63  ;;  %1750 = vmatprep.subr.bf16.mxu1 %v1155_v56 }
 0x26e   : > { %1203 = vmatpush1.bf16.msra.mxu0 %v1153_v29  ;;  %1751 = vmatpush3.bf16.msra.mxu1 %v1155_v56 }
 0x271   : > { %1221 = vmatmul.mubr.bf16.vlgmr.msra.gmra.mrb[0].mxu0 %v2438_v48  ;;  %1753 = vmatmul.mubr.bf16.vlgmr.msra.gmra.mrb[0].mxu1 %v1816_v61 }
 0x272   : > { %1230 = vmatprep.mubr.bf16.mxu0 %v1877_v37  ;;  %1756 = vmatprep.mubr.bf16.mxu1 %v1817_v60 }
 0x279   : > { %1231 = vmatmul.mubr.bf16.gmra.mrb[4].mxu0 %v1816_v61  ;;  %1757 = vmatmul.mubr.bf16.gmra.mrb[4].mxu1 %v1818_v7 }
 0x27a   : > { %1240 = vmatprep.mubr.bf16.mxu0 %v1877_v37 }
 0x281   : > { %1241 = vmatmul.mubr.bf16.gmra.mrb[8].mxu0 %v1817_v60 }
 0x282   : > { %1250 = vmatprep.mubr.bf16.mxu0 %v1877_v37 }
 0x289   : > { %1251 = vmatmul.mubr.bf16.gmra.mrb[12].mxu0 %v1818_v7 }
 0x344   : > { %v1222_v8 = vpop.f32.mrb[0].mxu0  ;;  %v1754_v48 = vpop.f32.mrb[0].mxu1 }
 0x345   : > { %v1454_v9 = vmul.f32 %v1222_v8, %v1222_v8  ;;  %v1713_v62 = vpack.c.bf16 %v1754_v48, %v1754_v48  ;;  %v1224_v35 = vpop.f32.mrb[1].mxu0  ;;  %v1295_v4 = vpop.f32.mrb[1].mxu1  ;;  %v1462_v27 = vmul.f32 %v1754_v48, %v1754_v48 }
 0x346   : > { %v1708_v5 = vpack.c.bf16 %v1224_v35, %v1222_v8  ;;  %v1455_v13 = vmul.f32 %v1224_v35, %v1224_v35  ;;  %v1709_v15 = vpack.c.bf16 %v1295_v4, %v1295_v4  ;;  %v1226_v37 = vpop.f32.mrb[2].mxu0  ;;  %v1755_v16 = vpop.f32.mrb[2].mxu1  ;;  %v1422_v6 = vadd.f32 %v1224_v35, %v1222_v8 }
 0x347   : > { %1411 = vst [vmem:[%s2504_s7 + $0x20] sm:$0xf] %v1713_v62  ;;  %v1457_v51 = vmul.f32 %v1226_v37, %v1226_v37  ;;  %v1715_v18 = vpack.c.bf16 %v1755_v16, %v1755_v16  ;;  %v1228_v10 = vpop.f32.mrb[3].mxu0  ;;  %v1298_v11 = vpop.f32.mrb[3].mxu1  ;;  %v1456_v12 = vmul.f32 %v1295_v4, %v1295_v4  ;;  %v1465_v46 = vmul.f32 %v1755_v16, %v1755_v16 }
 0x348   : > { %1406 = vst [vmem:[%s2504_s7] sm:$0xff] %v1708_v5  ;;  %1407 = vst [vmem:[%s2504_s7 + $0x8] sm:$0xf] %v1709_v15  ;;  %v1710_v17 = vpack.c.bf16 %v1228_v10, %v1226_v37  ;;  %v1458_v0 = vmul.f32 %v1228_v10, %v1228_v10  ;;  %v1711_v31 = vpack.c.bf16 %v1298_v11, %v1298_v11  ;;  %v1879_v62 = vmov 0.0  }
 0x349   : > { %v1423_v21 = vadd.f32 %v1422_v6, %v1295_v4  ;;  %1413 = vst [vmem:[%s2504_s7 + $0x2c] sm:$0xf] %v1715_v18  ;;  %v1426_v22 = vadd.f32 %v1228_v10, %v1226_v37  ;;  %v1478_v19 = vadd.f32 %v1455_v13, %v1454_v9  ;;  %v1459_v24 = vmul.f32 %v1298_v11, %v1298_v11 }
 0x34a   : > { %1408 = vst [vmem:[%s2504_s7 + $0xc] sm:$0xff] %v1710_v17  ;;  %1409 = vst [vmem:[%s2504_s7 + $0x14] sm:$0xf] %v1711_v31  ;;  %v1482_v20 = vadd.f32 %v1458_v0, %v1457_v51 }
 0x34b   : > { %1424 = vadd.xlane.f32.xlu0 %v1423_v21  ;;  %v1427_v14 = vadd.f32 %v1426_v22, %v1298_v11  ;;  %v1479_v33 = vadd.f32 %v1478_v19, %v1456_v12  ;;  %1524 = vst.msk [vmem:[%s2530_s11 + $0x8] sm:$0xff] %vm362_vm0, %v1879_v62  ;;  %1523 = vst.msk [vmem:[%s2530_s11] sm:$0xff] %vm362_vm0, %v1879_v62 }
 0x34c   : > { %v1232_v25 = vpop.f32.mrb[4].mxu0  ;;  %v1483_v26 = vadd.f32 %v1482_v20, %v1459_v24  ;;  %v2512_v28 = vpop.f32.mrb[4].mxu1  ;;  %1525 = vst.msk [vmem:[%s2530_s11 + $0x10] sm:$0xff] %vm362_vm0, %v1879_v62  ;;  %1526 = vst.msk [vmem:[%s2530_s11 + $0x18] sm:$0xff] %vm362_vm0, %v1879_v62 }
 0x34d   : > { %1428 = vadd.xlane.f32.xlu1 %v1427_v14  ;;  %v1460_v42 = vmul.f32 %v1232_v25, %v1232_v25  ;;  %v1234_v38 = vpop.f32.mrb[5].mxu0  ;;  %v1721_v39 = vpack.c.bf16 %v2512_v28, %v2512_v28  ;;  %v1311_v40 = vpop.f32.mrb[5].mxu1  ;;  %1527 = vst.msk [vmem:[%s2530_s11 + $0x20] sm:$0xff] %vm362_vm0, %v1879_v62  ;;  %1528 = vst.msk [vmem:[%s2530_s11 + $0x28] sm:$0xff] %vm362_vm0, %v1879_v62  ;;  %v1474_v21 = vmul.f32 %v2512_v28, %v2512_v28 }
 0x34e   : > { %v1712_v47 = vpack.c.bf16 %v1234_v38, %v1232_v25  ;;  %v1461_v45 = vmul.f32 %v1234_v38, %v1234_v38  ;;  %v1236_v49 = vpop.f32.mrb[6].mxu0  ;;  %v1430_v52 = vadd.f32 %v1234_v38, %v1232_v25  ;;  %v1717_v53 = vpack.c.bf16 %v1311_v40, %v1311_v40  ;;  %v2516_v30 = vpop.f32.mrb[6].mxu1  ;;  %1529 = vst.msk [vmem:[%s2530_s11 + $0x30] sm:$0xff] %vm362_vm0, %v1879_v62 }
 0x34f   : > { %1484 = vadd.xlane.f32.xlu0 %v1483_v26  ;;  %v1463_v50 = vmul.f32 %v1236_v49, %v1236_v49  ;;  %v1238_v57 = vpop.f32.mrb[7].mxu0  ;;  %1419 = vst [vmem:[%s2504_s7 + $0x50] sm:$0xf] %v1721_v39  ;;  %v1723_v32 = vpack.c.bf16 %v2516_v30, %v2516_v30  ;;  %v1314_v58 = vpop.f32.mrb[7].mxu1  ;;  %v1468_v56 = vmul.f32 %v1311_v40, %v1311_v40  ;;  %1530 = vst.msk [vmem:[%s2530_s11 + $0x38] sm:$0xff] %vm362_vm0, %v1879_v62 }
 0x350   : > { %1410 = vst [vmem:[%s2504_s7 + $0x18] sm:$0xff] %v1712_v47  ;;  %v1714_v59 = vpack.c.bf16 %v1238_v57, %v1236_v49  ;;  %v1464_v34 = vmul.f32 %v1238_v57, %v1238_v57  ;;  %v1431_v36 = vadd.f32 %v1754_v48, %v1430_v52  ;;  %v1486_v43 = vadd.f32 %v1461_v45, %v1460_v42 }
 0x351   : > { %1415 = vst [vmem:[%s2504_s7 + $0x38] sm:$0xf] %v1717_v53  ;;  %1480 = vadd.xlane.f32.xlu1 %v1479_v33  ;;  %v1434_v44 = vadd.f32 %v1238_v57, %v1236_v49  ;;  %1421 = vst [vmem:[%s2504_s7 + $0x5c] sm:$0xf] %v1723_v32  ;;  %v1719_v41 = vpack.c.bf16 %v1314_v58, %v1314_v58  ;;  %v1471_v9 = vmul.f32 %v1314_v58, %v1314_v58 }
 0x352   : > { %1412 = vst [vmem:[%s2504_s7 + $0x24] sm:$0xff] %v1714_v59  ;;  %v1487_v1 = vadd.f32 %v1486_v43, %v1462_v27  ;;  %v1490_v23 = vadd.f32 %v1464_v34, %v1463_v50  ;;  %v1477_v38 = vmul.f32 %v2516_v30, %v2516_v30  ;;  %v1532_v45 = vld [vmem:[%s2530_s11 + $0x8] sm:$0xff]  ;;  %v1531_v50 = vld [vmem:[%s2530_s11] sm:$0xff] }
 0x353   : > { %1432 = vadd.xlane.f32.xlu0 %v1431_v36  ;;  %v1435_v54 = vadd.f32 %v1755_v16, %v1434_v44  ;;  %1417 = vst [vmem:[%s2504_s7 + $0x44] sm:$0xf] %v1719_v41  ;;  %v1534_v44 = vld [vmem:[%s2530_s11 + $0x18] sm:$0xff] }
 0x354   : > { %v1242_v2 = vpop.f32.mrb[8].mxu0  ;;  %v1491_v55 = vadd.f32 %v1490_v23, %v1465_v46 }
 0x355   : > { %1488 = vadd.xlane.f32.xlu1 %v1487_v1  ;;  %v1466_v3 = vmul.f32 %v1242_v2, %v1242_v2  ;;  %v1244_v63 = vpop.f32.mrb[9].mxu0 }
 0x356   : > { %v1716_v29 = vpack.c.bf16 %v1244_v63, %v1242_v2  ;;  %v1467_v61 = vmul.f32 %v1244_v63, %v1244_v63  ;;  %v1246_v60 = vpop.f32.mrb[10].mxu0  ;;  %v1438_v7 = vadd.f32 %v1244_v63, %v1242_v2 }
 0x357   : > { %1436 = vadd.xlane.f32.xlu0 %v1435_v54  ;;  %v1469_v8 = vmul.f32 %v1246_v60, %v1246_v60  ;;  %v1248_v48 = vpop.f32.mrb[11].mxu0  ;;  %v1535_v54 = vld [vmem:[%s2530_s11 + $0x20] sm:$0xff] }
 0x358   : > { %1414 = vst [vmem:[%s2504_s7 + $0x30] sm:$0xff] %v1716_v29  ;;  %v1718_v35 = vpack.c.bf16 %v1248_v48, %v1246_v60  ;;  %v1470_v4 = vmul.f32 %v1248_v48, %v1248_v48  ;;  %v1439_v5 = vadd.f32 %v1438_v7, %v1311_v40  ;;  %v1494_v13 = vadd.f32 %v1467_v61, %v1466_v3 }
 0x359   : > { %v1442_v15 = vadd.f32 %v1248_v48, %v1246_v60 }
 0x35a   : > { %1416 = vst [vmem:[%s2504_s7 + $0x3c] sm:$0xff] %v1718_v35  ;;  %1440 = vadd.xlane.f32.xlu1 %v1439_v5  ;;  %v1495_v37 = vadd.f32 %v1494_v13, %v1468_v56  ;;  %v1498_v16 = vadd.f32 %v1470_v4, %v1469_v8  ;;  %v1536_v56 = vld [vmem:[%s2530_s11 + $0x28] sm:$0xff]  ;;  %v1537_v8 = vld [vmem:[%s2530_s11 + $0x30] sm:$0xff]  ;;  %v1538_v4 = vld [vmem:[%s2530_s11 + $0x38] sm:$0xff] }
 0x35b   : > { %1492 = vadd.xlane.f32.xlu0 %v1491_v55  ;;  %v1443_v6 = vadd.f32 %v1442_v15, %v1314_v58  ;;  %v1533_v58 = vld [vmem:[%s2530_s11 + $0x10] sm:$0xff] }
 0x35c   : > { %v1252_v51 = vpop.f32.mrb[12].mxu0  ;;  %v1499_v18 = vadd.f32 %v1498_v16, %v1471_v9 }
 0x35d   : > { %v1472_v10 = vmul.f32 %v1252_v51, %v1252_v51  ;;  %v1254_v11 = vpop.f32.mrb[13].mxu0 }
 0x35e   : > { %v1720_v12 = vpack.c.bf16 %v1254_v11, %v1252_v51  ;;  %v1446_v17 = vadd.f32 %v1254_v11, %v1252_v51  ;;  %v1473_v0 = vmul.f32 %v1254_v11, %v1254_v11  ;;  %1496 = vadd.xlane.f32.xlu1 %v1495_v37  ;;  %v1256_v31 = vpop.f32.mrb[14].mxu0 }
 0x35f   : > { %1444 = vadd.xlane.f32.xlu0 %v1443_v6  ;;  %v1475_v22 = vmul.f32 %v1256_v31, %v1256_v31  ;;  %v1258_v19 = vpop.f32.mrb[15].mxu0 }
 0x360   : > { %1418 = vst [vmem:[%s2504_s7 + $0x48] sm:$0xff] %v1720_v12  ;;  %v1502_v24 = vadd.f32 %v1473_v0, %v1472_v10  ;;  %v1722_v20 = vpack.c.bf16 %v1258_v19, %v1256_v31  ;;  %v1450_v14 = vadd.f32 %v1258_v19, %v1256_v31  ;;  %v1476_v33 = vmul.f32 %v1258_v19, %v1258_v19 }
 0x361   : > { %v1447_v25 = vadd.f32 %v2512_v28, %v1446_v17 }
 0x362   : > { %1420 = vst [vmem:[%s2504_s7 + $0x54] sm:$0xff] %v1722_v20  ;;  %v1503_v26 = vadd.f32 %v1502_v24, %v1474_v21  ;;  %v1451_v42 = vadd.f32 %v2516_v30, %v1450_v14  ;;  %v1506_v39 = vadd.f32 %v1476_v33, %v1475_v22 }
 0x363   : > { %1500 = vadd.xlane.f32.xlu0 %v1499_v18  ;;  %1448 = vadd.xlane.f32.xlu1 %v1447_v25 }
 0x364   : > { %v1507_v40 = vadd.f32 %v1506_v39, %v1477_v38 }
 0x367   : > { %1452 = vadd.xlane.f32.xlu0 %v1451_v42  ;;  %1504 = vadd.xlane.f32.xlu1 %v1503_v26 }
 0x36b   : > { %1508 = vadd.xlane.f32.xlu0 %v1507_v40 }
 0x3d8   : > { %v1425_v47 = vpop.xlane.xlu0 %1424 }
 0x3da   : > { %v1429_v28 = vpop.xlane.xlu1 %1428 }
 0x3dc   : > { %v1485_v49 = vpop.xlane.xlu0 %1484 }
 0x3dd   : > { %v1512_v52 = vsel %vm747_vm1, %v1429_v28, %v1485_v49 }
 0x3de   : > { %v1540_v53 = vadd.f32 %v1532_v45, %v1512_v52  ;;  %v1481_v57 = vpop.xlane.xlu1 %1480 }
 0x3df   : > { %v1511_v30 = vsel %vm747_vm1, %v1425_v47, %v1481_v57 }
 0x3e0   : > { %1549 = vst.msk [vmem:[%s2530_s11 + $0x8] sm:$0xff] %vm362_vm0, %v1540_v53  ;;  %v1433_v27 = vpop.xlane.xlu0 %1432  ;;  %v1539_v32 = vadd.f32 %v1531_v50, %v1511_v30 }
 0x3e2   : > { %1548 = vst.msk [vmem:[%s2530_s11] sm:$0xff] %vm362_vm0, %v1539_v32  ;;  %v1489_v59 = vpop.xlane.xlu1 %1488 }
 0x3e3   : > { %v1513_v34 = vsel %vm747_vm1, %v1433_v27, %v1489_v59 }
 0x3e4   : > { %v1437_v36 = vpop.xlane.xlu0 %1436  ;;  %v1541_v43 = vadd.f32 %v1533_v58, %v1513_v34 }
 0x3e6   : > { %1550 = vst.msk [vmem:[%s2530_s11 + $0x10] sm:$0xff] %vm362_vm0, %v1541_v43 }
 0x3e7   : > { %v1441_v1 = vpop.xlane.xlu1 %1440 }
 0x3e8   : > { %v1493_v41 = vpop.xlane.xlu0 %1492 }
 0x3e9   : > { %v1514_v46 = vsel %vm747_vm1, %v1437_v36, %v1493_v41 }
 0x3ea   : > { %v1542_v23 = vadd.f32 %v1534_v44, %v1514_v46 }
 0x3eb   : > { %v1497_v2 = vpop.xlane.xlu1 %1496 }
 0x3ec   : > { %1551 = vst.msk [vmem:[%s2530_s11 + $0x18] sm:$0xff] %vm362_vm0, %v1542_v23  ;;  %v1445_v55 = vpop.xlane.xlu0 %1444  ;;  %v1515_v3 = vsel %vm747_vm1, %v1441_v1, %v1497_v2 }
 0x3ed   : > { %v1543_v63 = vadd.f32 %v1535_v54, %v1515_v3 }
 0x3ef   : > { %1552 = vst.msk [vmem:[%s2530_s11 + $0x20] sm:$0xff] %vm362_vm0, %v1543_v63 }
 0x3f0   : > { %v1501_v29 = vpop.xlane.xlu0 %1500  ;;  %v1449_v60 = vpop.xlane.xlu1 %1448 }
 0x3f1   : > { %v1516_v61 = vsel %vm747_vm1, %v1445_v55, %v1501_v29 }
 0x3f2   : > { %v1544_v7 = vadd.f32 %v1536_v56, %v1516_v61 }
 0x3f4   : > { %1553 = vst.msk [vmem:[%s2530_s11 + $0x28] sm:$0xff] %vm362_vm0, %v1544_v7  ;;  %v1453_v48 = vpop.xlane.xlu0 %1452  ;;  %v1505_v9 = vpop.xlane.xlu1 %1504 }
 0x3f5   : > { %v1517_v62 = vsel %vm747_vm1, %v1449_v60, %v1505_v9 }
 0x3f6   : > { %v1545_v35 = vadd.f32 %v1537_v8, %v1517_v62 }
 0x3f8   : > { %v1509_v5 = vpop.xlane.xlu0 %1508  ;;  %1554 = vst.msk [vmem:[%s2530_s11 + $0x30] sm:$0xff] %vm362_vm0, %v1545_v35 }
 0x3f9   : > { %v1518_v13 = vsel %vm747_vm1, %v1453_v48, %v1509_v5 }
 0x3fa   : > { %v1546_v15 = vadd.f32 %v1538_v4, %v1518_v13 }
 0x3fc   : > { %1555 = vst.msk [vmem:[%s2530_s11 + $0x38] sm:$0xff] %vm362_vm0, %v1546_v15 }
 0x3fd PF: > { %s16_s20 = sadd.s32 1, %s1873_s20   ;;  %s2605_s18 = smov %s1869_s19 }
 0x3fe   : > { %p13_p5 = scmp.ge.s32.totalorder %s16_s20, 4   ;;  %s2606_s19 = smov %s2608_s21 }
 0x400   :  { %15 = sbr.rel (!%p13_p5) target bundleno = 2 (0x2), region = 86 }

// kernel: mlp_head_weight_forward.5
= control target key start
LH: loop header
LB: loop body
LE: loop exit
PB: predicated region body
PF: predicated region fallthrough
CT: control target
= control target key end

     0   :  { %s3290_s18 = smov 0   ;;  %s3292_s19 = smov 0   ;;  %s4674_s0 = inlined_call_operand.vmem [shape: f32[2,256,2], index: 0, kind: input, shape index: {}]   ;;  %s4675_s1 = inlined_call_operand.vmem [shape: f32[256,2], index: 1, kind: input, shape index: {}]   ;;  %s4676_s2 = inlined_call_operand.vmem [shape: bf16[2,256,384], index: 2, kind: input, shape index: {}]   ;;  %s4677_s3 = inlined_call_operand.vmem [shape: bf16[128,256], index: 3, kind: input, shape index: {}]   ;;  %s4678_s4 = inlined_call_operand.vmem [shape: bf16[2,128,384], index: 4, kind: output, shape index: {0}]   ;;  %s4679_s5 = inlined_call_operand.vmem [shape: f32[2,128,2], index: 5, kind: output, shape index: {1}]  }
   0x1   :  { %s3294_s20 = smov 0  }
   0x2 LB: > { %s28_s21 = sadd.s32 1, %s3249_s19  ;;  %p2912_p0 = scmp.ge.s32.totalorder %s3253_s20, 1  ;;  %s3253_s20 = sphi %s3294_s20, %s16_s20   ;;  %s3249_s19 = sphi %s3292_s19, %s4711_s19   ;;  %s3245_s18 = sphi %s3290_s18, %s4710_s18  }
   0x3   : > { %p30_p1 = scmp.ge.s32.totalorder %s28_s21, 2  ;;  %p211_p2 = scmp.lt.s32.totalorder %s3253_s20, 3 }
   0x5   : > { %s4713_s21 = smov (%p30_p1, %s28_s21), 0  ;;  %p212_p3 = pnand %p2912_p0, %p211_p2 }
   0x7   : > { %215 = sbr.rel (%p212_p3) target bundleno = 1157 (0x485), region = 36 }
   0xe   : > { %v346_v0 = vld [vmem:[%s4674_s0] sm:$0xff]  ;;  %vm442_vm0 = vcmask 15360   ;;  %v348_v2 = vld [vmem:[%s4674_s0 + $0x10] sm:$0xff]  ;;  %v347_v7 = vld [vmem:[%s4674_s0 + $0x8] sm:$0xff]  ;;  %s3255_s16 = smov 1   ;;  %s3256_s29 = smov 127  }
   0xf   : > { %v378_v1 = vld [vmem:[%s4674_s0 + $0x100] sm:$0xff]  ;;  %v443_v3 = vsel %vm442_vm0, %v346_v0, 0.0  ;;  %v380_v5 = vld [vmem:[%s4674_s0 + $0x110] sm:$0xff]  ;;  %v449_v6 = vsel %vm442_vm0, %v348_v2, 0.0  ;;  %v379_v8 = vld [vmem:[%s4674_s0 + $0x108] sm:$0xff]  ;;  %v446_v11 = vsel %vm442_vm0, %v347_v7, 0.0 }
  0x10   : > { %v444_v4 = vsel %vm442_vm0, %v378_v1, 0.0  ;;  %v450_v10 = vsel %vm442_vm0, %v380_v5, 0.0  ;;  %v447_v12 = vsel %vm442_vm0, %v379_v8, 0.0  ;;  %v349_v13 = vld [vmem:[%s4674_s0 + $0x18] sm:$0xff]  ;;  %v350_v15 = vld [vmem:[%s4674_s0 + $0x20] sm:$0xff]  ;;  %v351_v21 = vld [vmem:[%s4674_s0 + $0x28] sm:$0xff] }
  0x11   : > { %v445_v9 = vadd.f32 %v444_v4, %v443_v3  ;;  %v381_v14 = vld [vmem:[%s4674_s0 + $0x118] sm:$0xff]  ;;  %v451_v16 = vadd.f32 %v450_v10, %v449_v6  ;;  %v448_v17 = vadd.f32 %v447_v12, %v446_v11  ;;  %v452_v18 = vsel %vm442_vm0, %v349_v13, 0.0  ;;  %v382_v20 = vld [vmem:[%s4674_s0 + $0x120] sm:$0xff]  ;;  %v383_v22 = vld [vmem:[%s4674_s0 + $0x128] sm:$0xff]  ;;  %p253_p4 = scmp.lt.s32.totalorder %s3245_s18, 1 }
  0x12   : > { %v453_v19 = vsel %vm442_vm0, %v381_v14, 0.0  ;;  %v455_v25 = vsel %vm442_vm0, %v350_v15, 0.0  ;;  %v456_v26 = vsel %vm442_vm0, %v382_v20, 0.0  ;;  %v352_v27 = vld [vmem:[%s4674_s0 + $0x30] sm:$0xff]  ;;  %v458_v32 = vsel %vm442_vm0, %v351_v21, 0.0  ;;  %v353_v33 = vld [vmem:[%s4674_s0 + $0x38] sm:$0xff] }
  0x13   : > { %v3354_v23 = vmul.f32 0.0013020834, %v445_v9  ;;  %v454_v24 = vadd.f32 %v453_v19, %v452_v18  ;;  %v384_v28 = vld [vmem:[%s4674_s0 + $0x130] sm:$0xff]  ;;  %v3364_v29 = vmul.f32 0.0013020834, %v451_v16  ;;  %v457_v31 = vadd.f32 %v456_v26, %v455_v25  ;;  %v385_v38 = vld [vmem:[%s4674_s0 + $0x138] sm:$0xff] }
  0x14   : > { %v3366_v30 = vmul.f32 0.0013020834, %v448_v17  ;;  %v459_v36 = vsel %vm442_vm0, %v383_v22, 0.0  ;;  %v461_v37 = vsel %vm442_vm0, %v352_v27, 0.0  ;;  %v354_v39 = vld [vmem:[%s4674_s0 + $0x40] sm:$0xff]  ;;  %v355_v44 = vld [vmem:[%s4674_s0 + $0x48] sm:$0xff] }
  0x15   : > { %v571_v34 = vmul.f32 %v3354_v23, %v3354_v23  ;;  %v3374_v35 = vmul.f32 0.0013020834, %v454_v24  ;;  %v573_v40 = vmul.f32 %v3364_v29, %v3364_v29  ;;  %v460_v42 = vadd.f32 %v459_v36, %v458_v32  ;;  %v386_v43 = vld [vmem:[%s4674_s0 + $0x140] sm:$0xff]  ;;  %v387_v45 = vld [vmem:[%s4674_s0 + $0x148] sm:$0xff]  ;;  %v356_v58 = vld [vmem:[%s4674_s0 + $0x50] sm:$0xff]  ;;  %s4715_s18 = smov (!%p253_p4, %s3245_s18), 1 }
  0x16   : > { %v572_v41 = vmul.f32 %v3366_v30, %v3366_v30  ;;  %v3398_v46 = vmul.f32 0.0013020834, %v457_v31  ;;  %v462_v47 = vsel %vm442_vm0, %v384_v28, 0.0  ;;  %v464_v48 = vsel %vm442_vm0, %v353_v33, 0.0  ;;  %v388_v59 = vld [vmem:[%s4674_s0 + $0x150] sm:$0xff]  ;;  %v357_v62 = vld [vmem:[%s4674_s0 + $0x58] sm:$0xff] }
  0x17   : > { %635 = vrot.lane.b32.xlu0 %v571_v34, %s3255_s16  ;;  %v465_v49 = vsel %vm442_vm0, %v385_v38, 0.0  ;;  %639 = vrot.lane.b32.xlu1 %v573_v40, %s3255_s16  ;;  %v574_v50 = vmul.f32 %v3374_v35, %v3374_v35  ;;  %v3406_v51 = vmul.f32 0.0013020834, %v460_v42  ;;  %v463_v52 = vadd.f32 %v462_v47, %v461_v37  ;;  %v389_v63 = vld [vmem:[%s4674_s0 + $0x158] sm:$0xff]  ;;  %v358_v6 = vld [vmem:[%s4674_s0 + $0x60] sm:$0xff]  ;;  %s3065_s28 = smul.u32 192, %s4715_s18 }
  0x18   : > { %v466_v53 = vadd.f32 %v465_v49, %v464_v48  ;;  %v467_v54 = vsel %vm442_vm0, %v354_v39, 0.0  ;;  %v468_v55 = vsel %vm442_vm0, %v386_v43, 0.0  ;;  %v470_v56 = vsel %vm442_vm0, %v355_v44, 0.0  ;;  %v390_v7 = vld [vmem:[%s4674_s0 + $0x160] sm:$0xff]  ;;  %v359_v12 = vld [vmem:[%s4674_s0 + $0x68] sm:$0xff]  ;;  %v360_v20 = vld [vmem:[%s4674_s0 + $0x70] sm:$0xff] }
  0x19   : > { %v471_v57 = vsel %vm442_vm0, %v387_v45, 0.0  ;;  %v3418_v60 = vmul.f32 0.0013020834, %v463_v52  ;;  %v469_v61 = vadd.f32 %v468_v55, %v467_v54  ;;  %v575_v0 = vmul.f32 %v3398_v46, %v3398_v46  ;;  %v391_v13 = vld [vmem:[%s4674_s0 + $0x168] sm:$0xff]  ;;  %v392_v21 = vld [vmem:[%s4674_s0 + $0x170] sm:$0xff]  ;;  %v361_v25 = vld [vmem:[%s4674_s0 + $0x78] sm:$0xff]  ;;  %s4529_s6 = scalar_lea.vmem %s4678_s4, %s3065_s28 }
  0x1a   : > { %v472_v1 = vadd.f32 %v471_v57, %v470_v56  ;;  %v576_v2 = vmul.f32 %v3406_v51, %v3406_v51  ;;  %v3432_v3 = vmul.f32 0.0013020834, %v466_v53  ;;  %v473_v4 = vsel %vm442_vm0, %v356_v58, 0.0  ;;  %v393_v26 = vld [vmem:[%s4674_s0 + $0x178] sm:$0xff]  ;;  %v362_v40 = vld [vmem:[%s4674_s0 + $0x80] sm:$0xff]  ;;  %v363_v42 = vld [vmem:[%s4674_s0 + $0x88] sm:$0xff] }
  0x1b   : > { %637 = vrot.lane.b32.xlu0 %v572_v41, %s3255_s16  ;;  %641 = vrot.lane.b32.xlu1 %v574_v50, %s3255_s16  ;;  %v474_v5 = vsel %vm442_vm0, %v388_v59, 0.0  ;;  %v476_v8 = vsel %vm442_vm0, %v357_v62, 0.0  ;;  %v477_v9 = vsel %vm442_vm0, %v389_v63, 0.0  ;;  %v577_v10 = vmul.f32 %v3418_v60, %v3418_v60  ;;  %v394_v41 = vld [vmem:[%s4674_s0 + $0x180] sm:$0xff]  ;;  %v395_v43 = vld [vmem:[%s4674_s0 + $0x188] sm:$0xff]  ;;  %s2967_s7 = sshll.u32 %s4715_s18, 7 }
  0x1c   : > { %v3446_v11 = vmul.f32 0.0013020834, %v469_v61  ;;  %v3455_v14 = vmul.f32 0.0013020834, %v472_v1  ;;  %v475_v15 = vadd.f32 %v474_v5, %v473_v4  ;;  %v479_v16 = vsel %vm442_vm0, %v358_v6, 0.0  ;;  %v364_v52 = vld [vmem:[%s4674_s0 + $0x90] sm:$0xff]  ;;  %s4543_s9 = scalar_lea.vmem %s4679_s5, %s2967_s7 }
  0x1d   : > { %v480_v17 = vsel %vm442_vm0, %v390_v7, 0.0  ;;  %v578_v18 = vmul.f32 %v3432_v3, %v3432_v3  ;;  %v478_v19 = vadd.f32 %v477_v9, %v476_v8  ;;  %v482_v22 = vsel %vm442_vm0, %v359_v12, 0.0  ;;  %v396_v53 = vld [vmem:[%s4674_s0 + $0x190] sm:$0xff]  ;;  %v365_v54 = vld [vmem:[%s4674_s0 + $0x98] sm:$0xff]  ;;  %v398_v1 = vld [vmem:[%s4674_s0 + $0x1a0] sm:$0xff] }
  0x1e   : > { %v483_v24 = vsel %vm442_vm0, %v391_v13, 0.0  ;;  %v579_v27 = vmul.f32 %v3446_v11, %v3446_v11  ;;  %v481_v28 = vadd.f32 %v480_v17, %v479_v16  ;;  %v580_v31 = vmul.f32 %v3455_v14, %v3455_v14  ;;  %v397_v59 = vld [vmem:[%s4674_s0 + $0x198] sm:$0xff]  ;;  %v367_v7 = vld [vmem:[%s4674_s0 + $0xa8] sm:$0xff] }
  0x1f   : > { %643 = vrot.lane.b32.xlu0 %v575_v0, %s3255_s16  ;;  %645 = vrot.lane.b32.xlu1 %v576_v2, %s3255_s16  ;;  %v3481_v32 = vmul.f32 0.0013020834, %v475_v15  ;;  %v485_v33 = vsel %vm442_vm0, %v360_v20, 0.0  ;;  %v486_v34 = vsel %vm442_vm0, %v392_v21, 0.0  ;;  %v3486_v36 = vmul.f32 0.0013020834, %v478_v19 }
  0x20   : > { %v484_v37 = vadd.f32 %v483_v24, %v482_v22  ;;  %v488_v38 = vsel %vm442_vm0, %v361_v25, 0.0  ;;  %v489_v39 = vsel %vm442_vm0, %v393_v26, 0.0  ;;  %v3502_v44 = vmul.f32 0.0013020834, %v481_v28  ;;  %v366_v0 = vld [vmem:[%s4674_s0 + $0xa0] sm:$0xff]  ;;  %v399_v12 = vld [vmem:[%s4674_s0 + $0x1a8] sm:$0xff] }
  0x21   : > { %v487_v45 = vadd.f32 %v486_v34, %v485_v33  ;;  %v581_v47 = vmul.f32 %v3481_v32, %v3481_v32  ;;  %v490_v48 = vadd.f32 %v489_v39, %v488_v38  ;;  %v491_v49 = vsel %vm442_vm0, %v362_v40, 0.0  ;;  %v368_v25 = vld [vmem:[%s4674_s0 + $0xb0] sm:$0xff]  ;;  %v401_v28 = vld [vmem:[%s4674_s0 + $0x1b8] sm:$0xff] }
  0x22   : > { %v492_v50 = vsel %vm442_vm0, %v394_v41, 0.0  ;;  %v582_v55 = vmul.f32 %v3486_v36, %v3486_v36  ;;  %v3521_v56 = vmul.f32 0.0013020834, %v484_v37  ;;  %v494_v57 = vsel %vm442_vm0, %v363_v42, 0.0  ;;  %v400_v26 = vld [vmem:[%s4674_s0 + $0x1b0] sm:$0xff] }
  0x23   : > { %647 = vrot.lane.b32.xlu0 %v577_v10, %s3255_s16  ;;  %649 = vrot.lane.b32.xlu1 %v578_v18, %s3255_s16  ;;  %v495_v58 = vsel %vm442_vm0, %v395_v43, 0.0  ;;  %v583_v61 = vmul.f32 %v3502_v44, %v3502_v44  ;;  %v3530_v62 = vmul.f32 0.0013020834, %v487_v45  ;;  %v493_v63 = vadd.f32 %v492_v50, %v491_v49  ;;  %v370_v45 = vld [vmem:[%s4674_s0 + $0xc0] sm:$0xff]  ;;  %v403_v49 = vld [vmem:[%s4674_s0 + $0x1c8] sm:$0xff] }
  0x24   : > { %v3539_v2 = vmul.f32 0.0013020834, %v490_v48  ;;  %v496_v4 = vadd.f32 %v495_v58, %v494_v57  ;;  %v497_v5 = vsel %vm442_vm0, %v364_v52, 0.0  ;;  %v498_v6 = vsel %vm442_vm0, %v396_v53, 0.0  ;;  %v371_v48 = vld [vmem:[%s4674_s0 + $0xc8] sm:$0xff] }
  0x25   : > { %v584_v8 = vmul.f32 %v3521_v56, %v3521_v56  ;;  %v500_v9 = vsel %vm442_vm0, %v365_v54, 0.0  ;;  %v501_v10 = vsel %vm442_vm0, %v397_v59, 0.0  ;;  %v585_v13 = vmul.f32 %v3530_v62, %v3530_v62 }
  0x26   : > { %v3556_v15 = vmul.f32 0.0013020834, %v493_v63  ;;  %v499_v16 = vadd.f32 %v498_v6, %v497_v5  ;;  %v3559_v17 = vmul.f32 0.0013020834, %v496_v4  ;;  %v502_v18 = vadd.f32 %v501_v10, %v500_v9  ;;  %v373_v4 = vld [vmem:[%s4674_s0 + $0xd8] sm:$0xff] }
  0x27   : > { %651 = vrot.lane.b32.xlu0 %v579_v27, %s3255_s16  ;;  %653 = vrot.lane.b32.xlu1 %v580_v31, %s3255_s16  ;;  %v503_v19 = vsel %vm442_vm0, %v366_v0, 0.0  ;;  %v504_v20 = vsel %vm442_vm0, %v398_v1, 0.0  ;;  %v586_v21 = vmul.f32 %v3539_v2, %v3539_v2  ;;  %v506_v22 = vsel %vm442_vm0, %v367_v7, 0.0  ;;  %v369_v27 = vld [vmem:[%s4674_s0 + $0xb8] sm:$0xff]  ;;  %v372_v0 = vld [vmem:[%s4674_s0 + $0xd0] sm:$0xff] }
  0x28   : > { %v507_v24 = vsel %vm442_vm0, %v399_v12, 0.0  ;;  %v3580_v31 = vmul.f32 0.0013020834, %v499_v16  ;;  %v505_v33 = vadd.f32 %v504_v20, %v503_v19  ;;  %v587_v34 = vmul.f32 %v3556_v15, %v3556_v15  ;;  %v404_v1 = vld [vmem:[%s4674_s0 + $0x1d0] sm:$0xff]  ;;  %v405_v5 = vld [vmem:[%s4674_s0 + $0x1d8] sm:$0xff]  ;;  %v374_v20 = vld [vmem:[%s4674_s0 + $0xe0] sm:$0xff] }
  0x29   : > { %v588_v37 = vmul.f32 %v3559_v17, %v3559_v17  ;;  %v3587_v38 = vmul.f32 0.0013020834, %v502_v18  ;;  %v508_v39 = vadd.f32 %v507_v24, %v506_v22  ;;  %v509_v40 = vsel %vm442_vm0, %v368_v25, 0.0  ;;  %v375_v22 = vld [vmem:[%s4674_s0 + $0xe8] sm:$0xff] }
  0x2a   : > { %v510_v41 = vsel %vm442_vm0, %v400_v26, 0.0  ;;  %v512_v42 = vsel %vm442_vm0, %v369_v27, 0.0  ;;  %v513_v43 = vsel %vm442_vm0, %v401_v28, 0.0  ;;  %v589_v50 = vmul.f32 %v3580_v31, %v3580_v31  ;;  %v407_v24 = vld [vmem:[%s4674_s0 + $0x1e8] sm:$0xff] }
  0x2b   : > { %655 = vrot.lane.b32.xlu0 %v581_v47, %s3255_s16  ;;  %657 = vrot.lane.b32.xlu1 %v582_v55, %s3255_s16  ;;  %v402_v47 = vld [vmem:[%s4674_s0 + $0x1c0] sm:$0xff]  ;;  %v3608_v52 = vmul.f32 0.0013020834, %v505_v33  ;;  %v590_v53 = vmul.f32 %v3587_v38, %v3587_v38  ;;  %v3613_v54 = vmul.f32 0.0013020834, %v508_v39  ;;  %v511_v55 = vadd.f32 %v510_v41, %v509_v40 }
  0x2c   : > { %v514_v57 = vadd.f32 %v513_v43, %v512_v42  ;;  %v515_v58 = vsel %vm442_vm0, %v370_v45, 0.0  ;;  %v516_v59 = vsel %vm442_vm0, %v402_v47, 0.0  ;;  %v519_v63 = vsel %vm442_vm0, %v403_v49, 0.0  ;;  %v376_v42 = vld [vmem:[%s4674_s0 + $0xf0] sm:$0xff]  ;;  %v377_v45 = vld [vmem:[%s4674_s0 + $0xf8] sm:$0xff] }
  0x2d   : > { %v591_v6 = vmul.f32 %v3608_v52, %v3608_v52  ;;  %v3635_v7 = vmul.f32 0.0013020834, %v511_v55  ;;  %v592_v10 = vmul.f32 %v3613_v54, %v3613_v54  ;;  %v522_v16 = vsel %vm442_vm0, %v404_v1, 0.0  ;;  %v408_v43 = vld [vmem:[%s4674_s0 + $0x1f0] sm:$0xff]  ;;  %v409_v47 = vld [vmem:[%s4674_s0 + $0x1f8] sm:$0xff] }
  0x2e   : > { %v3640_v12 = vmul.f32 0.0013020834, %v514_v57  ;;  %v524_v18 = vsel %vm442_vm0, %v373_v4, 0.0  ;;  %v525_v19 = vsel %vm442_vm0, %v405_v5, 0.0  ;;  %v530_v40 = vsel %vm442_vm0, %v375_v22, 0.0 }
  0x2f   : > { %659 = vrot.lane.b32.xlu0 %v583_v61, %s3255_s16  ;;  %661 = vrot.lane.b32.xlu1 %v584_v8, %s3255_s16  ;;  %v518_v61 = vsel %vm442_vm0, %v371_v48, 0.0  ;;  %v517_v8 = vadd.f32 %v516_v59, %v515_v58  ;;  %v593_v25 = vmul.f32 %v3635_v7, %v3635_v7  ;;  %v531_v41 = vsel %vm442_vm0, %v407_v24, 0.0 }
  0x30   : > { %v520_v9 = vadd.f32 %v519_v63, %v518_v61  ;;  %v594_v33 = vmul.f32 %v3640_v12, %v3640_v12  ;;  %v532_v57 = vadd.f32 %v531_v41, %v530_v40  ;;  %v533_v58 = vsel %vm442_vm0, %v376_v42, 0.0 }
  0x31   : > { %v3661_v26 = vmul.f32 0.0013020834, %v517_v8  ;;  %v534_v59 = vsel %vm442_vm0, %v408_v43, 0.0  ;;  %v536_v61 = vsel %vm442_vm0, %v377_v45, 0.0  ;;  %v537_v63 = vsel %vm442_vm0, %v409_v47, 0.0 }
  0x32   : > { %v3663_v27 = vmul.f32 0.0013020834, %v520_v9  ;;  %v535_v4 = vadd.f32 %v534_v59, %v533_v58  ;;  %v538_v8 = vadd.f32 %v537_v63, %v536_v61  ;;  %vm1211_vm1 = vcmask 7168  }
  0x33   : > { %663 = vrot.lane.b32.xlu0 %v585_v13, %s3255_s16  ;;  %665 = vrot.lane.b32.xlu1 %v586_v21, %s3255_s16  ;;  %v521_v13 = vsel %vm442_vm0, %v372_v0, 0.0  ;;  %v406_v21 = vld [vmem:[%s4674_s0 + $0x1e0] sm:$0xff]  ;;  %v595_v48 = vmul.f32 %v3661_v26, %v3661_v26 }
  0x34   : > { %v523_v28 = vadd.f32 %v522_v16, %v521_v13  ;;  %v528_v39 = vsel %vm442_vm0, %v406_v21, 0.0  ;;  %v596_v49 = vmul.f32 %v3663_v27, %v3663_v27  ;;  %v3716_v16 = vmul.f32 0.0013020834, %v538_v8 }
  0x37   : > { %667 = vrot.lane.b32.xlu0 %v587_v34, %s3255_s16  ;;  %669 = vrot.lane.b32.xlu1 %v588_v37, %s3255_s16  ;;  %v526_v34 = vadd.f32 %v525_v19, %v524_v18  ;;  %v527_v37 = vsel %vm442_vm0, %v374_v20, 0.0  ;;  %v602_v19 = vmul.f32 %v3716_v16, %v3716_v16 }
  0x39   : > { %v3692_v55 = vmul.f32 0.0013020834, %v526_v34 }
  0x3b   : > { %671 = vrot.lane.b32.xlu0 %v589_v50, %s3255_s16  ;;  %673 = vrot.lane.b32.xlu1 %v590_v53, %s3255_s16  ;;  %v3689_v50 = vmul.f32 0.0013020834, %v523_v28  ;;  %v529_v53 = vadd.f32 %v528_v39, %v527_v37  ;;  %v598_v5 = vmul.f32 %v3692_v55, %v3692_v55 }
  0x3d   : > { %v597_v0 = vmul.f32 %v3689_v50, %v3689_v50  ;;  %v3701_v1 = vmul.f32 0.0013020834, %v529_v53 }
  0x3f   : > { %675 = vrot.lane.b32.xlu0 %v591_v6, %s3255_s16  ;;  %677 = vrot.lane.b32.xlu1 %v592_v10, %s3255_s16  ;;  %v3706_v6 = vmul.f32 0.0013020834, %v532_v57  ;;  %v599_v9 = vmul.f32 %v3701_v1, %v3701_v1  ;;  %v3711_v10 = vmul.f32 0.0013020834, %v535_v4 }
  0x41   : > { %v600_v13 = vmul.f32 %v3706_v6, %v3706_v6  ;;  %v601_v18 = vmul.f32 %v3711_v10, %v3711_v10 }
  0x43   : > { %679 = vrot.lane.b32.xlu0 %v593_v25, %s3255_s16  ;;  %681 = vrot.lane.b32.xlu1 %v594_v33, %s3255_s16 }
  0x47   : > { %683 = vrot.lane.b32.xlu0 %v595_v48, %s3255_s16  ;;  %685 = vrot.lane.b32.xlu1 %v596_v49, %s3255_s16 }
  0x4b   : > { %687 = vrot.lane.b32.xlu0 %v597_v0, %s3255_s16  ;;  %689 = vrot.lane.b32.xlu1 %v598_v5, %s3255_s16 }
  0x4f   : > { %691 = vrot.lane.b32.xlu0 %v599_v9, %s3255_s16  ;;  %693 = vrot.lane.b32.xlu1 %v600_v13, %s3255_s16 }
  0x53   : > { %695 = vrot.lane.b32.xlu0 %v601_v18, %s3255_s16  ;;  %697 = vrot.lane.b32.xlu1 %v602_v19, %s3255_s16 }
  0x89   : > { %v636_v20 = vpop.permute.xlu0 %635  ;;  %v640_v22 = vpop.permute.xlu1 %639 }
  0x8a   : > { %v731_v21 = vsub.f32 %v3354_v23, %v636_v20  ;;  %v733_v24 = vsub.f32 %v3364_v29, %v640_v22 }
  0x8c   : > { %v763_v25 = vmax.f32 %v731_v21, 0.0  ;;  %v765_v28 = vmax.f32 %v733_v24, 0.0 }
  0x8d   : > { %v638_v33 = vpop.permute.xlu0 %637  ;;  %v642_v39 = vpop.permute.xlu1 %641 }
  0x8e   : > { %v795_v34 = vadd.f32 1e-05, %v763_v25  ;;  %v732_v37 = vsub.f32 %v3366_v30, %v638_v33  ;;  %v797_v40 = vadd.f32 1e-05, %v765_v28  ;;  %v734_v41 = vsub.f32 %v3374_v35, %v642_v39 }
  0x90   : > { %3167 = vrsqrt.f32 %v795_v34  ;;  %v764_v42 = vmax.f32 %v732_v37, 0.0  ;;  %v766_v43 = vmax.f32 %v734_v41, 0.0 }
  0x91   : > { %v644_v45 = vpop.permute.xlu0 %643  ;;  %3169 = vrsqrt.f32 %v797_v40  ;;  %v646_v49 = vpop.permute.xlu1 %645 }
  0x92   : > { %v796_v47 = vadd.f32 1e-05, %v764_v42  ;;  %v735_v48 = vsub.f32 %v3398_v46, %v644_v45  ;;  %v798_v53 = vadd.f32 1e-05, %v766_v43  ;;  %v736_v57 = vsub.f32 %v3406_v51, %v646_v49 }
  0x94   : > { %3171 = vrsqrt.f32 %v796_v47  ;;  %v767_v58 = vmax.f32 %v735_v48, 0.0  ;;  %v768_v59 = vmax.f32 %v736_v57, 0.0 }
  0x95   : > { %v648_v61 = vpop.permute.xlu0 %647  ;;  %3173 = vrsqrt.f32 %v798_v53  ;;  %v650_v4 = vpop.permute.xlu1 %649 }
  0x96   : > { %v799_v63 = vadd.f32 1e-05, %v767_v58  ;;  %v737_v0 = vsub.f32 %v3418_v60, %v648_v61  ;;  %v800_v5 = vadd.f32 1e-05, %v768_v59  ;;  %v738_v8 = vsub.f32 %v3432_v3, %v650_v4 }
  0x98   : > { %3175 = vrsqrt.f32 %v799_v63  ;;  %v769_v9 = vmax.f32 %v737_v0, 0.0  ;;  %v770_v13 = vmax.f32 %v738_v8, 0.0 }
  0x99   : > { %v652_v18 = vpop.permute.xlu0 %651  ;;  %3177 = vrsqrt.f32 %v800_v5  ;;  %v654_v22 = vpop.permute.xlu1 %653 }
  0x9a   : > { %v3168_v19 = vpop.eup %3167  ;;  %v801_v20 = vadd.f32 1e-05, %v769_v9  ;;  %v739_v21 = vsub.f32 %v3446_v11, %v652_v18  ;;  %v802_v24 = vadd.f32 1e-05, %v770_v13  ;;  %v740_v25 = vsub.f32 %v3455_v14, %v654_v22 }
  0x9b   : > { %891 = vrot.lane.b32.xlu0 %v3168_v19, %s3256_s29  ;;  %v3170_v28 = vpop.eup %3169 }
  0x9c   : > { %3179 = vrsqrt.f32 %v801_v20  ;;  %v771_v33 = vmax.f32 %v739_v21, 0.0  ;;  %v772_v34 = vmax.f32 %v740_v25, 0.0 }
  0x9d   : > { %v656_v37 = vpop.permute.xlu0 %655  ;;  %3181 = vrsqrt.f32 %v802_v24  ;;  %v658_v42 = vpop.permute.xlu1 %657 }
  0x9e   : > { %v3172_v39 = vpop.eup %3171  ;;  %v803_v40 = vadd.f32 1e-05, %v771_v33  ;;  %v741_v41 = vsub.f32 %v3481_v32, %v656_v37  ;;  %v804_v43 = vadd.f32 1e-05, %v772_v34  ;;  %v742_v45 = vsub.f32 %v3486_v36, %v658_v42 }
  0x9f   : > { %895 = vrot.lane.b32.xlu0 %v3170_v28, %s3256_s29  ;;  %893 = vrot.lane.b32.xlu1 %v3172_v39, %s3256_s29  ;;  %v3174_v47 = vpop.eup %3173 }
  0xa0   : > { %3183 = vrsqrt.f32 %v803_v40  ;;  %v773_v48 = vmax.f32 %v741_v41, 0.0  ;;  %v774_v49 = vmax.f32 %v742_v45, 0.0 }
  0xa1   : > { %v660_v53 = vpop.permute.xlu0 %659  ;;  %3185 = vrsqrt.f32 %v804_v43  ;;  %v662_v61 = vpop.permute.xlu1 %661 }
  0xa2   : > { %v3176_v57 = vpop.eup %3175  ;;  %v805_v58 = vadd.f32 1e-05, %v773_v48  ;;  %v743_v59 = vsub.f32 %v3502_v44, %v660_v53  ;;  %v806_v63 = vadd.f32 1e-05, %v774_v49  ;;  %v744_v0 = vsub.f32 %v3521_v56, %v662_v61 }
  0xa3   : > { %897 = vrot.lane.b32.xlu1 %v3174_v47, %s3256_s29  ;;  %899 = vrot.lane.b32.xlu0 %v3176_v57, %s3256_s29  ;;  %v3178_v4 = vpop.eup %3177 }
  0xa4   : > { %3187 = vrsqrt.f32 %v805_v58  ;;  %v775_v5 = vmax.f32 %v743_v59, 0.0  ;;  %v776_v8 = vmax.f32 %v744_v0, 0.0 }
  0xa5   : > { %v664_v9 = vpop.permute.xlu0 %663  ;;  %3189 = vrsqrt.f32 %v806_v63  ;;  %v666_v20 = vpop.permute.xlu1 %665 }
  0xa6   : > { %v3180_v13 = vpop.eup %3179  ;;  %v807_v18 = vadd.f32 1e-05, %v775_v5  ;;  %v745_v19 = vsub.f32 %v3530_v62, %v664_v9  ;;  %v808_v21 = vadd.f32 1e-05, %v776_v8  ;;  %v746_v22 = vsub.f32 %v3539_v2, %v666_v20 }
  0xa7   : > { %901 = vrot.lane.b32.xlu1 %v3178_v4, %s3256_s29  ;;  %903 = vrot.lane.b32.xlu0 %v3180_v13, %s3256_s29  ;;  %v3182_v24 = vpop.eup %3181 }
  0xa8   : > { %3191 = vrsqrt.f32 %v807_v18  ;;  %v777_v25 = vmax.f32 %v745_v19, 0.0  ;;  %v778_v28 = vmax.f32 %v746_v22, 0.0 }
  0xa9   : > { %v668_v33 = vpop.permute.xlu0 %667  ;;  %3193 = vrsqrt.f32 %v808_v21  ;;  %v670_v40 = vpop.permute.xlu1 %669 }
  0xaa   : > { %v3184_v34 = vpop.eup %3183  ;;  %v809_v37 = vadd.f32 1e-05, %v777_v25  ;;  %v747_v39 = vsub.f32 %v3556_v15, %v668_v33  ;;  %v810_v41 = vadd.f32 1e-05, %v778_v28  ;;  %v748_v42 = vsub.f32 %v3559_v17, %v670_v40 }
  0xab   : > { %905 = vrot.lane.b32.xlu1 %v3182_v24, %s3256_s29  ;;  %907 = vrot.lane.b32.xlu0 %v3184_v34, %s3256_s29  ;;  %v3186_v43 = vpop.eup %3185 }
  0xac   : > { %3195 = vrsqrt.f32 %v809_v37  ;;  %v779_v45 = vmax.f32 %v747_v39, 0.0  ;;  %v780_v47 = vmax.f32 %v748_v42, 0.0 }
  0xad   : > { %v672_v48 = vpop.permute.xlu0 %671  ;;  %3197 = vrsqrt.f32 %v810_v41  ;;  %v674_v58 = vpop.permute.xlu1 %673 }
  0xae   : > { %v3188_v49 = vpop.eup %3187  ;;  %v811_v53 = vadd.f32 1e-05, %v779_v45  ;;  %v749_v57 = vsub.f32 %v3580_v31, %v672_v48  ;;  %v812_v59 = vadd.f32 1e-05, %v780_v47  ;;  %v750_v61 = vsub.f32 %v3587_v38, %v674_v58 }
  0xaf   : > { %909 = vrot.lane.b32.xlu1 %v3186_v43, %s3256_s29  ;;  %911 = vrot.lane.b32.xlu0 %v3188_v49, %s3256_s29  ;;  %v3190_v63 = vpop.eup %3189 }
  0xb0   : > { %3199 = vrsqrt.f32 %v811_v53  ;;  %v781_v0 = vmax.f32 %v749_v57, 0.0  ;;  %v782_v4 = vmax.f32 %v750_v61, 0.0 }
  0xb1   : > { %v676_v5 = vpop.permute.xlu0 %675  ;;  %3201 = vrsqrt.f32 %v812_v59  ;;  %v678_v18 = vpop.permute.xlu1 %677 }
  0xb2   : > { %v3192_v8 = vpop.eup %3191  ;;  %v813_v9 = vadd.f32 1e-05, %v781_v0  ;;  %v751_v13 = vsub.f32 %v3608_v52, %v676_v5  ;;  %v814_v19 = vadd.f32 1e-05, %v782_v4  ;;  %v752_v20 = vsub.f32 %v3613_v54, %v678_v18 }
  0xb3   : > { %913 = vrot.lane.b32.xlu1 %v3190_v63, %s3256_s29  ;;  %915 = vrot.lane.b32.xlu0 %v3192_v8, %s3256_s29  ;;  %v3194_v21 = vpop.eup %3193 }
  0xb4   : > { %3203 = vrsqrt.f32 %v813_v9  ;;  %v783_v22 = vmax.f32 %v751_v13, 0.0  ;;  %v784_v24 = vmax.f32 %v752_v20, 0.0 }
  0xb5   : > { %v680_v25 = vpop.permute.xlu0 %679  ;;  %3205 = vrsqrt.f32 %v814_v19  ;;  %v682_v37 = vpop.permute.xlu1 %681 }
  0xb6   : > { %v3196_v28 = vpop.eup %3195  ;;  %v815_v33 = vadd.f32 1e-05, %v783_v22  ;;  %v753_v34 = vsub.f32 %v3635_v7, %v680_v25  ;;  %v816_v39 = vadd.f32 1e-05, %v784_v24  ;;  %v754_v40 = vsub.f32 %v3640_v12, %v682_v37 }
  0xb7   : > { %917 = vrot.lane.b32.xlu1 %v3194_v21, %s3256_s29  ;;  %919 = vrot.lane.b32.xlu0 %v3196_v28, %s3256_s29  ;;  %v3198_v41 = vpop.eup %3197 }
  0xb8   : > { %3207 = vrsqrt.f32 %v815_v33  ;;  %v785_v42 = vmax.f32 %v753_v34, 0.0  ;;  %v786_v43 = vmax.f32 %v754_v40, 0.0 }
  0xb9   : > { %v684_v45 = vpop.permute.xlu0 %683  ;;  %3209 = vrsqrt.f32 %v816_v39  ;;  %v686_v53 = vpop.permute.xlu1 %685 }
  0xba   : > { %v3200_v47 = vpop.eup %3199  ;;  %v817_v48 = vadd.f32 1e-05, %v785_v42  ;;  %v755_v49 = vsub.f32 %v3661_v26, %v684_v45  ;;  %v818_v57 = vadd.f32 1e-05, %v786_v43  ;;  %v756_v58 = vsub.f32 %v3663_v27, %v686_v53 }
  0xbb   : > { %921 = vrot.lane.b32.xlu1 %v3198_v41, %s3256_s29  ;;  %923 = vrot.lane.b32.xlu0 %v3200_v47, %s3256_s29  ;;  %v3202_v59 = vpop.eup %3201 }
  0xbc   : > { %3211 = vrsqrt.f32 %v817_v48  ;;  %v787_v61 = vmax.f32 %v755_v49, 0.0  ;;  %v788_v63 = vmax.f32 %v756_v58, 0.0 }
  0xbd   : > { %v688_v0 = vpop.permute.xlu0 %687  ;;  %3213 = vrsqrt.f32 %v818_v57  ;;  %v690_v9 = vpop.permute.xlu1 %689 }
  0xbe   : > { %v3204_v4 = vpop.eup %3203  ;;  %v819_v5 = vadd.f32 1e-05, %v787_v61  ;;  %v757_v8 = vsub.f32 %v3689_v50, %v688_v0  ;;  %v820_v13 = vadd.f32 1e-05, %v788_v63  ;;  %v758_v18 = vsub.f32 %v3692_v55, %v690_v9 }
  0xbf   : > { %925 = vrot.lane.b32.xlu1 %v3202_v59, %s3256_s29  ;;  %927 = vrot.lane.b32.xlu0 %v3204_v4, %s3256_s29  ;;  %v3206_v19 = vpop.eup %3205 }
  0xc0   : > { %3215 = vrsqrt.f32 %v819_v5  ;;  %v789_v20 = vmax.f32 %v757_v8, 0.0  ;;  %v790_v21 = vmax.f32 %v758_v18, 0.0 }
  0xc1   : > { %v692_v22 = vpop.permute.xlu0 %691  ;;  %3217 = vrsqrt.f32 %v820_v13  ;;  %v694_v33 = vpop.permute.xlu1 %693 }
  0xc2   : > { %v3208_v24 = vpop.eup %3207  ;;  %v821_v25 = vadd.f32 1e-05, %v789_v20  ;;  %v759_v28 = vsub.f32 %v3701_v1, %v692_v22  ;;  %v822_v34 = vadd.f32 1e-05, %v790_v21  ;;  %v760_v37 = vsub.f32 %v3706_v6, %v694_v33  ;;  %v3793_v20 = vld [vmem:[%s4675_s1] sm:$0xff] }
  0xc3   : > { %929 = vrot.lane.b32.xlu1 %v3206_v19, %s3256_s29  ;;  %931 = vrot.lane.b32.xlu0 %v3208_v24, %s3256_s29  ;;  %v3210_v39 = vpop.eup %3209  ;;  %v3801_v24 = vld [vmem:[%s4675_s1 + $0x8] sm:$0xff] }
  0xc4   : > { %3219 = vrsqrt.f32 %v821_v25  ;;  %v791_v40 = vmax.f32 %v759_v28, 0.0  ;;  %v792_v41 = vmax.f32 %v760_v37, 0.0  ;;  %v3806_v25 = vld [vmem:[%s4675_s1 + $0x10] sm:$0xff]  ;;  %v4680_v28 = vmov 0  }
  0xc5   : > { %v696_v42 = vpop.permute.xlu0 %695  ;;  %3221 = vrsqrt.f32 %v822_v34  ;;  %v698_v48 = vpop.permute.xlu1 %697  ;;  %3095 = vset.pattern.permute.xlu0 %v4680_v28  ;;  %3096 = vset.pattern.permute.xlu1 %v4680_v28  ;;  %v4042_v28 = vld [vmem:[%s4675_s1 + $0xb8] sm:$0xff] }
  0xc6   : > { %v3212_v43 = vpop.eup %3211  ;;  %v823_v45 = vadd.f32 1e-05, %v791_v40  ;;  %v761_v47 = vsub.f32 %v3711_v10, %v696_v42  ;;  %v824_v49 = vadd.f32 1e-05, %v792_v41  ;;  %v762_v53 = vsub.f32 %v3716_v16, %v698_v48  ;;  %v3822_v41 = vld [vmem:[%s4675_s1 + $0x18] sm:$0xff]  ;;  %v3827_v42 = vld [vmem:[%s4675_s1 + $0x20] sm:$0xff] }
  0xc7   : > { %933 = vrot.lane.b32.xlu1 %v3210_v39, %s3256_s29  ;;  %935 = vrot.lane.b32.xlu0 %v3212_v43, %s3256_s29  ;;  %v3214_v57 = vpop.eup %3213  ;;  %4693 = vst [vmem:[#allocation5_spill] sm:$0xff] %v4042_v28 }
  0xc8   : > { %3223 = vrsqrt.f32 %v823_v45  ;;  %v793_v58 = vmax.f32 %v761_v47, 0.0  ;;  %v794_v59 = vmax.f32 %v762_v53, 0.0  ;;  %v3844_v53 = vld [vmem:[%s4675_s1 + $0x28] sm:$0xff] }
  0xc9   : > { %3225 = vrsqrt.f32 %v824_v49 }
  0xca   : > { %v3216_v61 = vpop.eup %3215  ;;  %v825_v63 = vadd.f32 1e-05, %v793_v58  ;;  %v826_v0 = vadd.f32 1e-05, %v794_v59 }
  0xcb   : > { %937 = vrot.lane.b32.xlu1 %v3214_v57, %s3256_s29  ;;  %939 = vrot.lane.b32.xlu0 %v3216_v61, %s3256_s29  ;;  %v3218_v4 = vpop.eup %3217 }
  0xcc   : > { %3227 = vrsqrt.f32 %v825_v63 }
  0xcd   : > { %3229 = vrsqrt.f32 %v826_v0  ;;  %v3866_v0 = vld [vmem:[%s4675_s1 + $0x38] sm:$0xff] }
  0xce   : > { %v3220_v5 = vpop.eup %3219 }
  0xcf   : > { %941 = vrot.lane.b32.xlu1 %v3218_v4, %s3256_s29  ;;  %943 = vrot.lane.b32.xlu0 %v3220_v5, %s3256_s29  ;;  %v3222_v8 = vpop.eup %3221 }
  0xd2   : > { %v3224_v9 = vpop.eup %3223 }
  0xd3   : > { %945 = vrot.lane.b32.xlu1 %v3222_v8, %s3256_s29  ;;  %947 = vrot.lane.b32.xlu0 %v3224_v9, %s3256_s29  ;;  %v3226_v13 = vpop.eup %3225 }
  0xd6   : > { %v3228_v18 = vpop.eup %3227 }
  0xd7   : > { %949 = vrot.lane.b32.xlu1 %v3226_v13, %s3256_s29  ;;  %951 = vrot.lane.b32.xlu0 %v3228_v18, %s3256_s29  ;;  %v3230_v19 = vpop.eup %3229  ;;  %v3888_v18 = vld [vmem:[%s4675_s1 + $0x48] sm:$0xff] }
  0xdb   : > { %953 = vrot.lane.b32.xlu1 %v3230_v19, %s3256_s29 }
 0x10d   : > { %v892_v21 = vpop.permute.xlu0 %891 }
 0x10e   : > { %v3796_v22 = vmul.f32 %v892_v21, %v3793_v20 }
 0x110   : > { %v1019_v33 = vmul.f32 %v3796_v22, %v3354_v23 }
 0x111   : > { %v894_v34 = vpop.permute.xlu1 %893  ;;  %v896_v37 = vpop.permute.xlu0 %895 }
 0x112   : > { %v3813_v39 = vmul.f32 %v894_v34, %v3801_v24  ;;  %v3816_v40 = vmul.f32 %v896_v37, %v3806_v25  ;;  %1083 = vrot.lane.b32.xlu0 %v1019_v33, %s3255_s16 }
 0x114   : > { %v1020_v23 = vmul.f32 %v3813_v39, %v3366_v30  ;;  %v1021_v43 = vmul.f32 %v3816_v40, %v3364_v29  ;;  %v3849_v29 = vld [vmem:[%s4675_s1 + $0x30] sm:$0xff] }
 0x115   : > { %v898_v45 = vpop.permute.xlu1 %897  ;;  %v900_v47 = vpop.permute.xlu0 %899 }
 0x116   : > { %v3834_v48 = vmul.f32 %v898_v45, %v3822_v41  ;;  %v3837_v49 = vmul.f32 %v900_v47, %v3827_v42  ;;  %1085 = vrot.lane.b32.xlu1 %v1020_v23, %s3255_s16  ;;  %1087 = vrot.lane.b32.xlu0 %v1021_v43, %s3255_s16  ;;  %v3910_v23 = vld [vmem:[%s4675_s1 + $0x58] sm:$0xff] }
 0x118   : > { %v1022_v30 = vmul.f32 %v3834_v48, %v3374_v35  ;;  %v1023_v57 = vmul.f32 %v3837_v49, %v3398_v46  ;;  %v3871_v35 = vld [vmem:[%s4675_s1 + $0x40] sm:$0xff] }
 0x119   : > { %v902_v58 = vpop.permute.xlu1 %901  ;;  %v904_v59 = vpop.permute.xlu0 %903 }
 0x11a   : > { %v3856_v61 = vmul.f32 %v902_v58, %v3844_v53  ;;  %v3859_v63 = vmul.f32 %v904_v59, %v3849_v29  ;;  %1089 = vrot.lane.b32.xlu1 %v1022_v30, %s3255_s16  ;;  %1091 = vrot.lane.b32.xlu0 %v1023_v57, %s3255_s16  ;;  %v3932_v58 = vld [vmem:[%s4675_s1 + $0x68] sm:$0xff] }
 0x11c   : > { %v1024_v46 = vmul.f32 %v3856_v61, %v3406_v51  ;;  %v1025_v4 = vmul.f32 %v3859_v63, %v3418_v60  ;;  %v3893_v51 = vld [vmem:[%s4675_s1 + $0x50] sm:$0xff] }
 0x11d   : > { %v906_v5 = vpop.permute.xlu1 %905  ;;  %v908_v8 = vpop.permute.xlu0 %907 }
 0x11e   : > { %v3878_v9 = vmul.f32 %v906_v5, %v3866_v0  ;;  %v3881_v13 = vmul.f32 %v908_v8, %v3871_v35  ;;  %1093 = vrot.lane.b32.xlu1 %v1024_v46, %s3255_s16  ;;  %1095 = vrot.lane.b32.xlu0 %v1025_v4, %s3255_s16 }
 0x120   : > { %v1026_v60 = vmul.f32 %v3878_v9, %v3432_v3  ;;  %v1027_v19 = vmul.f32 %v3881_v13, %v3446_v11  ;;  %v3915_v3 = vld [vmem:[%s4675_s1 + $0x60] sm:$0xff] }
 0x121   : > { %v910_v21 = vpop.permute.xlu1 %909  ;;  %v912_v33 = vpop.permute.xlu0 %911 }
 0x122   : > { %v3900_v34 = vmul.f32 %v910_v21, %v3888_v18  ;;  %v3903_v37 = vmul.f32 %v912_v33, %v3893_v51  ;;  %1097 = vrot.lane.b32.xlu1 %v1026_v60, %s3255_s16  ;;  %1099 = vrot.lane.b32.xlu0 %v1027_v19, %s3255_s16  ;;  %v3954_v60 = vld [vmem:[%s4675_s1 + $0x78] sm:$0xff] }
 0x124   : > { %v1028_v11 = vmul.f32 %v3900_v34, %v3455_v14  ;;  %v1029_v43 = vmul.f32 %v3903_v37, %v3481_v32  ;;  %v3937_v14 = vld [vmem:[%s4675_s1 + $0x70] sm:$0xff] }
 0x125   : > { %v914_v45 = vpop.permute.xlu1 %913  ;;  %v916_v47 = vpop.permute.xlu0 %915 }
 0x126   : > { %v3922_v30 = vmul.f32 %v914_v45, %v3910_v23  ;;  %v3925_v57 = vmul.f32 %v916_v47, %v3915_v3  ;;  %1101 = vrot.lane.b32.xlu1 %v1028_v11, %s3255_s16  ;;  %1103 = vrot.lane.b32.xlu0 %v1029_v43, %s3255_s16  ;;  %v3976_v45 = vld [vmem:[%s4675_s1 + $0x88] sm:$0xff] }
 0x128   : > { %v1030_v32 = vmul.f32 %v3922_v30, %v3486_v36  ;;  %v1031_v59 = vmul.f32 %v3925_v57, %v3502_v44  ;;  %v3959_v36 = vld [vmem:[%s4675_s1 + $0x80] sm:$0xff] }
 0x129   : > { %v918_v46 = vpop.permute.xlu1 %917  ;;  %v920_v4 = vpop.permute.xlu0 %919 }
 0x12a   : > { %v3944_v5 = vmul.f32 %v918_v46, %v3932_v58  ;;  %v3947_v8 = vmul.f32 %v920_v4, %v3937_v14  ;;  %1105 = vrot.lane.b32.xlu1 %v1030_v32, %s3255_s16  ;;  %1107 = vrot.lane.b32.xlu0 %v1031_v59, %s3255_s16 }
 0x12c   : > { %v1032_v44 = vmul.f32 %v3944_v5, %v3521_v56  ;;  %v1033_v19 = vmul.f32 %v3947_v8, %v3530_v62  ;;  %v3981_v56 = vld [vmem:[%s4675_s1 + $0x90] sm:$0xff] }
 0x12d   : > { %v922_v21 = vpop.permute.xlu1 %921  ;;  %v924_v33 = vpop.permute.xlu0 %923 }
 0x12e   : > { %v3966_v11 = vmul.f32 %v922_v21, %v3954_v60  ;;  %v3969_v43 = vmul.f32 %v924_v33, %v3959_v36  ;;  %1109 = vrot.lane.b32.xlu1 %v1032_v44, %s3255_s16  ;;  %1111 = vrot.lane.b32.xlu0 %v1033_v19, %s3255_s16  ;;  %v3998_v44 = vld [vmem:[%s4675_s1 + $0x98] sm:$0xff] }
 0x130   : > { %v1034_v62 = vmul.f32 %v3966_v11, %v3539_v2  ;;  %v1035_v47 = vmul.f32 %v3969_v43, %v3556_v15  ;;  %v4003_v2 = vld [vmem:[%s4675_s1 + $0xa0] sm:$0xff] }
 0x131   : > { %v926_v32 = vpop.permute.xlu1 %925  ;;  %v928_v59 = vpop.permute.xlu0 %927 }
 0x132   : > { %v3988_v46 = vmul.f32 %v926_v32, %v3976_v45  ;;  %v3991_v4 = vmul.f32 %v928_v59, %v3981_v56  ;;  %1113 = vrot.lane.b32.xlu1 %v1034_v62, %s3255_s16  ;;  %1115 = vrot.lane.b32.xlu0 %v1035_v47, %s3255_s16  ;;  %v4020_v32 = vld [vmem:[%s4675_s1 + $0xa8] sm:$0xff] }
 0x133   : > { %4691 = vst [vmem:[#allocation3_spill] sm:$0xff] %v4020_v32 }
 0x134   : > { %v1036_v15 = vmul.f32 %v3988_v46, %v3559_v17  ;;  %v1037_v19 = vmul.f32 %v3991_v4, %v3580_v31  ;;  %v4025_v17 = vld [vmem:[%s4675_s1 + $0xb0] sm:$0xff] }
 0x135   : > { %v930_v21 = vpop.permute.xlu1 %929  ;;  %v932_v33 = vpop.permute.xlu0 %931  ;;  %4692 = vst [vmem:[#allocation4_spill] sm:$0xff] %v4025_v17 }
 0x136   : > { %v4010_v62 = vmul.f32 %v930_v21, %v3998_v44  ;;  %v4013_v47 = vmul.f32 %v932_v33, %v4003_v2  ;;  %1117 = vrot.lane.b32.xlu1 %v1036_v15, %s3255_s16  ;;  %1119 = vrot.lane.b32.xlu0 %v1037_v19, %s3255_s16 }
 0x138   : > { %v1038_v31 = vmul.f32 %v4010_v62, %v3587_v38  ;;  %v1039_v59 = vmul.f32 %v4013_v47, %v3608_v52  ;;  %v4047_v38 = vld [vmem:[%s4675_s1 + $0xc0] sm:$0xff] }
 0x139   : > { %v934_v21 = vpop.permute.xlu1 %933  ;;  %v936_v15 = vpop.permute.xlu0 %935  ;;  %4694 = vst [vmem:[#allocation6_spill] sm:$0xff] %v4047_v38 }
 0x13a   : > { %v4032_v19 = vmul.f32 %v934_v21, %v4020_v32  ;;  %v4035_v33 = vmul.f32 %v936_v15, %v4025_v17  ;;  %1121 = vrot.lane.b32.xlu1 %v1038_v31, %s3255_s16  ;;  %1123 = vrot.lane.b32.xlu0 %v1039_v59, %s3255_s16  ;;  %v4064_v32 = vld [vmem:[%s4675_s1 + $0xc8] sm:$0xff] }
 0x13b   : > { %4695 = vst [vmem:[#allocation7_spill] sm:$0xff] %v4064_v32 }
 0x13c   : > { %v1040_v52 = vmul.f32 %v4032_v19, %v3613_v54  ;;  %v1041_v21 = vmul.f32 %v4035_v33, %v3635_v7  ;;  %v4069_v54 = vld [vmem:[%s4675_s1 + $0xd0] sm:$0xff] }
 0x13d   : > { %v938_v15 = vpop.permute.xlu1 %937  ;;  %v940_v31 = vpop.permute.xlu0 %939  ;;  %4696 = vst [vmem:[#allocation8_spill] sm:$0xff] %v4069_v54 }
 0x13e   : > { %v4054_v59 = vmul.f32 %v938_v15, %v4042_v28  ;;  %v4057_v17 = vmul.f32 %v940_v31, %v4047_v38  ;;  %1125 = vrot.lane.b32.xlu1 %v1040_v52, %s3255_s16  ;;  %1127 = vrot.lane.b32.xlu0 %v1041_v21, %s3255_s16  ;;  %v4086_v28 = vld [vmem:[%s4675_s1 + $0xd8] sm:$0xff] }
 0x13f   : > { %4697 = vst [vmem:[#allocation9_spill] sm:$0xff] %v4086_v28 }
 0x140   : > { %v1042_v7 = vmul.f32 %v4054_v59, %v3640_v12  ;;  %v1043_v15 = vmul.f32 %v4057_v17, %v3661_v26  ;;  %v4091_v12 = vld [vmem:[%s4675_s1 + $0xe0] sm:$0xff] }
 0x141   : > { %v942_v31 = vpop.permute.xlu1 %941  ;;  %v944_v52 = vpop.permute.xlu0 %943  ;;  %4698 = vst [vmem:[#allocation10_spill] sm:$0xff] %v4091_v12 }
 0x142   : > { %v4076_v21 = vmul.f32 %v942_v31, %v4064_v32  ;;  %v4079_v38 = vmul.f32 %v944_v52, %v4069_v54  ;;  %1129 = vrot.lane.b32.xlu1 %v1042_v7, %s3255_s16  ;;  %1131 = vrot.lane.b32.xlu0 %v1043_v15, %s3255_s16  ;;  %v4108_v32 = vld [vmem:[%s4675_s1 + $0xe8] sm:$0xff] }
 0x143   : > { %4699 = vst [vmem:[#allocation11_spill] sm:$0xff] %v4108_v32 }
 0x144   : > { %v1044_v26 = vmul.f32 %v4076_v21, %v3663_v27  ;;  %v1045_v31 = vmul.f32 %v4079_v38, %v3689_v50  ;;  %v4113_v27 = vld [vmem:[%s4675_s1 + $0xf0] sm:$0xff] }
 0x145   : > { %v946_v52 = vpop.permute.xlu1 %945  ;;  %v948_v7 = vpop.permute.xlu0 %947 }
 0x146   : > { %v4098_v15 = vmul.f32 %v946_v52, %v4086_v28  ;;  %v4101_v54 = vmul.f32 %v948_v7, %v4091_v12  ;;  %1133 = vrot.lane.b32.xlu1 %v1044_v26, %s3255_s16  ;;  %1135 = vrot.lane.b32.xlu0 %v1045_v31, %s3255_s16  ;;  %v4130_v28 = vld [vmem:[%s4675_s1 + $0xf8] sm:$0xff] }
 0x148   : > { %v1046_v50 = vmul.f32 %v4098_v15, %v3692_v55  ;;  %v1047_v52 = vmul.f32 %v4101_v54, %v3701_v1 }
 0x149   : > { %v950_v7 = vpop.permute.xlu1 %949  ;;  %v952_v26 = vpop.permute.xlu0 %951 }
 0x14a   : > { %v4120_v31 = vmul.f32 %v950_v7, %v4108_v32  ;;  %v4123_v12 = vmul.f32 %v952_v26, %v4113_v27  ;;  %1137 = vrot.lane.b32.xlu1 %v1046_v50, %s3255_s16  ;;  %1139 = vrot.lane.b32.xlu0 %v1047_v52, %s3255_s16 }
 0x14c   : > { %v1048_v55 = vmul.f32 %v4120_v31, %v3706_v6  ;;  %v1049_v1 = vmul.f32 %v4123_v12, %v3711_v10 }
 0x14d   : > { %v954_v7 = vpop.permute.xlu1 %953 }
 0x14e   : > { %v4137_v32 = vmul.f32 %v954_v7, %v4130_v28  ;;  %1141 = vrot.lane.b32.xlu1 %v1048_v55, %s3255_s16  ;;  %1143 = vrot.lane.b32.xlu0 %v1049_v1, %s3255_s16 }
 0x150   : > { %v1050_v50 = vmul.f32 %v4137_v32, %v3716_v16 }
 0x152   : > { %1145 = vrot.lane.b32.xlu1 %v1050_v50, %s3255_s16  ;;  %s3064_s16 = smul.u32 384, %s4715_s18 }
 0x154   : > { %s4337_s11 = scalar_lea.vmem %s4676_s2, %s3064_s16 }
 0x184   : > { %v1084_v52 = vpop.permute.xlu0 %1083 }
 0x185   : > { %v1179_v6 = vsub.f32 %v3793_v20, %v1084_v52 }
 0x187   : > { %v1212_v10 = vsel %vm1211_vm1, %v3796_v22, %v1179_v6 }
 0x188   : > { %1244 = vst.msk [vmem:[#allocation2] sm:$0xff] %vm442_vm0, %v1212_v10  ;;  %v1086_v26 = vpop.permute.xlu1 %1085  ;;  %v1088_v7 = vpop.permute.xlu0 %1087 }
 0x189   : > { %v1180_v55 = vsub.f32 %v3801_v24, %v1086_v26  ;;  %v1181_v1 = vsub.f32 %v3806_v25, %v1088_v7 }
 0x18b   : > { %v1213_v16 = vsel %vm1211_vm1, %v3813_v39, %v1180_v55  ;;  %v1214_v50 = vsel %vm1211_vm1, %v3816_v40, %v1181_v1  ;;  %v3258_v55 = vmov 1  }
 0x18c   : > { %1245 = vst.msk [vmem:[#allocation2 + $0x8] sm:$0xff] %vm442_vm0, %v1213_v16  ;;  %1246 = vst.msk [vmem:[#allocation2 + $0x10] sm:$0xff] %vm442_vm0, %v1214_v50  ;;  %v1090_v20 = vpop.permute.xlu1 %1089  ;;  %v1092_v22 = vpop.permute.xlu0 %1091 }
 0x18d   : > { %v1182_v52 = vsub.f32 %v3822_v41, %v1090_v20  ;;  %v1183_v6 = vsub.f32 %v3827_v42, %v1092_v22 }
 0x18f   : > { %v1215_v24 = vsel %vm1211_vm1, %v3834_v48, %v1182_v52  ;;  %v1216_v25 = vsel %vm1211_vm1, %v3837_v49, %v1183_v6  ;;  %v1276_v39 = vld [vmem:[#allocation2] sm:$0xff] }
 0x190   : > { %1247 = vst.msk [vmem:[#allocation2 + $0x18] sm:$0xff] %vm442_vm0, %v1215_v24  ;;  %1248 = vst.msk [vmem:[#allocation2 + $0x20] sm:$0xff] %vm442_vm0, %v1216_v25  ;;  %v1094_v40 = vpop.permute.xlu1 %1093  ;;  %1406 = vperm.xlu0 %3095, %v1276_v39   ;;  %v1096_v10 = vpop.permute.xlu0 %1095  ;;  %v4700_v24 = vmov 0  }
 0x191   : > { %v1184_v26 = vsub.f32 %v3844_v53, %v1094_v40  ;;  %v1185_v41 = vsub.f32 %v3849_v29, %v1096_v10 }
 0x193   : > { %v1217_v42 = vsel %vm1211_vm1, %v3856_v61, %v1184_v26  ;;  %v1218_v48 = vsel %vm1211_vm1, %v3859_v63, %v1185_v41  ;;  %v1277_v7 = vld [vmem:[#allocation2 + $0x8] sm:$0xff]  ;;  %v1278_v20 = vld [vmem:[#allocation2 + $0x10] sm:$0xff] }
 0x194   : > { %1249 = vst.msk [vmem:[#allocation2 + $0x28] sm:$0xff] %vm442_vm0, %v1217_v42  ;;  %1250 = vst.msk [vmem:[#allocation2 + $0x30] sm:$0xff] %vm442_vm0, %v1218_v48  ;;  %1411 = vperm.xlu1 %3096, %v1277_v7   ;;  %v1098_v49 = vpop.permute.xlu1 %1097  ;;  %3098 = vset.pattern.permute.xlu0 %v3258_v55  ;;  %v1100_v1 = vpop.permute.xlu0 %1099 }
 0x195   : > { %v1186_v53 = vsub.f32 %v3866_v0, %v1098_v49  ;;  %v1187_v29 = vsub.f32 %v3871_v35, %v1100_v1  ;;  %1665 = vperm.xlu0 %3098, %v1277_v7  }
 0x197   : > { %v1219_v61 = vsel %vm1211_vm1, %v3878_v9, %v1186_v53  ;;  %v1220_v63 = vsel %vm1211_vm1, %v3881_v13, %v1187_v29  ;;  %v1279_v40 = vld [vmem:[#allocation2 + $0x18] sm:$0xff] }
 0x198   : > { %1251 = vst.msk [vmem:[#allocation2 + $0x38] sm:$0xff] %vm442_vm0, %v1219_v61  ;;  %1252 = vst.msk [vmem:[#allocation2 + $0x40] sm:$0xff] %vm442_vm0, %v1220_v63  ;;  %3097 = vset.pattern.permute.xlu1 %v3258_v55  ;;  %v1102_v16 = vpop.permute.xlu1 %1101  ;;  %v1104_v50 = vpop.permute.xlu0 %1103 }
 0x199   : > { %v1188_v0 = vsub.f32 %v3888_v18, %v1102_v16  ;;  %v1189_v35 = vsub.f32 %v3893_v51, %v1104_v50  ;;  %1661 = vperm.xlu1 %3097, %v1276_v39   ;;  %1669 = vperm.xlu0 %3098, %v1278_v20   ;;  %v1280_v51 = vld [vmem:[#allocation2 + $0x20] sm:$0xff] }
 0x19b   : > { %v1221_v9 = vsel %vm1211_vm1, %v3900_v34, %v1188_v0  ;;  %v1222_v13 = vsel %vm1211_vm1, %v3903_v37, %v1189_v35  ;;  %v1281_v10 = vld [vmem:[#allocation2 + $0x28] sm:$0xff]  ;;  %v1282_v42 = vld [vmem:[#allocation2 + $0x30] sm:$0xff] }
 0x19c   : > { %1253 = vst.msk [vmem:[#allocation2 + $0x48] sm:$0xff] %vm442_vm0, %v1221_v9  ;;  %1254 = vst.msk [vmem:[#allocation2 + $0x50] sm:$0xff] %vm442_vm0, %v1222_v13  ;;  %v1106_v22 = vpop.permute.xlu1 %1105  ;;  %v1108_v52 = vpop.permute.xlu0 %1107  ;;  %v4703_v9 = vld [vmem:[#allocation5_spill] sm:$0xff] }
 0x19d   : > { %v1190_v6 = vsub.f32 %v3910_v23, %v1106_v22  ;;  %v1191_v18 = vsub.f32 %v3915_v3, %v1108_v52  ;;  %3099 = vset.pattern.permute.xlu1 %v4700_v24  ;;  %3101 = vset.pattern.permute.xlu0 %v4700_v24  ;;  %v4704_v22 = vld [vmem:[#allocation6_spill] sm:$0xff] }
 0x19e   : > { %1416 = vperm.xlu1 %3099, %v1278_v20   ;;  %1426 = vperm.xlu0 %3101, %v1280_v51  }
 0x19f   : > { %v1223_v34 = vsel %vm1211_vm1, %v3922_v30, %v1190_v6  ;;  %v1224_v37 = vsel %vm1211_vm1, %v3925_v57, %v1191_v18 }
 0x1a0   : > { %1255 = vst.msk [vmem:[#allocation2 + $0x58] sm:$0xff] %vm442_vm0, %v1223_v34  ;;  %1256 = vst.msk [vmem:[#allocation2 + $0x60] sm:$0xff] %vm442_vm0, %v1224_v37  ;;  %v1110_v23 = vpop.permute.xlu1 %1109  ;;  %v1112_v25 = vpop.permute.xlu0 %1111  ;;  %v4706_v37 = vld [vmem:[#allocation8_spill] sm:$0xff] }
 0x1a1   : > { %v1192_v3 = vsub.f32 %v3932_v58, %v1110_v23  ;;  %v1193_v39 = vsub.f32 %v3937_v14, %v1112_v25  ;;  %v1283_v25 = vld [vmem:[#allocation2 + $0x38] sm:$0xff] }
 0x1a2   : > { %1421 = vperm.xlu1 %3099, %v1279_v40   ;;  %3104 = vset.pattern.permute.xlu0 %v3258_v55 }
 0x1a3   : > { %v1225_v30 = vsel %vm1211_vm1, %v3944_v5, %v1192_v3  ;;  %v1226_v57 = vsel %vm1211_vm1, %v3947_v8, %v1193_v39  ;;  %1681 = vperm.xlu0 %3104, %v1281_v10   ;;  %v1285_v63 = vld [vmem:[#allocation2 + $0x48] sm:$0xff]  ;;  %v1286_v35 = vld [vmem:[#allocation2 + $0x50] sm:$0xff] }
 0x1a4   : > { %1257 = vst.msk [vmem:[#allocation2 + $0x68] sm:$0xff] %vm442_vm0, %v1225_v30  ;;  %1258 = vst.msk [vmem:[#allocation2 + $0x70] sm:$0xff] %vm442_vm0, %v1226_v57  ;;  %v1114_v26 = vpop.permute.xlu1 %1113  ;;  %v1116_v58 = vpop.permute.xlu0 %1115  ;;  %v4708_v57 = vld [vmem:[#allocation10_spill] sm:$0xff] }
 0x1a5   : > { %v1194_v14 = vsub.f32 %v3954_v60, %v1114_v26  ;;  %v1195_v41 = vsub.f32 %v3959_v36, %v1116_v58 }
 0x1a6   : > { %3100 = vset.pattern.permute.xlu1 %v3258_v55 }
 0x1a7   : > { %v1227_v5 = vsel %vm1211_vm1, %v3966_v11, %v1194_v14  ;;  %v1228_v8 = vsel %vm1211_vm1, %v3969_v43, %v1195_v41  ;;  %1673 = vperm.xlu1 %3100, %v1279_v40   ;;  %1685 = vperm.xlu0 %3104, %v1282_v42   ;;  %v4226_v43 = vld [vmem:[#allocation2 + $0x40] sm:$0xff] }
 0x1a8   : > { %1259 = vst.msk [vmem:[#allocation2 + $0x78] sm:$0xff] %vm442_vm0, %v1227_v5  ;;  %1260 = vst.msk [vmem:[#allocation2 + $0x80] sm:$0xff] %vm442_vm0, %v1228_v8  ;;  %v1118_v48 = vpop.permute.xlu1 %1117  ;;  %v1120_v7 = vpop.permute.xlu0 %1119  ;;  %v1288_v3 = vld [vmem:[#allocation2 + $0x60] sm:$0xff] }
 0x1a9   : > { %v1196_v60 = vsub.f32 %v3976_v45, %v1118_v48  ;;  %v1197_v36 = vsub.f32 %v3981_v56, %v1120_v7 }
 0x1ab   : > { %v1229_v49 = vsel %vm1211_vm1, %v3988_v46, %v1196_v60  ;;  %v1230_v11 = vsel %vm1211_vm1, %v3991_v4, %v1197_v36  ;;  %3102 = vset.pattern.permute.xlu1 %v4700_v24  ;;  %3107 = vset.pattern.permute.xlu0 %v4700_v24  ;;  %v1289_v58 = vld [vmem:[#allocation2 + $0x68] sm:$0xff]  ;;  %v1290_v48 = vld [vmem:[#allocation2 + $0x70] sm:$0xff] }
 0x1ac   : > { %1261 = vst.msk [vmem:[#allocation2 + $0x88] sm:$0xff] %vm442_vm0, %v1229_v49  ;;  %1262 = vst.msk [vmem:[#allocation2 + $0x90] sm:$0xff] %vm442_vm0, %v1230_v11  ;;  %v1122_v1 = vpop.permute.xlu1 %1121  ;;  %1431 = vperm.xlu1 %3102, %v1281_v10   ;;  %1446 = vperm.xlu0 %3107, %v4226_v43   ;;  %v1124_v45 = vpop.permute.xlu0 %1123  ;;  %v4707_v10 = vld [vmem:[#allocation9_spill] sm:$0xff] }
 0x1ad   : > { %v1198_v56 = vsub.f32 %v3998_v44, %v1122_v1  ;;  %v1199_v46 = vsub.f32 %v4003_v2, %v1124_v45  ;;  %v4701_v44 = vld [vmem:[#allocation3_spill] sm:$0xff]  ;;  %v4702_v2 = vld [vmem:[#allocation4_spill] sm:$0xff] }
 0x1af   : > { %v1231_v4 = vsel %vm1211_vm1, %v4010_v62, %v1198_v56  ;;  %v1232_v53 = vsel %vm1211_vm1, %v4013_v47, %v1199_v46  ;;  %v1291_v45 = vld [vmem:[#allocation2 + $0x78] sm:$0xff] }
 0x1b0   : > { %1263 = vst.msk [vmem:[#allocation2 + $0x98] sm:$0xff] %vm442_vm0, %v1231_v4  ;;  %1264 = vst.msk [vmem:[#allocation2 + $0xa0] sm:$0xff] %vm442_vm0, %v1232_v53  ;;  %v1126_v29 = vpop.permute.xlu1 %1125  ;;  %3103 = vset.pattern.permute.xlu1 %v3258_v55  ;;  %3110 = vset.pattern.permute.xlu0 %v3258_v55  ;;  %v1128_v61 = vpop.permute.xlu0 %1127 }
 0x1b1   : > { %v1200_v16 = vsub.f32 %v4701_v44, %v1126_v29  ;;  %v1201_v50 = vsub.f32 %v4702_v2, %v1128_v61  ;;  %1677 = vperm.xlu1 %3103, %v1280_v51   ;;  %1697 = vperm.xlu0 %3110, %v1285_v63   ;;  %v4705_v51 = vld [vmem:[#allocation7_spill] sm:$0xff]  ;;  %v280_v61 = vld [vmem:[%s4337_s11 + $0xc] sm:$0xff]  ;;  %v279_v44 = vld [vmem:[%s4337_s11 + $0x8] ss:$12 sps:$4 sm:$0xff]  }
 0x1b2   : > { %v1311_v2 = vunpack.c.l.bf16 %v280_v61 }
 0x1b3   : > { %v1233_v62 = vsel %vm1211_vm1, %v4032_v19, %v1200_v16  ;;  %v1234_v47 = vsel %vm1211_vm1, %v4035_v33, %v1201_v50  ;;  %v278_v16 = vld [vmem:[%s4337_s11] sm:$0xff]  ;;  %v1313_v50 = vunpack.c.h.bf16 %v279_v44 }
 0x1b4   : > { %1265 = vst.msk [vmem:[#allocation2 + $0xa8] sm:$0xff] %vm442_vm0, %v1233_v62  ;;  %1266 = vst.msk [vmem:[#allocation2 + $0xb0] sm:$0xff] %vm442_vm0, %v1234_v47  ;;  %v1130_v20 = vpop.permute.xlu1 %1129  ;;  %v1132_v0 = vpop.permute.xlu0 %1131  ;;  %v1312_v62 = vunpack.c.h.bf16 %v280_v61  ;;  %v1308_v47 = vunpack.c.l.bf16 %v278_v16 }
 0x1b5   : > { %v1202_v13 = vsub.f32 %v4703_v9, %v1130_v20  ;;  %v1203_v52 = vsub.f32 %v4704_v22, %v1132_v0  ;;  %3105 = vset.pattern.permute.xlu1 %v4700_v24  ;;  %1701 = vperm.xlu0 %3110, %v1286_v35   ;;  %v1309_v20 = vunpack.c.h.bf16 %v278_v16  ;;  %v1310_v0 = vunpack.c.l.bf16 %v279_v44 }
 0x1b6   : > { %1436 = vperm.xlu1 %3105, %v1282_v42   ;;  %v4709_v42 = vld [vmem:[#allocation11_spill] sm:$0xff] }
 0x1b7   : > { %v1235_v19 = vsel %vm1211_vm1, %v4054_v59, %v1202_v13  ;;  %v1236_v33 = vsel %vm1211_vm1, %v4057_v17, %v1203_v52  ;;  %v1296_v36 = vld [vmem:[#allocation2 + $0xa0] sm:$0xff]  ;;  %v1295_v29 = vld [vmem:[#allocation2 + $0x98] sm:$0xff] }
 0x1b8   : > { %1267 = vst.msk [vmem:[#allocation2 + $0xb8] sm:$0xff] %vm442_vm0, %v1235_v19  ;;  %1268 = vst.msk [vmem:[#allocation2 + $0xc0] sm:$0xff] %vm442_vm0, %v1236_v33  ;;  %v1134_v6 = vpop.permute.xlu1 %1133  ;;  %v1136_v18 = vpop.permute.xlu0 %1135 }
 0x1b9   : > { %v1204_v34 = vsub.f32 %v4705_v51, %v1134_v6  ;;  %v1205_v23 = vsub.f32 %v4706_v37, %v1136_v18  ;;  %3113 = vset.pattern.permute.xlu0 %v4700_v24 }
 0x1ba   : > { %1441 = vperm.xlu1 %3105, %v1283_v25   ;;  %1466 = vperm.xlu0 %3113, %v1288_v3  }
 0x1bb   : > { %v1237_v59 = vsel %vm1211_vm1, %v4076_v21, %v1204_v34  ;;  %v1238_v17 = vsel %vm1211_vm1, %v4079_v38, %v1205_v23  ;;  %v1297_v49 = vld [vmem:[#allocation2 + $0xa8] sm:$0xff]  ;;  %v1298_v11 = vld [vmem:[#allocation2 + $0xb0] sm:$0xff] }
 0x1bc   : > { %1269 = vst.msk [vmem:[#allocation2 + $0xc8] sm:$0xff] %vm442_vm0, %v1237_v59  ;;  %1270 = vst.msk [vmem:[#allocation2 + $0xd0] sm:$0xff] %vm442_vm0, %v1238_v17  ;;  %v1138_v39 = vpop.permute.xlu1 %1137  ;;  %v1140_v40 = vpop.permute.xlu0 %1139 }
 0x1bd   : > { %v1206_v30 = vsub.f32 %v4707_v10, %v1138_v39  ;;  %v1207_v26 = vsub.f32 %v4708_v57, %v1140_v40 }
 0x1be   : > { %3106 = vset.pattern.permute.xlu1 %v3258_v55  ;;  %3116 = vset.pattern.permute.xlu0 %v3258_v55 }
 0x1bf   : > { %v1239_v21 = vsel %vm1211_vm1, %v4098_v15, %v1206_v30  ;;  %v1240_v38 = vsel %vm1211_vm1, %v4101_v54, %v1207_v26  ;;  %1689 = vperm.xlu1 %3106, %v1283_v25   ;;  %1713 = vperm.xlu0 %3116, %v1289_v58   ;;  %v1299_v23 = vld [vmem:[#allocation2 + $0xb8] sm:$0xff] }
 0x1c0   : > { %1271 = vst.msk [vmem:[#allocation2 + $0xd8] sm:$0xff] %vm442_vm0, %v1239_v21  ;;  %1272 = vst.msk [vmem:[#allocation2 + $0xe0] sm:$0xff] %vm442_vm0, %v1240_v38  ;;  %v1142_v14 = vpop.permute.xlu1 %1141  ;;  %v1144_v41 = vpop.permute.xlu0 %1143  ;;  %v282_v25 = vld [vmem:[%s4337_s11 + $0x18] sm:$0xff] }
 0x1c1   : > { %v1208_v5 = vsub.f32 %v4709_v42, %v1142_v14  ;;  %v1209_v8 = vsub.f32 %v4113_v27, %v1144_v41  ;;  %v1315_v38 = vunpack.c.h.bf16 %v282_v25 }
 0x1c3   : > { %v1241_v7 = vsel %vm1211_vm1, %v4120_v31, %v1208_v5  ;;  %v1242_v15 = vsel %vm1211_vm1, %v4123_v12, %v1209_v8  ;;  %3108 = vset.pattern.permute.xlu1 %v4700_v24  ;;  %1717 = vperm.xlu0 %3116, %v1290_v48   ;;  %v1292_v31 = vld [vmem:[#allocation2 + $0x80] sm:$0xff]  ;;  %v1293_v12 = vld [vmem:[#allocation2 + $0x88] sm:$0xff]  ;;  %v4309_v56 = vld [vmem:[#allocation2 + $0xd0] sm:$0xff] }
 0x1c4   : > { %1273 = vst.msk [vmem:[#allocation2 + $0xe8] sm:$0xff] %vm442_vm0, %v1241_v7  ;;  %1274 = vst.msk [vmem:[#allocation2 + $0xf0] sm:$0xff] %vm442_vm0, %v1242_v15  ;;  %v1146_v54 = vpop.permute.xlu1 %1145  ;;  %1451 = vperm.xlu1 %3108, %v1285_v63   ;;  %v4306_v1 = vld [vmem:[#allocation2 + $0xc8] sm:$0xff] }
 0x1c5   : > { %v1210_v60 = vsub.f32 %v4130_v28, %v1146_v54  ;;  %v1294_v28 = vld [vmem:[#allocation2 + $0x90] sm:$0xff]  ;;  %v284_v5 = vld [vmem:[%s4337_s11 + $0x24] sm:$0xff] }
 0x1c6   : > { %v1317_v54 = vunpack.c.l.bf16 %v284_v5 }
 0x1c7   : > { %v1243_v27 = vsel %vm1211_vm1, %v4137_v32, %v1210_v60  ;;  %3119 = vset.pattern.permute.xlu0 %v4700_v24  ;;  %v1287_v32 = vld [vmem:[#allocation2 + $0x58] sm:$0xff]  ;;  %v4314_v46 = vld [vmem:[#allocation2 + $0xe0] sm:$0xff]  ;;  %v1318_v60 = vunpack.c.h.bf16 %v284_v5 }
 0x1c8   : > { %1275 = vst.msk [vmem:[#allocation2 + $0xf8] sm:$0xff] %vm442_vm0, %v1243_v27  ;;  %3109 = vset.pattern.permute.xlu1 %v3258_v55  ;;  %1486 = vperm.xlu0 %3119, %v1292_v31  }
 0x1c9   : > { %1693 = vperm.xlu1 %3109, %v4226_v43   ;;  %v4301_v43 = vld [vmem:[#allocation2 + $0xc0] sm:$0xff] }
 0x1cb   : > { %v4319_v4 = vld [vmem:[#allocation2 + $0xe8] sm:$0xff]  ;;  %v4323_v53 = vld [vmem:[#allocation2 + $0xf0] sm:$0xff] }
 0x1cc   : > { %3122 = vset.pattern.permute.xlu0 %v3258_v55 }
 0x1cd   : > { %3111 = vset.pattern.permute.xlu1 %v4700_v24  ;;  %1729 = vperm.xlu0 %3122, %v1293_v12  }
 0x1ce   : > { %1456 = vperm.xlu1 %3111, %v1286_v35  }
 0x1d1   : > { %1733 = vperm.xlu0 %3122, %v1294_v28  }
 0x1d2   : > { %1461 = vperm.xlu1 %3111, %v1287_v32  }
 0x1d5   : > { %3125 = vset.pattern.permute.xlu0 %v4700_v24 }
 0x1d6   : > { %3112 = vset.pattern.permute.xlu1 %v3258_v55  ;;  %1506 = vperm.xlu0 %3125, %v1296_v36  }
 0x1d7   : > { %1705 = vperm.xlu1 %3112, %v1287_v32  }
 0x1da   : > { %3128 = vset.pattern.permute.xlu0 %v3258_v55 }
 0x1db   : > { %3114 = vset.pattern.permute.xlu1 %v4700_v24  ;;  %1745 = vperm.xlu0 %3128, %v1297_v49  }
 0x1dc   : > { %1471 = vperm.xlu1 %3114, %v1289_v58   ;;  %v1314_v58 = vunpack.c.l.bf16 %v282_v25 }
 0x1df   : > { %1749 = vperm.xlu0 %3128, %v1298_v11  }
 0x1e0   : > { %3115 = vset.pattern.permute.xlu1 %v3258_v55 }
 0x1e1   : > { %1709 = vperm.xlu1 %3115, %v1288_v3  }
 0x1e3   : > { %3131 = vset.pattern.permute.xlu0 %v4700_v24 }
 0x1e4   : > { %1526 = vperm.xlu0 %3131, %v4301_v43  }
 0x1e5   : > { %3117 = vset.pattern.permute.xlu1 %v4700_v24 }
 0x1e6   : > { %1476 = vperm.xlu1 %3117, %v1290_v48  }
 0x1e8   : > { %3134 = vset.pattern.permute.xlu0 %v3258_v55 }
 0x1e9   : > { %1761 = vperm.xlu0 %3134, %v4306_v1  }
 0x1ea   : > { %1481 = vperm.xlu1 %3117, %v1291_v45  }
 0x1ed   : > { %1765 = vperm.xlu0 %3134, %v4309_v56  }
 0x1ee   : > { %3118 = vset.pattern.permute.xlu1 %v3258_v55 }
 0x1ef   : > { %1721 = vperm.xlu1 %3118, %v1291_v45   ;;  %v4368_v45 = vld [vmem:[%s4337_s11 + $0x2c] ss:$24 sps:$4 sm:$0xff]  }
 0x1f0   : > { %v1325_v16 = vunpack.c.h.bf16 %v4368_v45 }
 0x1f1   : > { %3137 = vset.pattern.permute.xlu0 %v4700_v24 }
 0x1f2   : > { %1546 = vperm.xlu0 %3137, %v4314_v46  }
 0x1f3   : > { %3120 = vset.pattern.permute.xlu1 %v4700_v24 }
 0x1f4   : > { %1491 = vperm.xlu1 %3120, %v1293_v12   ;;  %v288_v12 = vld [vmem:[%s4337_s11 + $0x3c] sm:$0xff] }
 0x1f5   : > { %v1324_v44 = vunpack.c.h.bf16 %v288_v12 }
 0x1f6   : > { %3140 = vset.pattern.permute.xlu0 %v3258_v55 }
 0x1f7   : > { %1777 = vperm.xlu0 %3140, %v4319_v4  }
 0x1f8   : > { %3121 = vset.pattern.permute.xlu1 %v3258_v55 }
 0x1f9   : > { %1725 = vperm.xlu1 %3121, %v1292_v31  }
 0x1fb   : > { %1781 = vperm.xlu0 %3140, %v4323_v53  }
 0x1fd   : > { %3123 = vset.pattern.permute.xlu1 %v4700_v24 }
 0x1fe   : > { %1496 = vperm.xlu1 %3123, %v1294_v28  }
 0x202   : > { %1501 = vperm.xlu1 %3123, %v1295_v29  }
 0x206   : > { %3124 = vset.pattern.permute.xlu1 %v3258_v55 }
 0x207   : > { %1737 = vperm.xlu1 %3124, %v1295_v29  }
 0x20b   : > { %3126 = vset.pattern.permute.xlu1 %v4700_v24 }
 0x20c   : > { %1511 = vperm.xlu1 %3126, %v1297_v49  }
 0x20f   : > { %v1407_v63 = vpop.permute.xlu0 %1406 }
 0x210   : > { %3127 = vset.pattern.permute.xlu1 %v3258_v55  ;;  %v1564_v6 = vmul.f32 %v1407_v63, %v1308_v47  ;;  %v1565_v18 = vmul.f32 %v1407_v63, %v1309_v20  ;;  %v1566_v51 = vmul.f32 %v1407_v63, %v1310_v0  ;;  %v1323_v63 = vunpack.c.l.bf16 %v288_v12  ;;  %v4391_v12 = vld [vmem:[%s4337_s11 + $0x5c] ss:$60 sps:$4 sm:$0xff]  }
 0x211   : > { %1741 = vperm.xlu1 %3127, %v1296_v36  }
 0x213   : > { %v1412_v35 = vpop.permute.xlu1 %1411 }
 0x214   : > { %v1666_v9 = vpop.permute.xlu0 %1665  ;;  %v1567_v13 = vmul.f32 %v1412_v35, %v1311_v2  ;;  %v1569_v22 = vmul.f32 %v1412_v35, %v1313_v50  ;;  %v1568_v52 = vmul.f32 %v1412_v35, %v1312_v62 }
 0x215   : > { %3129 = vset.pattern.permute.xlu1 %v4700_v24 }
 0x216   : > { %v1791_v19 = vadd.f32 %v1666_v9, %v1567_v13  ;;  %1516 = vperm.xlu1 %3129, %v1298_v11   ;;  %v1792_v33 = vadd.f32 %v1666_v9, %v1568_v52  ;;  %v1793_v34 = vadd.f32 %v1666_v9, %v1569_v22  ;;  %v286_v11 = vld [vmem:[%s4337_s11 + $0x30] sm:$0xff] }
 0x217   : > { %v1320_v20 = vunpack.c.l.bf16 %v286_v11  ;;  %v1321_v0 = vunpack.c.h.bf16 %v286_v11 }
 0x218   : > { %v1662_v37 = vpop.permute.xlu1 %1661  ;;  %v1888_v39 = vmax.f32 %v1792_v33, 0.0  ;;  %v1887_v40 = vmax.f32 %v1791_v19, 0.0  ;;  %v1889_v26 = vmax.f32 %v1793_v34, 0.0  ;;  %v4351_v8 = vpop.permute.xlu0 %1669 }
 0x219   : > { %v1789_v3 = vadd.f32 %v1662_v37, %v1565_v18  ;;  %v1788_v59 = vadd.f32 %v1662_v37, %v1564_v6  ;;  %v1790_v17 = vadd.f32 %v1662_v37, %v1566_v51 }
 0x21a   : > { %1521 = vperm.xlu1 %3129, %v1299_v23  }
 0x21b   : > { %v1885_v10 = vmax.f32 %v1789_v3, 0.0  ;;  %v1884_v30 = vmax.f32 %v1788_v59, 0.0  ;;  %v1886_v57 = vmax.f32 %v1790_v17, 0.0  ;;  %v4382_v3 = vld [vmem:[%s4337_s11 + $0x50] ss:$24 sps:$4 sm:$0xff]  }
 0x21d   : > { %v4345_v21 = vpop.permute.xlu1 %1416  ;;  %v1981_v14 = vpack.c.bf16 %v1888_v39, %v1885_v10  ;;  %v1980_v41 = vpack.c.bf16 %v1887_v40, %v1884_v30  ;;  %v4347_v42 = vpack.c.bf16 %v1889_v26, %v1886_v57  ;;  %v1427_v49 = vpop.permute.xlu0 %1426  ;;  %v1303_v40 = vld [vmem:[#allocation2 + $0xd8] sm:$0xff]  ;;  %v290_v10 = vld [vmem:[%s4337_s11 + $0x48] sm:$0xff]  ;;  %v1328_v30 = vunpack.c.l.bf16 %v4382_v3 }
 0x21e   : > { %3130 = vset.pattern.permute.xlu1 %v3258_v55  ;;  %v1570_v48 = vmul.f32 %v4345_v21, %v1314_v58  ;;  %v1571_v7 = vmul.f32 %v4345_v21, %v1315_v38  ;;  %v1576_v51 = vmul.f32 %v1427_v49, %v1320_v20  ;;  %v1577_v34 = vmul.f32 %v1427_v49, %v1321_v0  ;;  %v4398_v0 = vld [vmem:[%s4337_s11 + $0x74] ss:$84 sps:$4 sm:$0xff]  }
 0x21f   : > { %1753 = vperm.xlu1 %3130, %v1299_v23   ;;  %2124 = vmatprep.subr.bf16.mxu0 %v1981_v14  ;;  %v1327_v5 = vunpack.c.h.bf16 %v290_v10 }
 0x220   : > { %2125 = vmatpush1.bf16.msra.mxu0 %v1980_v41  ;;  %v1795_v28 = vadd.f32 %v4351_v8, %v1571_v7  ;;  %v1794_v32 = vadd.f32 %v4351_v8, %v1570_v48  ;;  %v1326_v41 = vunpack.c.l.bf16 %v290_v10 }
 0x221   : > { %v4355_v15 = vpop.permute.xlu1 %1421 }
 0x222   : > { %v1573_v27 = vmul.f32 %v4355_v15, %v1317_v54  ;;  %v1574_v31 = vmul.f32 %v4355_v15, %v1318_v60  ;;  %v1891_v2 = vmax.f32 %v1795_v28, 0.0  ;;  %v1890_v62 = vmax.f32 %v1794_v32, 0.0  ;;  %v1682_v6 = vpop.permute.xlu0 %1681 }
 0x223   : > { %3132 = vset.pattern.permute.xlu1 %v4700_v24 }
 0x224   : > { %1531 = vperm.xlu1 %3132, %v4306_v1   ;;  %v4373_v1 = vld [vmem:[%s4337_s11 + $0x20] ss:$24 sps:$4 sm:$0xff]  }
 0x225   : > { %v1322_v35 = vunpack.c.h.bf16 %v4373_v1 }
 0x226   : > { %v4364_v36 = vpop.permute.xlu1 %1673  ;;  %v1686_v28 = vpop.permute.xlu0 %1685 }
 0x227   : > { %v1797_v29 = vadd.f32 %v4364_v36, %v1573_v27  ;;  %v1798_v61 = vadd.f32 %v4364_v36, %v1574_v31  ;;  %v1578_v37 = vmul.f32 %v1427_v49, %v1322_v35  ;;  %v292_v31 = vld [vmem:[%s4337_s11 + $0x54] sm:$0xff] }
 0x228   : > { %3133 = vset.pattern.permute.xlu1 %v3258_v55 }
 0x229   : > { %1757 = vperm.xlu1 %3133, %v4301_v43   ;;  %v1894_v50 = vmax.f32 %v1798_v61, 0.0  ;;  %v1893_v47 = vmax.f32 %v1797_v29, 0.0  ;;  %v1329_v61 = vunpack.c.l.bf16 %v292_v31 }
 0x22b   : > { %v1432_v9 = vpop.permute.xlu1 %1431  ;;  %v1984_v13 = vpack.c.bf16 %v1894_v50, %v1891_v2  ;;  %v1983_v22 = vpack.c.bf16 %v1893_v47, %v1890_v62  ;;  %v296_v50 = vld [vmem:[%s4337_s11 + $0x6c] sm:$0xff] }
 0x22c   : > { %v1579_v52 = vmul.f32 %v1432_v9, %v1323_v63  ;;  %v1580_v19 = vmul.f32 %v1432_v9, %v1324_v44  ;;  %v1581_v33 = vmul.f32 %v1432_v9, %v1325_v16  ;;  %v1330_v63 = vunpack.c.h.bf16 %v292_v31  ;;  %v1447_v9 = vpop.permute.xlu0 %1446 }
 0x22d   : > { %3135 = vset.pattern.permute.xlu1 %v4700_v24  ;;  %2126 = vmatprep.subr.bf16.mxu0 %v1984_v13  ;;  %v1331_v44 = vunpack.c.l.bf16 %v4391_v12  ;;  %v294_v13 = vld [vmem:[%s4337_s11 + $0x60] sm:$0xff] }
 0x22e   : > { %1536 = vperm.xlu1 %3135, %v4309_v56   ;;  %2127 = vmatpush1.bf16.msra.mxu0 %v1983_v22  ;;  %v1804_v43 = vadd.f32 %v1682_v6, %v1580_v19  ;;  %v1803_v18 = vadd.f32 %v1682_v6, %v1579_v52  ;;  %v1805_v23 = vadd.f32 %v1682_v6, %v1581_v33  ;;  %v1335_v33 = vunpack.c.l.bf16 %v296_v50 }
 0x22f   : > { %v1336_v6 = vunpack.c.h.bf16 %v296_v50 }
 0x230   : > { %v1678_v25 = vpop.permute.xlu1 %1677  ;;  %v1900_v56 = vmax.f32 %v1804_v43, 0.0  ;;  %v1899_v57 = vmax.f32 %v1803_v18, 0.0  ;;  %v1901_v14 = vmax.f32 %v1805_v23, 0.0  ;;  %v1337_v43 = vunpack.c.l.bf16 %v4398_v0 }
 0x231   : > { %v1800_v59 = vadd.f32 %v1678_v25, %v1576_v51  ;;  %v1801_v17 = vadd.f32 %v1678_v25, %v1577_v34  ;;  %v1802_v39 = vadd.f32 %v1678_v25, %v1578_v37  ;;  %v1332_v25 = vunpack.c.l.bf16 %v294_v13 }
 0x232   : > { %1541 = vperm.xlu1 %3135, %v1303_v40  }
 0x233   : > { %v1896_v26 = vmax.f32 %v1800_v59, 0.0  ;;  %v1897_v58 = vmax.f32 %v1801_v17, 0.0  ;;  %v1898_v38 = vmax.f32 %v1802_v39, 0.0  ;;  %v1333_v59 = vunpack.c.h.bf16 %v294_v13 }
 0x234   : > { %v1334_v17 = vunpack.c.h.bf16 %v4382_v3  ;;  %v1588_v3 = vmul.f32 %v1447_v9, %v1332_v25  ;;  %v3145_v25 = vld [vmem:[%s4677_s3 + $0x4] ss:$8 sps:$4 sm:$0xff]  }
 0x235   : > { %v1437_v48 = vpop.permute.xlu1 %1436  ;;  %v1987_v7 = vpack.c.bf16 %v1900_v56, %v1897_v58  ;;  %v1986_v54 = vpack.c.bf16 %v1899_v57, %v1896_v26  ;;  %v4386_v60 = vpack.c.bf16 %v1901_v14, %v1898_v38  ;;  %v1698_v58 = vpop.permute.xlu0 %1697  ;;  %2156 = vmatprep.mubr.bf16.mxu0 %v3145_v25  ;;  %2269 = vmatprep.mubr.bf16.mxu1 %v3145_v25  ;;  %v308_v25 = vld [vmem:[%s4337_s11 + $0xb4] sm:$0xff] }
 0x236   : > { %v1584_v27 = vmul.f32 %v1437_v48, %v1328_v30  ;;  %3136 = vset.pattern.permute.xlu1 %v3258_v55  ;;  %v1582_v32 = vmul.f32 %v1437_v48, %v1326_v41  ;;  %v1583_v49 = vmul.f32 %v1437_v48, %v1327_v5  ;;  %v1589_v41 = vmul.f32 %v1447_v9, %v1333_v59  ;;  %v299_v48 = vld [vmem:[%s4337_s11 + $0x80] ss:$12 sps:$4 sm:$0xff]  }
 0x237   : > { %1769 = vperm.xlu1 %3136, %v1303_v40   ;;  %2128 = vmatprep.subr.bf16.mxu0 %v1987_v7  ;;  %v1590_v5 = vmul.f32 %v1447_v9, %v1334_v17  ;;  %v302_v17 = vld [vmem:[%s4337_s11 + $0x90] sm:$0xff] }
 0x238   : > { %v1808_v11 = vadd.f32 %v1686_v28, %v1584_v27  ;;  %2129 = vmatpush1.bf16.msra.mxu0 %v1986_v54  ;;  %v1806_v16 = vadd.f32 %v1686_v28, %v1582_v32  ;;  %v1807_v2 = vadd.f32 %v1686_v28, %v1583_v49  ;;  %v1307_v28 = vld [vmem:[#allocation2 + $0xf8] sm:$0xff] }
 0x239   : > { %v1442_v29 = vpop.permute.xlu1 %1441  ;;  %v298_v32 = vld [vmem:[%s4337_s11 + $0x78] sm:$0xff]  ;;  %v1702_v9 = vpop.permute.xlu0 %1701 }
 0x23a   : > { %v1585_v62 = vmul.f32 %v1442_v29, %v1329_v61  ;;  %v1586_v47 = vmul.f32 %v1442_v29, %v1330_v63  ;;  %v1587_v20 = vmul.f32 %v1442_v29, %v1331_v44  ;;  %v1903_v18 = vmax.f32 %v1807_v2, 0.0 }
 0x23b   : > { %3138 = vset.pattern.permute.xlu1 %v4700_v24  ;;  %v1904_v23 = vmax.f32 %v1808_v11, 0.0  ;;  %v1338_v44 = vunpack.c.l.bf16 %v298_v32 }
 0x23c   : > { %1551 = vperm.xlu1 %3138, %v4319_v4   ;;  %v1902_v4 = vmax.f32 %v1806_v16, 0.0  ;;  %v1339_v16 = vunpack.c.h.bf16 %v298_v32 }
 0x23d   : > { %v1467_v59 = vpop.permute.xlu0 %1466 }
 0x23e   : > { %v1690_v35 = vpop.permute.xlu1 %1689 }
 0x23f   : > { %v1809_v22 = vadd.f32 %v1690_v35, %v1585_v62  ;;  %v1810_v52 = vadd.f32 %v1690_v35, %v1586_v47  ;;  %v1811_v19 = vadd.f32 %v1690_v35, %v1587_v20  ;;  %v300_v35 = vld [vmem:[%s4337_s11 + $0x84] sm:$0xff] }
 0x240   : > { %3139 = vset.pattern.permute.xlu1 %v3258_v55 }
 0x241   : > { %v1905_v51 = vmax.f32 %v1809_v22, 0.0  ;;  %v1906_v34 = vmax.f32 %v1810_v52, 0.0  ;;  %v1907_v37 = vmax.f32 %v1811_v19, 0.0  ;;  %1773 = vperm.xlu1 %3139, %v4314_v46  }
 0x243   : > { %v1452_v39 = vpop.permute.xlu1 %1451  ;;  %v1990_v40 = vpack.c.bf16 %v1906_v34, %v1903_v18  ;;  %v1989_v10 = vpack.c.bf16 %v1905_v51, %v1902_v4  ;;  %v4405_v30 = vpack.c.bf16 %v1907_v37, %v1904_v23  ;;  %v304_v51 = vld [vmem:[%s4337_s11 + $0x9c] sm:$0xff] }
 0x244   : > { %v1591_v56 = vmul.f32 %v1452_v39, %v1335_v33  ;;  %v1592_v57 = vmul.f32 %v1452_v39, %v1336_v6  ;;  %v1593_v26 = vmul.f32 %v1452_v39, %v1337_v43  ;;  %v1341_v33 = vunpack.c.l.bf16 %v300_v35  ;;  %v4421_v39 = vld [vmem:[%s4337_s11 + $0xa4] ss:$84 sps:$4 sm:$0xff]  }
 0x245   : > { %3141 = vset.pattern.permute.xlu1 %v4700_v24  ;;  %2130 = vmatprep.subr.bf16.mxu0 %v1990_v40  ;;  %v1340_v24 = vunpack.c.l.bf16 %v299_v48  ;;  %v1342_v6 = vunpack.c.h.bf16 %v300_v35  ;;  %v1343_v43 = vunpack.c.h.bf16 %v299_v48  ;;  %v1344_v48 = vunpack.c.l.bf16 %v302_v17  ;;  %v4428_v35 = vld [vmem:[%s4337_s11 + $0xb0] ss:$120 sps:$4 sm:$0xff]  }
 0x246   : > { %v1815_v46 = vadd.f32 %v1698_v58, %v1591_v56  ;;  %v1816_v38 = vadd.f32 %v1698_v58, %v1592_v57  ;;  %v1817_v14 = vadd.f32 %v1698_v58, %v1593_v26  ;;  %1556 = vperm.xlu1 %3141, %v4323_v53   ;;  %2131 = vmatpush1.bf16.msra.mxu0 %v1989_v10  ;;  %v1347_v57 = vunpack.c.l.bf16 %v304_v51 }
 0x247   : > { %v1348_v26 = vunpack.c.h.bf16 %v304_v51  ;;  %v1349_v58 = vunpack.c.l.bf16 %v4421_v39 }
 0x248   : > { %v1694_v7 = vpop.permute.xlu1 %1693  ;;  %v1912_v49 = vmax.f32 %v1816_v38, 0.0  ;;  %v1911_v11 = vmax.f32 %v1815_v46, 0.0  ;;  %v1913_v53 = vmax.f32 %v1817_v14, 0.0 }
 0x249   : > { %v1812_v54 = vadd.f32 %v1694_v7, %v1588_v3  ;;  %v1813_v27 = vadd.f32 %v1694_v7, %v1589_v41  ;;  %v1814_v31 = vadd.f32 %v1694_v7, %v1590_v5  ;;  %v1345_v7 = vunpack.c.h.bf16 %v302_v17 }
 0x24a   : > { %1561 = vperm.xlu1 %3141, %v1307_v28  }
 0x24b   : > { %v1908_v29 = vmax.f32 %v1812_v54, 0.0  ;;  %v1909_v61 = vmax.f32 %v1813_v27, 0.0  ;;  %v1910_v63 = vmax.f32 %v1814_v31, 0.0  ;;  %v1346_v54 = vunpack.c.h.bf16 %v4391_v12 }
 0x24d   : > { %v1457_v2 = vpop.permute.xlu1 %1456  ;;  %v1993_v50 = vpack.c.bf16 %v1912_v49, %v1909_v61  ;;  %v1992_v62 = vpack.c.bf16 %v1911_v11, %v1908_v29  ;;  %v4411_v47 = vpack.c.bf16 %v1913_v53, %v1910_v63  ;;  %v1714_v29 = vpop.permute.xlu0 %1713 }
 0x24e   : > { %v1596_v20 = vmul.f32 %v1457_v2, %v1340_v24  ;;  %3142 = vset.pattern.permute.xlu1 %v3258_v55  ;;  %v1594_v13 = vmul.f32 %v1457_v2, %v1338_v44  ;;  %v1595_v22 = vmul.f32 %v1457_v2, %v1339_v16  ;;  %v1600_v44 = vmul.f32 %v1467_v59, %v1344_v48 }
 0x24f   : > { %1785 = vperm.xlu1 %3142, %v1307_v28   ;;  %2132 = vmatprep.subr.bf16.mxu0 %v1993_v50  ;;  %v1601_v16 = vmul.f32 %v1467_v59, %v1345_v7  ;;  %v1602_v2 = vmul.f32 %v1467_v59, %v1346_v54  ;;  %v4436_v59 = vld [vmem:[%s4337_s11 + $0xbc] ss:$156 sps:$4 sm:$0xff]   ;;  %v313_v7 = vld [vmem:[%s4337_s11 + $0xd4] ss:$12 sps:$4 sm:$0xff]  }
 0x250   : > { %v1820_v52 = vadd.f32 %v1702_v9, %v1596_v20  ;;  %2133 = vmatpush1.bf16.msra.mxu0 %v1992_v62  ;;  %v1818_v18 = vadd.f32 %v1702_v9, %v1594_v13  ;;  %v1819_v4 = vadd.f32 %v1702_v9, %v1595_v22  ;;  %v306_v9 = vld [vmem:[%s4337_s11 + $0xa8] sm:$0xff]  ;;  %v1352_v13 = vunpack.c.l.bf16 %v4428_v35 }
 0x251   : > { %v1462_v19 = vpop.permute.xlu1 %1461  ;;  %v1718_v17 = vpop.permute.xlu0 %1717 }
 0x252   : > { %v1597_v34 = vmul.f32 %v1462_v19, %v1341_v33  ;;  %v1598_v37 = vmul.f32 %v1462_v19, %v1342_v6  ;;  %v1599_v55 = vmul.f32 %v1462_v19, %v1343_v43  ;;  %v1915_v46 = vmax.f32 %v1819_v4, 0.0 }
 0x253   : > { %v1914_v38 = vmax.f32 %v1818_v18, 0.0  ;;  %v1916_v5 = vmax.f32 %v1820_v52, 0.0  ;;  %v1350_v18 = vunpack.c.l.bf16 %v306_v9  ;;  %v1351_v4 = vunpack.c.h.bf16 %v306_v9 }
 0x256   : > { %v1706_v23 = vpop.permute.xlu1 %1705 }
 0x257   : > { %v1821_v40 = vadd.f32 %v1706_v23, %v1597_v34  ;;  %v1822_v10 = vadd.f32 %v1706_v23, %v1598_v37  ;;  %v1823_v56 = vadd.f32 %v1706_v23, %v1599_v55 }
 0x259   : > { %v1917_v14 = vmax.f32 %v1821_v40, 0.0  ;;  %v1918_v3 = vmax.f32 %v1822_v10, 0.0  ;;  %v1919_v41 = vmax.f32 %v1823_v56, 0.0 }
 0x25b   : > { %v1472_v27 = vpop.permute.xlu1 %1471  ;;  %v1996_v31 = vpack.c.bf16 %v1918_v3, %v1915_v46  ;;  %v1995_v28 = vpack.c.bf16 %v1917_v14, %v1914_v38  ;;  %v4425_v32 = vpack.c.bf16 %v1919_v41, %v1916_v5  ;;  %v1355_v46 = vunpack.c.l.bf16 %v4436_v59  ;;  %v312_v3 = vld [vmem:[%s4337_s11 + $0xcc] sm:$0xff] }
 0x25c   : > { %v1603_v24 = vmul.f32 %v1472_v27, %v1347_v57  ;;  %v1604_v49 = vmul.f32 %v1472_v27, %v1348_v26  ;;  %v1605_v11 = vmul.f32 %v1472_v27, %v1349_v58  ;;  %v1353_v26 = vunpack.c.l.bf16 %v308_v25  ;;  %v1487_v27 = vpop.permute.xlu0 %1486 }
 0x25d   : > { %2134 = vmatprep.subr.bf16.mxu0 %v1996_v31  ;;  %v1354_v58 = vunpack.c.h.bf16 %v308_v25  ;;  %v310_v31 = vld [vmem:[%s4337_s11 + $0xc0] sm:$0xff] }
 0x25e   : > { %v1827_v61 = vadd.f32 %v1714_v29, %v1603_v24  ;;  %v1828_v63 = vadd.f32 %v1714_v29, %v1604_v49  ;;  %v1829_v53 = vadd.f32 %v1714_v29, %v1605_v11  ;;  %2135 = vmatpush1.bf16.msra.mxu0 %v1995_v28  ;;  %v1359_v11 = vunpack.c.l.bf16 %v312_v3 }
 0x25f   : > { %v1360_v29 = vunpack.c.h.bf16 %v312_v3  ;;  %v1364_v3 = vunpack.c.h.bf16 %v313_v7 }
 0x260   : > { %v1710_v12 = vpop.permute.xlu1 %1709  ;;  %v1924_v22 = vmax.f32 %v1828_v63, 0.0  ;;  %v1923_v52 = vmax.f32 %v1827_v61, 0.0  ;;  %v1925_v43 = vmax.f32 %v1829_v53, 0.0  ;;  %v1361_v61 = vunpack.c.l.bf16 %v313_v7 }
 0x261   : > { %v1824_v50 = vadd.f32 %v1710_v12, %v1600_v44  ;;  %v1825_v62 = vadd.f32 %v1710_v12, %v1601_v16  ;;  %v1826_v20 = vadd.f32 %v1710_v12, %v1602_v2 }
 0x263   : > { %v1920_v19 = vmax.f32 %v1824_v50, 0.0  ;;  %v1921_v33 = vmax.f32 %v1825_v62, 0.0  ;;  %v1922_v6 = vmax.f32 %v1826_v20, 0.0  ;;  %v1356_v50 = vunpack.c.l.bf16 %v310_v31 }
 0x264   : > { %v1357_v62 = vunpack.c.h.bf16 %v310_v31  ;;  %v1358_v20 = vunpack.c.h.bf16 %v4398_v0  ;;  %v1316_v31 = vunpack.c.l.bf16 %v4373_v1 }
 0x265   : > { %v1477_v51 = vpop.permute.xlu1 %1476  ;;  %v1999_v34 = vpack.c.bf16 %v1924_v22, %v1921_v33  ;;  %v1998_v37 = vpack.c.bf16 %v1923_v52, %v1920_v19  ;;  %v4432_v55 = vpack.c.bf16 %v1925_v43, %v1922_v6  ;;  %v1730_v43 = vpop.permute.xlu0 %1729 }
 0x266   : > { %v1608_v23 = vmul.f32 %v1477_v51, %v1352_v13  ;;  %v1606_v40 = vmul.f32 %v1477_v51, %v1350_v18  ;;  %v1607_v10 = vmul.f32 %v1477_v51, %v1351_v4  ;;  %v1612_v51 = vmul.f32 %v1487_v27, %v1356_v50 }
 0x267   : > { %2136 = vmatprep.subr.bf16.mxu0 %v1999_v34  ;;  %v1613_v34 = vmul.f32 %v1487_v27, %v1357_v62  ;;  %v1572_v1 = vmul.f32 %v4345_v21, %v1316_v31 }
 0x268   : > { %v1832_v56 = vadd.f32 %v1718_v17, %v1608_v23  ;;  %2137 = vmatpush1.bf16.msra.mxu0 %v1998_v37  ;;  %v1830_v38 = vadd.f32 %v1718_v17, %v1606_v40  ;;  %v1831_v14 = vadd.f32 %v1718_v17, %v1607_v10  ;;  %v1614_v37 = vmul.f32 %v1487_v27, %v1358_v20  ;;  %v314_v40 = vld [vmem:[%s4337_s11 + $0xd8] sm:$0xff] }
 0x269   : > { %v1482_v57 = vpop.permute.xlu1 %1481  ;;  %v1734_v7 = vpop.permute.xlu0 %1733 }
 0x26a   : > { %v1609_v41 = vmul.f32 %v1482_v57, %v1353_v26  ;;  %v1610_v5 = vmul.f32 %v1482_v57, %v1354_v58  ;;  %v1611_v48 = vmul.f32 %v1482_v57, %v1355_v46  ;;  %v1927_v63 = vmax.f32 %v1831_v14, 0.0 }
 0x26b   : > { %v1926_v53 = vmax.f32 %v1830_v38, 0.0  ;;  %v1928_v12 = vmax.f32 %v1832_v56, 0.0  ;;  %v1363_v14 = vunpack.c.h.bf16 %v314_v40 }
 0x26e   : > { %v1722_v54 = vpop.permute.xlu1 %1721 }
 0x26f   : > { %v1833_v28 = vadd.f32 %v1722_v54, %v1609_v41  ;;  %v1834_v24 = vadd.f32 %v1722_v54, %v1610_v5  ;;  %v1835_v49 = vadd.f32 %v1722_v54, %v1611_v48  ;;  %v1362_v5 = vunpack.c.l.bf16 %v314_v40 }
 0x271   : > { %v1929_v44 = vmax.f32 %v1833_v28, 0.0  ;;  %v1930_v16 = vmax.f32 %v1834_v24, 0.0  ;;  %v1931_v2 = vmax.f32 %v1835_v49, 0.0  ;;  %v1319_v28 = vunpack.c.l.bf16 %v4368_v45  ;;  %v316_v24 = vld [vmem:[%s4337_s11 + $0xe4] sm:$0xff] }
 0x272   : > { %v317_v49 = vld [vmem:[%s4337_s11 + $0xec] ss:$24 sps:$4 sm:$0xff]  }
 0x273   : > { %v1492_v9 = vpop.permute.xlu1 %1491  ;;  %v2002_v13 = vpack.c.bf16 %v1930_v16, %v1927_v63  ;;  %v2001_v22 = vpack.c.bf16 %v1929_v44, %v1926_v53  ;;  %v4443_v52 = vpack.c.bf16 %v1931_v2, %v1928_v12  ;;  %v1365_v53 = vunpack.c.l.bf16 %v316_v24  ;;  %v320_v2 = vld [vmem:[%s4337_s11 + $0xfc] sm:$0xff] }
 0x274   : > { %v1615_v19 = vmul.f32 %v1492_v9, %v1359_v11  ;;  %v1616_v33 = vmul.f32 %v1492_v9, %v1360_v29  ;;  %v1617_v6 = vmul.f32 %v1492_v9, %v1361_v61  ;;  %v1366_v44 = vunpack.c.h.bf16 %v316_v24 }
 0x275   : > { %2138 = vmatprep.subr.bf16.mxu0 %v2002_v13  ;;  %v1367_v16 = vunpack.c.l.bf16 %v317_v49  ;;  %v1575_v45 = vmul.f32 %v4355_v15, %v1319_v28  ;;  %v1373_v15 = vunpack.c.h.bf16 %v317_v49 }
 0x276   : > { %v1840_v18 = vadd.f32 %v1730_v43, %v1616_v33  ;;  %2139 = vmatpush1.bf16.msra.mxu0 %v2001_v22  ;;  %v1841_v4 = vadd.f32 %v1730_v43, %v1617_v6  ;;  %v1839_v23 = vadd.f32 %v1730_v43, %v1615_v19  ;;  %v1371_v19 = vunpack.c.l.bf16 %v320_v2  ;;  %v1507_v6 = vpop.permute.xlu0 %1506  ;;  %v318_v43 = vld [vmem:[%s4337_s11 + $0xf0] sm:$0xff] }
 0x277   : > { %v1799_v12 = vadd.f32 %v4364_v36, %v1575_v45  ;;  %v1796_v33 = vadd.f32 %v4351_v8, %v1572_v1  ;;  %v1368_v40 = vunpack.c.l.bf16 %v318_v43 }
 0x278   : > { %v1726_v25 = vpop.permute.xlu1 %1725  ;;  %v1936_v56 = vmax.f32 %v1840_v18, 0.0  ;;  %v1937_v57 = vmax.f32 %v1841_v4, 0.0  ;;  %v1935_v38 = vmax.f32 %v1839_v23, 0.0 }
 0x279   : > { %v1836_v0 = vadd.f32 %v1726_v25, %v1612_v51  ;;  %v1837_v17 = vadd.f32 %v1726_v25, %v1613_v34  ;;  %v1838_v10 = vadd.f32 %v1726_v25, %v1614_v37  ;;  %v1372_v51 = vunpack.c.h.bf16 %v320_v2 }
 0x27a   : > { %v1895_v36 = vmax.f32 %v1799_v12, 0.0 }
 0x27b   : > { %v1932_v26 = vmax.f32 %v1836_v0, 0.0  ;;  %v1933_v58 = vmax.f32 %v1837_v17, 0.0  ;;  %v1934_v46 = vmax.f32 %v1838_v10, 0.0  ;;  %v1369_v10 = vunpack.c.h.bf16 %v318_v43 }
 0x27d   : > { %v1497_v41 = vpop.permute.xlu1 %1496  ;;  %v2005_v48 = vpack.c.bf16 %v1936_v56, %v1933_v58  ;;  %v2006_v54 = vpack.c.bf16 %v1937_v57, %v1934_v46  ;;  %v2004_v27 = vpack.c.bf16 %v1935_v38, %v1932_v26  ;;  %v1892_v56 = vmax.f32 %v1796_v33, 0.0 }
 0x27e   : > { %v1619_v11 = vmul.f32 %v1497_v41, %v1363_v14  ;;  %v1620_v29 = vmul.f32 %v1497_v41, %v1364_v3  ;;  %v1618_v61 = vmul.f32 %v1497_v41, %v1362_v5  ;;  %v1370_v57 = vunpack.c.h.bf16 %v4421_v39  ;;  %v1746_v5 = vpop.permute.xlu0 %1745 }
 0x27f   : > { %2140 = vmatprep.subr.bf16.mxu0 %v2005_v48  ;;  %3000 = vmatprep.subr.bf16.mxu1 %v2006_v54  ;;  %v1985_v41 = vpack.c.bf16 %v1895_v36, %v1892_v56  ;;  %v1625_v31 = vmul.f32 %v1507_v6, %v1369_v10  ;;  %v326_v10 = vld [vmem:[%s4337_s11 + $0x120] sm:$0xff] }
 0x280   : > { %2141 = vmatpush1.bf16.msra.mxu0 %v2004_v27  ;;  %3001 = vmatpush3.bf16.msra.mxu1 %v4347_v42  ;;  %v1843_v50 = vadd.f32 %v1734_v7, %v1619_v11  ;;  %v1844_v62 = vadd.f32 %v1734_v7, %v1620_v29  ;;  %v1842_v20 = vadd.f32 %v1734_v7, %v1618_v61  ;;  %v322_v7 = vld [vmem:[%s4337_s11 + $0x108] sm:$0xff]  ;;  %v323_v61 = vld [vmem:[%s4337_s11 + $0x110] ss:$12 sps:$4 sm:$0xff]  }
 0x281   : > { %v1502_v63 = vpop.permute.xlu1 %1501  ;;  %v1624_v27 = vmul.f32 %v1507_v6, %v1368_v40  ;;  %v1626_v39 = vmul.f32 %v1507_v6, %v1370_v57  ;;  %v1375_v2 = vunpack.c.h.bf16 %v322_v7  ;;  %v1376_v12 = vunpack.c.l.bf16 %v323_v61 }
 0x282   : > { %v1621_v9 = vmul.f32 %v1502_v63, %v1365_v53  ;;  %v1622_v13 = vmul.f32 %v1502_v63, %v1366_v44  ;;  %v1623_v42 = vmul.f32 %v1502_v63, %v1367_v16  ;;  %v1939_v34 = vmax.f32 %v1843_v50, 0.0  ;;  %v1750_v33 = vpop.permute.xlu0 %1749 }
 0x283   : > { %v1940_v37 = vmax.f32 %v1844_v62, 0.0  ;;  %v1938_v17 = vmax.f32 %v1842_v20, 0.0  ;;  %v1374_v62 = vunpack.c.l.bf16 %v322_v7 }
 0x286   : > { %v1738_v22 = vpop.permute.xlu1 %1737  ;;  %v1527_v40 = vpop.permute.xlu0 %1526 }
 0x287   : > { %v1845_v18 = vadd.f32 %v1738_v22, %v1621_v9  ;;  %v1846_v4 = vadd.f32 %v1738_v22, %v1622_v13  ;;  %v1847_v21 = vadd.f32 %v1738_v22, %v1623_v42  ;;  %v324_v42 = vld [vmem:[%s4337_s11 + $0x114] sm:$0xff] }
 0x289   : > { %v1941_v23 = vmax.f32 %v1845_v18, 0.0  ;;  %v1942_v25 = vmax.f32 %v1846_v4, 0.0  ;;  %v1943_v0 = vmax.f32 %v1847_v21, 0.0  ;;  %v1377_v18 = vunpack.c.l.bf16 %v324_v42 }
 0x28a   : > { %v1378_v4 = vunpack.c.h.bf16 %v324_v42  ;;  %v1379_v21 = vunpack.c.h.bf16 %v323_v61  ;;  %v1762_v7 = vpop.permute.xlu0 %1761 }
 0x28b   : > { %v1512_v8 = vpop.permute.xlu1 %1511  ;;  %v2008_v26 = vpack.c.bf16 %v1942_v25, %v1939_v34  ;;  %v2009_v58 = vpack.c.bf16 %v1943_v0, %v1940_v37  ;;  %v2007_v46 = vpack.c.bf16 %v1941_v23, %v1938_v17  ;;  %v328_v34 = vld [vmem:[%s4337_s11 + $0x12c] sm:$0xff]  ;;  %v329_v0 = vld [vmem:[%s4337_s11 + $0x134] ss:$12 sps:$4 sm:$0xff]  }
 0x28c   : > { %v1627_v38 = vmul.f32 %v1512_v8, %v1371_v19  ;;  %v1628_v14 = vmul.f32 %v1512_v8, %v1372_v51  ;;  %v1629_v3 = vmul.f32 %v1512_v8, %v1373_v15  ;;  %v1383_v8 = vunpack.c.l.bf16 %v328_v34 }
 0x28d   : > { %2142 = vmatprep.subr.bf16.mxu0 %v2008_v26  ;;  %3002 = vmatprep.subr.bf16.mxu1 %v2009_v58  ;;  %v1384_v26 = vunpack.c.h.bf16 %v328_v34  ;;  %v1385_v58 = vunpack.c.l.bf16 %v329_v0 }
 0x28e   : > { %v1852_v48 = vadd.f32 %v1746_v5, %v1628_v14  ;;  %v1853_v54 = vadd.f32 %v1746_v5, %v1629_v3  ;;  %2143 = vmatpush1.bf16.msra.mxu0 %v2007_v46  ;;  %3003 = vmatpush3.bf16.msra.mxu1 %v1985_v41  ;;  %v1851_v28 = vadd.f32 %v1746_v5, %v1627_v38 }
 0x290   : > { %v1742_v24 = vpop.permute.xlu1 %1741  ;;  %v1948_v63 = vmax.f32 %v1852_v48, 0.0  ;;  %v1949_v53 = vmax.f32 %v1853_v54, 0.0  ;;  %v1947_v45 = vmax.f32 %v1851_v28, 0.0  ;;  %v1380_v48 = vunpack.c.l.bf16 %v326_v10 }
 0x291   : > { %v1848_v49 = vadd.f32 %v1742_v24, %v1624_v27  ;;  %v1849_v11 = vadd.f32 %v1742_v24, %v1625_v31  ;;  %v1850_v29 = vadd.f32 %v1742_v24, %v1626_v39  ;;  %v1381_v54 = vunpack.c.h.bf16 %v326_v10 }
 0x292   : > { %v1382_v27 = vunpack.c.h.bf16 %v4428_v35 }
 0x293   : > { %v1944_v44 = vmax.f32 %v1848_v49, 0.0  ;;  %v1945_v16 = vmax.f32 %v1849_v11, 0.0  ;;  %v1946_v1 = vmax.f32 %v1850_v29, 0.0 }
 0x295   : > { %v1517_v50 = vpop.permute.xlu1 %1516  ;;  %v2011_v20 = vpack.c.bf16 %v1948_v63, %v1945_v16  ;;  %v2012_v9 = vpack.c.bf16 %v1949_v53, %v1946_v1  ;;  %v2010_v13 = vpack.c.bf16 %v1947_v45, %v1944_v44  ;;  %v1636_v53 = vmul.f32 %v1527_v40, %v1380_v48 }
 0x296   : > { %v1631_v22 = vmul.f32 %v1517_v50, %v1375_v2  ;;  %v1632_v19 = vmul.f32 %v1517_v50, %v1376_v12  ;;  %v1630_v6 = vmul.f32 %v1517_v50, %v1374_v62  ;;  %v1637_v44 = vmul.f32 %v1527_v40, %v1381_v54  ;;  %v330_v50 = vld [vmem:[%s4337_s11 + $0x138] sm:$0xff] }
 0x297   : > { %2144 = vmatprep.subr.bf16.mxu0 %v2011_v20  ;;  %3004 = vmatprep.subr.bf16.mxu1 %v2012_v9  ;;  %v1638_v16 = vmul.f32 %v1527_v40, %v1382_v27 }
 0x298   : > { %2145 = vmatpush1.bf16.msra.mxu0 %v2010_v13  ;;  %3005 = vmatpush3.bf16.msra.mxu1 %v4386_v60  ;;  %v1855_v51 = vadd.f32 %v1750_v33, %v1631_v22  ;;  %v1856_v15 = vadd.f32 %v1750_v33, %v1632_v19  ;;  %v1854_v37 = vadd.f32 %v1750_v33, %v1630_v6  ;;  %v1387_v19 = vunpack.c.h.bf16 %v330_v50 }
 0x299   : > { %v1522_v43 = vpop.permute.xlu1 %1521  ;;  %v1388_v33 = vunpack.c.h.bf16 %v329_v0  ;;  %v1386_v6 = vunpack.c.l.bf16 %v330_v50 }
 0x29a   : > { %v1633_v36 = vmul.f32 %v1522_v43, %v1377_v18  ;;  %v1634_v23 = vmul.f32 %v1522_v43, %v1378_v4  ;;  %v1635_v25 = vmul.f32 %v1522_v43, %v1379_v21  ;;  %v1951_v46 = vmax.f32 %v1855_v51, 0.0  ;;  %v332_v21 = vld [vmem:[%s4337_s11 + $0x144] sm:$0xff] }
 0x29b   : > { %v1952_v38 = vmax.f32 %v1856_v15, 0.0  ;;  %v1950_v5 = vmax.f32 %v1854_v37, 0.0  ;;  %v333_v51 = vld [vmem:[%s4337_s11 + $0x14c] ss:$24 sps:$4 sm:$0xff]   ;;  %v1766_v37 = vpop.permute.xlu0 %1765  ;;  %v1390_v0 = vunpack.c.h.bf16 %v332_v21 }
 0x29c   : > { %v1397_v48 = vunpack.c.h.bf16 %v333_v51 }
 0x29e   : > { %v1754_v17 = vpop.permute.xlu1 %1753 }
 0x29f   : > { %v1857_v56 = vadd.f32 %v1754_v17, %v1633_v36  ;;  %v1858_v60 = vadd.f32 %v1754_v17, %v1634_v23  ;;  %v1859_v57 = vadd.f32 %v1754_v17, %v1635_v25  ;;  %v1389_v25 = vunpack.c.l.bf16 %v332_v21 }
 0x2a0   : > { %v1391_v17 = vunpack.c.l.bf16 %v333_v51 }
 0x2a1   : > { %v1953_v14 = vmax.f32 %v1857_v56, 0.0  ;;  %v1954_v3 = vmax.f32 %v1858_v60, 0.0  ;;  %v1955_v41 = vmax.f32 %v1859_v57, 0.0  ;;  %v336_v56 = vld [vmem:[%s4337_s11 + $0x15c] sm:$0xff] }
 0x2a3   : > { %v1532_v31 = vpop.permute.xlu1 %1531  ;;  %v2014_v39 = vpack.c.bf16 %v1954_v3, %v1951_v46  ;;  %v2015_v28 = vpack.c.bf16 %v1955_v41, %v1952_v38  ;;  %v2013_v24 = vpack.c.bf16 %v1953_v14, %v1950_v5  ;;  %v1547_v46 = vpop.permute.xlu0 %1546  ;;  %v334_v38 = vld [vmem:[%s4337_s11 + $0x150] sm:$0xff]  ;;  %v1395_v41 = vunpack.c.l.bf16 %v336_v56 }
 0x2a4   : > { %v1639_v49 = vmul.f32 %v1532_v31, %v1383_v8  ;;  %v1640_v11 = vmul.f32 %v1532_v31, %v1384_v26  ;;  %v1641_v29 = vmul.f32 %v1532_v31, %v1385_v58  ;;  %v1396_v5 = vunpack.c.h.bf16 %v336_v56 }
 0x2a5   : > { %2146 = vmatprep.subr.bf16.mxu0 %v2014_v39  ;;  %3006 = vmatprep.subr.bf16.mxu1 %v2015_v28 }
 0x2a6   : > { %v1864_v61 = vadd.f32 %v1762_v7, %v1640_v11  ;;  %v1865_v63 = vadd.f32 %v1762_v7, %v1641_v29  ;;  %2147 = vmatpush1.bf16.msra.mxu0 %v2013_v24  ;;  %3007 = vmatpush3.bf16.msra.mxu1 %v4405_v30  ;;  %v1863_v35 = vadd.f32 %v1762_v7, %v1639_v49  ;;  %v1392_v49 = vunpack.c.l.bf16 %v334_v38 }
 0x2a7   : > { %v1393_v11 = vunpack.c.h.bf16 %v334_v38  ;;  %v1394_v29 = vunpack.c.h.bf16 %v4436_v59 }
 0x2a8   : > { %v1758_v1 = vpop.permute.xlu1 %1757  ;;  %v1960_v62 = vmax.f32 %v1864_v61, 0.0  ;;  %v1961_v20 = vmax.f32 %v1865_v63, 0.0  ;;  %v1959_v22 = vmax.f32 %v1863_v35, 0.0 }
 0x2a9   : > { %v1860_v45 = vadd.f32 %v1758_v1, %v1636_v53  ;;  %v1861_v2 = vadd.f32 %v1758_v1, %v1637_v44  ;;  %v1862_v12 = vadd.f32 %v1758_v1, %v1638_v16  ;;  %v1778_v1 = vpop.permute.xlu0 %1777  ;;  %v1649_v50 = vmul.f32 %v1547_v46, %v1393_v11  ;;  %v3143_v11 = vld [vmem:[%s4677_s3] ss:$8 sps:$4 sm:$0xff]  }
 0x2aa   : > { %v1650_v59 = vmul.f32 %v1547_v46, %v1394_v29  ;;  %v3146_v29 = vld [vmem:[%s4677_s3 + $0x14] ss:$8 sps:$4 sm:$0xff]  }
 0x2ab   : > { %v1956_v9 = vmax.f32 %v1860_v45, 0.0  ;;  %v1957_v13 = vmax.f32 %v1861_v2, 0.0  ;;  %v1958_v42 = vmax.f32 %v1862_v12, 0.0  ;;  %v1648_v12 = vmul.f32 %v1547_v46, %v1392_v49 }
 0x2ad   : > { %v1537_v30 = vpop.permute.xlu1 %1536  ;;  %v2017_v43 = vpack.c.bf16 %v1960_v62, %v1957_v13  ;;  %v2018_v18 = vpack.c.bf16 %v1961_v20, %v1958_v42  ;;  %v2016_v4 = vpack.c.bf16 %v1959_v22, %v1956_v9  ;;  %v338_v22 = vld [vmem:[%s4337_s11 + $0x168] sm:$0xff] }
 0x2ae   : > { %v1643_v15 = vmul.f32 %v1537_v30, %v1387_v19  ;;  %v1644_v34 = vmul.f32 %v1537_v30, %v1388_v33  ;;  %v1642_v36 = vmul.f32 %v1537_v30, %v1386_v6  ;;  %v339_v19 = vld [vmem:[%s4337_s11 + $0x170] ss:$12 sps:$4 sm:$0xff]   ;;  %v1399_v21 = vunpack.c.h.bf16 %v338_v22 }
 0x2af   : > { %2148 = vmatprep.subr.bf16.mxu0 %v2017_v43  ;;  %3008 = vmatprep.subr.bf16.mxu1 %v2018_v18  ;;  %v1400_v51 = vunpack.c.l.bf16 %v339_v19 }
 0x2b0   : > { %2149 = vmatpush1.bf16.msra.mxu0 %v2016_v4  ;;  %3009 = vmatpush3.bf16.msra.mxu1 %v4411_v47  ;;  %v1867_v40 = vadd.f32 %v1766_v37, %v1643_v15  ;;  %v1868_v10 = vadd.f32 %v1766_v37, %v1644_v34  ;;  %v1866_v60 = vadd.f32 %v1766_v37, %v1642_v36  ;;  %v1398_v15 = vunpack.c.l.bf16 %v338_v22 }
 0x2b1   : > { %v1542_v23 = vpop.permute.xlu1 %1541 }
 0x2b2   : > { %v1645_v57 = vmul.f32 %v1542_v23, %v1389_v25  ;;  %v1646_v8 = vmul.f32 %v1542_v23, %v1390_v0  ;;  %v1647_v26 = vmul.f32 %v1542_v23, %v1391_v17  ;;  %v1963_v54 = vmax.f32 %v1867_v40, 0.0  ;;  %v340_v23 = vld [vmem:[%s4337_s11 + $0x174] sm:$0xff] }
 0x2b3   : > { %v1964_v27 = vmax.f32 %v1868_v10, 0.0  ;;  %v1962_v24 = vmax.f32 %v1866_v60, 0.0  ;;  %v1401_v10 = vunpack.c.l.bf16 %v340_v23  ;;  %v1402_v56 = vunpack.c.h.bf16 %v340_v23 }
 0x2b4   : > { %v1403_v60 = vunpack.c.h.bf16 %v339_v19 }
 0x2b6   : > { %v1770_v58 = vpop.permute.xlu1 %1769 }
 0x2b7   : > { %v1869_v14 = vadd.f32 %v1770_v58, %v1645_v57  ;;  %v1870_v3 = vadd.f32 %v1770_v58, %v1646_v8  ;;  %v1871_v47 = vadd.f32 %v1770_v58, %v1647_v26  ;;  %v1782_v57 = vpop.permute.xlu0 %1781 }
 0x2b9   : > { %v1965_v31 = vmax.f32 %v1869_v14, 0.0  ;;  %v1966_v39 = vmax.f32 %v1870_v3, 0.0  ;;  %v1967_v28 = vmax.f32 %v1871_v47, 0.0 }
 0x2bb   : > { %v1552_v7 = vpop.permute.xlu1 %1551  ;;  %v2020_v61 = vpack.c.bf16 %v1966_v39, %v1963_v54  ;;  %v2021_v63 = vpack.c.bf16 %v1967_v28, %v1964_v27  ;;  %v2019_v53 = vpack.c.bf16 %v1965_v31, %v1962_v24 }
 0x2bc   : > { %v1651_v44 = vmul.f32 %v1552_v7, %v1395_v41  ;;  %v1652_v16 = vmul.f32 %v1552_v7, %v1396_v5  ;;  %v1653_v35 = vmul.f32 %v1552_v7, %v1397_v48  ;;  %v3148_v7 = vld [vmem:[%s4677_s3 + $0x10] ss:$8 sps:$4 sm:$0xff]  }
 0x2bd   : > { %2150 = vmatprep.subr.bf16.mxu0 %v2020_v61  ;;  %3010 = vmatprep.subr.bf16.mxu1 %v2021_v63  ;;  %v3149_v61 = vld [vmem:[%s4677_s3 + $0x24] ss:$8 sps:$4 sm:$0xff]   ;;  %v3152_v63 = vld [vmem:[%s4677_s3 + $0x34] ss:$8 sps:$4 sm:$0xff]  }
 0x2be   : > { %v1876_v45 = vadd.f32 %v1778_v1, %v1652_v16  ;;  %v1877_v2 = vadd.f32 %v1778_v1, %v1653_v35  ;;  %2151 = vmatpush1.bf16.msra.mxu0 %v2019_v53  ;;  %3011 = vmatpush3.bf16.msra.mxu1 %v4425_v32  ;;  %v1875_v62 = vadd.f32 %v1778_v1, %v1651_v44  ;;  %v3154_v53 = vld [vmem:[%s4677_s3 + $0x30] ss:$8 sps:$4 sm:$0xff]   ;;  %v3155_v44 = vld [vmem:[%s4677_s3 + $0x44] ss:$8 sps:$4 sm:$0xff]   ;;  %v3157_v16 = vld [vmem:[%s4677_s3 + $0x40] ss:$8 sps:$4 sm:$0xff]  }
 0x2bf   : > { %v3158_v35 = vld [vmem:[%s4677_s3 + $0x54] ss:$8 sps:$4 sm:$0xff]   ;;  %v3160_v1 = vld [vmem:[%s4677_s3 + $0x50] ss:$8 sps:$4 sm:$0xff]  }
 0x2c0   : > { %v1774_v20 = vpop.permute.xlu1 %1773  ;;  %v1972_v33 = vmax.f32 %v1876_v45, 0.0  ;;  %v1973_v30 = vmax.f32 %v1877_v2, 0.0  ;;  %v1971_v4 = vmax.f32 %v1875_v62, 0.0  ;;  %v3161_v45 = vld [vmem:[%s4677_s3 + $0x64] ss:$8 sps:$4 sm:$0xff]  }
 0x2c1   : > { %v1872_v9 = vadd.f32 %v1774_v20, %v1648_v12  ;;  %v1873_v13 = vadd.f32 %v1774_v20, %v1649_v50  ;;  %v1874_v42 = vadd.f32 %v1774_v20, %v1650_v59  ;;  %v3163_v2 = vld [vmem:[%s4677_s3 + $0x60] ss:$8 sps:$4 sm:$0xff]   ;;  %v3164_v12 = vld [vmem:[%s4677_s3 + $0x74] ss:$8 sps:$4 sm:$0xff]   ;;  %v3166_v50 = vld [vmem:[%s4677_s3 + $0x70] ss:$8 sps:$4 sm:$0xff]  }
 0x2c3   : > { %v1968_v6 = vmax.f32 %v1872_v9, 0.0  ;;  %v1969_v43 = vmax.f32 %v1873_v13, 0.0  ;;  %v1970_v18 = vmax.f32 %v1874_v42, 0.0 }
 0x2c5   : > { %v1557_v32 = vpop.permute.xlu1 %1556  ;;  %v2023_v34 = vpack.c.bf16 %v1972_v33, %v1969_v43  ;;  %v2024_v37 = vpack.c.bf16 %v1973_v30, %v1970_v18  ;;  %v2022_v36 = vpack.c.bf16 %v1971_v4, %v1968_v6 }
 0x2c6   : > { %v1655_v25 = vmul.f32 %v1557_v32, %v1399_v21  ;;  %v1656_v0 = vmul.f32 %v1557_v32, %v1400_v51  ;;  %v1654_v17 = vmul.f32 %v1557_v32, %v1398_v15 }
 0x2c7   : > { %2152 = vmatprep.subr.bf16.mxu0 %v2023_v34  ;;  %3012 = vmatprep.subr.bf16.mxu1 %v2024_v37 }
 0x2c8   : > { %2153 = vmatpush1.bf16.msra.mxu0 %v2022_v36  ;;  %3013 = vmatpush3.bf16.msra.mxu1 %v4432_v55  ;;  %v1879_v8 = vadd.f32 %v1782_v57, %v1655_v25  ;;  %v1880_v26 = vadd.f32 %v1782_v57, %v1656_v0  ;;  %v1878_v58 = vadd.f32 %v1782_v57, %v1654_v17 }
 0x2c9   : > { %v1562_v40 = vpop.permute.xlu1 %1561 }
 0x2ca   : > { %v1657_v46 = vmul.f32 %v1562_v40, %v1401_v10  ;;  %v1658_v38 = vmul.f32 %v1562_v40, %v1402_v56  ;;  %v1659_v14 = vmul.f32 %v1562_v40, %v1403_v60  ;;  %v1975_v48 = vmax.f32 %v1879_v8, 0.0 }
 0x2cb   : > { %v1976_v54 = vmax.f32 %v1880_v26, 0.0  ;;  %v1974_v39 = vmax.f32 %v1878_v58, 0.0 }
 0x2ce   : > { %v1786_v3 = vpop.permute.xlu1 %1785 }
 0x2cf   : > { %v1881_v47 = vadd.f32 %v1786_v3, %v1657_v46  ;;  %v1882_v41 = vadd.f32 %v1786_v3, %v1658_v38  ;;  %v1883_v5 = vadd.f32 %v1786_v3, %v1659_v14 }
 0x2d1   : > { %v1977_v27 = vmax.f32 %v1881_v47, 0.0  ;;  %v1978_v55 = vmax.f32 %v1882_v41, 0.0  ;;  %v1979_v31 = vmax.f32 %v1883_v5, 0.0 }
 0x2d3   : > { %v2026_v28 = vpack.c.bf16 %v1978_v55, %v1975_v48  ;;  %v2027_v24 = vpack.c.bf16 %v1979_v31, %v1976_v54  ;;  %v2025_v49 = vpack.c.bf16 %v1977_v27, %v1974_v39 }
 0x2d5   : > { %2154 = vmatprep.subr.bf16.mxu0 %v2026_v28  ;;  %3014 = vmatprep.subr.bf16.mxu1 %v2027_v24 }
 0x2d6   : > { %2155 = vmatpush1.bf16.msra.mxu0 %v2025_v49  ;;  %3015 = vmatpush3.bf16.msra.mxu1 %v4443_v52  ;;  %v3151_v52 = vld [vmem:[%s4677_s3 + $0x20] ss:$8 sps:$4 sm:$0xff]  }
 0x2d9   : > { %2157 = vmatmul.mubr.bf16.vlgmr.msra.gmra.mrb[0].mxu0 %v3143_v11  ;;  %2270 = vmatmul.mubr.bf16.vlgmr.msra.gmra.mrb[0].mxu1 %v3143_v11 }
 0x2da   : > { %2166 = vmatprep.mubr.bf16.mxu0 %v3146_v29  ;;  %2277 = vmatprep.mubr.bf16.mxu1 %v3146_v29 }
 0x2e1   : > { %2167 = vmatmul.mubr.bf16.gmra.mrb[4].mxu0 %v3148_v7  ;;  %2278 = vmatmul.mubr.bf16.gmra.mrb[4].mxu1 %v3148_v7 }
 0x2e2   : > { %2176 = vmatprep.mubr.bf16.mxu0 %v3149_v61  ;;  %2285 = vmatprep.mubr.bf16.mxu1 %v3149_v61 }
 0x2e9   : > { %2177 = vmatmul.mubr.bf16.gmra.mrb[8].mxu0 %v3151_v52  ;;  %2286 = vmatmul.mubr.bf16.gmra.mrb[8].mxu1 %v3151_v52 }
 0x2ea   : > { %2186 = vmatprep.mubr.bf16.mxu0 %v3152_v63  ;;  %2293 = vmatprep.mubr.bf16.mxu1 %v3152_v63 }
 0x2f1   : > { %2187 = vmatmul.mubr.bf16.gmra.mrb[12].mxu0 %v3154_v53  ;;  %2294 = vmatmul.mubr.bf16.gmra.mrb[12].mxu1 %v3154_v53 }
 0x2f2   : > { %2196 = vmatprep.mubr.bf16.mxu0 %v3155_v44  ;;  %2301 = vmatprep.mubr.bf16.mxu1 %v3155_v44 }
 0x2f9   : > { %2197 = vmatmul.mubr.bf16.gmra.mrb[16].mxu0 %v3157_v16  ;;  %2302 = vmatmul.mubr.bf16.gmra.mrb[16].mxu1 %v3157_v16 }
 0x2fa   : > { %2206 = vmatprep.mubr.bf16.mxu0 %v3158_v35  ;;  %2309 = vmatprep.mubr.bf16.mxu1 %v3158_v35 }
 0x301   : > { %2207 = vmatmul.mubr.bf16.gmra.mrb[20].mxu0 %v3160_v1  ;;  %2310 = vmatmul.mubr.bf16.gmra.mrb[20].mxu1 %v3160_v1 }
 0x302   : > { %2216 = vmatprep.mubr.bf16.mxu0 %v3161_v45  ;;  %2317 = vmatprep.mubr.bf16.mxu1 %v3161_v45 }
 0x309   : > { %2217 = vmatmul.mubr.bf16.gmra.mrb[24].mxu0 %v3163_v2  ;;  %2318 = vmatmul.mubr.bf16.gmra.mrb[24].mxu1 %v3163_v2 }
 0x30a   : > { %2226 = vmatprep.mubr.bf16.mxu0 %v3164_v12  ;;  %2325 = vmatprep.mubr.bf16.mxu1 %v3164_v12 }
 0x311   : > { %2227 = vmatmul.mubr.bf16.gmra.mrb[28].mxu0 %v3166_v50  ;;  %2326 = vmatmul.mubr.bf16.gmra.mrb[28].mxu1 %v3166_v50 }
 0x3ac   : > { %v2158_v59 = vpop.f32.mrb[0].mxu0  ;;  %v3016_v62 = vpop.f32.mrb[0].mxu1 }
 0x3ad   : > { %v2590_v20 = vmul.f32 %v2158_v59, %v2158_v59  ;;  %v2160_v9 = vpop.f32.mrb[1].mxu0  ;;  %v3017_v13 = vpop.f32.mrb[1].mxu1 }
 0x3ae   : > { %v2968_v42 = vpack.c.bf16 %v2160_v9, %v2158_v59  ;;  %v2526_v22 = vadd.f32 %v2160_v9, %v2158_v59  ;;  %v2591_v19 = vmul.f32 %v2160_v9, %v2160_v9  ;;  %v3018_v33 = vadd.f32 %v3017_v13, %v3016_v62  ;;  %v2162_v30 = vpop.f32.mrb[2].mxu0  ;;  %v3019_v6 = vpop.f32.mrb[2].mxu1 }
 0x3af   : > { %v2593_v43 = vmul.f32 %v2162_v30, %v2162_v30  ;;  %v2164_v18 = vpop.f32.mrb[3].mxu0  ;;  %v3020_v4 = vpop.f32.mrb[3].mxu1 }
 0x3b0   : > { %2494 = vst [vmem:[%s4529_s6] sm:$0xff] %v2968_v42  ;;  %v2638_v21 = vadd.f32 %v2591_v19, %v2590_v20  ;;  %v2969_v51 = vpack.c.bf16 %v3018_v33, %v3018_v33  ;;  %v2592_v32 = vmul.f32 %v3018_v33, %v3018_v33  ;;  %v2970_v15 = vpack.c.bf16 %v2164_v18, %v2162_v30 }
 0x3b1   : > { %v2530_v34 = vadd.f32 %v2164_v18, %v2162_v30  ;;  %v2594_v37 = vmul.f32 %v2164_v18, %v2164_v18  ;;  %v3021_v36 = vadd.f32 %v3020_v4, %v3019_v6  ;;  %v2527_v23 = vadd.f32 %v3018_v33, %v2526_v22 }
 0x3b2   : > { %2495 = vst [vmem:[%s4529_s6 + $0x8] sm:$0xf] %v2969_v51  ;;  %2496 = vst [vmem:[%s4529_s6 + $0xc] sm:$0xff] %v2970_v15  ;;  %v2639_v25 = vadd.f32 %v2638_v21, %v2592_v32  ;;  %v3259_v6 = vmov 0.0  }
 0x3b3   : > { %v2642_v0 = vadd.f32 %v2594_v37, %v2593_v43  ;;  %v2971_v17 = vpack.c.bf16 %v3021_v36, %v3021_v36  ;;  %v2595_v40 = vmul.f32 %v3021_v36, %v3021_v36  ;;  %2528 = vadd.xlane.f32.xlu0 %v2527_v23  ;;  %v2531_v10 = vadd.f32 %v3021_v36, %v2530_v34 }
 0x3b4   : > { %v3022_v56 = vpop.f32.mrb[4].mxu1  ;;  %v2168_v60 = vpop.f32.mrb[4].mxu0  ;;  %2724 = vst.msk [vmem:[%s4543_s9 + $0x8] sm:$0xff] %vm442_vm0, %v3259_v6  ;;  %2723 = vst.msk [vmem:[%s4543_s9] sm:$0xff] %vm442_vm0, %v3259_v6 }
 0x3b5   : > { %2497 = vst [vmem:[%s4529_s6 + $0x14] sm:$0xf] %v2971_v17  ;;  %2532 = vadd.xlane.f32.xlu1 %v2531_v10  ;;  %v2596_v57 = vmul.f32 %v2168_v60, %v2168_v60  ;;  %v2170_v8 = vpop.f32.mrb[5].mxu0  ;;  %v3023_v26 = vpop.f32.mrb[5].mxu1  ;;  %v2643_v58 = vadd.f32 %v2642_v0, %v2595_v40  ;;  %2725 = vst.msk [vmem:[%s4543_s9 + $0x10] sm:$0xff] %vm442_vm0, %v3259_v6 }
 0x3b6   : > { %v2972_v46 = vpack.c.bf16 %v2170_v8, %v2168_v60  ;;  %v2534_v38 = vadd.f32 %v2170_v8, %v2168_v60  ;;  %v2597_v14 = vmul.f32 %v2170_v8, %v2170_v8  ;;  %v3024_v3 = vadd.f32 %v3023_v26, %v3022_v56  ;;  %v3025_v47 = vpop.f32.mrb[6].mxu1  ;;  %v2172_v41 = vpop.f32.mrb[6].mxu0  ;;  %2726 = vst.msk [vmem:[%s4543_s9 + $0x18] sm:$0xff] %vm442_vm0, %v3259_v6 }
 0x3b7   : > { %2644 = vadd.xlane.f32.xlu0 %v2643_v58  ;;  %v2599_v5 = vmul.f32 %v2172_v41, %v2172_v41  ;;  %v2174_v48 = vpop.f32.mrb[7].mxu0  ;;  %v3026_v54 = vpop.f32.mrb[7].mxu1  ;;  %2727 = vst.msk [vmem:[%s4543_s9 + $0x20] sm:$0xff] %vm442_vm0, %v3259_v6  ;;  %2728 = vst.msk [vmem:[%s4543_s9 + $0x28] sm:$0xff] %vm442_vm0, %v3259_v6 }
 0x3b8   : > { %2498 = vst [vmem:[%s4529_s6 + $0x18] sm:$0xff] %v2972_v46  ;;  %v2646_v27 = vadd.f32 %v2597_v14, %v2596_v57  ;;  %v2973_v55 = vpack.c.bf16 %v3024_v3, %v3024_v3  ;;  %v2598_v31 = vmul.f32 %v3024_v3, %v3024_v3  ;;  %v2974_v39 = vpack.c.bf16 %v2174_v48, %v2172_v41 }
 0x3b9   : > { %v2538_v28 = vadd.f32 %v2174_v48, %v2172_v41  ;;  %v2600_v24 = vmul.f32 %v2174_v48, %v2174_v48  ;;  %v3027_v49 = vadd.f32 %v3026_v54, %v3025_v47  ;;  %2640 = vadd.xlane.f32.xlu1 %v2639_v25  ;;  %v2535_v11 = vadd.f32 %v3024_v3, %v2534_v38 }
 0x3ba   : > { %2499 = vst [vmem:[%s4529_s6 + $0x20] sm:$0xf] %v2973_v55  ;;  %2500 = vst [vmem:[%s4529_s6 + $0x24] sm:$0xff] %v2974_v39  ;;  %v2647_v29 = vadd.f32 %v2646_v27, %v2598_v31 }
 0x3bb   : > { %v2650_v7 = vadd.f32 %v2600_v24, %v2599_v5  ;;  %v2975_v61 = vpack.c.bf16 %v3027_v49, %v3027_v49  ;;  %v2601_v52 = vmul.f32 %v3027_v49, %v3027_v49  ;;  %2536 = vadd.xlane.f32.xlu0 %v2535_v11  ;;  %v2539_v63 = vadd.f32 %v3027_v49, %v2538_v28 }
 0x3bc   : > { %v3028_v53 = vpop.f32.mrb[8].mxu1  ;;  %v2178_v44 = vpop.f32.mrb[8].mxu0  ;;  %2729 = vst.msk [vmem:[%s4543_s9 + $0x30] sm:$0xff] %vm442_vm0, %v3259_v6  ;;  %2730 = vst.msk [vmem:[%s4543_s9 + $0x38] sm:$0xff] %vm442_vm0, %v3259_v6 }
 0x3bd   : > { %2501 = vst [vmem:[%s4529_s6 + $0x2c] sm:$0xf] %v2975_v61  ;;  %2648 = vadd.xlane.f32.xlu1 %v2647_v29  ;;  %v2602_v16 = vmul.f32 %v2178_v44, %v2178_v44  ;;  %v2180_v35 = vpop.f32.mrb[9].mxu0  ;;  %v3029_v1 = vpop.f32.mrb[9].mxu1  ;;  %v2651_v45 = vadd.f32 %v2650_v7, %v2601_v52  ;;  %2731 = vst.msk [vmem:[%s4543_s9 + $0x40] sm:$0xff] %vm442_vm0, %v3259_v6 }
 0x3be   : > { %v2976_v2 = vpack.c.bf16 %v2180_v35, %v2178_v44  ;;  %v2542_v12 = vadd.f32 %v2180_v35, %v2178_v44  ;;  %v2603_v50 = vmul.f32 %v2180_v35, %v2180_v35  ;;  %v3030_v59 = vadd.f32 %v3029_v1, %v3028_v53  ;;  %v3031_v62 = vpop.f32.mrb[10].mxu1  ;;  %v2182_v20 = vpop.f32.mrb[10].mxu0  ;;  %2732 = vst.msk [vmem:[%s4543_s9 + $0x48] sm:$0xff] %vm442_vm0, %v3259_v6 }
 0x3bf   : > { %2540 = vadd.xlane.f32.xlu0 %v2539_v63  ;;  %v2605_v9 = vmul.f32 %v2182_v20, %v2182_v20  ;;  %v2184_v13 = vpop.f32.mrb[11].mxu0  ;;  %v3032_v42 = vpop.f32.mrb[11].mxu1  ;;  %2733 = vst.msk [vmem:[%s4543_s9 + $0x50] sm:$0xff] %vm442_vm0, %v3259_v6  ;;  %2734 = vst.msk [vmem:[%s4543_s9 + $0x58] sm:$0xff] %vm442_vm0, %v3259_v6 }
 0x3c0   : > { %2502 = vst [vmem:[%s4529_s6 + $0x30] sm:$0xff] %v2976_v2  ;;  %v2654_v22 = vadd.f32 %v2603_v50, %v2602_v16  ;;  %v2977_v19 = vpack.c.bf16 %v3030_v59, %v3030_v59  ;;  %v2604_v33 = vmul.f32 %v3030_v59, %v3030_v59  ;;  %v2978_v30 = vpack.c.bf16 %v2184_v13, %v2182_v20 }
 0x3c1   : > { %2735 = vst.msk [vmem:[%s4543_s9 + $0x60] sm:$0xff] %vm442_vm0, %v3259_v6  ;;  %2736 = vst.msk [vmem:[%s4543_s9 + $0x68] sm:$0xff] %vm442_vm0, %v3259_v6  ;;  %v2546_v43 = vadd.f32 %v2184_v13, %v2182_v20  ;;  %v2606_v18 = vmul.f32 %v2184_v13, %v2184_v13  ;;  %v3033_v4 = vadd.f32 %v3032_v42, %v3031_v62 }
 0x3c2   : > { %2737 = vst.msk [vmem:[%s4543_s9 + $0x70] sm:$0xff] %vm442_vm0, %v3259_v6  ;;  %2738 = vst.msk [vmem:[%s4543_s9 + $0x78] sm:$0xff] %vm442_vm0, %v3259_v6  ;;  %v2543_v21 = vadd.f32 %v3030_v59, %v2542_v12  ;;  %v2655_v51 = vadd.f32 %v2654_v22, %v2604_v33 }
 0x3c3   : > { %2503 = vst [vmem:[%s4529_s6 + $0x38] sm:$0xf] %v2977_v19  ;;  %2504 = vst [vmem:[%s4529_s6 + $0x3c] sm:$0xff] %v2978_v30  ;;  %v2658_v32 = vadd.f32 %v2606_v18, %v2605_v9  ;;  %v2979_v15 = vpack.c.bf16 %v3033_v4, %v3033_v4  ;;  %v2607_v34 = vmul.f32 %v3033_v4, %v3033_v4  ;;  %2652 = vadd.xlane.f32.xlu0 %v2651_v45 }
 0x3c4   : > { %2544 = vadd.xlane.f32.xlu1 %v2543_v21  ;;  %v2188_v37 = vpop.f32.mrb[12].mxu0  ;;  %v3034_v36 = vpop.f32.mrb[12].mxu1  ;;  %v2547_v23 = vadd.f32 %v3033_v4, %v2546_v43 }
 0x3c5   : > { %2505 = vst [vmem:[%s4529_s6 + $0x44] sm:$0xf] %v2979_v15  ;;  %v2608_v25 = vmul.f32 %v2188_v37, %v2188_v37  ;;  %v2190_v0 = vpop.f32.mrb[13].mxu0  ;;  %v3035_v17 = vpop.f32.mrb[13].mxu1  ;;  %v2659_v40 = vadd.f32 %v2658_v32, %v2607_v34 }
 0x3c6   : > { %v2980_v10 = vpack.c.bf16 %v2190_v0, %v2188_v37  ;;  %v2550_v56 = vadd.f32 %v2190_v0, %v2188_v37  ;;  %v2609_v60 = vmul.f32 %v2190_v0, %v2190_v0  ;;  %v3036_v57 = vadd.f32 %v3035_v17, %v3034_v36  ;;  %v3037_v8 = vpop.f32.mrb[14].mxu1  ;;  %v2192_v26 = vpop.f32.mrb[14].mxu0 }
 0x3c7   : > { %2548 = vadd.xlane.f32.xlu0 %v2547_v23  ;;  %v2611_v58 = vmul.f32 %v2192_v26, %v2192_v26  ;;  %v2194_v46 = vpop.f32.mrb[15].mxu0  ;;  %v3038_v38 = vpop.f32.mrb[15].mxu1 }
 0x3c8   : > { %2656 = vadd.xlane.f32.xlu1 %v2655_v51  ;;  %2506 = vst [vmem:[%s4529_s6 + $0x48] sm:$0xff] %v2980_v10  ;;  %v2662_v14 = vadd.f32 %v2609_v60, %v2608_v25  ;;  %v2981_v3 = vpack.c.bf16 %v3036_v57, %v3036_v57  ;;  %v2610_v47 = vmul.f32 %v3036_v57, %v3036_v57 }
 0x3c9   : > { %v2982_v41 = vpack.c.bf16 %v2194_v46, %v2192_v26  ;;  %v2554_v5 = vadd.f32 %v2194_v46, %v2192_v26  ;;  %v2612_v48 = vmul.f32 %v2194_v46, %v2194_v46  ;;  %v3039_v54 = vadd.f32 %v3038_v38, %v3037_v8 }
 0x3ca   : > { %v2551_v27 = vadd.f32 %v3036_v57, %v2550_v56  ;;  %2507 = vst [vmem:[%s4529_s6 + $0x50] sm:$0xf] %v2981_v3  ;;  %v2663_v55 = vadd.f32 %v2662_v14, %v2610_v47 }
 0x3cb   : > { %2508 = vst [vmem:[%s4529_s6 + $0x54] sm:$0xff] %v2982_v41  ;;  %v2666_v31 = vadd.f32 %v2612_v48, %v2611_v58  ;;  %v2983_v39 = vpack.c.bf16 %v3039_v54, %v3039_v54  ;;  %v2613_v28 = vmul.f32 %v3039_v54, %v3039_v54  ;;  %2660 = vadd.xlane.f32.xlu0 %v2659_v40 }
 0x3cc   : > { %2552 = vadd.xlane.f32.xlu1 %v2551_v27  ;;  %v2198_v24 = vpop.f32.mrb[16].mxu0  ;;  %v3040_v49 = vpop.f32.mrb[16].mxu1  ;;  %v2555_v11 = vadd.f32 %v3039_v54, %v2554_v5 }
 0x3cd   : > { %2509 = vst [vmem:[%s4529_s6 + $0x5c] sm:$0xf] %v2983_v39  ;;  %v2614_v29 = vmul.f32 %v2198_v24, %v2198_v24  ;;  %v2200_v7 = vpop.f32.mrb[17].mxu0  ;;  %v3041_v61 = vpop.f32.mrb[17].mxu1  ;;  %v2667_v52 = vadd.f32 %v2666_v31, %v2613_v28 }
 0x3ce   : > { %v2984_v63 = vpack.c.bf16 %v2200_v7, %v2198_v24  ;;  %v2558_v53 = vadd.f32 %v2200_v7, %v2198_v24  ;;  %v2615_v44 = vmul.f32 %v2200_v7, %v2200_v7  ;;  %v3042_v16 = vadd.f32 %v3041_v61, %v3040_v49  ;;  %v3043_v35 = vpop.f32.mrb[18].mxu1  ;;  %v2202_v1 = vpop.f32.mrb[18].mxu0 }
 0x3cf   : > { %2556 = vadd.xlane.f32.xlu0 %v2555_v11  ;;  %v2617_v45 = vmul.f32 %v2202_v1, %v2202_v1  ;;  %v2204_v2 = vpop.f32.mrb[19].mxu0  ;;  %v3044_v12 = vpop.f32.mrb[19].mxu1 }
 0x3d0   : > { %2664 = vadd.xlane.f32.xlu1 %v2663_v55  ;;  %2510 = vst [vmem:[%s4529_s6 + $0x60] sm:$0xff] %v2984_v63  ;;  %v2670_v50 = vadd.f32 %v2615_v44, %v2614_v29  ;;  %v2985_v59 = vpack.c.bf16 %v3042_v16, %v3042_v16  ;;  %v2616_v62 = vmul.f32 %v3042_v16, %v3042_v16 }
 0x3d1   : > { %v2986_v20 = vpack.c.bf16 %v2204_v2, %v2202_v1  ;;  %v2562_v9 = vadd.f32 %v2204_v2, %v2202_v1  ;;  %v2618_v13 = vmul.f32 %v2204_v2, %v2204_v2  ;;  %v3045_v42 = vadd.f32 %v3044_v12, %v3043_v35 }
 0x3d2   : > { %v2559_v22 = vadd.f32 %v3042_v16, %v2558_v53  ;;  %2511 = vst [vmem:[%s4529_s6 + $0x68] sm:$0xf] %v2985_v59  ;;  %v2671_v19 = vadd.f32 %v2670_v50, %v2616_v62 }
 0x3d3   : > { %2512 = vst [vmem:[%s4529_s6 + $0x6c] sm:$0xff] %v2986_v20  ;;  %v2674_v33 = vadd.f32 %v2618_v13, %v2617_v45  ;;  %v2987_v30 = vpack.c.bf16 %v3045_v42, %v3045_v42  ;;  %v2619_v6 = vmul.f32 %v3045_v42, %v3045_v42  ;;  %2668 = vadd.xlane.f32.xlu0 %v2667_v52 }
 0x3d4   : > { %2560 = vadd.xlane.f32.xlu1 %v2559_v22  ;;  %v2208_v43 = vpop.f32.mrb[20].mxu0  ;;  %v3046_v18 = vpop.f32.mrb[20].mxu1  ;;  %v2563_v4 = vadd.f32 %v3045_v42, %v2562_v9 }
 0x3d5   : > { %2513 = vst [vmem:[%s4529_s6 + $0x74] sm:$0xf] %v2987_v30  ;;  %v2620_v21 = vmul.f32 %v2208_v43, %v2208_v43  ;;  %v2210_v51 = vpop.f32.mrb[21].mxu0  ;;  %v3047_v32 = vpop.f32.mrb[21].mxu1  ;;  %v2675_v15 = vadd.f32 %v2674_v33, %v2619_v6 }
 0x3d6   : > { %v2988_v34 = vpack.c.bf16 %v2210_v51, %v2208_v43  ;;  %v2566_v37 = vadd.f32 %v2210_v51, %v2208_v43  ;;  %v2621_v36 = vmul.f32 %v2210_v51, %v2210_v51  ;;  %v3048_v23 = vadd.f32 %v3047_v32, %v3046_v18  ;;  %v3049_v25 = vpop.f32.mrb[22].mxu1  ;;  %v2212_v0 = vpop.f32.mrb[22].mxu0 }
 0x3d7   : > { %2564 = vadd.xlane.f32.xlu0 %v2563_v4  ;;  %v2623_v17 = vmul.f32 %v2212_v0, %v2212_v0  ;;  %v2214_v40 = vpop.f32.mrb[23].mxu0  ;;  %v3050_v10 = vpop.f32.mrb[23].mxu1 }
 0x3d8   : > { %2672 = vadd.xlane.f32.xlu1 %v2671_v19  ;;  %2514 = vst [vmem:[%s4529_s6 + $0x78] sm:$0xff] %v2988_v34  ;;  %v2678_v56 = vadd.f32 %v2621_v36, %v2620_v21  ;;  %v2989_v60 = vpack.c.bf16 %v3048_v23, %v3048_v23  ;;  %v2622_v57 = vmul.f32 %v3048_v23, %v3048_v23 }
 0x3d9   : > { %v2990_v8 = vpack.c.bf16 %v2214_v40, %v2212_v0  ;;  %v2570_v26 = vadd.f32 %v2214_v40, %v2212_v0  ;;  %v2624_v58 = vmul.f32 %v2214_v40, %v2214_v40  ;;  %v3051_v46 = vadd.f32 %v3050_v10, %v3049_v25 }
 0x3da   : > { %v2567_v38 = vadd.f32 %v3048_v23, %v2566_v37  ;;  %2515 = vst [vmem:[%s4529_s6 + $0x80] sm:$0xf] %v2989_v60  ;;  %v2679_v14 = vadd.f32 %v2678_v56, %v2622_v57 }
 0x3db   : > { %2516 = vst [vmem:[%s4529_s6 + $0x84] sm:$0xff] %v2990_v8  ;;  %v2682_v3 = vadd.f32 %v2624_v58, %v2623_v17  ;;  %v2991_v47 = vpack.c.bf16 %v3051_v46, %v3051_v46  ;;  %v2625_v41 = vmul.f32 %v3051_v46, %v3051_v46  ;;  %2676 = vadd.xlane.f32.xlu0 %v2675_v15 }
 0x3dc   : > { %2568 = vadd.xlane.f32.xlu1 %v2567_v38  ;;  %v2218_v5 = vpop.f32.mrb[24].mxu0  ;;  %v3052_v48 = vpop.f32.mrb[24].mxu1  ;;  %v2571_v54 = vadd.f32 %v3051_v46, %v2570_v26 }
 0x3dd   : > { %2517 = vst [vmem:[%s4529_s6 + $0x8c] sm:$0xf] %v2991_v47  ;;  %v2626_v27 = vmul.f32 %v2218_v5, %v2218_v5  ;;  %v2220_v55 = vpop.f32.mrb[25].mxu0  ;;  %v3053_v31 = vpop.f32.mrb[25].mxu1  ;;  %v2683_v39 = vadd.f32 %v2682_v3, %v2625_v41  ;;  %v2739_v41 = vld [vmem:[%s4543_s9] sm:$0xff] }
 0x3de   : > { %v2992_v28 = vpack.c.bf16 %v2220_v55, %v2218_v5  ;;  %v2574_v24 = vadd.f32 %v2220_v55, %v2218_v5  ;;  %v2627_v49 = vmul.f32 %v2220_v55, %v2220_v55  ;;  %v3054_v11 = vadd.f32 %v3053_v31, %v3052_v48  ;;  %v3055_v29 = vpop.f32.mrb[26].mxu1  ;;  %v2222_v7 = vpop.f32.mrb[26].mxu0  ;;  %v2741_v31 = vld [vmem:[%s4543_s9 + $0x10] sm:$0xff] }
 0x3df   : > { %2572 = vadd.xlane.f32.xlu0 %v2571_v54  ;;  %v2629_v61 = vmul.f32 %v2222_v7, %v2222_v7  ;;  %v2224_v52 = vpop.f32.mrb[27].mxu0  ;;  %v3056_v63 = vpop.f32.mrb[27].mxu1 }
 0x3e0   : > { %2680 = vadd.xlane.f32.xlu1 %v2679_v14  ;;  %2518 = vst [vmem:[%s4529_s6 + $0x90] sm:$0xff] %v2992_v28  ;;  %v2686_v53 = vadd.f32 %v2627_v49, %v2626_v27  ;;  %v2993_v44 = vpack.c.bf16 %v3054_v11, %v3054_v11  ;;  %v2628_v16 = vmul.f32 %v3054_v11, %v3054_v11  ;;  %v2740_v14 = vld [vmem:[%s4543_s9 + $0x8] sm:$0xff] }
 0x3e1   : > { %v2994_v35 = vpack.c.bf16 %v2224_v52, %v2222_v7  ;;  %v2578_v1 = vadd.f32 %v2224_v52, %v2222_v7  ;;  %v2630_v45 = vmul.f32 %v2224_v52, %v2224_v52  ;;  %v3057_v2 = vadd.f32 %v3056_v63, %v3055_v29  ;;  %v2743_v63 = vld [vmem:[%s4543_s9 + $0x20] sm:$0xff] }
 0x3e2   : > { %v2575_v12 = vadd.f32 %v3054_v11, %v2574_v24  ;;  %2519 = vst [vmem:[%s4529_s6 + $0x98] sm:$0xf] %v2993_v44  ;;  %v2687_v50 = vadd.f32 %v2686_v53, %v2628_v16  ;;  %v2742_v11 = vld [vmem:[%s4543_s9 + $0x18] sm:$0xff] }
 0x3e3   : > { %2520 = vst [vmem:[%s4529_s6 + $0x9c] sm:$0xff] %v2994_v35  ;;  %v2690_v59 = vadd.f32 %v2630_v45, %v2629_v61  ;;  %v2995_v62 = vpack.c.bf16 %v3057_v2, %v3057_v2  ;;  %v2631_v20 = vmul.f32 %v3057_v2, %v3057_v2  ;;  %2684 = vadd.xlane.f32.xlu0 %v2683_v39 }
 0x3e4   : > { %2576 = vadd.xlane.f32.xlu1 %v2575_v12  ;;  %v2228_v9 = vpop.f32.mrb[28].mxu0  ;;  %v3058_v13 = vpop.f32.mrb[28].mxu1  ;;  %v2579_v42 = vadd.f32 %v3057_v2, %v2578_v1  ;;  %v2744_v1 = vld [vmem:[%s4543_s9 + $0x28] sm:$0xff] }
 0x3e5   : > { %2521 = vst [vmem:[%s4529_s6 + $0xa4] sm:$0xf] %v2995_v62  ;;  %v2632_v22 = vmul.f32 %v2228_v9, %v2228_v9  ;;  %v2230_v19 = vpop.f32.mrb[29].mxu0  ;;  %v3059_v33 = vpop.f32.mrb[29].mxu1  ;;  %v2691_v30 = vadd.f32 %v2690_v59, %v2631_v20  ;;  %v2745_v59 = vld [vmem:[%s4543_s9 + $0x30] sm:$0xff] }
 0x3e6   : > { %v2996_v6 = vpack.c.bf16 %v2230_v19, %v2228_v9  ;;  %v2582_v43 = vadd.f32 %v2230_v19, %v2228_v9  ;;  %v2633_v18 = vmul.f32 %v2230_v19, %v2230_v19  ;;  %v3060_v4 = vadd.f32 %v3059_v33, %v3058_v13  ;;  %v3061_v21 = vpop.f32.mrb[30].mxu1  ;;  %v2232_v51 = vpop.f32.mrb[30].mxu0 }
 0x3e7   : > { %2580 = vadd.xlane.f32.xlu0 %v2579_v42  ;;  %v2635_v32 = vmul.f32 %v2232_v51, %v2232_v51  ;;  %v2234_v15 = vpop.f32.mrb[31].mxu0  ;;  %v3062_v34 = vpop.f32.mrb[31].mxu1  ;;  %v2746_v42 = vld [vmem:[%s4543_s9 + $0x38] sm:$0xff] }
 0x3e8   : > { %2688 = vadd.xlane.f32.xlu1 %v2687_v50  ;;  %2522 = vst [vmem:[%s4529_s6 + $0xa8] sm:$0xff] %v2996_v6  ;;  %v2694_v37 = vadd.f32 %v2633_v18, %v2632_v22  ;;  %v2997_v36 = vpack.c.bf16 %v3060_v4, %v3060_v4  ;;  %v2634_v23 = vmul.f32 %v3060_v4, %v3060_v4  ;;  %v2747_v6 = vld [vmem:[%s4543_s9 + $0x40] sm:$0xff] }
 0x3e9   : > { %v2998_v25 = vpack.c.bf16 %v2234_v15, %v2232_v51  ;;  %v2586_v0 = vadd.f32 %v2234_v15, %v2232_v51  ;;  %v2636_v17 = vmul.f32 %v2234_v15, %v2234_v15  ;;  %v3063_v40 = vadd.f32 %v3062_v34, %v3061_v21  ;;  %v2748_v51 = vld [vmem:[%s4543_s9 + $0x48] sm:$0xff] }
 0x3ea   : > { %v2583_v10 = vadd.f32 %v3060_v4, %v2582_v43  ;;  %2523 = vst [vmem:[%s4529_s6 + $0xb0] sm:$0xf] %v2997_v36  ;;  %v2695_v56 = vadd.f32 %v2694_v37, %v2634_v23  ;;  %v2749_v36 = vld [vmem:[%s4543_s9 + $0x50] sm:$0xff] }
 0x3eb   : > { %2524 = vst [vmem:[%s4529_s6 + $0xb4] sm:$0xff] %v2998_v25  ;;  %v2698_v60 = vadd.f32 %v2636_v17, %v2635_v32  ;;  %v2999_v57 = vpack.c.bf16 %v3063_v40, %v3063_v40  ;;  %v2637_v8 = vmul.f32 %v3063_v40, %v3063_v40  ;;  %2692 = vadd.xlane.f32.xlu0 %v2691_v30 }
 0x3ec   : > { %2584 = vadd.xlane.f32.xlu1 %v2583_v10  ;;  %v2587_v26 = vadd.f32 %v3063_v40, %v2586_v0  ;;  %v2750_v40 = vld [vmem:[%s4543_s9 + $0x58] sm:$0xff] }
 0x3ed   : > { %2525 = vst [vmem:[%s4529_s6 + $0xbc] sm:$0xf] %v2999_v57  ;;  %v2699_v58 = vadd.f32 %v2698_v60, %v2637_v8  ;;  %v2751_v8 = vld [vmem:[%s4543_s9 + $0x60] sm:$0xff] }
 0x3ef   : > { %2588 = vadd.xlane.f32.xlu0 %v2587_v26 }
 0x3f0   : > { %2696 = vadd.xlane.f32.xlu1 %v2695_v56 }
 0x3f3   : > { %2700 = vadd.xlane.f32.xlu0 %v2699_v58 }
 0x440   : > { %v2529_v46 = vpop.xlane.xlu0 %2528 }
 0x442   : > { %v2533_v38 = vpop.xlane.xlu1 %2532 }
 0x444   : > { %v2645_v3 = vpop.xlane.xlu0 %2644 }
 0x445   : > { %v2704_v47 = vsel %vm1211_vm1, %v2533_v38, %v2645_v3 }
 0x446   : > { %v2756_v5 = vadd.f32 %v2740_v14, %v2704_v47  ;;  %v2641_v48 = vpop.xlane.xlu1 %2640  ;;  %v2752_v14 = vld [vmem:[%s4543_s9 + $0x68] sm:$0xff] }
 0x447   : > { %v2703_v54 = vsel %vm1211_vm1, %v2529_v46, %v2641_v48  ;;  %v2753_v48 = vld [vmem:[%s4543_s9 + $0x70] sm:$0xff] }
 0x448   : > { %2773 = vst.msk [vmem:[%s4543_s9 + $0x8] sm:$0xff] %vm442_vm0, %v2756_v5  ;;  %v2755_v27 = vadd.f32 %v2739_v41, %v2703_v54  ;;  %v2537_v55 = vpop.xlane.xlu0 %2536 }
 0x44a   : > { %2772 = vst.msk [vmem:[%s4543_s9] sm:$0xff] %vm442_vm0, %v2755_v27  ;;  %v2649_v39 = vpop.xlane.xlu1 %2648 }
 0x44b   : > { %v2705_v28 = vsel %vm1211_vm1, %v2537_v55, %v2649_v39  ;;  %v2754_v39 = vld [vmem:[%s4543_s9 + $0x78] sm:$0xff] }
 0x44c   : > { %v2757_v24 = vadd.f32 %v2741_v31, %v2705_v28  ;;  %v2541_v49 = vpop.xlane.xlu0 %2540 }
 0x44e   : > { %2774 = vst.msk [vmem:[%s4543_s9 + $0x10] sm:$0xff] %vm442_vm0, %v2757_v24 }
 0x450   : > { %v2653_v29 = vpop.xlane.xlu0 %2652 }
 0x451   : > { %v2545_v7 = vpop.xlane.xlu1 %2544  ;;  %v2706_v61 = vsel %vm1211_vm1, %v2541_v49, %v2653_v29 }
 0x452   : > { %v2758_v52 = vadd.f32 %v2742_v11, %v2706_v61 }
 0x454   : > { %2775 = vst.msk [vmem:[%s4543_s9 + $0x18] sm:$0xff] %vm442_vm0, %v2758_v52  ;;  %v2549_v44 = vpop.xlane.xlu0 %2548 }
 0x455   : > { %v2657_v53 = vpop.xlane.xlu1 %2656 }
 0x456   : > { %v2707_v16 = vsel %vm1211_vm1, %v2545_v7, %v2657_v53 }
 0x457   : > { %v2759_v35 = vadd.f32 %v2743_v63, %v2707_v16 }
 0x458   : > { %v2661_v45 = vpop.xlane.xlu0 %2660 }
 0x459   : > { %2776 = vst.msk [vmem:[%s4543_s9 + $0x20] sm:$0xff] %vm442_vm0, %v2759_v35  ;;  %v2553_v2 = vpop.xlane.xlu1 %2552  ;;  %v2708_v12 = vsel %vm1211_vm1, %v2549_v44, %v2661_v45 }
 0x45a   : > { %v2760_v50 = vadd.f32 %v2744_v1, %v2708_v12 }
 0x45c   : > { %2777 = vst.msk [vmem:[%s4543_s9 + $0x28] sm:$0xff] %vm442_vm0, %v2760_v50  ;;  %v2557_v20 = vpop.xlane.xlu0 %2556 }
 0x45d   : > { %v2665_v62 = vpop.xlane.xlu1 %2664 }
 0x45e   : > { %v2709_v9 = vsel %vm1211_vm1, %v2553_v2, %v2665_v62 }
 0x45f   : > { %v2761_v13 = vadd.f32 %v2745_v59, %v2709_v9 }
 0x460   : > { %v2669_v22 = vpop.xlane.xlu0 %2668 }
 0x461   : > { %2778 = vst.msk [vmem:[%s4543_s9 + $0x30] sm:$0xff] %vm442_vm0, %v2761_v13  ;;  %v2561_v19 = vpop.xlane.xlu1 %2560  ;;  %v2710_v33 = vsel %vm1211_vm1, %v2557_v20, %v2669_v22 }
 0x462   : > { %v2762_v30 = vadd.f32 %v2746_v42, %v2710_v33 }
 0x464   : > { %2779 = vst.msk [vmem:[%s4543_s9 + $0x38] sm:$0xff] %vm442_vm0, %v2762_v30  ;;  %v2565_v18 = vpop.xlane.xlu0 %2564 }
 0x465   : > { %v2673_v43 = vpop.xlane.xlu1 %2672 }
 0x466   : > { %v2711_v4 = vsel %vm1211_vm1, %v2561_v19, %v2673_v43 }
 0x467   : > { %v2763_v21 = vadd.f32 %v2747_v6, %v2711_v4 }
 0x468   : > { %v2677_v32 = vpop.xlane.xlu0 %2676 }
 0x469   : > { %2780 = vst.msk [vmem:[%s4543_s9 + $0x40] sm:$0xff] %vm442_vm0, %v2763_v21  ;;  %v2569_v15 = vpop.xlane.xlu1 %2568  ;;  %v2712_v34 = vsel %vm1211_vm1, %v2565_v18, %v2677_v32 }
 0x46a   : > { %v2764_v37 = vadd.f32 %v2748_v51, %v2712_v34 }
 0x46c   : > { %2781 = vst.msk [vmem:[%s4543_s9 + $0x48] sm:$0xff] %vm442_vm0, %v2764_v37  ;;  %v2573_v25 = vpop.xlane.xlu0 %2572 }
 0x46d   : > { %v2681_v23 = vpop.xlane.xlu1 %2680 }
 0x46e   : > { %v2713_v0 = vsel %vm1211_vm1, %v2569_v15, %v2681_v23 }
 0x46f   : > { %v2765_v17 = vadd.f32 %v2749_v36, %v2713_v0 }
 0x470   : > { %v2685_v10 = vpop.xlane.xlu0 %2684 }
 0x471   : > { %2782 = vst.msk [vmem:[%s4543_s9 + $0x50] sm:$0xff] %vm442_vm0, %v2765_v17  ;;  %v2577_v56 = vpop.xlane.xlu1 %2576  ;;  %v2714_v60 = vsel %vm1211_vm1, %v2573_v25, %v2685_v10 }
 0x472   : > { %v2766_v57 = vadd.f32 %v2750_v40, %v2714_v60 }
 0x474   : > { %2783 = vst.msk [vmem:[%s4543_s9 + $0x58] sm:$0xff] %vm442_vm0, %v2766_v57  ;;  %v2581_v58 = vpop.xlane.xlu0 %2580 }
 0x475   : > { %v2689_v26 = vpop.xlane.xlu1 %2688 }
 0x476   : > { %v2715_v46 = vsel %vm1211_vm1, %v2577_v56, %v2689_v26 }
 0x477   : > { %v2767_v38 = vadd.f32 %v2751_v8, %v2715_v46 }
 0x478   : > { %v2693_v3 = vpop.xlane.xlu0 %2692 }
 0x479   : > { %2784 = vst.msk [vmem:[%s4543_s9 + $0x60] sm:$0xff] %vm442_vm0, %v2767_v38  ;;  %v2585_v47 = vpop.xlane.xlu1 %2584  ;;  %v2716_v41 = vsel %vm1211_vm1, %v2581_v58, %v2693_v3 }
 0x47a   : > { %v2768_v5 = vadd.f32 %v2752_v14, %v2716_v41 }
 0x47c   : > { %2785 = vst.msk [vmem:[%s4543_s9 + $0x68] sm:$0xff] %vm442_vm0, %v2768_v5  ;;  %v2589_v27 = vpop.xlane.xlu0 %2588 }
 0x47d   : > { %v2697_v54 = vpop.xlane.xlu1 %2696 }
 0x47e   : > { %v2717_v55 = vsel %vm1211_vm1, %v2585_v47, %v2697_v54 }
 0x47f   : > { %v2769_v31 = vadd.f32 %v2753_v48, %v2717_v55 }
 0x480   : > { %v2701_v28 = vpop.xlane.xlu0 %2700 }
 0x481   : > { %2786 = vst.msk [vmem:[%s4543_s9 + $0x70] sm:$0xff] %vm442_vm0, %v2769_v31  ;;  %v2718_v24 = vsel %vm1211_vm1, %v2589_v27, %v2701_v28 }
 0x482   : > { %v2770_v49 = vadd.f32 %v2754_v39, %v2718_v24 }
 0x484   : > { %2787 = vst.msk [vmem:[%s4543_s9 + $0x78] sm:$0xff] %vm442_vm0, %v2770_v49 }
 0x485 PF: > { %s16_s20 = sadd.s32 1, %s3253_s20   ;;  %s4710_s18 = smov %s3249_s19 }
 0x486   : > { %p13_p5 = scmp.ge.s32.totalorder %s16_s20, 4   ;;  %s4711_s19 = smov %s4713_s21 }
 0x488   :  { %15 = sbr.rel (!%p13_p5) target bundleno = 2 (0x2), region = 86 }

// kernel: mlp_head_weight_forward.4
= control target key start
LH: loop header
LB: loop body
LE: loop exit
PB: predicated region body
PF: predicated region fallthrough
CT: control target
= control target key end

     0   :  { %s3863_s12 = smov 0   ;;  %s3865_s13 = smov 0   ;;  %s4833_s0 = inlined_call_operand.vmem [shape: bf16[2,512,384], index: 0, kind: input, shape index: {}]   ;;  %s4834_s1 = inlined_call_operand.vmem [shape: bf16[256,512], index: 1, kind: input, shape index: {}]   ;;  %s4835_s2 = inlined_call_operand.vmem [shape: bf16[2,256,384], index: 2, kind: output, shape index: {0}]   ;;  %s4836_s3 = inlined_call_operand.vmem [shape: f32[2,256,2], index: 3, kind: output, shape index: {1}]  }
   0x1   :  { %s3867_s14 = smov 0  }
   0x2 LB: > { %s26_s15 = sadd.s32 1, %s3836_s13  ;;  %p2983_p0 = scmp.ge.s32.totalorder %s3840_s14, 1  ;;  %s3840_s14 = sphi %s3867_s14, %s14_s14   ;;  %s3836_s13 = sphi %s3865_s13, %s4838_s13   ;;  %s3832_s12 = sphi %s3863_s12, %s4837_s12  }
   0x3   : > { %p28_p1 = scmp.ge.s32.totalorder %s26_s15, 2  ;;  %p161_p2 = scmp.lt.s32.totalorder %s3840_s14, 3 }
   0x5   : > { %s4840_s15 = smov (%p28_p1, %s26_s15), 0  ;;  %p162_p3 = pnand %p2983_p0, %p161_p2 }
   0x6   : > { %p199_p4 = scmp.lt.s32.totalorder (!%p162_p3), %s3832_s12, 1  ;;  %v3636_v0 = vld [vmem:[%s4834_s1 + $0x4] ss:$16 sps:$4 sm:$0xff] (!%p162_p3)   ;;  %v3928_v34 = vld [vmem:[%s4834_s1] ss:$16 sps:$4 sm:$0xff] (!%p162_p3)   ;;  %vm2729_vm0 = vcmask (!%p162_p3), 15360  }
   0x7   : > { %165 = sbr.rel (%p162_p3) target bundleno = 703 (0x2bf), region = 28  ;;  %1666 = vmatprep.mubr.bf16.mxu1 (!%p162_p3), %v3636_v0  ;;  %1280 = vmatprep.mubr.bf16.mxu0 (!%p162_p3), %v3636_v0  ;;  %v3933_v35 = vld [vmem:[%s4834_s1 + $0x24] ss:$16 sps:$4 sm:$0xff] (!%p162_p3)   ;;  %v3944_v40 = vld [vmem:[%s4834_s1 + $0x20] ss:$16 sps:$4 sm:$0xff] (!%p162_p3)   ;;  %vm2692_vm1 = vcmask (!%p162_p3), 7168  }
   0x8   : > { %v3952_v44 = vld [vmem:[%s4834_s1 + $0x44] ss:$16 sps:$4 sm:$0xff] (!%p162_p3)   ;;  %v3964_v50 = vld [vmem:[%s4834_s1 + $0x40] ss:$16 sps:$4 sm:$0xff] (!%p162_p3)  }
   0x9   : > { %v3971_v53 = vld [vmem:[%s4834_s1 + $0x64] ss:$16 sps:$4 sm:$0xff] (!%p162_p3)   ;;  %v3982_v58 = vld [vmem:[%s4834_s1 + $0x60] ss:$16 sps:$4 sm:$0xff] (!%p162_p3)  }
   0xa   : > { %v3989_v61 = vld [vmem:[%s4834_s1 + $0x84] ss:$16 sps:$4 sm:$0xff] (!%p162_p3)  }
   0xe   : > { %s4842_s12 = smov (!%p199_p4, %s3832_s12), 1 }
   0xf   : > { %s3567_s18 = smul.u32 768, %s4842_s12  ;;  %s3214_s11 = sshll.u32 %s4842_s12, 8 }
  0x10   : > { %s3568_s7 = smul.u32 384, %s4842_s12 }
  0x11   : > { %s3890_s21 = scalar_lea.vmem %s4833_s0, %s3567_s18  ;;  %s4396_s18 = scalar_lea.vmem %s4836_s3, %s3214_s11 }
  0x12   : > { %v3594_v1 = vld [vmem:[%s3890_s21 + $0x4] ss:$12 sps:$4 sm:$0xff]   ;;  %v3596_v2 = vld [vmem:[%s3890_s21 + $0xc8] ss:$12 sps:$4 sm:$0xff]   ;;  %v3597_v3 = vld [vmem:[%s3890_s21] ss:$12 sps:$4 sm:$0xff]   ;;  %s4304_s10 = scalar_lea.vmem %s4835_s2, %s3568_s7 }
  0x13   : > { %1248 = vmatprep.subr.bf16.mxu0 %v3594_v1  ;;  %3279 = vmatprep.subr.bf16.mxu1 %v3596_v2  ;;  %v3598_v4 = vld [vmem:[%s3890_s21 + $0x8] ss:$12 sps:$4 sm:$0xff]   ;;  %v3601_v6 = vld [vmem:[%s3890_s21 + $0xe0] ss:$12 sps:$4 sm:$0xff]   ;;  %v3602_v7 = vld [vmem:[%s3890_s21 + $0x18] ss:$12 sps:$4 sm:$0xff]  }
  0x14   : > { %1249 = vmatpush1.bf16.msra.mxu0 %v3597_v3  ;;  %v3599_v5 = vld [vmem:[%s3890_s21 + $0x1c] ss:$12 sps:$4 sm:$0xff]   ;;  %3280 = vmatpush3.bf16.msra.mxu1 %v3598_v4  ;;  %v3603_v8 = vld [vmem:[%s3890_s21 + $0x20] ss:$12 sps:$4 sm:$0xff]   ;;  %v3606_v10 = vld [vmem:[%s3890_s21 + $0xf8] ss:$12 sps:$4 sm:$0xff]  }
  0x15   : > { %1250 = vmatprep.subr.bf16.mxu0 %v3599_v5  ;;  %3281 = vmatprep.subr.bf16.mxu1 %v3601_v6  ;;  %v3604_v9 = vld [vmem:[%s3890_s21 + $0x34] ss:$12 sps:$4 sm:$0xff]   ;;  %v3607_v11 = vld [vmem:[%s3890_s21 + $0x30] ss:$12 sps:$4 sm:$0xff]   ;;  %v3608_v12 = vld [vmem:[%s3890_s21 + $0x38] ss:$12 sps:$4 sm:$0xff]  }
  0x16   : > { %v3609_v13 = vld [vmem:[%s3890_s21 + $0x4c] ss:$12 sps:$4 sm:$0xff]   ;;  %v3611_v14 = vld [vmem:[%s3890_s21 + $0x110] ss:$12 sps:$4 sm:$0xff]   ;;  %v3612_v15 = vld [vmem:[%s3890_s21 + $0x48] ss:$12 sps:$4 sm:$0xff]  }
  0x17   : > { %v3613_v16 = vld [vmem:[%s3890_s21 + $0x50] ss:$12 sps:$4 sm:$0xff]   ;;  %v3616_v18 = vld [vmem:[%s3890_s21 + $0x128] ss:$12 sps:$4 sm:$0xff]   ;;  %v3617_v19 = vld [vmem:[%s3890_s21 + $0x60] ss:$12 sps:$4 sm:$0xff]  }
  0x18   : > { %1251 = vmatpush1.bf16.msra.mxu0 %v3602_v7  ;;  %3282 = vmatpush3.bf16.msra.mxu1 %v3603_v8  ;;  %v3614_v17 = vld [vmem:[%s3890_s21 + $0x64] ss:$12 sps:$4 sm:$0xff]   ;;  %v3618_v20 = vld [vmem:[%s3890_s21 + $0x68] ss:$12 sps:$4 sm:$0xff]   ;;  %v3621_v22 = vld [vmem:[%s3890_s21 + $0x140] ss:$12 sps:$4 sm:$0xff]  }
  0x19   : > { %1252 = vmatprep.subr.bf16.mxu0 %v3604_v9  ;;  %3283 = vmatprep.subr.bf16.mxu1 %v3606_v10  ;;  %v3619_v21 = vld [vmem:[%s3890_s21 + $0x7c] ss:$12 sps:$4 sm:$0xff]   ;;  %v3622_v23 = vld [vmem:[%s3890_s21 + $0x78] ss:$12 sps:$4 sm:$0xff]   ;;  %v3623_v24 = vld [vmem:[%s3890_s21 + $0x80] ss:$12 sps:$4 sm:$0xff]  }
  0x1a   : > { %v3624_v25 = vld [vmem:[%s3890_s21 + $0x94] ss:$12 sps:$4 sm:$0xff]   ;;  %v3626_v26 = vld [vmem:[%s3890_s21 + $0x158] ss:$12 sps:$4 sm:$0xff]   ;;  %v3627_v27 = vld [vmem:[%s3890_s21 + $0x90] ss:$12 sps:$4 sm:$0xff]  }
  0x1b   : > { %v3628_v28 = vld [vmem:[%s3890_s21 + $0x98] ss:$12 sps:$4 sm:$0xff]   ;;  %v3631_v30 = vld [vmem:[%s3890_s21 + $0x170] ss:$12 sps:$4 sm:$0xff]   ;;  %v3632_v31 = vld [vmem:[%s3890_s21 + $0xa8] ss:$12 sps:$4 sm:$0xff]  }
  0x1c   : > { %1253 = vmatpush1.bf16.msra.mxu0 %v3607_v11  ;;  %3284 = vmatpush3.bf16.msra.mxu1 %v3608_v12  ;;  %v3629_v29 = vld [vmem:[%s3890_s21 + $0xac] ss:$12 sps:$4 sm:$0xff]   ;;  %v3633_v32 = vld [vmem:[%s3890_s21 + $0xb0] ss:$12 sps:$4 sm:$0xff]   ;;  %v3645_v39 = vld [vmem:[%s3890_s21 + $0xf4] ss:$12 sps:$4 sm:$0xff]  }
  0x1d   : > { %1254 = vmatprep.subr.bf16.mxu0 %v3609_v13  ;;  %3285 = vmatprep.subr.bf16.mxu1 %v3611_v14  ;;  %v3637_v33 = vld [vmem:[%s3890_s21 + $0xc4] ss:$12 sps:$4 sm:$0xff]   ;;  %v3639_v36 = vld [vmem:[%s3890_s21 + $0xc0] ss:$12 sps:$4 sm:$0xff]   ;;  %v3640_v37 = vld [vmem:[%s3890_s21 + $0xdc] ss:$12 sps:$4 sm:$0xff]  }
  0x1e   : > { %v3642_v38 = vld [vmem:[%s3890_s21 + $0xd8] ss:$12 sps:$4 sm:$0xff]   ;;  %v3670_v41 = vld [vmem:[%s3890_s21 + $0x248] ss:$12 sps:$4 sm:$0xff]   ;;  %v3648_v43 = vld [vmem:[%s3890_s21 + $0xf0] ss:$12 sps:$4 sm:$0xff]  }
  0x1f   : > { %v3673_v42 = vld [vmem:[%s3890_s21 + $0x188] ss:$12 sps:$4 sm:$0xff]   ;;  %v3649_v45 = vld [vmem:[%s3890_s21 + $0x10c] ss:$12 sps:$4 sm:$0xff]   ;;  %v3654_v48 = vld [vmem:[%s3890_s21 + $0x124] ss:$12 sps:$4 sm:$0xff]  }
  0x20   : > { %1255 = vmatpush1.bf16.msra.mxu0 %v3612_v15  ;;  %3286 = vmatpush3.bf16.msra.mxu1 %v3613_v16  ;;  %v3651_v46 = vld [vmem:[%s3890_s21 + $0x108] ss:$12 sps:$4 sm:$0xff]   ;;  %v3684_v47 = vld [vmem:[%s3890_s21 + $0x260] ss:$12 sps:$4 sm:$0xff]   ;;  %v3660_v54 = vld [vmem:[%s3890_s21 + $0x138] ss:$12 sps:$4 sm:$0xff]  }
  0x21   : > { %1256 = vmatprep.subr.bf16.mxu0 %v3614_v17  ;;  %3287 = vmatprep.subr.bf16.mxu1 %v3616_v18  ;;  %v3687_v49 = vld [vmem:[%s3890_s21 + $0x1a0] ss:$12 sps:$4 sm:$0xff]   ;;  %v3658_v52 = vld [vmem:[%s3890_s21 + $0x13c] ss:$12 sps:$4 sm:$0xff]   ;;  %v3698_v55 = vld [vmem:[%s3890_s21 + $0x278] ss:$12 sps:$4 sm:$0xff]  }
  0x22   : > { %v3657_v51 = vld [vmem:[%s3890_s21 + $0x120] ss:$12 sps:$4 sm:$0xff]   ;;  %v3701_v57 = vld [vmem:[%s3890_s21 + $0x1b8] ss:$12 sps:$4 sm:$0xff]   ;;  %v3666_v59 = vld [vmem:[%s3890_s21 + $0x150] ss:$12 sps:$4 sm:$0xff]  }
  0x23   : > { %v3663_v56 = vld [vmem:[%s3890_s21 + $0x154] ss:$12 sps:$4 sm:$0xff]   ;;  %v3667_v60 = vld [vmem:[%s3890_s21 + $0x16c] ss:$12 sps:$4 sm:$0xff]   ;;  %v3712_v62 = vld [vmem:[%s3890_s21 + $0x290] ss:$12 sps:$4 sm:$0xff]  }
  0x24   : > { %1257 = vmatpush1.bf16.msra.mxu0 %v3617_v19  ;;  %3288 = vmatpush3.bf16.msra.mxu1 %v3618_v20  ;;  %v3669_v63 = vld [vmem:[%s3890_s21 + $0x168] ss:$12 sps:$4 sm:$0xff]   ;;  %v3715_v0 = vld [vmem:[%s3890_s21 + $0x1d0] ss:$12 sps:$4 sm:$0xff]   ;;  %v3674_v2 = vld [vmem:[%s3890_s21 + $0x180] ss:$12 sps:$4 sm:$0xff]  }
  0x25   : > { %1258 = vmatprep.subr.bf16.mxu0 %v3619_v21  ;;  %3289 = vmatprep.subr.bf16.mxu1 %v3621_v22  ;;  %v3676_v1 = vld [vmem:[%s3890_s21 + $0x184] ss:$12 sps:$4 sm:$0xff]   ;;  %v3726_v5 = vld [vmem:[%s3890_s21 + $0x2a8] ss:$12 sps:$4 sm:$0xff]   ;;  %v3740_v13 = vld [vmem:[%s3890_s21 + $0x2c0] ss:$12 sps:$4 sm:$0xff]  }
  0x26   : > { %v4001_v3 = vld [vmem:[%s4834_s1 + $0x80] ss:$16 sps:$4 sm:$0xff]   ;;  %v4006_v4 = vld [vmem:[%s4834_s1 + $0xa4] ss:$16 sps:$4 sm:$0xff]   ;;  %v3682_v6 = vld [vmem:[%s3890_s21 + $0x19c] ss:$12 sps:$4 sm:$0xff]  }
  0x27   : > { %v3729_v7 = vld [vmem:[%s3890_s21 + $0x1e8] ss:$12 sps:$4 sm:$0xff]   ;;  %v3680_v8 = vld [vmem:[%s3890_s21 + $0x198] ss:$12 sps:$4 sm:$0xff]   ;;  %v4020_v10 = vld [vmem:[%s4834_s1 + $0xa0] ss:$16 sps:$4 sm:$0xff]  }
  0x28   : > { %1259 = vmatpush1.bf16.msra.mxu0 %v3622_v23  ;;  %3290 = vmatpush3.bf16.msra.mxu1 %v3623_v24  ;;  %v3690_v9 = vld [vmem:[%s3890_s21 + $0x1b4] ss:$12 sps:$4 sm:$0xff]   ;;  %v3688_v12 = vld [vmem:[%s3890_s21 + $0x1b0] ss:$12 sps:$4 sm:$0xff]   ;;  %v3696_v14 = vld [vmem:[%s3890_s21 + $0x1cc] ss:$12 sps:$4 sm:$0xff]  }
  0x29   : > { %1260 = vmatprep.subr.bf16.mxu0 %v3624_v25  ;;  %3291 = vmatprep.subr.bf16.mxu1 %v3626_v26  ;;  %v4025_v11 = vld [vmem:[%s4834_s1 + $0xc4] ss:$16 sps:$4 sm:$0xff]   ;;  %v3743_v15 = vld [vmem:[%s3890_s21 + $0x200] ss:$12 sps:$4 sm:$0xff]   ;;  %v3710_v21 = vld [vmem:[%s3890_s21 + $0x1fc] ss:$12 sps:$4 sm:$0xff]  }
  0x2a   : > { %v3694_v16 = vld [vmem:[%s3890_s21 + $0x1c8] ss:$12 sps:$4 sm:$0xff]   ;;  %v4039_v17 = vld [vmem:[%s4834_s1 + $0xc0] ss:$16 sps:$4 sm:$0xff]   ;;  %v3754_v22 = vld [vmem:[%s3890_s21 + $0x2d8] ss:$12 sps:$4 sm:$0xff]  }
  0x2b   : > { %v3704_v18 = vld [vmem:[%s3890_s21 + $0x1e4] ss:$12 sps:$4 sm:$0xff]   ;;  %v3702_v20 = vld [vmem:[%s3890_s21 + $0x1e0] ss:$12 sps:$4 sm:$0xff]  }
  0x2c   : > { %1261 = vmatpush1.bf16.msra.mxu0 %v3627_v27  ;;  %3292 = vmatpush3.bf16.msra.mxu1 %v3628_v28  ;;  %v4045_v19 = vld [vmem:[%s4834_s1 + $0xe4] ss:$16 sps:$4 sm:$0xff]   ;;  %v3756_v24 = vld [vmem:[%s3890_s21 + $0x2f0] ss:$12 sps:$4 sm:$0xff]  }
  0x2d   : > { %1262 = vmatprep.subr.bf16.mxu0 %v3629_v29  ;;  %3293 = vmatprep.subr.bf16.mxu1 %v3631_v30  ;;  %v3755_v23 = vld [vmem:[%s3890_s21 + $0x218] ss:$12 sps:$4 sm:$0xff]   ;;  %v3757_v25 = vld [vmem:[%s3890_s21 + $0x230] ss:$12 sps:$4 sm:$0xff]   ;;  %v3718_v27 = vld [vmem:[%s3890_s21 + $0x214] ss:$12 sps:$4 sm:$0xff]  }
  0x2e   : > { %v3708_v26 = vld [vmem:[%s3890_s21 + $0x1f8] ss:$12 sps:$4 sm:$0xff]   ;;  %v3697_v28 = vld [vmem:[%s4834_s1 + $0xe0] ss:$16 sps:$4 sm:$0xff]  }
  0x2f   : > { %v3699_v29 = vld [vmem:[%s4834_s1 + $0x104] ss:$16 sps:$4 sm:$0xff]   ;;  %v3716_v30 = vld [vmem:[%s3890_s21 + $0x210] ss:$12 sps:$4 sm:$0xff]  }
  0x30   : > { %1263 = vmatpush1.bf16.msra.mxu0 %v3632_v31  ;;  %3294 = vmatpush3.bf16.msra.mxu1 %v3633_v32  ;;  %v3724_v31 = vld [vmem:[%s3890_s21 + $0x22c] ss:$12 sps:$4 sm:$0xff]   ;;  %v3722_v32 = vld [vmem:[%s3890_s21 + $0x228] ss:$12 sps:$4 sm:$0xff]  }
  0x31   : > { %1264 = vmatprep.subr.bf16.mxu0 %v3637_v33  ;;  %3391 = vmatprep.subr.bf16.mxu1 %v3670_v41  ;;  %v3732_v33 = vld [vmem:[%s3890_s21 + $0x244] ss:$12 sps:$4 sm:$0xff]  }
  0x32   : > { %v3713_v41 = vld [vmem:[%s4834_s1 + $0x144] ss:$16 sps:$4 sm:$0xff]  }
  0x33   : > { %1667 = vmatmul.mubr.bf16.vlgmr.msra.gmra.mrb[0].mxu1 %v3928_v34 }
  0x34   : > { %1265 = vmatpush1.bf16.msra.mxu0 %v3639_v36  ;;  %1674 = vmatprep.mubr.bf16.mxu1 %v3933_v35  ;;  %v3730_v36 = vld [vmem:[%s3890_s21 + $0x240] ss:$12 sps:$4 sm:$0xff]  }
  0x35   : > { %1266 = vmatprep.subr.bf16.mxu0 %v3640_v37  ;;  %3392 = vmatpush3.bf16.msra.mxu1 %v3673_v42  ;;  %v3738_v37 = vld [vmem:[%s3890_s21 + $0x25c] ss:$12 sps:$4 sm:$0xff]  }
  0x36   : > { %3393 = vmatprep.subr.bf16.mxu1 %v3684_v47  ;;  %v3744_v42 = vld [vmem:[%s3890_s21 + $0x270] ss:$12 sps:$4 sm:$0xff]   ;;  %v3720_v47 = vld [vmem:[%s4834_s1 + $0x164] ss:$16 sps:$4 sm:$0xff]  }
  0x38   : > { %1267 = vmatpush1.bf16.msra.mxu0 %v3642_v38  ;;  %v3736_v38 = vld [vmem:[%s3890_s21 + $0x258] ss:$12 sps:$4 sm:$0xff]  }
  0x39   : > { %1268 = vmatprep.subr.bf16.mxu0 %v3645_v39  ;;  %3394 = vmatpush3.bf16.msra.mxu1 %v3687_v49  ;;  %v3746_v39 = vld [vmem:[%s3890_s21 + $0x274] ss:$12 sps:$4 sm:$0xff]   ;;  %v3768_v49 = vld [vmem:[%s3890_s21 + $0x2bc] ss:$12 sps:$4 sm:$0xff]  }
  0x3a   : > { %3395 = vmatprep.subr.bf16.mxu1 %v3698_v55  ;;  %v3780_v55 = vld [vmem:[%s3890_s21 + $0x2ec] ss:$12 sps:$4 sm:$0xff]  }
  0x3b   : > { %1675 = vmatmul.mubr.bf16.gmra.mrb[4].mxu1 %v3944_v40 }
  0x3c   : > { %1269 = vmatpush1.bf16.msra.mxu0 %v3648_v43  ;;  %1682 = vmatprep.mubr.bf16.mxu1 %v3952_v44  ;;  %v3752_v43 = vld [vmem:[%s3890_s21 + $0x28c] ss:$12 sps:$4 sm:$0xff]  }
  0x3d   : > { %1270 = vmatprep.subr.bf16.mxu0 %v3649_v45  ;;  %3396 = vmatpush3.bf16.msra.mxu1 %v3701_v57  ;;  %v3763_v45 = vld [vmem:[%s3890_s21 + $0x2a4] ss:$12 sps:$4 sm:$0xff]  }
  0x3e   : > { %3397 = vmatprep.subr.bf16.mxu1 %v3712_v62  ;;  %v3733_v57 = vld [vmem:[%s4834_s1 + $0x180] ss:$16 sps:$4 sm:$0xff]   ;;  %v3748_v62 = vld [vmem:[%s4834_s1 + $0x1e4] ss:$16 sps:$4 sm:$0xff]  }
  0x40   : > { %1271 = vmatpush1.bf16.msra.mxu0 %v3651_v46  ;;  %v3719_v46 = vld [vmem:[%s4834_s1 + $0x140] ss:$16 sps:$4 sm:$0xff]  }
  0x41   : > { %1272 = vmatprep.subr.bf16.mxu0 %v3654_v48  ;;  %3398 = vmatpush3.bf16.msra.mxu1 %v3715_v0  ;;  %v3761_v48 = vld [vmem:[%s3890_s21 + $0x2a0] ss:$12 sps:$4 sm:$0xff]  }
  0x42   : > { %3399 = vmatprep.subr.bf16.mxu1 %v3726_v5  ;;  %v3760_v0 = vld [vmem:[%s4834_s1 + $0xc] ss:$16 sps:$4 sm:$0xff]   ;;  %v3775_v5 = vld [vmem:[%s4834_s1 + $0x48] ss:$16 sps:$4 sm:$0xff]  }
  0x43   : > { %1683 = vmatmul.mubr.bf16.gmra.mrb[8].mxu1 %v3964_v50 }
  0x44   : > { %1273 = vmatpush1.bf16.msra.mxu0 %v3657_v51  ;;  %1690 = vmatprep.mubr.bf16.mxu1 %v3971_v53  ;;  %v3774_v51 = vld [vmem:[%s3890_s21 + $0x2d4] ss:$12 sps:$4 sm:$0xff]  }
  0x45   : > { %1274 = vmatprep.subr.bf16.mxu0 %v3658_v52  ;;  %3400 = vmatpush3.bf16.msra.mxu1 %v3729_v7  ;;  %v3725_v52 = vld [vmem:[%s4834_s1 + $0x160] ss:$16 sps:$4 sm:$0xff]   ;;  %v3781_v7 = vld [vmem:[%s4834_s1 + $0x68] ss:$16 sps:$4 sm:$0xff]  }
  0x46   : > { %3401 = vmatprep.subr.bf16.mxu1 %v3740_v13  ;;  %v3790_v13 = vld [vmem:[%s4834_s1 + $0xc8] ss:$16 sps:$4 sm:$0xff]  }
  0x48   : > { %1275 = vmatpush1.bf16.msra.mxu0 %v3660_v54  ;;  %v3772_v54 = vld [vmem:[%s3890_s21 + $0x2d0] ss:$12 sps:$4 sm:$0xff]  }
  0x49   : > { %1276 = vmatprep.subr.bf16.mxu0 %v3663_v56  ;;  %3402 = vmatpush3.bf16.msra.mxu1 %v3743_v15  ;;  %v3778_v56 = vld [vmem:[%s3890_s21 + $0x2e8] ss:$12 sps:$4 sm:$0xff]  }
  0x4a   : > { %3403 = vmatprep.subr.bf16.mxu1 %v3754_v22  ;;  %v3793_v15 = vld [vmem:[%s4834_s1 + $0xe8] ss:$16 sps:$4 sm:$0xff]   ;;  %v3803_v22 = vld [vmem:[%s4834_s1 + $0x16c] ss:$16 sps:$4 sm:$0xff]  }
  0x4b   : > { %1691 = vmatmul.mubr.bf16.gmra.mrb[12].mxu1 %v3982_v58 }
  0x4c   : > { %1277 = vmatpush1.bf16.msra.mxu0 %v3666_v59  ;;  %1698 = vmatprep.mubr.bf16.mxu1 %v3989_v61  ;;  %v3739_v59 = vld [vmem:[%s4834_s1 + $0x1a0] ss:$16 sps:$4 sm:$0xff]  }
  0x4d   : > { %1278 = vmatprep.subr.bf16.mxu0 %v3667_v60  ;;  %3404 = vmatpush3.bf16.msra.mxu1 %v3755_v23  ;;  %v3741_v60 = vld [vmem:[%s4834_s1 + $0x1c4] ss:$16 sps:$4 sm:$0xff]  }
  0x4e   : > { %3405 = vmatprep.subr.bf16.mxu1 %v3756_v24  ;;  %v3805_v24 = vld [vmem:[%s4834_s1 + $0x168] ss:$16 sps:$4 sm:$0xff]  }
  0x50   : > { %1279 = vmatpush1.bf16.msra.mxu0 %v3669_v63  ;;  %v3753_v63 = vld [vmem:[%s4834_s1 + $0x1e0] ss:$16 sps:$4 sm:$0xff]  }
  0x51   : > { %1441 = vmatprep.subr.bf16.mxu0 %v3676_v1  ;;  %3406 = vmatpush3.bf16.msra.mxu1 %v3757_v25  ;;  %v3758_v1 = vld [vmem:[%s4834_s1 + $0x8] ss:$16 sps:$4 sm:$0xff]  }
  0x53   : > { %1281 = vmatmul.mubr.bf16.vlgmr.msra.gmra.mrb[0].mxu0 %v3928_v34  ;;  %1699 = vmatmul.mubr.bf16.gmra.mrb[16].mxu1 %v4001_v3  ;;  %v3705_v34 = vld [vmem:[%s4834_s1 + $0x100] ss:$16 sps:$4 sm:$0xff]  }
  0x54   : > { %1442 = vmatpush1.bf16.msra.mxu0 %v3674_v2  ;;  %1290 = vmatprep.mubr.bf16.mxu0 %v3933_v35  ;;  %v3706_v35 = vld [vmem:[%s4834_s1 + $0x124] ss:$16 sps:$4 sm:$0xff]   ;;  %v3764_v2 = vld [vmem:[%s4834_s1 + $0x2c] ss:$16 sps:$4 sm:$0xff]  }
  0x55   : > { %1706 = vmatprep.mubr.bf16.mxu1 %v4006_v4  ;;  %1443 = vmatprep.subr.bf16.mxu0 %v3682_v6  ;;  %v3776_v6 = vld [vmem:[%s4834_s1 + $0x6c] ss:$16 sps:$4 sm:$0xff]  }
  0x58   : > { %1444 = vmatpush1.bf16.msra.mxu0 %v3680_v8  ;;  %v3782_v8 = vld [vmem:[%s4834_s1 + $0x8c] ss:$16 sps:$4 sm:$0xff]  }
  0x59   : > { %1445 = vmatprep.subr.bf16.mxu0 %v3690_v9  ;;  %v3784_v9 = vld [vmem:[%s4834_s1 + $0x88] ss:$16 sps:$4 sm:$0xff]  }
  0x5b   : > { %1291 = vmatmul.mubr.bf16.gmra.mrb[4].mxu0 %v3944_v40  ;;  %1707 = vmatmul.mubr.bf16.gmra.mrb[20].mxu1 %v4020_v10  ;;  %v3711_v40 = vld [vmem:[%s4834_s1 + $0x120] ss:$16 sps:$4 sm:$0xff]  }
  0x5c   : > { %1300 = vmatprep.mubr.bf16.mxu0 %v3952_v44  ;;  %1714 = vmatprep.mubr.bf16.mxu1 %v4025_v11  ;;  %v3750_v44 = vld [vmem:[%s3890_s21 + $0x288] ss:$12 sps:$4 sm:$0xff]  }
  0x5d   : > { %1446 = vmatpush1.bf16.msra.mxu0 %v3688_v12  ;;  %v3788_v12 = vld [vmem:[%s4834_s1 + $0xcc] ss:$16 sps:$4 sm:$0xff]  }
  0x5e   : > { %1447 = vmatprep.subr.bf16.mxu0 %v3696_v14  ;;  %v3791_v14 = vld [vmem:[%s4834_s1 + $0xec] ss:$16 sps:$4 sm:$0xff]  }
  0x61   : > { %1448 = vmatpush1.bf16.msra.mxu0 %v3694_v16  ;;  %v3794_v16 = vld [vmem:[%s4834_s1 + $0x10c] ss:$16 sps:$4 sm:$0xff]  }
  0x62   : > { %1449 = vmatprep.subr.bf16.mxu0 %v3704_v18  ;;  %v3797_v18 = vld [vmem:[%s4834_s1 + $0x12c] ss:$16 sps:$4 sm:$0xff]  }
  0x63   : > { %1301 = vmatmul.mubr.bf16.gmra.mrb[8].mxu0 %v3964_v50  ;;  %1715 = vmatmul.mubr.bf16.gmra.mrb[24].mxu1 %v4039_v17  ;;  %v3766_v50 = vld [vmem:[%s3890_s21 + $0x2b8] ss:$12 sps:$4 sm:$0xff]  }
  0x64   : > { %1310 = vmatprep.mubr.bf16.mxu0 %v3971_v53  ;;  %1722 = vmatprep.mubr.bf16.mxu1 %v4045_v19  ;;  %v3727_v53 = vld [vmem:[%s4834_s1 + $0x184] ss:$16 sps:$4 sm:$0xff]  }
  0x65   : > { %1450 = vmatpush1.bf16.msra.mxu0 %v3702_v20  ;;  %v3800_v20 = vld [vmem:[%s4834_s1 + $0x14c] ss:$16 sps:$4 sm:$0xff]  }
  0x66   : > { %1451 = vmatprep.subr.bf16.mxu0 %v3710_v21  ;;  %v3802_v21 = vld [vmem:[%s4834_s1 + $0x148] ss:$16 sps:$4 sm:$0xff]  }
  0x69   : > { %1452 = vmatpush1.bf16.msra.mxu0 %v3708_v26  ;;  %v3806_v26 = vld [vmem:[%s4834_s1 + $0x18c] ss:$16 sps:$4 sm:$0xff]  }
  0x6a   : > { %1453 = vmatprep.subr.bf16.mxu0 %v3718_v27 }
  0x6b   : > { %1311 = vmatmul.mubr.bf16.gmra.mrb[12].mxu0 %v3982_v58  ;;  %1723 = vmatmul.mubr.bf16.gmra.mrb[28].mxu1 %v3697_v28  ;;  %v3734_v58 = vld [vmem:[%s4834_s1 + $0x1a4] ss:$16 sps:$4 sm:$0xff]  }
  0x6c   : > { %1320 = vmatprep.mubr.bf16.mxu0 %v3989_v61  ;;  %1730 = vmatprep.mubr.bf16.mxu1 %v3699_v29  ;;  %v3747_v61 = vld [vmem:[%s4834_s1 + $0x1c0] ss:$16 sps:$4 sm:$0xff]  }
  0x6d   : > { %1454 = vmatpush1.bf16.msra.mxu0 %v3716_v30 }
  0x6e   : > { %1455 = vmatprep.subr.bf16.mxu0 %v3724_v31 }
  0x71   : > { %1456 = vmatpush1.bf16.msra.mxu0 %v3722_v32  ;;  %v3808_v32 = vld [vmem:[%s4834_s1 + $0x188] ss:$16 sps:$4 sm:$0xff]  }
  0x72   : > { %1457 = vmatprep.subr.bf16.mxu0 %v3732_v33 }
  0x73   : > { %1321 = vmatmul.mubr.bf16.gmra.mrb[16].mxu0 %v4001_v3  ;;  %1731 = vmatmul.mubr.bf16.gmra.mrb[32].mxu1 %v3705_v34  ;;  %v3769_v3 = vld [vmem:[%s4834_s1 + $0x28] ss:$16 sps:$4 sm:$0xff]  }
  0x74   : > { %1330 = vmatprep.mubr.bf16.mxu0 %v4006_v4  ;;  %1738 = vmatprep.mubr.bf16.mxu1 %v3706_v35  ;;  %v3770_v4 = vld [vmem:[%s4834_s1 + $0x4c] ss:$16 sps:$4 sm:$0xff]  }
  0x75   : > { %1458 = vmatpush1.bf16.msra.mxu0 %v3730_v36 }
  0x76   : > { %1459 = vmatprep.subr.bf16.mxu0 %v3738_v37 }
  0x79   : > { %1460 = vmatpush1.bf16.msra.mxu0 %v3736_v38 }
  0x7a   : > { %1461 = vmatprep.subr.bf16.mxu0 %v3746_v39 }
  0x7b   : > { %1331 = vmatmul.mubr.bf16.gmra.mrb[20].mxu0 %v4020_v10  ;;  %1739 = vmatmul.mubr.bf16.gmra.mrb[36].mxu1 %v3711_v40  ;;  %v3785_v10 = vld [vmem:[%s4834_s1 + $0xac] ss:$16 sps:$4 sm:$0xff]  }
  0x7c   : > { %1340 = vmatprep.mubr.bf16.mxu0 %v4025_v11  ;;  %1746 = vmatprep.mubr.bf16.mxu1 %v3713_v41  ;;  %v3787_v11 = vld [vmem:[%s4834_s1 + $0xa8] ss:$16 sps:$4 sm:$0xff]  }
  0x7d   : > { %1462 = vmatpush1.bf16.msra.mxu0 %v3744_v42  ;;  %v3812_v42 = vld [vmem:[%s4834_s1 + $0x1cc] ss:$16 sps:$4 sm:$0xff]  }
  0x7e   : > { %1463 = vmatprep.subr.bf16.mxu0 %v3752_v43 }
  0x81   : > { %1464 = vmatpush1.bf16.msra.mxu0 %v3750_v44 }
  0x82   : > { %1465 = vmatprep.subr.bf16.mxu0 %v3763_v45 }
  0x83   : > { %1341 = vmatmul.mubr.bf16.gmra.mrb[24].mxu0 %v4039_v17  ;;  %1747 = vmatmul.mubr.bf16.gmra.mrb[40].mxu1 %v3719_v46  ;;  %v3796_v17 = vld [vmem:[%s4834_s1 + $0x108] ss:$16 sps:$4 sm:$0xff]  }
  0x84   : > { %1350 = vmatprep.mubr.bf16.mxu0 %v4045_v19  ;;  %1754 = vmatprep.mubr.bf16.mxu1 %v3720_v47  ;;  %v3799_v19 = vld [vmem:[%s4834_s1 + $0x128] ss:$16 sps:$4 sm:$0xff]  }
  0x85   : > { %1466 = vmatpush1.bf16.msra.mxu0 %v3761_v48  ;;  %v3814_v48 = vld [vmem:[%s4834_s1 + $0x1c8] ss:$16 sps:$4 sm:$0xff]  }
  0x86   : > { %1467 = vmatprep.subr.bf16.mxu0 %v3768_v49 }
  0x89   : > { %1468 = vmatpush1.bf16.msra.mxu0 %v3766_v50  ;;  %v3815_v50 = vld [vmem:[%s4834_s1 + $0x1ec] ss:$16 sps:$4 sm:$0xff]  }
  0x8a   : > { %1469 = vmatprep.subr.bf16.mxu0 %v3774_v51 }
  0x8b   : > { %1351 = vmatmul.mubr.bf16.gmra.mrb[28].mxu0 %v3697_v28  ;;  %1755 = vmatmul.mubr.bf16.gmra.mrb[44].mxu1 %v3725_v52 }
  0x8c   : > { %1360 = vmatprep.mubr.bf16.mxu0 %v3699_v29  ;;  %1762 = vmatprep.mubr.bf16.mxu1 %v3727_v53 }
  0x8d   : > { %1470 = vmatpush1.bf16.msra.mxu0 %v3772_v54 }
  0x8e   : > { %1471 = vmatprep.subr.bf16.mxu0 %v3780_v55 }
  0x91   : > { %1472 = vmatpush1.bf16.msra.mxu0 %v3778_v56  ;;  %v3817_v56 = vld [vmem:[%s4834_s1 + $0x1e8] ss:$16 sps:$4 sm:$0xff]  }
  0x93   : > { %1361 = vmatmul.mubr.bf16.gmra.mrb[32].mxu0 %v3705_v34  ;;  %1763 = vmatmul.mubr.bf16.gmra.mrb[48].mxu1 %v3733_v57  ;;  %v3809_v34 = vld [vmem:[%s4834_s1 + $0x1ac] ss:$16 sps:$4 sm:$0xff]  }
  0x94   : > { %1370 = vmatprep.mubr.bf16.mxu0 %v3706_v35  ;;  %1770 = vmatprep.mubr.bf16.mxu1 %v3734_v58 }
  0x9b   : > { %1371 = vmatmul.mubr.bf16.gmra.mrb[36].mxu0 %v3711_v40  ;;  %1771 = vmatmul.mubr.bf16.gmra.mrb[52].mxu1 %v3739_v59  ;;  %v3811_v40 = vld [vmem:[%s4834_s1 + $0x1a8] ss:$16 sps:$4 sm:$0xff]  }
  0x9c   : > { %1380 = vmatprep.mubr.bf16.mxu0 %v3713_v41  ;;  %1778 = vmatprep.mubr.bf16.mxu1 %v3741_v60 }
  0xa3   : > { %1381 = vmatmul.mubr.bf16.gmra.mrb[40].mxu0 %v3719_v46  ;;  %1779 = vmatmul.mubr.bf16.gmra.mrb[56].mxu1 %v3747_v61 }
  0xa4   : > { %1390 = vmatprep.mubr.bf16.mxu0 %v3720_v47  ;;  %1786 = vmatprep.mubr.bf16.mxu1 %v3748_v62 }
  0xab   : > { %1391 = vmatmul.mubr.bf16.gmra.mrb[44].mxu0 %v3725_v52  ;;  %1787 = vmatmul.mubr.bf16.gmra.mrb[60].mxu1 %v3753_v63 }
  0xac   : > { %1400 = vmatprep.mubr.bf16.mxu0 %v3727_v53  ;;  %1827 = vmatprep.mubr.bf16.mxu1 %v3760_v0 }
  0xb3   : > { %1401 = vmatmul.mubr.bf16.gmra.mrb[48].mxu0 %v3733_v57  ;;  %1828 = vmatmul.mubr.bf16.vlgmr.msra.gmra.mrb[64].mxu1 %v3758_v1 }
  0xb4   : > { %1410 = vmatprep.mubr.bf16.mxu0 %v3734_v58  ;;  %1835 = vmatprep.mubr.bf16.mxu1 %v3764_v2 }
  0xbb   : > { %1411 = vmatmul.mubr.bf16.gmra.mrb[52].mxu0 %v3739_v59  ;;  %1836 = vmatmul.mubr.bf16.gmra.mrb[68].mxu1 %v3769_v3 }
  0xbc   : > { %1420 = vmatprep.mubr.bf16.mxu0 %v3741_v60  ;;  %1843 = vmatprep.mubr.bf16.mxu1 %v3770_v4 }
  0xc3   : > { %1421 = vmatmul.mubr.bf16.gmra.mrb[56].mxu0 %v3747_v61  ;;  %1844 = vmatmul.mubr.bf16.gmra.mrb[72].mxu1 %v3775_v5 }
  0xc4   : > { %1430 = vmatprep.mubr.bf16.mxu0 %v3748_v62  ;;  %1851 = vmatprep.mubr.bf16.mxu1 %v3776_v6 }
  0xcb   : > { %1431 = vmatmul.mubr.bf16.gmra.mrb[60].mxu0 %v3753_v63  ;;  %1852 = vmatmul.mubr.bf16.gmra.mrb[76].mxu1 %v3781_v7 }
  0xcc   : > { %1473 = vmatprep.mubr.bf16.mxu0 %v3760_v0  ;;  %1859 = vmatprep.mubr.bf16.mxu1 %v3782_v8 }
  0xd3   : > { %1474 = vmatmul.mubr.bf16.vlgmr.msra.gmra.mrb[0].mxu0 %v3758_v1  ;;  %1860 = vmatmul.mubr.bf16.gmra.mrb[80].mxu1 %v3784_v9 }
  0xd4   : > { %1483 = vmatprep.mubr.bf16.mxu0 %v3764_v2  ;;  %1867 = vmatprep.mubr.bf16.mxu1 %v3785_v10 }
  0xdb   : > { %1484 = vmatmul.mubr.bf16.gmra.mrb[4].mxu0 %v3769_v3  ;;  %1868 = vmatmul.mubr.bf16.gmra.mrb[84].mxu1 %v3787_v11 }
  0xdc   : > { %1493 = vmatprep.mubr.bf16.mxu0 %v3770_v4  ;;  %1875 = vmatprep.mubr.bf16.mxu1 %v3788_v12 }
  0xe3   : > { %1494 = vmatmul.mubr.bf16.gmra.mrb[8].mxu0 %v3775_v5  ;;  %1876 = vmatmul.mubr.bf16.gmra.mrb[88].mxu1 %v3790_v13 }
  0xe4   : > { %1503 = vmatprep.mubr.bf16.mxu0 %v3776_v6  ;;  %1883 = vmatprep.mubr.bf16.mxu1 %v3791_v14 }
  0xeb   : > { %1504 = vmatmul.mubr.bf16.gmra.mrb[12].mxu0 %v3781_v7  ;;  %1884 = vmatmul.mubr.bf16.gmra.mrb[92].mxu1 %v3793_v15 }
  0xec   : > { %1513 = vmatprep.mubr.bf16.mxu0 %v3782_v8  ;;  %1891 = vmatprep.mubr.bf16.mxu1 %v3794_v16 }
  0xf3   : > { %1514 = vmatmul.mubr.bf16.gmra.mrb[16].mxu0 %v3784_v9  ;;  %1892 = vmatmul.mubr.bf16.gmra.mrb[96].mxu1 %v3796_v17 }
  0xf4   : > { %1523 = vmatprep.mubr.bf16.mxu0 %v3785_v10  ;;  %1899 = vmatprep.mubr.bf16.mxu1 %v3797_v18 }
  0xfb   : > { %1524 = vmatmul.mubr.bf16.gmra.mrb[20].mxu0 %v3787_v11  ;;  %1900 = vmatmul.mubr.bf16.gmra.mrb[100].mxu1 %v3799_v19 }
  0xfc   : > { %1533 = vmatprep.mubr.bf16.mxu0 %v3788_v12  ;;  %1907 = vmatprep.mubr.bf16.mxu1 %v3800_v20 }
 0x103   : > { %1534 = vmatmul.mubr.bf16.gmra.mrb[24].mxu0 %v3790_v13  ;;  %1908 = vmatmul.mubr.bf16.gmra.mrb[104].mxu1 %v3802_v21 }
 0x104   : > { %1543 = vmatprep.mubr.bf16.mxu0 %v3791_v14  ;;  %1915 = vmatprep.mubr.bf16.mxu1 %v3803_v22 }
 0x106   : > { %v3295_v23 = vpop.f32.mrb[0].mxu1 }
 0x107   : > { %v3296_v25 = vpop.f32.mrb[1].mxu1 }
 0x108   : > { %v4212_v27 = vadd.f32 %v3296_v25, %v3295_v23  ;;  %v3298_v28 = vpop.f32.mrb[2].mxu1 }
 0x109   : > { %v3299_v29 = vpop.f32.mrb[3].mxu1 }
 0x10a   : > { %v4214_v30 = vadd.f32 %v3299_v29, %v3298_v28 }
 0x10b   : > { %1544 = vmatmul.mubr.bf16.gmra.mrb[28].mxu0 %v3793_v15  ;;  %1916 = vmatmul.mubr.bf16.gmra.mrb[108].mxu1 %v3805_v24 }
 0x10c   : > { %1553 = vmatprep.mubr.bf16.mxu0 %v3794_v16  ;;  %1923 = vmatprep.mubr.bf16.mxu1 %v3806_v26 }
 0x10e   : > { %v3301_v31 = vpop.f32.mrb[4].mxu1 }
 0x10f   : > { %v3302_v33 = vpop.f32.mrb[5].mxu1 }
 0x110   : > { %v4222_v35 = vadd.f32 %v3302_v33, %v3301_v31  ;;  %v3304_v36 = vpop.f32.mrb[6].mxu1 }
 0x111   : > { %v3305_v37 = vpop.f32.mrb[7].mxu1 }
 0x112   : > { %v4224_v38 = vadd.f32 %v3305_v37, %v3304_v36 }
 0x113   : > { %1554 = vmatmul.mubr.bf16.gmra.mrb[32].mxu0 %v3796_v17  ;;  %1924 = vmatmul.mubr.bf16.gmra.mrb[112].mxu1 %v3808_v32 }
 0x114   : > { %1563 = vmatprep.mubr.bf16.mxu0 %v3797_v18  ;;  %1931 = vmatprep.mubr.bf16.mxu1 %v3809_v34 }
 0x116   : > { %v3307_v39 = vpop.f32.mrb[8].mxu1 }
 0x117   : > { %v3308_v41 = vpop.f32.mrb[9].mxu1 }
 0x118   : > { %v4232_v43 = vadd.f32 %v3308_v41, %v3307_v39  ;;  %v3310_v44 = vpop.f32.mrb[10].mxu1 }
 0x119   : > { %v3311_v45 = vpop.f32.mrb[11].mxu1 }
 0x11a   : > { %v4234_v46 = vadd.f32 %v3311_v45, %v3310_v44 }
 0x11b   : > { %1564 = vmatmul.mubr.bf16.gmra.mrb[36].mxu0 %v3799_v19  ;;  %1932 = vmatmul.mubr.bf16.gmra.mrb[116].mxu1 %v3811_v40 }
 0x11c   : > { %1573 = vmatprep.mubr.bf16.mxu0 %v3800_v20  ;;  %1939 = vmatprep.mubr.bf16.mxu1 %v3812_v42 }
 0x11e   : > { %v3313_v47 = vpop.f32.mrb[12].mxu1 }
 0x11f   : > { %v3314_v49 = vpop.f32.mrb[13].mxu1 }
 0x120   : > { %v4242_v51 = vadd.f32 %v3314_v49, %v3313_v47  ;;  %v3316_v52 = vpop.f32.mrb[14].mxu1 }
 0x121   : > { %v3317_v53 = vpop.f32.mrb[15].mxu1 }
 0x122   : > { %v4244_v54 = vadd.f32 %v3317_v53, %v3316_v52 }
 0x123   : > { %1574 = vmatmul.mubr.bf16.gmra.mrb[40].mxu0 %v3802_v21  ;;  %1940 = vmatmul.mubr.bf16.gmra.mrb[120].mxu1 %v3814_v48 }
 0x124   : > { %1583 = vmatprep.mubr.bf16.mxu0 %v3803_v22  ;;  %1947 = vmatprep.mubr.bf16.mxu1 %v3815_v50 }
 0x126   : > { %v3319_v55 = vpop.f32.mrb[16].mxu1 }
 0x127   : > { %v3320_v57 = vpop.f32.mrb[17].mxu1 }
 0x128   : > { %v4249_v58 = vadd.f32 %v3320_v57, %v3319_v55  ;;  %v3322_v59 = vpop.f32.mrb[18].mxu1 }
 0x129   : > { %v3323_v60 = vpop.f32.mrb[19].mxu1 }
 0x12a   : > { %v4251_v61 = vadd.f32 %v3323_v60, %v3322_v59 }
 0x12b   : > { %1584 = vmatmul.mubr.bf16.gmra.mrb[44].mxu0 %v3805_v24  ;;  %1948 = vmatmul.mubr.bf16.gmra.mrb[124].mxu1 %v3817_v56 }
 0x12c   : > { %1593 = vmatprep.mubr.bf16.mxu0 %v3806_v26 }
 0x12e   : > { %v3325_v62 = vpop.f32.mrb[20].mxu1 }
 0x12f   : > { %v3326_v63 = vpop.f32.mrb[21].mxu1 }
 0x130   : > { %v4253_v0 = vadd.f32 %v3326_v63, %v3325_v62  ;;  %v3328_v1 = vpop.f32.mrb[22].mxu1 }
 0x131   : > { %v3329_v2 = vpop.f32.mrb[23].mxu1 }
 0x132   : > { %v4255_v3 = vadd.f32 %v3329_v2, %v3328_v1 }
 0x133   : > { %1594 = vmatmul.mubr.bf16.gmra.mrb[48].mxu0 %v3808_v32 }
 0x134   : > { %1603 = vmatprep.mubr.bf16.mxu0 %v3809_v34 }
 0x136   : > { %v3331_v4 = vpop.f32.mrb[24].mxu1 }
 0x137   : > { %v3332_v5 = vpop.f32.mrb[25].mxu1 }
 0x138   : > { %v4257_v6 = vadd.f32 %v3332_v5, %v3331_v4  ;;  %v3334_v7 = vpop.f32.mrb[26].mxu1 }
 0x139   : > { %v3335_v8 = vpop.f32.mrb[27].mxu1 }
 0x13a   : > { %v4259_v9 = vadd.f32 %v3335_v8, %v3334_v7 }
 0x13b   : > { %1604 = vmatmul.mubr.bf16.gmra.mrb[52].mxu0 %v3811_v40 }
 0x13c   : > { %1613 = vmatprep.mubr.bf16.mxu0 %v3812_v42 }
 0x13e   : > { %v3337_v10 = vpop.f32.mrb[28].mxu1 }
 0x13f   : > { %v3338_v11 = vpop.f32.mrb[29].mxu1 }
 0x140   : > { %v4261_v12 = vadd.f32 %v3338_v11, %v3337_v10  ;;  %v3340_v13 = vpop.f32.mrb[30].mxu1 }
 0x141   : > { %v3341_v14 = vpop.f32.mrb[31].mxu1 }
 0x142   : > { %v4263_v15 = vadd.f32 %v3341_v14, %v3340_v13 }
 0x143   : > { %1614 = vmatmul.mubr.bf16.gmra.mrb[56].mxu0 %v3814_v48 }
 0x144   : > { %1623 = vmatprep.mubr.bf16.mxu0 %v3815_v50 }
 0x146   : > { %v3343_v16 = vpop.f32.mrb[32].mxu1 }
 0x147   : > { %v3344_v17 = vpop.f32.mrb[33].mxu1 }
 0x148   : > { %v4265_v18 = vadd.f32 %v3344_v17, %v3343_v16  ;;  %v3346_v19 = vpop.f32.mrb[34].mxu1 }
 0x149   : > { %v3347_v20 = vpop.f32.mrb[35].mxu1 }
 0x14a   : > { %v4267_v21 = vadd.f32 %v3347_v20, %v3346_v19 }
 0x14b   : > { %1624 = vmatmul.mubr.bf16.gmra.mrb[60].mxu0 %v3817_v56 }
 0x14e   : > { %v3349_v22 = vpop.f32.mrb[36].mxu1 }
 0x14f   : > { %v3350_v23 = vpop.f32.mrb[37].mxu1 }
 0x150   : > { %v4269_v24 = vadd.f32 %v3350_v23, %v3349_v22  ;;  %v3352_v25 = vpop.f32.mrb[38].mxu1 }
 0x151   : > { %v3353_v26 = vpop.f32.mrb[39].mxu1 }
 0x152   : > { %v4271_v28 = vadd.f32 %v3353_v26, %v3352_v25 }
 0x156   : > { %v3355_v29 = vpop.f32.mrb[40].mxu1 }
 0x157   : > { %v3356_v31 = vpop.f32.mrb[41].mxu1 }
 0x158   : > { %v4273_v32 = vadd.f32 %v3356_v31, %v3355_v29  ;;  %v3358_v33 = vpop.f32.mrb[42].mxu1 }
 0x159   : > { %v3359_v34 = vpop.f32.mrb[43].mxu1 }
 0x15a   : > { %v4275_v36 = vadd.f32 %v3359_v34, %v3358_v33 }
 0x15e   : > { %v3361_v37 = vpop.f32.mrb[44].mxu1 }
 0x15f   : > { %v3362_v39 = vpop.f32.mrb[45].mxu1 }
 0x160   : > { %v4277_v40 = vadd.f32 %v3362_v39, %v3361_v37  ;;  %v3364_v41 = vpop.f32.mrb[46].mxu1 }
 0x161   : > { %v3365_v42 = vpop.f32.mrb[47].mxu1 }
 0x162   : > { %v4279_v44 = vadd.f32 %v3365_v42, %v3364_v41 }
 0x166   : > { %v3367_v45 = vpop.f32.mrb[48].mxu1 }
 0x167   : > { %v3368_v47 = vpop.f32.mrb[49].mxu1 }
 0x168   : > { %v4281_v48 = vadd.f32 %v3368_v47, %v3367_v45  ;;  %v3370_v49 = vpop.f32.mrb[50].mxu1 }
 0x169   : > { %v3371_v50 = vpop.f32.mrb[51].mxu1 }
 0x16a   : > { %v4283_v52 = vadd.f32 %v3371_v50, %v3370_v49 }
 0x16e   : > { %v3373_v53 = vpop.f32.mrb[52].mxu1 }
 0x16f   : > { %v3374_v55 = vpop.f32.mrb[53].mxu1 }
 0x170   : > { %v4285_v56 = vadd.f32 %v3374_v55, %v3373_v53  ;;  %v3376_v57 = vpop.f32.mrb[54].mxu1 }
 0x171   : > { %v3377_v59 = vpop.f32.mrb[55].mxu1 }
 0x172   : > { %v4287_v60 = vadd.f32 %v3377_v59, %v3376_v57 }
 0x176   : > { %v3379_v62 = vpop.f32.mrb[56].mxu1 }
 0x177   : > { %v3380_v63 = vpop.f32.mrb[57].mxu1 }
 0x178   : > { %v4289_v1 = vadd.f32 %v3380_v63, %v3379_v62  ;;  %v3382_v2 = vpop.f32.mrb[58].mxu1 }
 0x179   : > { %v3383_v4 = vpop.f32.mrb[59].mxu1 }
 0x17a   : > { %v4291_v5 = vadd.f32 %v3383_v4, %v3382_v2 }
 0x17e   : > { %v3385_v7 = vpop.f32.mrb[60].mxu1 }
 0x17f   : > { %v3386_v8 = vpop.f32.mrb[61].mxu1 }
 0x180   : > { %v4293_v10 = vadd.f32 %v3386_v8, %v3385_v7  ;;  %v3388_v11 = vpop.f32.mrb[62].mxu1 }
 0x181   : > { %v3389_v13 = vpop.f32.mrb[63].mxu1 }
 0x182   : > { %v4295_v14 = vadd.f32 %v3389_v13, %v3388_v11 }
 0x186   : > { %v3407_v16 = vpop.f32.mrb[64].mxu1 }
 0x187   : > { %v3408_v17 = vpop.f32.mrb[65].mxu1 }
 0x188   : > { %v3409_v19 = vadd.f32 %v3408_v17, %v3407_v16  ;;  %v3410_v20 = vpop.f32.mrb[66].mxu1 }
 0x189   : > { %v3411_v22 = vpop.f32.mrb[67].mxu1 }
 0x18a   : > { %v4299_v23 = vadd.f32 %v3409_v19, %v4212_v27  ;;  %v3412_v25 = vadd.f32 %v3411_v22, %v3410_v20 }
 0x18c   : > { %v3216_v26 = vpack.c.bf16 %v4299_v23, %v4299_v23  ;;  %v4309_v29 = vadd.f32 %v3412_v25, %v4214_v30 }
 0x18e   : > { %2277 = vst [vmem:[%s4304_s10 + $0x8] sm:$0xf] %v3216_v26  ;;  %v3218_v27 = vpack.c.bf16 %v4309_v29, %v4309_v29  ;;  %v3413_v31 = vpop.f32.mrb[68].mxu1 }
 0x18f   : > { %v3414_v33 = vpop.f32.mrb[69].mxu1 }
 0x190   : > { %2279 = vst [vmem:[%s4304_s10 + $0x14] sm:$0xf] %v3218_v27  ;;  %v3415_v34 = vadd.f32 %v3414_v33, %v3413_v31  ;;  %v3416_v37 = vpop.f32.mrb[70].mxu1 }
 0x191   : > { %v3417_v39 = vpop.f32.mrb[71].mxu1 }
 0x192   : > { %v4316_v41 = vadd.f32 %v3415_v34, %v4222_v35  ;;  %v3418_v42 = vadd.f32 %v3417_v39, %v3416_v37 }
 0x194   : > { %v3220_v30 = vpack.c.bf16 %v4316_v41, %v4316_v41  ;;  %v4321_v45 = vadd.f32 %v3418_v42, %v4224_v38 }
 0x196   : > { %2281 = vst [vmem:[%s4304_s10 + $0x20] sm:$0xf] %v3220_v30  ;;  %v3222_v47 = vpack.c.bf16 %v4321_v45, %v4321_v45  ;;  %v3419_v49 = vpop.f32.mrb[72].mxu1 }
 0x197   : > { %v3420_v50 = vpop.f32.mrb[73].mxu1 }
 0x198   : > { %2283 = vst [vmem:[%s4304_s10 + $0x2c] sm:$0xf] %v3222_v47  ;;  %v3421_v53 = vadd.f32 %v3420_v50, %v3419_v49  ;;  %v3422_v55 = vpop.f32.mrb[74].mxu1 }
 0x199   : > { %v3423_v35 = vpop.f32.mrb[75].mxu1 }
 0x19a   : > { %v4328_v57 = vadd.f32 %v3421_v53, %v4232_v43  ;;  %v3424_v59 = vadd.f32 %v3423_v35, %v3422_v55  ;;  %v2470_v35 = vmul.f32 %v4299_v23, %v4299_v23 }
 0x19c   : > { %v3224_v38 = vpack.c.bf16 %v4328_v57, %v4328_v57  ;;  %v4333_v62 = vadd.f32 %v3424_v59, %v4234_v46 }
 0x19e   : > { %2285 = vst [vmem:[%s4304_s10 + $0x38] sm:$0xf] %v3224_v38  ;;  %v3226_v63 = vpack.c.bf16 %v4333_v62, %v4333_v62  ;;  %v3425_v2 = vpop.f32.mrb[76].mxu1  ;;  %v2473_v38 = vmul.f32 %v4309_v29, %v4309_v29 }
 0x19f   : > { %v3426_v4 = vpop.f32.mrb[77].mxu1 }
 0x1a0   : > { %2287 = vst [vmem:[%s4304_s10 + $0x44] sm:$0xf] %v3226_v63  ;;  %v3427_v7 = vadd.f32 %v3426_v4, %v3425_v2  ;;  %v3428_v8 = vpop.f32.mrb[78].mxu1 }
 0x1a1   : > { %v3429_v11 = vpop.f32.mrb[79].mxu1 }
 0x1a2   : > { %v4340_v43 = vadd.f32 %v3427_v7, %v4242_v51  ;;  %v3430_v13 = vadd.f32 %v3429_v11, %v3428_v8 }
 0x1a4   : > { %v3228_v16 = vpack.c.bf16 %v4340_v43, %v4340_v43  ;;  %v4345_v46 = vadd.f32 %v3430_v13, %v4244_v54 }
 0x1a6   : > { %v1475_v17 = vpop.f32.mrb[0].mxu0  ;;  %2289 = vst [vmem:[%s4304_s10 + $0x50] sm:$0xf] %v3228_v16  ;;  %v3230_v19 = vpack.c.bf16 %v4345_v46, %v4345_v46  ;;  %v3431_v22 = vpop.f32.mrb[80].mxu1 }
 0x1a7   : > { %v2468_v20 = vmul.f32 %v1475_v17, %v1475_v17  ;;  %v1477_v25 = vpop.f32.mrb[1].mxu0  ;;  %v3432_v51 = vpop.f32.mrb[81].mxu1 }
 0x1a8   : > { %v3215_v26 = vpack.c.bf16 %v1477_v25, %v1475_v17  ;;  %v2469_v27 = vmul.f32 %v1477_v25, %v1477_v25  ;;  %v1479_v31 = vpop.f32.mrb[2].mxu0  ;;  %v2340_v33 = vadd.f32 %v1477_v25, %v1475_v17  ;;  %2291 = vst [vmem:[%s4304_s10 + $0x5c] sm:$0xf] %v3230_v19  ;;  %v3433_v34 = vadd.f32 %v3432_v51, %v3431_v22  ;;  %v3434_v54 = vpop.f32.mrb[82].mxu1 }
 0x1a9   : > { %v2471_v37 = vmul.f32 %v1479_v31, %v1479_v31  ;;  %v1481_v39 = vpop.f32.mrb[3].mxu0  ;;  %v3435_v47 = vpop.f32.mrb[83].mxu1 }
 0x1aa   : > { %2276 = vst [vmem:[%s4304_s10] sm:$0xff] %v3215_v26  ;;  %v3217_v42 = vpack.c.bf16 %v1481_v39, %v1479_v31  ;;  %v2472_v30 = vmul.f32 %v1481_v39, %v1481_v39  ;;  %v2341_v49 = vadd.f32 %v2340_v33, %v4299_v23  ;;  %v2344_v50 = vadd.f32 %v1481_v39, %v1479_v31 }
 0x1ab   : > { %v4354_v53 = vadd.f32 %v3433_v34, %v4249_v58  ;;  %v3436_v55 = vadd.f32 %v3435_v47, %v3434_v54  ;;  %v2564_v59 = vadd.f32 %v2469_v27, %v2468_v20  ;;  %v2476_v31 = vmul.f32 %v4316_v41, %v4316_v41 }
 0x1ac   : > { %2278 = vst [vmem:[%s4304_s10 + $0xc] sm:$0xff] %v3217_v42  ;;  %2342 = vadd.xlane.f32.xlu0 %v2341_v49  ;;  %v2568_v63 = vadd.f32 %v2472_v30, %v2471_v37  ;;  %v2345_v2 = vadd.f32 %v2344_v50, %v4309_v29  ;;  %v2479_v50 = vmul.f32 %v4321_v45, %v4321_v45 }
 0x1ad   : > { %v3232_v4 = vpack.c.bf16 %v4354_v53, %v4354_v53  ;;  %v4365_v7 = vadd.f32 %v3436_v55, %v4251_v61  ;;  %v2565_v58 = vadd.f32 %v2564_v59, %v2470_v35 }
 0x1ae   : > { %v1485_v8 = vpop.f32.mrb[4].mxu0  ;;  %v2569_v11 = vadd.f32 %v2568_v63, %v2473_v38  ;;  %v3437_v16 = vpop.f32.mrb[84].mxu1 }
 0x1af   : > { %2293 = vst [vmem:[%s4304_s10 + $0x68] sm:$0xf] %v3232_v4  ;;  %v3234_v23 = vpack.c.bf16 %v4365_v7, %v4365_v7  ;;  %v2474_v13 = vmul.f32 %v1485_v8, %v1485_v8  ;;  %v1487_v17 = vpop.f32.mrb[5].mxu0  ;;  %v3438_v20 = vpop.f32.mrb[85].mxu1 }
 0x1b0   : > { %v3219_v19 = vpack.c.bf16 %v1487_v17, %v1485_v8  ;;  %v2475_v29 = vmul.f32 %v1487_v17, %v1487_v17  ;;  %2570 = vadd.xlane.f32.xlu1 %v2569_v11  ;;  %2346 = vadd.xlane.f32.xlu0 %v2345_v2  ;;  %v1489_v22 = vpop.f32.mrb[6].mxu0  ;;  %v2348_v61 = vadd.f32 %v1487_v17, %v1485_v8  ;;  %v3440_v26 = vpop.f32.mrb[86].mxu1 }
 0x1b1   : > { %2295 = vst [vmem:[%s4304_s10 + $0x74] sm:$0xf] %v3234_v23  ;;  %v3439_v25 = vadd.f32 %v3438_v20, %v3437_v16  ;;  %v2477_v27 = vmul.f32 %v1489_v22, %v1489_v22  ;;  %v1491_v51 = vpop.f32.mrb[7].mxu0  ;;  %v3441_v37 = vpop.f32.mrb[87].mxu1  ;;  %v3842_v20 = vmov 0.0  }
 0x1b2   : > { %2280 = vst [vmem:[%s4304_s10 + $0x18] sm:$0xff] %v3219_v19  ;;  %v3221_v33 = vpack.c.bf16 %v1491_v51, %v1489_v22  ;;  %v2478_v34 = vmul.f32 %v1491_v51, %v1491_v51  ;;  %v2349_v54 = vadd.f32 %v2348_v61, %v4316_v41  ;;  %v2572_v39 = vadd.f32 %v2475_v29, %v2474_v13 }
 0x1b3   : > { %v4376_v42 = vadd.f32 %v3439_v25, %v4253_v0  ;;  %v3442_v30 = vadd.f32 %v3441_v37, %v3440_v26  ;;  %v2352_v47 = vadd.f32 %v1491_v51, %v1489_v22  ;;  %v2482_v29 = vmul.f32 %v4328_v57, %v4328_v57  ;;  %2731 = vst.msk [vmem:[%s4396_s18 + $0x8] sm:$0xff] %vm2729_vm0, %v3842_v20 }
 0x1b4   : > { %2282 = vst [vmem:[%s4304_s10 + $0x24] sm:$0xff] %v3221_v33  ;;  %2566 = vadd.xlane.f32.xlu0 %v2565_v58  ;;  %2350 = vadd.xlane.f32.xlu1 %v2349_v54  ;;  %v2573_v49 = vadd.f32 %v2572_v39, %v2476_v31  ;;  %v2576_v55 = vadd.f32 %v2478_v34, %v2477_v27  ;;  %2730 = vst.msk [vmem:[%s4396_s18] sm:$0xff] %vm2729_vm0, %v3842_v20 }
 0x1b5   : > { %v3236_v35 = vpack.c.bf16 %v4376_v42, %v4376_v42  ;;  %v4384_v41 = vadd.f32 %v3442_v30, %v4255_v3  ;;  %v2353_v59 = vadd.f32 %v2352_v47, %v4321_v45  ;;  %2732 = vst.msk [vmem:[%s4396_s18 + $0x10] sm:$0xff] %vm2729_vm0, %v3842_v20  ;;  %2733 = vst.msk [vmem:[%s4396_s18 + $0x18] sm:$0xff] %vm2729_vm0, %v3842_v20 }
 0x1b6   : > { %v1495_v0 = vpop.f32.mrb[8].mxu0  ;;  %v4387_v38 = vadd.f32 %v2576_v55, %v2479_v50  ;;  %v3443_v4 = vpop.f32.mrb[88].mxu1  ;;  %2734 = vst.msk [vmem:[%s4396_s18 + $0x20] sm:$0xff] %vm2729_vm0, %v3842_v20  ;;  %2735 = vst.msk [vmem:[%s4396_s18 + $0x28] sm:$0xff] %vm2729_vm0, %v3842_v20  ;;  %v2485_v37 = vmul.f32 %v4333_v62, %v4333_v62 }
 0x1b7   : > { %2297 = vst [vmem:[%s4304_s10 + $0x80] sm:$0xf] %v3236_v35  ;;  %v3238_v63 = vpack.c.bf16 %v4384_v41, %v4384_v41  ;;  %v2480_v2 = vmul.f32 %v1495_v0, %v1495_v0  ;;  %v1497_v58 = vpop.f32.mrb[9].mxu0  ;;  %v3444_v8 = vpop.f32.mrb[89].mxu1  ;;  %2736 = vst.msk [vmem:[%s4396_s18 + $0x30] sm:$0xff] %vm2729_vm0, %v3842_v20 }
 0x1b8   : > { %v3223_v3 = vpack.c.bf16 %v1497_v58, %v1495_v0  ;;  %v2481_v45 = vmul.f32 %v1497_v58, %v1497_v58  ;;  %2574 = vadd.xlane.f32.xlu0 %v2573_v49  ;;  %2354 = vadd.xlane.f32.xlu1 %v2353_v59  ;;  %v1499_v11 = vpop.f32.mrb[10].mxu0  ;;  %v2356_v23 = vadd.f32 %v1497_v58, %v1495_v0  ;;  %v3446_v16 = vpop.f32.mrb[90].mxu1 }
 0x1b9   : > { %2299 = vst [vmem:[%s4304_s10 + $0x8c] sm:$0xf] %v3238_v63  ;;  %v3445_v13 = vadd.f32 %v3444_v8, %v3443_v4  ;;  %v2483_v17 = vmul.f32 %v1499_v11, %v1499_v11  ;;  %v1501_v19 = vpop.f32.mrb[11].mxu0  ;;  %2737 = vst.msk [vmem:[%s4396_s18 + $0x38] sm:$0xff] %vm2729_vm0, %v3842_v20  ;;  %v3447_v25 = vpop.f32.mrb[91].mxu1 }
 0x1ba   : > { %2738 = vst.msk [vmem:[%s4396_s18 + $0x40] sm:$0xff] %vm2729_vm0, %v3842_v20  ;;  %2739 = vst.msk [vmem:[%s4396_s18 + $0x48] sm:$0xff] %vm2729_vm0, %v3842_v20  ;;  %v3225_v22 = vpack.c.bf16 %v1501_v19, %v1499_v11  ;;  %v2484_v61 = vmul.f32 %v1501_v19, %v1501_v19  ;;  %v2357_v26 = vadd.f32 %v2356_v23, %v4328_v57 }
 0x1bb   : > { %2740 = vst.msk [vmem:[%s4396_s18 + $0x50] sm:$0xff] %vm2729_vm0, %v3842_v20  ;;  %2741 = vst.msk [vmem:[%s4396_s18 + $0x58] sm:$0xff] %vm2729_vm0, %v3842_v20  ;;  %v2580_v27 = vadd.f32 %v2481_v45, %v2480_v2  ;;  %v4468_v51 = vadd.f32 %v3445_v13, %v4257_v6  ;;  %v3448_v31 = vadd.f32 %v3447_v25, %v3446_v16 }
 0x1bc   : > { %2742 = vst.msk [vmem:[%s4396_s18 + $0x60] sm:$0xff] %vm2729_vm0, %v3842_v20  ;;  %2743 = vst.msk [vmem:[%s4396_s18 + $0x68] sm:$0xff] %vm2729_vm0, %v3842_v20  ;;  %v2360_v33 = vadd.f32 %v1501_v19, %v1499_v11  ;;  %2578 = vadd.xlane.f32.xlu1 %v4387_v38  ;;  %2358 = vadd.xlane.f32.xlu0 %v2357_v26  ;;  %v2584_v54 = vadd.f32 %v2484_v61, %v2483_v17 }
 0x1bd   : > { %2744 = vst.msk [vmem:[%s4396_s18 + $0x70] sm:$0xff] %vm2729_vm0, %v3842_v20  ;;  %2745 = vst.msk [vmem:[%s4396_s18 + $0x78] sm:$0xff] %vm2729_vm0, %v3842_v20  ;;  %v2581_v34 = vadd.f32 %v2580_v27, %v2482_v29  ;;  %v3240_v39 = vpack.c.bf16 %v4468_v51, %v4468_v51  ;;  %v4477_v57 = vadd.f32 %v3448_v31, %v4259_v9 }
 0x1be   : > { %2746 = vst.msk [vmem:[%s4396_s18 + $0x80] sm:$0xff] %vm2729_vm0, %v3842_v20  ;;  %2747 = vst.msk [vmem:[%s4396_s18 + $0x88] sm:$0xff] %vm2729_vm0, %v3842_v20  ;;  %v2361_v6 = vadd.f32 %v2360_v33, %v4333_v62  ;;  %v1505_v30 = vpop.f32.mrb[12].mxu0  ;;  %v2585_v47 = vadd.f32 %v2584_v54, %v2485_v37  ;;  %v3449_v55 = vpop.f32.mrb[92].mxu1 }
 0x1bf   : > { %2748 = vst.msk [vmem:[%s4396_s18 + $0x90] sm:$0xff] %vm2729_vm0, %v3842_v20  ;;  %2749 = vst.msk [vmem:[%s4396_s18 + $0x98] sm:$0xff] %vm2729_vm0, %v3842_v20  ;;  %v3242_v49 = vpack.c.bf16 %v4477_v57, %v4477_v57  ;;  %v2486_v50 = vmul.f32 %v1505_v30, %v1505_v30  ;;  %v1507_v35 = vpop.f32.mrb[13].mxu0  ;;  %v3450_v38 = vpop.f32.mrb[93].mxu1 }
 0x1c0   : > { %2750 = vst.msk [vmem:[%s4396_s18 + $0xa0] sm:$0xff] %vm2729_vm0, %v3842_v20  ;;  %2751 = vst.msk [vmem:[%s4396_s18 + $0xa8] sm:$0xff] %vm2729_vm0, %v3842_v20  ;;  %v3227_v59 = vpack.c.bf16 %v1507_v35, %v1505_v30  ;;  %v2487_v0 = vmul.f32 %v1507_v35, %v1507_v35  ;;  %2582 = vadd.xlane.f32.xlu0 %v2581_v34  ;;  %2362 = vadd.xlane.f32.xlu1 %v2361_v6  ;;  %v1509_v9 = vpop.f32.mrb[14].mxu0  ;;  %v3452_v2 = vpop.f32.mrb[94].mxu1 }
 0x1c1   : > { %2752 = vst.msk [vmem:[%s4396_s18 + $0xb0] sm:$0xff] %vm2729_vm0, %v3842_v20  ;;  %2753 = vst.msk [vmem:[%s4396_s18 + $0xb8] sm:$0xff] %vm2729_vm0, %v3842_v20  ;;  %v2364_v63 = vadd.f32 %v1507_v35, %v1505_v30  ;;  %v3451_v62 = vadd.f32 %v3450_v38, %v3449_v55  ;;  %v2489_v4 = vmul.f32 %v1509_v9, %v1509_v9  ;;  %v1511_v58 = vpop.f32.mrb[15].mxu0  ;;  %v3453_v11 = vpop.f32.mrb[95].mxu1 }
 0x1c2   : > { %2754 = vst.msk [vmem:[%s4396_s18 + $0xc0] sm:$0xff] %vm2729_vm0, %v3842_v20  ;;  %2755 = vst.msk [vmem:[%s4396_s18 + $0xc8] sm:$0xff] %vm2729_vm0, %v3842_v20  ;;  %v3229_v45 = vpack.c.bf16 %v1511_v58, %v1509_v9  ;;  %v2490_v8 = vmul.f32 %v1511_v58, %v1511_v58  ;;  %v2588_v13 = vadd.f32 %v2487_v0, %v2486_v50 }
 0x1c3   : > { %2756 = vst.msk [vmem:[%s4396_s18 + $0xd0] sm:$0xff] %vm2729_vm0, %v3842_v20  ;;  %2757 = vst.msk [vmem:[%s4396_s18 + $0xd8] sm:$0xff] %vm2729_vm0, %v3842_v20  ;;  %v2365_v23 = vadd.f32 %v2364_v63, %v4340_v43  ;;  %v4489_v16 = vadd.f32 %v3451_v62, %v4261_v12  ;;  %v3454_v17 = vadd.f32 %v3453_v11, %v3452_v2 }
 0x1c4   : > { %2758 = vst.msk [vmem:[%s4396_s18 + $0xe0] sm:$0xff] %vm2729_vm0, %v3842_v20  ;;  %2759 = vst.msk [vmem:[%s4396_s18 + $0xe8] sm:$0xff] %vm2729_vm0, %v3842_v20  ;;  %v2368_v19 = vadd.f32 %v1511_v58, %v1509_v9  ;;  %2586 = vadd.xlane.f32.xlu1 %v2585_v47  ;;  %v2494_v50 = vmul.f32 %v4354_v53, %v4354_v53 }
 0x1c5   : > { %2760 = vst.msk [vmem:[%s4396_s18 + $0xf0] sm:$0xff] %vm2729_vm0, %v3842_v20  ;;  %2761 = vst.msk [vmem:[%s4396_s18 + $0xf8] sm:$0xff] %vm2729_vm0, %v3842_v20  ;;  %2366 = vadd.xlane.f32.xlu0 %v2365_v23  ;;  %v2491_v20 = vmul.f32 %v4345_v46, %v4345_v46  ;;  %v3244_v61 = vpack.c.bf16 %v4489_v16, %v4489_v16 }
 0x1c6   : > { %2284 = vst [vmem:[%s4304_s10 + $0x30] sm:$0xff] %v3223_v3  ;;  %2286 = vst [vmem:[%s4304_s10 + $0x3c] sm:$0xff] %v3225_v22  ;;  %v2488_v3 = vmul.f32 %v4340_v43, %v4340_v43  ;;  %v2592_v22 = vadd.f32 %v2490_v8, %v2489_v4  ;;  %v4497_v43 = vadd.f32 %v3454_v17, %v4263_v15  ;;  %v1515_v25 = vpop.f32.mrb[16].mxu0  ;;  %v3455_v33 = vpop.f32.mrb[96].mxu1 }
 0x1c7   : > { %2301 = vst [vmem:[%s4304_s10 + $0x98] sm:$0xf] %v3240_v39  ;;  %2303 = vst [vmem:[%s4304_s10 + $0xa4] sm:$0xf] %v3242_v49  ;;  %v2369_v12 = vadd.f32 %v2368_v19, %v4345_v46  ;;  %v2492_v31 = vmul.f32 %v1515_v25, %v1515_v25  ;;  %v1517_v34 = vpop.f32.mrb[17].mxu0  ;;  %v3456_v39 = vpop.f32.mrb[97].mxu1  ;;  %v2497_v4 = vmul.f32 %v4365_v7, %v4365_v7 }
 0x1c8   : > { %2288 = vst [vmem:[%s4304_s10 + $0x48] sm:$0xff] %v3227_v59  ;;  %2290 = vst [vmem:[%s4304_s10 + $0x54] sm:$0xff] %v3229_v45  ;;  %v2589_v29 = vadd.f32 %v2588_v13, %v2488_v3  ;;  %v2593_v26 = vadd.f32 %v2592_v22, %v2491_v20  ;;  %v3246_v27 = vpack.c.bf16 %v4497_v43, %v4497_v43  ;;  %v1519_v15 = vpop.f32.mrb[18].mxu0  ;;  %v3458_v30 = vpop.f32.mrb[98].mxu1 }
 0x1c9   : > { %2305 = vst [vmem:[%s4304_s10 + $0xb0] sm:$0xf] %v3244_v61  ;;  %v3231_v37 = vpack.c.bf16 %v1517_v34, %v1515_v25  ;;  %v2493_v54 = vmul.f32 %v1517_v34, %v1517_v34  ;;  %2370 = vadd.xlane.f32.xlu1 %v2369_v12  ;;  %v2372_v6 = vadd.f32 %v1517_v34, %v1515_v25  ;;  %v1521_v49 = vpop.f32.mrb[19].mxu0  ;;  %v3459_v59 = vpop.f32.mrb[99].mxu1 }
 0x1ca   : > { %2590 = vadd.xlane.f32.xlu0 %v2589_v29  ;;  %2307 = vst [vmem:[%s4304_s10 + $0xbc] sm:$0xf] %v3246_v27  ;;  %v3457_v46 = vadd.f32 %v3456_v39, %v3455_v33  ;;  %v2495_v47 = vmul.f32 %v1519_v15, %v1519_v15  ;;  %v3233_v55 = vpack.c.bf16 %v1521_v49, %v1519_v15 }
 0x1cb   : > { %2292 = vst [vmem:[%s4304_s10 + $0x60] sm:$0xff] %v3231_v37  ;;  %v2496_v35 = vmul.f32 %v1521_v49, %v1521_v49  ;;  %v2373_v0 = vadd.f32 %v2372_v6, %v4354_v53  ;;  %v2596_v38 = vadd.f32 %v2493_v54, %v2492_v31  ;;  %v3460_v63 = vadd.f32 %v3459_v59, %v3458_v30 }
 0x1cc   : > { %v4509_v9 = vadd.f32 %v3457_v46, %v4265_v18  ;;  %v2376_v62 = vadd.f32 %v1521_v49, %v1519_v15  ;;  %2294 = vst [vmem:[%s4304_s10 + $0x6c] sm:$0xff] %v3233_v55  ;;  %v2503_v46 = vmul.f32 %v4384_v41, %v4384_v41 }
 0x1cd   : > { %2594 = vadd.xlane.f32.xlu1 %v2593_v26  ;;  %v2597_v2 = vadd.f32 %v2596_v38, %v2494_v50  ;;  %v2600_v58 = vadd.f32 %v2496_v35, %v2495_v47  ;;  %v4517_v53 = vadd.f32 %v3460_v63, %v4267_v21  ;;  %v2500_v26 = vmul.f32 %v4376_v42, %v4376_v42 }
 0x1ce   : > { %2374 = vadd.xlane.f32.xlu0 %v2373_v0  ;;  %v3248_v3 = vpack.c.bf16 %v4509_v9, %v4509_v9  ;;  %v2377_v18 = vadd.f32 %v2376_v62, %v4365_v7  ;;  %v1525_v45 = vpop.f32.mrb[20].mxu0  ;;  %v3461_v13 = vpop.f32.mrb[100].mxu1 }
 0x1cf   : > { %v2601_v8 = vadd.f32 %v2600_v58, %v2497_v4  ;;  %v3250_v11 = vpack.c.bf16 %v4517_v53, %v4517_v53  ;;  %v2498_v23 = vmul.f32 %v1525_v45, %v1525_v45  ;;  %v1527_v17 = vpop.f32.mrb[21].mxu0  ;;  %v3462_v20 = vpop.f32.mrb[101].mxu1 }
 0x1d0   : > { %2309 = vst [vmem:[%s4304_s10 + $0xc8] sm:$0xf] %v3248_v3  ;;  %v3235_v19 = vpack.c.bf16 %v1527_v17, %v1525_v45  ;;  %v2499_v29 = vmul.f32 %v1527_v17, %v1527_v17  ;;  %v1529_v21 = vpop.f32.mrb[22].mxu0  ;;  %v2380_v22 = vadd.f32 %v1527_v17, %v1525_v45  ;;  %v3463_v7 = vadd.f32 %v3462_v20, %v3461_v13  ;;  %v3464_v61 = vpop.f32.mrb[102].mxu1 }
 0x1d1   : > { %2378 = vadd.xlane.f32.xlu1 %v2377_v18  ;;  %2311 = vst [vmem:[%s4304_s10 + $0xd4] sm:$0xf] %v3250_v11  ;;  %v2501_v12 = vmul.f32 %v1529_v21, %v1529_v21  ;;  %v1531_v25 = vpop.f32.mrb[23].mxu0  ;;  %v3465_v33 = vpop.f32.mrb[103].mxu1  ;;  %v2506_v18 = vmul.f32 %v4468_v51, %v4468_v51 }
 0x1d2   : > { %2598 = vadd.xlane.f32.xlu0 %v2597_v2  ;;  %2296 = vst [vmem:[%s4304_s10 + $0x78] sm:$0xff] %v3235_v19  ;;  %v3237_v27 = vpack.c.bf16 %v1531_v25, %v1529_v21  ;;  %v2502_v31 = vmul.f32 %v1531_v25, %v1531_v25  ;;  %v2381_v34 = vadd.f32 %v2380_v22, %v4376_v42 }
 0x1d3   : > { %v2604_v37 = vadd.f32 %v2499_v29, %v2498_v23  ;;  %v4529_v54 = vadd.f32 %v3463_v7, %v4269_v24  ;;  %v3466_v39 = vadd.f32 %v3465_v33, %v3464_v61  ;;  %v2384_v15 = vadd.f32 %v1531_v25, %v1529_v21 }
 0x1d4   : > { %2298 = vst [vmem:[%s4304_s10 + $0x84] sm:$0xff] %v3237_v27  ;;  %v2608_v30 = vadd.f32 %v2502_v31, %v2501_v12  ;;  %v2509_v21 = vmul.f32 %v4477_v57, %v4477_v57 }
 0x1d5   : > { %2602 = vadd.xlane.f32.xlu1 %v2601_v8  ;;  %v2605_v6 = vadd.f32 %v2604_v37, %v2500_v26  ;;  %v3252_v47 = vpack.c.bf16 %v4529_v54, %v4529_v54  ;;  %v4537_v42 = vadd.f32 %v3466_v39, %v4271_v28  ;;  %v2385_v24 = vadd.f32 %v2384_v15, %v4384_v41 }
 0x1d6   : > { %2382 = vadd.xlane.f32.xlu0 %v2381_v34  ;;  %v1535_v49 = vpop.f32.mrb[24].mxu0  ;;  %v2609_v50 = vadd.f32 %v2608_v30, %v2503_v46  ;;  %v3467_v59 = vpop.f32.mrb[104].mxu1  ;;  %v2512_v30 = vmul.f32 %v4489_v16, %v4489_v16 }
 0x1d7   : > { %2313 = vst [vmem:[%s4304_s10 + $0xe0] sm:$0xf] %v3252_v47  ;;  %v3254_v55 = vpack.c.bf16 %v4537_v42, %v4537_v42  ;;  %v2504_v35 = vmul.f32 %v1535_v49, %v1535_v49  ;;  %v1537_v0 = vpop.f32.mrb[25].mxu0  ;;  %v3468_v62 = vpop.f32.mrb[105].mxu1 }
 0x1d8   : > { %v3239_v38 = vpack.c.bf16 %v1537_v0, %v1535_v49  ;;  %v2505_v63 = vmul.f32 %v1537_v0, %v1537_v0  ;;  %v1539_v28 = vpop.f32.mrb[26].mxu0  ;;  %v2388_v2 = vadd.f32 %v1537_v0, %v1535_v49  ;;  %v3469_v41 = vadd.f32 %v3468_v62, %v3467_v59  ;;  %v3470_v4 = vpop.f32.mrb[106].mxu1 }
 0x1d9   : > { %2386 = vadd.xlane.f32.xlu1 %v2385_v24  ;;  %2315 = vst [vmem:[%s4304_s10 + $0xec] sm:$0xf] %v3254_v55  ;;  %v2507_v58 = vmul.f32 %v1539_v28, %v1539_v28  ;;  %v1541_v3 = vpop.f32.mrb[27].mxu0  ;;  %v3471_v11 = vpop.f32.mrb[107].mxu1 }
 0x1da   : > { %2606 = vadd.xlane.f32.xlu0 %v2605_v6  ;;  %2300 = vst [vmem:[%s4304_s10 + $0x90] sm:$0xff] %v3239_v38  ;;  %v3241_v45 = vpack.c.bf16 %v1541_v3, %v1539_v28  ;;  %v2508_v8 = vmul.f32 %v1541_v3, %v1541_v3  ;;  %v2389_v23 = vadd.f32 %v2388_v2, %v4468_v51 }
 0x1db   : > { %v2612_v13 = vadd.f32 %v2505_v63, %v2504_v35  ;;  %v4549_v17 = vadd.f32 %v3469_v41, %v4273_v32  ;;  %v3472_v19 = vadd.f32 %v3471_v11, %v3470_v4  ;;  %v2392_v29 = vadd.f32 %v1541_v3, %v1539_v28 }
 0x1dc   : > { %2302 = vst [vmem:[%s4304_s10 + $0x9c] sm:$0xff] %v3241_v45  ;;  %v2616_v22 = vadd.f32 %v2508_v8, %v2507_v58  ;;  %v2515_v63 = vmul.f32 %v4497_v43, %v4497_v43 }
 0x1dd   : > { %2610 = vadd.xlane.f32.xlu1 %v2609_v50  ;;  %v2613_v20 = vadd.f32 %v2612_v13, %v2506_v18  ;;  %v3256_v7 = vpack.c.bf16 %v4549_v17, %v4549_v17  ;;  %v4557_v51 = vadd.f32 %v3472_v19, %v4275_v36  ;;  %v2393_v32 = vadd.f32 %v2392_v29, %v4477_v57 }
 0x1de   : > { %2390 = vadd.xlane.f32.xlu0 %v2389_v23  ;;  %v1545_v61 = vpop.f32.mrb[28].mxu0  ;;  %v2617_v12 = vadd.f32 %v2616_v22, %v2509_v21  ;;  %v3473_v27 = vpop.f32.mrb[108].mxu1 }
 0x1df   : > { %2317 = vst [vmem:[%s4304_s10 + $0xf8] sm:$0xf] %v3256_v7  ;;  %v3258_v25 = vpack.c.bf16 %v4557_v51, %v4557_v51  ;;  %v2510_v26 = vmul.f32 %v1545_v61, %v1545_v61  ;;  %v1547_v31 = vpop.f32.mrb[29].mxu0  ;;  %v3474_v37 = vpop.f32.mrb[109].mxu1 }
 0x1e0   : > { %v3243_v33 = vpack.c.bf16 %v1547_v31, %v1545_v61  ;;  %v2511_v34 = vmul.f32 %v1547_v31, %v1547_v31  ;;  %v1549_v36 = vpop.f32.mrb[30].mxu0  ;;  %v2396_v39 = vadd.f32 %v1547_v31, %v1545_v61  ;;  %v3475_v57 = vadd.f32 %v3474_v37, %v3473_v27  ;;  %v3476_v15 = vpop.f32.mrb[110].mxu1 }
 0x1e1   : > { %2394 = vadd.xlane.f32.xlu1 %v2393_v32  ;;  %2319 = vst [vmem:[%s4304_s10 + $0x104] sm:$0xf] %v3258_v25  ;;  %v2513_v6 = vmul.f32 %v1549_v36, %v1549_v36  ;;  %v1551_v46 = vpop.f32.mrb[31].mxu0  ;;  %v3477_v49 = vpop.f32.mrb[111].mxu1  ;;  %v2521_v31 = vmul.f32 %v4517_v53, %v4517_v53 }
 0x1e2   : > { %2614 = vadd.xlane.f32.xlu0 %v2613_v20  ;;  %2304 = vst [vmem:[%s4304_s10 + $0xa8] sm:$0xff] %v3243_v33  ;;  %v3245_v47 = vpack.c.bf16 %v1551_v46, %v1549_v36  ;;  %v2514_v24 = vmul.f32 %v1551_v46, %v1551_v46  ;;  %v2397_v50 = vadd.f32 %v2396_v39, %v4489_v16 }
 0x1e3   : > { %v2620_v55 = vadd.f32 %v2511_v34, %v2510_v26  ;;  %v4569_v35 = vadd.f32 %v3475_v57, %v4277_v40  ;;  %v3478_v59 = vadd.f32 %v3477_v49, %v3476_v15  ;;  %v2400_v0 = vadd.f32 %v1551_v46, %v1549_v36 }
 0x1e4   : > { %2306 = vst [vmem:[%s4304_s10 + $0xb4] sm:$0xff] %v3245_v47  ;;  %v2624_v62 = vadd.f32 %v2514_v24, %v2513_v6  ;;  %v2518_v20 = vmul.f32 %v4509_v9, %v4509_v9 }
 0x1e5   : > { %2618 = vadd.xlane.f32.xlu1 %v2617_v12  ;;  %v2621_v38 = vadd.f32 %v2620_v55, %v2512_v30  ;;  %v3260_v28 = vpack.c.bf16 %v4569_v35, %v4569_v35  ;;  %v4577_v16 = vadd.f32 %v3478_v59, %v4279_v44  ;;  %v2401_v40 = vadd.f32 %v2400_v0, %v4497_v43 }
 0x1e6   : > { %2398 = vadd.xlane.f32.xlu0 %v2397_v50  ;;  %v1555_v2 = vpop.f32.mrb[32].mxu0  ;;  %v2625_v41 = vadd.f32 %v2624_v62, %v2515_v63  ;;  %v3479_v3 = vpop.f32.mrb[112].mxu1  ;;  %v2524_v59 = vmul.f32 %v4529_v54, %v4529_v54 }
 0x1e7   : > { %2321 = vst [vmem:[%s4304_s10 + $0x110] sm:$0xf] %v3260_v28  ;;  %v3262_v4 = vpack.c.bf16 %v4577_v16, %v4577_v16  ;;  %v2516_v58 = vmul.f32 %v1555_v2, %v1555_v2  ;;  %v1557_v18 = vpop.f32.mrb[33].mxu0  ;;  %v3480_v11 = vpop.f32.mrb[113].mxu1 }
 0x1e8   : > { %v3247_v45 = vpack.c.bf16 %v1557_v18, %v1555_v2  ;;  %v2517_v8 = vmul.f32 %v1557_v18, %v1557_v18  ;;  %v1559_v44 = vpop.f32.mrb[34].mxu0  ;;  %v2404_v23 = vadd.f32 %v1557_v18, %v1555_v2  ;;  %v3481_v43 = vadd.f32 %v3480_v11, %v3479_v3  ;;  %v3482_v13 = vpop.f32.mrb[114].mxu1 }
 0x1e9   : > { %2402 = vadd.xlane.f32.xlu1 %v2401_v40  ;;  %2323 = vst [vmem:[%s4304_s10 + $0x11c] sm:$0xf] %v3262_v4  ;;  %v2519_v19 = vmul.f32 %v1559_v44, %v1559_v44  ;;  %v1561_v29 = vpop.f32.mrb[35].mxu0  ;;  %v3483_v7 = vpop.f32.mrb[115].mxu1 }
 0x1ea   : > { %2622 = vadd.xlane.f32.xlu0 %v2621_v38  ;;  %2308 = vst [vmem:[%s4304_s10 + $0xc0] sm:$0xff] %v3247_v45  ;;  %v3249_v21 = vpack.c.bf16 %v1561_v29, %v1559_v44  ;;  %v2520_v22 = vmul.f32 %v1561_v29, %v1561_v29  ;;  %v2405_v32 = vadd.f32 %v2404_v23, %v4509_v9 }
 0x1eb   : > { %v2628_v61 = vadd.f32 %v2517_v8, %v2516_v58  ;;  %v4589_v12 = vadd.f32 %v3481_v43, %v4281_v48  ;;  %v3484_v25 = vadd.f32 %v3483_v7, %v3482_v13  ;;  %v2408_v26 = vadd.f32 %v1561_v29, %v1559_v44 }
 0x1ec   : > { %2310 = vst [vmem:[%s4304_s10 + $0xcc] sm:$0xff] %v3249_v21  ;;  %v2632_v33 = vadd.f32 %v2520_v22, %v2519_v19  ;;  %v2527_v58 = vmul.f32 %v4537_v42, %v4537_v42 }
 0x1ed   : > { %2626 = vadd.xlane.f32.xlu1 %v2625_v41  ;;  %v2629_v27 = vadd.f32 %v2628_v61, %v2518_v20  ;;  %v3264_v34 = vpack.c.bf16 %v4589_v12, %v4589_v12  ;;  %v4597_v9 = vadd.f32 %v3484_v25, %v4283_v52  ;;  %v2409_v48 = vadd.f32 %v2408_v26, %v4517_v53 }
 0x1ee   : > { %2406 = vadd.xlane.f32.xlu0 %v2405_v32  ;;  %v1565_v37 = vpop.f32.mrb[36].mxu0  ;;  %v2633_v36 = vadd.f32 %v2632_v33, %v2521_v31  ;;  %v3485_v15 = vpop.f32.mrb[116].mxu1  ;;  %v2530_v32 = vmul.f32 %v4549_v17, %v4549_v17 }
 0x1ef   : > { %2325 = vst [vmem:[%s4304_s10 + $0x128] sm:$0xf] %v3264_v34  ;;  %v3266_v39 = vpack.c.bf16 %v4597_v9, %v4597_v9  ;;  %v2522_v57 = vmul.f32 %v1565_v37, %v1565_v37  ;;  %v1567_v6 = vpop.f32.mrb[37].mxu0  ;;  %v3486_v47 = vpop.f32.mrb[117].mxu1 }
 0x1f0   : > { %v3251_v46 = vpack.c.bf16 %v1567_v6, %v1565_v37  ;;  %v2523_v30 = vmul.f32 %v1567_v6, %v1567_v6  ;;  %v1569_v52 = vpop.f32.mrb[38].mxu0  ;;  %v2412_v24 = vadd.f32 %v1567_v6, %v1565_v37  ;;  %v3487_v53 = vadd.f32 %v3486_v47, %v3485_v15  ;;  %v3488_v49 = vpop.f32.mrb[118].mxu1 }
 0x1f1   : > { %2410 = vadd.xlane.f32.xlu1 %v2409_v48  ;;  %2327 = vst [vmem:[%s4304_s10 + $0x134] sm:$0xf] %v3266_v39  ;;  %v2525_v50 = vmul.f32 %v1569_v52, %v1569_v52  ;;  %v1571_v55 = vpop.f32.mrb[39].mxu0  ;;  %v3489_v63 = vpop.f32.mrb[119].mxu1 }
 0x1f2   : > { %2630 = vadd.xlane.f32.xlu0 %v2629_v27  ;;  %2312 = vst [vmem:[%s4304_s10 + $0xd8] sm:$0xff] %v3251_v46  ;;  %v3253_v0 = vpack.c.bf16 %v1571_v55, %v1569_v52  ;;  %v2526_v38 = vmul.f32 %v1571_v55, %v1571_v55  ;;  %v2413_v62 = vadd.f32 %v2412_v24, %v4529_v54 }
 0x1f3   : > { %v2636_v28 = vadd.f32 %v2523_v30, %v2522_v57  ;;  %v4609_v40 = vadd.f32 %v3487_v53, %v4285_v56  ;;  %v3490_v2 = vadd.f32 %v3489_v63, %v3488_v49  ;;  %v2416_v41 = vadd.f32 %v1571_v55, %v1569_v52 }
 0x1f4   : > { %2314 = vst [vmem:[%s4304_s10 + $0xe4] sm:$0xff] %v3253_v0  ;;  %v2640_v3 = vadd.f32 %v2526_v38, %v2525_v50  ;;  %v2536_v38 = vmul.f32 %v4569_v35, %v4569_v35 }
 0x1f5   : > { %2634 = vadd.xlane.f32.xlu1 %v2633_v36  ;;  %v2637_v4 = vadd.f32 %v2636_v28, %v2524_v59  ;;  %v3268_v18 = vpack.c.bf16 %v4609_v40, %v4609_v40  ;;  %v4617_v54 = vadd.f32 %v3490_v2, %v4287_v60  ;;  %v2417_v56 = vadd.f32 %v2416_v41, %v4537_v42 }
 0x1f6   : > { %2414 = vadd.xlane.f32.xlu0 %v2413_v62  ;;  %v1575_v45 = vpop.f32.mrb[40].mxu0  ;;  %v2641_v8 = vadd.f32 %v2640_v3, %v2527_v58  ;;  %v3491_v23 = vpop.f32.mrb[120].mxu1  ;;  %v2533_v36 = vmul.f32 %v4557_v51, %v4557_v51 }
 0x1f7   : > { %2329 = vst [vmem:[%s4304_s10 + $0x140] sm:$0xf] %v3268_v18  ;;  %v3270_v11 = vpack.c.bf16 %v4617_v54, %v4617_v54  ;;  %v2528_v44 = vmul.f32 %v1575_v45, %v1575_v45  ;;  %v1577_v43 = vpop.f32.mrb[41].mxu0  ;;  %v3492_v29 = vpop.f32.mrb[121].mxu1 }
 0x1f8   : > { %v3255_v13 = vpack.c.bf16 %v1577_v43, %v1575_v45  ;;  %v2529_v19 = vmul.f32 %v1577_v43, %v1577_v43  ;;  %v1579_v60 = vpop.f32.mrb[42].mxu0  ;;  %v2420_v20 = vadd.f32 %v1577_v43, %v1575_v45  ;;  %v3493_v42 = vadd.f32 %v3492_v29, %v3491_v23  ;;  %v3494_v21 = vpop.f32.mrb[122].mxu1 }
 0x1f9   : > { %2418 = vadd.xlane.f32.xlu1 %v2417_v56  ;;  %2331 = vst [vmem:[%s4304_s10 + $0x14c] sm:$0xf] %v3270_v11  ;;  %v2531_v22 = vmul.f32 %v1579_v60, %v1579_v60  ;;  %v1581_v7 = vpop.f32.mrb[43].mxu0  ;;  %v3495_v26 = vpop.f32.mrb[123].mxu1  ;;  %v2539_v56 = vmul.f32 %v4577_v16, %v4577_v16 }
 0x1fa   : > { %2638 = vadd.xlane.f32.xlu0 %v2637_v4  ;;  %2316 = vst [vmem:[%s4304_s10 + $0xf0] sm:$0xff] %v3255_v13  ;;  %v3257_v61 = vpack.c.bf16 %v1581_v7, %v1579_v60  ;;  %v2532_v25 = vmul.f32 %v1581_v7, %v1581_v7  ;;  %v2421_v27 = vadd.f32 %v2420_v20, %v4549_v17 }
 0x1fb   : > { %v2644_v31 = vadd.f32 %v2529_v19, %v2528_v44  ;;  %v4629_v33 = vadd.f32 %v3493_v42, %v4289_v1  ;;  %v3496_v34 = vadd.f32 %v3495_v26, %v3494_v21  ;;  %v2424_v48 = vadd.f32 %v1581_v7, %v1579_v60 }
 0x1fc   : > { %2318 = vst [vmem:[%s4304_s10 + $0xfc] sm:$0xff] %v3257_v61  ;;  %v2648_v39 = vadd.f32 %v2532_v25, %v2531_v22  ;;  %v2545_v26 = vmul.f32 %v4597_v9, %v4597_v9 }
 0x1fd   : > { %2642 = vadd.xlane.f32.xlu1 %v2641_v8  ;;  %v2645_v37 = vadd.f32 %v2644_v31, %v2530_v32  ;;  %v3272_v57 = vpack.c.bf16 %v4629_v33, %v4629_v33  ;;  %v4637_v17 = vadd.f32 %v3496_v34, %v4291_v5  ;;  %v2425_v1 = vadd.f32 %v2424_v48, %v4557_v51 }
 0x1fe   : > { %2422 = vadd.xlane.f32.xlu0 %v2421_v27  ;;  %v1585_v15 = vpop.f32.mrb[44].mxu0  ;;  %v2649_v6 = vadd.f32 %v2648_v39, %v2533_v36  ;;  %v3497_v47 = vpop.f32.mrb[124].mxu1 }
 0x1ff   : > { %2333 = vst [vmem:[%s4304_s10 + $0x158] sm:$0xf] %v3272_v57  ;;  %v3274_v46 = vpack.c.bf16 %v4637_v17, %v4637_v17  ;;  %v2534_v30 = vmul.f32 %v1585_v15, %v1585_v15  ;;  %v1587_v52 = vpop.f32.mrb[45].mxu0  ;;  %v3498_v49 = vpop.f32.mrb[125].mxu1 }
 0x200   : > { %v3259_v24 = vpack.c.bf16 %v1587_v52, %v1585_v15  ;;  %v2535_v53 = vmul.f32 %v1587_v52, %v1587_v52  ;;  %v1589_v5 = vpop.f32.mrb[46].mxu0  ;;  %v2428_v50 = vadd.f32 %v1587_v52, %v1585_v15  ;;  %v3499_v51 = vadd.f32 %v3498_v49, %v3497_v47  ;;  %v3500_v55 = vpop.f32.mrb[126].mxu1 }
 0x201   : > { %2426 = vadd.xlane.f32.xlu1 %v2425_v1  ;;  %2335 = vst [vmem:[%s4304_s10 + $0x164] sm:$0xf] %v3274_v46  ;;  %v2537_v59 = vmul.f32 %v1589_v5, %v1589_v5  ;;  %v1591_v0 = vpop.f32.mrb[47].mxu0  ;;  %v3501_v28 = vpop.f32.mrb[127].mxu1  ;;  %v2548_v46 = vmul.f32 %v4609_v40, %v4609_v40  ;;  %v2551_v49 = vmul.f32 %v4617_v54, %v4617_v54 }
 0x202   : > { %2646 = vadd.xlane.f32.xlu0 %v2645_v37  ;;  %2320 = vst [vmem:[%s4304_s10 + $0x108] sm:$0xff] %v3259_v24  ;;  %v3261_v63 = vpack.c.bf16 %v1591_v0, %v1589_v5  ;;  %v2538_v62 = vmul.f32 %v1591_v0, %v1591_v0  ;;  %v2429_v2 = vadd.f32 %v2428_v50, %v4569_v35 }
 0x203   : > { %v2652_v41 = vadd.f32 %v2535_v53, %v2534_v30  ;;  %v4649_v4 = vadd.f32 %v3499_v51, %v4293_v10  ;;  %v3502_v58 = vadd.f32 %v3501_v28, %v3500_v55  ;;  %v2432_v3 = vadd.f32 %v1591_v0, %v1589_v5 }
 0x204   : > { %2322 = vst [vmem:[%s4304_s10 + $0x114] sm:$0xff] %v3261_v63  ;;  %v2656_v45 = vadd.f32 %v2538_v62, %v2537_v59 }
 0x205   : > { %2650 = vadd.xlane.f32.xlu1 %v2649_v6  ;;  %v2653_v18 = vadd.f32 %v2652_v41, %v2536_v38  ;;  %v3276_v8 = vpack.c.bf16 %v4649_v4, %v4649_v4  ;;  %v4657_v35 = vadd.f32 %v3502_v58, %v4295_v14  ;;  %v2433_v10 = vadd.f32 %v2432_v3, %v4577_v16 }
 0x206   : > { %2430 = vadd.xlane.f32.xlu0 %v2429_v2  ;;  %v1595_v11 = vpop.f32.mrb[48].mxu0  ;;  %v2657_v44 = vadd.f32 %v2656_v45, %v2539_v56  ;;  %v2542_v16 = vmul.f32 %v4589_v12, %v4589_v12  ;;  %v2554_v41 = vmul.f32 %v4629_v33, %v4629_v33 }
 0x207   : > { %2337 = vst [vmem:[%s4304_s10 + $0x170] sm:$0xf] %v3276_v8  ;;  %v3278_v23 = vpack.c.bf16 %v4657_v35, %v4657_v35  ;;  %v2540_v43 = vmul.f32 %v1595_v11, %v1595_v11  ;;  %v1597_v13 = vpop.f32.mrb[49].mxu0  ;;  %v2557_v8 = vmul.f32 %v4637_v17, %v4637_v17 }
 0x208   : > { %v3263_v19 = vpack.c.bf16 %v1597_v13, %v1595_v11  ;;  %v2541_v29 = vmul.f32 %v1597_v13, %v1597_v13  ;;  %v1599_v60 = vpop.f32.mrb[50].mxu0  ;;  %v2436_v20 = vadd.f32 %v1597_v13, %v1595_v11 }
 0x209   : > { %2434 = vadd.xlane.f32.xlu1 %v2433_v10  ;;  %2339 = vst [vmem:[%s4304_s10 + $0x17c] sm:$0xf] %v3278_v23  ;;  %v2543_v14 = vmul.f32 %v1599_v60, %v1599_v60  ;;  %v1601_v42 = vpop.f32.mrb[51].mxu0 }
 0x20a   : > { %2654 = vadd.xlane.f32.xlu0 %v2653_v18  ;;  %2324 = vst [vmem:[%s4304_s10 + $0x120] sm:$0xff] %v3263_v19  ;;  %v3265_v21 = vpack.c.bf16 %v1601_v42, %v1599_v60  ;;  %v2544_v22 = vmul.f32 %v1601_v42, %v1601_v42  ;;  %v2437_v7 = vadd.f32 %v2436_v20, %v4589_v12 }
 0x20b   : > { %v2660_v32 = vadd.f32 %v2541_v29, %v2540_v43  ;;  %v2440_v61 = vadd.f32 %v1601_v42, %v1599_v60 }
 0x20c   : > { %2326 = vst [vmem:[%s4304_s10 + $0x12c] sm:$0xff] %v3265_v21  ;;  %v2664_v27 = vadd.f32 %v2544_v22, %v2543_v14 }
 0x20d   : > { %2658 = vadd.xlane.f32.xlu1 %v2657_v44  ;;  %v2661_v25 = vadd.f32 %v2660_v32, %v2542_v16  ;;  %v2441_v31 = vadd.f32 %v2440_v61, %v4597_v9  ;;  %v2563_v61 = vmul.f32 %v4657_v35, %v4657_v35 }
 0x20e   : > { %2438 = vadd.xlane.f32.xlu0 %v2437_v7  ;;  %v1605_v34 = vpop.f32.mrb[52].mxu0  ;;  %v2665_v48 = vadd.f32 %v2664_v27, %v2545_v26 }
 0x20f   : > { %v2546_v37 = vmul.f32 %v1605_v34, %v1605_v34  ;;  %v1607_v36 = vpop.f32.mrb[53].mxu0 }
 0x210   : > { %v3267_v39 = vpack.c.bf16 %v1607_v36, %v1605_v34  ;;  %v2547_v12 = vmul.f32 %v1607_v36, %v1607_v36  ;;  %v1609_v57 = vpop.f32.mrb[54].mxu0  ;;  %v2444_v1 = vadd.f32 %v1607_v36, %v1605_v34 }
 0x211   : > { %2442 = vadd.xlane.f32.xlu1 %v2441_v31  ;;  %v2549_v15 = vmul.f32 %v1609_v57, %v1609_v57  ;;  %v1611_v6 = vpop.f32.mrb[55].mxu0  ;;  %v2763_v31 = vld [vmem:[%s4396_s18 + $0x8] sm:$0xff] }
 0x212   : > { %2662 = vadd.xlane.f32.xlu0 %v2661_v25  ;;  %2328 = vst [vmem:[%s4304_s10 + $0x138] sm:$0xff] %v3267_v39  ;;  %v3269_v30 = vpack.c.bf16 %v1611_v6, %v1609_v57  ;;  %v2550_v47 = vmul.f32 %v1611_v6, %v1611_v6  ;;  %v2445_v9 = vadd.f32 %v2444_v1, %v4609_v40  ;;  %v2762_v39 = vld [vmem:[%s4396_s18] sm:$0xff] }
 0x213   : > { %v2668_v52 = vadd.f32 %v2547_v12, %v2546_v37  ;;  %v2448_v24 = vadd.f32 %v1611_v6, %v1609_v57 }
 0x214   : > { %2330 = vst [vmem:[%s4304_s10 + $0x144] sm:$0xff] %v3269_v30  ;;  %v2672_v5 = vadd.f32 %v2550_v47, %v2549_v15  ;;  %v2764_v15 = vld [vmem:[%s4396_s18 + $0x10] sm:$0xff] }
 0x215   : > { %2666 = vadd.xlane.f32.xlu1 %v2665_v48  ;;  %v2669_v53 = vadd.f32 %v2668_v52, %v2548_v46  ;;  %v2449_v50 = vadd.f32 %v2448_v24, %v4617_v54 }
 0x216   : > { %2446 = vadd.xlane.f32.xlu0 %v2445_v9  ;;  %v1615_v51 = vpop.f32.mrb[56].mxu0  ;;  %v2673_v55 = vadd.f32 %v2672_v5, %v2551_v49  ;;  %v2765_v9 = vld [vmem:[%s4396_s18 + $0x18] sm:$0xff]  ;;  %v2766_v5 = vld [vmem:[%s4396_s18 + $0x20] sm:$0xff] }
 0x217   : > { %v2552_v59 = vmul.f32 %v1615_v51, %v1615_v51  ;;  %v1617_v0 = vpop.f32.mrb[57].mxu0 }
 0x218   : > { %v3271_v38 = vpack.c.bf16 %v1617_v0, %v1615_v51  ;;  %v2553_v40 = vmul.f32 %v1617_v0, %v1617_v0  ;;  %v1619_v63 = vpop.f32.mrb[58].mxu0  ;;  %v2452_v62 = vadd.f32 %v1617_v0, %v1615_v51  ;;  %v2767_v0 = vld [vmem:[%s4396_s18 + $0x28] sm:$0xff] }
 0x219   : > { %2450 = vadd.xlane.f32.xlu1 %v2449_v50  ;;  %v2555_v28 = vmul.f32 %v1619_v63, %v1619_v63  ;;  %v1621_v2 = vpop.f32.mrb[59].mxu0 }
 0x21a   : > { %2670 = vadd.xlane.f32.xlu0 %v2669_v53  ;;  %2332 = vst [vmem:[%s4304_s10 + $0x150] sm:$0xff] %v3271_v38  ;;  %v3273_v58 = vpack.c.bf16 %v1621_v2, %v1619_v63  ;;  %v2556_v3 = vmul.f32 %v1621_v2, %v1621_v2  ;;  %v2453_v54 = vadd.f32 %v2452_v62, %v4629_v33 }
 0x21b   : > { %v2676_v18 = vadd.f32 %v2553_v40, %v2552_v59  ;;  %v2456_v56 = vadd.f32 %v1621_v2, %v1619_v63 }
 0x21c   : > { %2334 = vst [vmem:[%s4304_s10 + $0x15c] sm:$0xff] %v3273_v58  ;;  %v2680_v10 = vadd.f32 %v2556_v3, %v2555_v28  ;;  %v2768_v28 = vld [vmem:[%s4396_s18 + $0x30] sm:$0xff] }
 0x21d   : > { %2674 = vadd.xlane.f32.xlu1 %v2673_v55  ;;  %v2677_v45 = vadd.f32 %v2676_v18, %v2554_v41  ;;  %v2457_v11 = vadd.f32 %v2456_v56, %v4637_v17  ;;  %v2560_v17 = vmul.f32 %v4649_v4, %v4649_v4 }
 0x21e   : > { %2454 = vadd.xlane.f32.xlu0 %v2453_v54  ;;  %v1625_v44 = vpop.f32.mrb[60].mxu0  ;;  %v2681_v23 = vadd.f32 %v2680_v10, %v2557_v8  ;;  %v2769_v54 = vld [vmem:[%s4396_s18 + $0x38] sm:$0xff]  ;;  %v2770_v10 = vld [vmem:[%s4396_s18 + $0x40] sm:$0xff] }
 0x21f   : > { %v2558_v43 = vmul.f32 %v1625_v44, %v1625_v44  ;;  %v1627_v13 = vpop.f32.mrb[61].mxu0 }
 0x220   : > { %v3275_v19 = vpack.c.bf16 %v1627_v13, %v1625_v44  ;;  %v2559_v33 = vmul.f32 %v1627_v13, %v1627_v13  ;;  %v1629_v29 = vpop.f32.mrb[62].mxu0  ;;  %v2460_v60 = vadd.f32 %v1627_v13, %v1625_v44  ;;  %v2771_v13 = vld [vmem:[%s4396_s18 + $0x48] sm:$0xff] }
 0x221   : > { %2458 = vadd.xlane.f32.xlu1 %v2457_v11  ;;  %v2561_v20 = vmul.f32 %v1629_v29, %v1629_v29  ;;  %v1631_v14 = vpop.f32.mrb[63].mxu0 }
 0x222   : > { %2678 = vadd.xlane.f32.xlu0 %v2677_v45  ;;  %2336 = vst [vmem:[%s4304_s10 + $0x168] sm:$0xff] %v3275_v19  ;;  %v3277_v42 = vpack.c.bf16 %v1631_v14, %v1629_v29  ;;  %v2464_v16 = vadd.f32 %v1631_v14, %v1629_v29  ;;  %v2562_v21 = vmul.f32 %v1631_v14, %v1631_v14 }
 0x223   : > { %v2461_v22 = vadd.f32 %v2460_v60, %v4649_v4  ;;  %v2684_v7 = vadd.f32 %v2559_v33, %v2558_v43 }
 0x224   : > { %2338 = vst [vmem:[%s4304_s10 + $0x174] sm:$0xff] %v3277_v42  ;;  %v2465_v32 = vadd.f32 %v2464_v16, %v4657_v35  ;;  %v2688_v25 = vadd.f32 %v2562_v21, %v2561_v20  ;;  %v2772_v20 = vld [vmem:[%s4396_s18 + $0x50] sm:$0xff] }
 0x225   : > { %2682 = vadd.xlane.f32.xlu1 %v2681_v23  ;;  %v2685_v26 = vadd.f32 %v2684_v7, %v2560_v17 }
 0x226   : > { %2462 = vadd.xlane.f32.xlu0 %v2461_v22  ;;  %v2689_v27 = vadd.f32 %v2688_v25, %v2563_v61  ;;  %v2773_v22 = vld [vmem:[%s4396_s18 + $0x58] sm:$0xff]  ;;  %v2774_v25 = vld [vmem:[%s4396_s18 + $0x60] sm:$0xff] }
 0x229   : > { %2466 = vadd.xlane.f32.xlu1 %v2465_v32 }
 0x22a   : > { %2686 = vadd.xlane.f32.xlu0 %v2685_v26 }
 0x22d   : > { %2690 = vadd.xlane.f32.xlu1 %v2689_v27 }
 0x239   : > { %v2343_v4 = vpop.xlane.xlu0 %2342 }
 0x23d   : > { %v2571_v34 = vpop.xlane.xlu1 %2570  ;;  %v2347_v48 = vpop.xlane.xlu0 %2346 }
 0x23e   : > { %v2694_v37 = vsel %vm2692_vm1, %v2347_v48, %v2571_v34  ;;  %v2775_v34 = vld [vmem:[%s4396_s18 + $0x68] sm:$0xff] }
 0x23f   : > { %v2795_v36 = vadd.f32 %v2763_v31, %v2694_v37 }
 0x241   : > { %2828 = vst.msk [vmem:[%s4396_s18 + $0x8] sm:$0xff] %vm2729_vm0, %v2795_v36  ;;  %v2567_v35 = vpop.xlane.xlu0 %2566  ;;  %v2351_v12 = vpop.xlane.xlu1 %2350 }
 0x242   : > { %v2693_v57 = vsel %vm2692_vm1, %v2343_v4, %v2567_v35  ;;  %v2776_v35 = vld [vmem:[%s4396_s18 + $0x70] sm:$0xff] }
 0x243   : > { %v2794_v1 = vadd.f32 %v2762_v39, %v2693_v57 }
 0x245   : > { %2827 = vst.msk [vmem:[%s4396_s18] sm:$0xff] %vm2729_vm0, %v2794_v1  ;;  %v2575_v6 = vpop.xlane.xlu0 %2574  ;;  %v2355_v46 = vpop.xlane.xlu1 %2354 }
 0x246   : > { %v2695_v30 = vsel %vm2692_vm1, %v2351_v12, %v2575_v6  ;;  %v2777_v6 = vld [vmem:[%s4396_s18 + $0x78] sm:$0xff] }
 0x247   : > { %v2796_v47 = vadd.f32 %v2764_v15, %v2695_v30 }
 0x249   : > { %2829 = vst.msk [vmem:[%s4396_s18 + $0x10] sm:$0xff] %vm2729_vm0, %v2796_v47  ;;  %v2579_v52 = vpop.xlane.xlu1 %2578  ;;  %v2359_v24 = vpop.xlane.xlu0 %2358 }
 0x24a   : > { %v2696_v53 = vsel %vm2692_vm1, %v2355_v46, %v2579_v52  ;;  %v2778_v52 = vld [vmem:[%s4396_s18 + $0x80] sm:$0xff] }
 0x24b   : > { %v2797_v49 = vadd.f32 %v2765_v9, %v2696_v53 }
 0x24d   : > { %2830 = vst.msk [vmem:[%s4396_s18 + $0x18] sm:$0xff] %vm2729_vm0, %v2797_v49  ;;  %v2583_v50 = vpop.xlane.xlu0 %2582  ;;  %v2363_v51 = vpop.xlane.xlu1 %2362 }
 0x24e   : > { %v2697_v55 = vsel %vm2692_vm1, %v2359_v24, %v2583_v50  ;;  %v2779_v50 = vld [vmem:[%s4396_s18 + $0x88] sm:$0xff] }
 0x24f   : > { %v2798_v59 = vadd.f32 %v2766_v5, %v2697_v55 }
 0x251   : > { %2831 = vst.msk [vmem:[%s4396_s18 + $0x20] sm:$0xff] %vm2729_vm0, %v2798_v59  ;;  %v2587_v38 = vpop.xlane.xlu1 %2586 }
 0x252   : > { %v2367_v40 = vpop.xlane.xlu0 %2366  ;;  %v2698_v63 = vsel %vm2692_vm1, %v2363_v51, %v2587_v38  ;;  %v2780_v38 = vld [vmem:[%s4396_s18 + $0x90] sm:$0xff] }
 0x253   : > { %v2799_v62 = vadd.f32 %v2767_v0, %v2698_v63 }
 0x255   : > { %2832 = vst.msk [vmem:[%s4396_s18 + $0x28] sm:$0xff] %vm2729_vm0, %v2799_v62 }
 0x256   : > { %v2371_v41 = vpop.xlane.xlu1 %2370 }
 0x257   : > { %v2591_v2 = vpop.xlane.xlu0 %2590 }
 0x258   : > { %v2699_v58 = vsel %vm2692_vm1, %v2367_v40, %v2591_v2  ;;  %v2781_v2 = vld [vmem:[%s4396_s18 + $0x98] sm:$0xff] }
 0x259   : > { %v2800_v3 = vadd.f32 %v2768_v28, %v2699_v58 }
 0x25a   : > { %v2595_v18 = vpop.xlane.xlu1 %2594 }
 0x25b   : > { %2833 = vst.msk [vmem:[%s4396_s18 + $0x30] sm:$0xff] %vm2729_vm0, %v2800_v3  ;;  %v2375_v56 = vpop.xlane.xlu0 %2374  ;;  %v2700_v45 = vsel %vm2692_vm1, %v2371_v41, %v2595_v18  ;;  %v2782_v18 = vld [vmem:[%s4396_s18 + $0xa0] sm:$0xff] }
 0x25c   : > { %v2801_v8 = vadd.f32 %v2769_v54, %v2700_v45 }
 0x25e   : > { %2834 = vst.msk [vmem:[%s4396_s18 + $0x38] sm:$0xff] %vm2729_vm0, %v2801_v8  ;;  %v2379_v44 = vpop.xlane.xlu1 %2378 }
 0x25f   : > { %v2599_v11 = vpop.xlane.xlu0 %2598 }
 0x260   : > { %v2701_v23 = vsel %vm2692_vm1, %v2375_v56, %v2599_v11  ;;  %v2783_v11 = vld [vmem:[%s4396_s18 + $0xa8] sm:$0xff] }
 0x261   : > { %v2802_v43 = vadd.f32 %v2770_v10, %v2701_v23 }
 0x262   : > { %v2603_v19 = vpop.xlane.xlu1 %2602 }
 0x263   : > { %2835 = vst.msk [vmem:[%s4396_s18 + $0x40] sm:$0xff] %vm2729_vm0, %v2802_v43  ;;  %v2383_v33 = vpop.xlane.xlu0 %2382  ;;  %v2702_v29 = vsel %vm2692_vm1, %v2379_v44, %v2603_v19  ;;  %v2784_v19 = vld [vmem:[%s4396_s18 + $0xb0] sm:$0xff] }
 0x264   : > { %v2803_v60 = vadd.f32 %v2771_v13, %v2702_v29 }
 0x266   : > { %2836 = vst.msk [vmem:[%s4396_s18 + $0x48] sm:$0xff] %vm2729_vm0, %v2803_v60  ;;  %v2387_v42 = vpop.xlane.xlu1 %2386 }
 0x267   : > { %v2607_v14 = vpop.xlane.xlu0 %2606 }
 0x268   : > { %v2703_v16 = vsel %vm2692_vm1, %v2383_v33, %v2607_v14  ;;  %v2785_v14 = vld [vmem:[%s4396_s18 + $0xb8] sm:$0xff] }
 0x269   : > { %v2804_v21 = vadd.f32 %v2772_v20, %v2703_v16 }
 0x26a   : > { %v2611_v17 = vpop.xlane.xlu1 %2610 }
 0x26b   : > { %2837 = vst.msk [vmem:[%s4396_s18 + $0x50] sm:$0xff] %vm2729_vm0, %v2804_v21  ;;  %v2391_v7 = vpop.xlane.xlu0 %2390  ;;  %v2704_v32 = vsel %vm2692_vm1, %v2387_v42, %v2611_v17  ;;  %v2786_v17 = vld [vmem:[%s4396_s18 + $0xc0] sm:$0xff] }
 0x26c   : > { %v2805_v61 = vadd.f32 %v2773_v22, %v2704_v32 }
 0x26e   : > { %2838 = vst.msk [vmem:[%s4396_s18 + $0x58] sm:$0xff] %vm2729_vm0, %v2805_v61  ;;  %v2395_v27 = vpop.xlane.xlu1 %2394 }
 0x26f   : > { %v2615_v26 = vpop.xlane.xlu0 %2614 }
 0x270   : > { %v2705_v4 = vsel %vm2692_vm1, %v2391_v7, %v2615_v26  ;;  %v2787_v26 = vld [vmem:[%s4396_s18 + $0xc8] sm:$0xff] }
 0x271   : > { %v2806_v31 = vadd.f32 %v2774_v25, %v2705_v4 }
 0x272   : > { %v2619_v48 = vpop.xlane.xlu1 %2618 }
 0x273   : > { %2839 = vst.msk [vmem:[%s4396_s18 + $0x60] sm:$0xff] %vm2729_vm0, %v2806_v31  ;;  %v2399_v37 = vpop.xlane.xlu0 %2398  ;;  %v2706_v36 = vsel %vm2692_vm1, %v2395_v27, %v2619_v48  ;;  %v2788_v48 = vld [vmem:[%s4396_s18 + $0xd0] sm:$0xff] }
 0x274   : > { %v2807_v39 = vadd.f32 %v2775_v34, %v2706_v36 }
 0x276   : > { %2840 = vst.msk [vmem:[%s4396_s18 + $0x68] sm:$0xff] %vm2729_vm0, %v2807_v39  ;;  %v2403_v57 = vpop.xlane.xlu1 %2402 }
 0x277   : > { %v2623_v12 = vpop.xlane.xlu0 %2622 }
 0x278   : > { %v2707_v1 = vsel %vm2692_vm1, %v2399_v37, %v2623_v12  ;;  %v2789_v12 = vld [vmem:[%s4396_s18 + $0xd8] sm:$0xff] }
 0x279   : > { %v2808_v15 = vadd.f32 %v2776_v35, %v2707_v1 }
 0x27a   : > { %v2627_v46 = vpop.xlane.xlu1 %2626 }
 0x27b   : > { %2841 = vst.msk [vmem:[%s4396_s18 + $0x70] sm:$0xff] %vm2729_vm0, %v2808_v15  ;;  %v2407_v30 = vpop.xlane.xlu0 %2406  ;;  %v2708_v47 = vsel %vm2692_vm1, %v2403_v57, %v2627_v46  ;;  %v2790_v46 = vld [vmem:[%s4396_s18 + $0xe0] sm:$0xff] }
 0x27c   : > { %v2809_v9 = vadd.f32 %v2777_v6, %v2708_v47 }
 0x27e   : > { %2842 = vst.msk [vmem:[%s4396_s18 + $0x78] sm:$0xff] %vm2729_vm0, %v2809_v9  ;;  %v2411_v53 = vpop.xlane.xlu1 %2410 }
 0x27f   : > { %v2631_v24 = vpop.xlane.xlu0 %2630 }
 0x280   : > { %v2709_v49 = vsel %vm2692_vm1, %v2407_v30, %v2631_v24  ;;  %v2791_v24 = vld [vmem:[%s4396_s18 + $0xe8] sm:$0xff] }
 0x281   : > { %v2810_v5 = vadd.f32 %v2778_v52, %v2709_v49 }
 0x282   : > { %v2635_v51 = vpop.xlane.xlu1 %2634 }
 0x283   : > { %2843 = vst.msk [vmem:[%s4396_s18 + $0x80] sm:$0xff] %vm2729_vm0, %v2810_v5  ;;  %v2415_v55 = vpop.xlane.xlu0 %2414  ;;  %v2710_v59 = vsel %vm2692_vm1, %v2411_v53, %v2635_v51  ;;  %v2792_v51 = vld [vmem:[%s4396_s18 + $0xf0] sm:$0xff] }
 0x284   : > { %v2811_v0 = vadd.f32 %v2779_v50, %v2710_v59 }
 0x286   : > { %2844 = vst.msk [vmem:[%s4396_s18 + $0x88] sm:$0xff] %vm2729_vm0, %v2811_v0  ;;  %v2419_v63 = vpop.xlane.xlu1 %2418 }
 0x287   : > { %v2639_v40 = vpop.xlane.xlu0 %2638 }
 0x288   : > { %v2711_v62 = vsel %vm2692_vm1, %v2415_v55, %v2639_v40  ;;  %v2793_v40 = vld [vmem:[%s4396_s18 + $0xf8] sm:$0xff] }
 0x289   : > { %v2812_v28 = vadd.f32 %v2780_v38, %v2711_v62 }
 0x28a   : > { %v2643_v41 = vpop.xlane.xlu1 %2642 }
 0x28b   : > { %2845 = vst.msk [vmem:[%s4396_s18 + $0x90] sm:$0xff] %vm2729_vm0, %v2812_v28  ;;  %v2423_v58 = vpop.xlane.xlu0 %2422  ;;  %v2712_v3 = vsel %vm2692_vm1, %v2419_v63, %v2643_v41 }
 0x28c   : > { %v2813_v54 = vadd.f32 %v2781_v2, %v2712_v3 }
 0x28e   : > { %2846 = vst.msk [vmem:[%s4396_s18 + $0x98] sm:$0xff] %vm2729_vm0, %v2813_v54  ;;  %v2427_v45 = vpop.xlane.xlu1 %2426 }
 0x28f   : > { %v2647_v56 = vpop.xlane.xlu0 %2646 }
 0x290   : > { %v2713_v8 = vsel %vm2692_vm1, %v2423_v58, %v2647_v56 }
 0x291   : > { %v2814_v10 = vadd.f32 %v2782_v18, %v2713_v8 }
 0x292   : > { %v2651_v44 = vpop.xlane.xlu1 %2650 }
 0x293   : > { %2847 = vst.msk [vmem:[%s4396_s18 + $0xa0] sm:$0xff] %vm2729_vm0, %v2814_v10  ;;  %v2431_v23 = vpop.xlane.xlu0 %2430  ;;  %v2714_v43 = vsel %vm2692_vm1, %v2427_v45, %v2651_v44 }
 0x294   : > { %v2815_v13 = vadd.f32 %v2783_v11, %v2714_v43 }
 0x296   : > { %2848 = vst.msk [vmem:[%s4396_s18 + $0xa8] sm:$0xff] %vm2729_vm0, %v2815_v13  ;;  %v2435_v29 = vpop.xlane.xlu1 %2434 }
 0x297   : > { %v2655_v33 = vpop.xlane.xlu0 %2654 }
 0x298   : > { %v2715_v60 = vsel %vm2692_vm1, %v2431_v23, %v2655_v33 }
 0x299   : > { %v2816_v20 = vadd.f32 %v2784_v19, %v2715_v60 }
 0x29a   : > { %v2659_v42 = vpop.xlane.xlu1 %2658 }
 0x29b   : > { %2849 = vst.msk [vmem:[%s4396_s18 + $0xb0] sm:$0xff] %vm2729_vm0, %v2816_v20  ;;  %v2439_v16 = vpop.xlane.xlu0 %2438  ;;  %v2716_v21 = vsel %vm2692_vm1, %v2435_v29, %v2659_v42 }
 0x29c   : > { %v2817_v22 = vadd.f32 %v2785_v14, %v2716_v21 }
 0x29e   : > { %2850 = vst.msk [vmem:[%s4396_s18 + $0xb8] sm:$0xff] %vm2729_vm0, %v2817_v22  ;;  %v2443_v32 = vpop.xlane.xlu1 %2442 }
 0x29f   : > { %v2663_v7 = vpop.xlane.xlu0 %2662 }
 0x2a0   : > { %v2717_v61 = vsel %vm2692_vm1, %v2439_v16, %v2663_v7 }
 0x2a1   : > { %v2818_v25 = vadd.f32 %v2786_v17, %v2717_v61 }
 0x2a2   : > { %v2667_v27 = vpop.xlane.xlu1 %2666 }
 0x2a3   : > { %2851 = vst.msk [vmem:[%s4396_s18 + $0xc0] sm:$0xff] %vm2729_vm0, %v2818_v25  ;;  %v2447_v4 = vpop.xlane.xlu0 %2446  ;;  %v2718_v31 = vsel %vm2692_vm1, %v2443_v32, %v2667_v27 }
 0x2a4   : > { %v2819_v34 = vadd.f32 %v2787_v26, %v2718_v31 }
 0x2a6   : > { %2852 = vst.msk [vmem:[%s4396_s18 + $0xc8] sm:$0xff] %vm2729_vm0, %v2819_v34  ;;  %v2451_v36 = vpop.xlane.xlu1 %2450 }
 0x2a7   : > { %v2671_v37 = vpop.xlane.xlu0 %2670 }
 0x2a8   : > { %v2719_v39 = vsel %vm2692_vm1, %v2447_v4, %v2671_v37 }
 0x2a9   : > { %v2820_v35 = vadd.f32 %v2788_v48, %v2719_v39 }
 0x2aa   : > { %v2675_v57 = vpop.xlane.xlu1 %2674 }
 0x2ab   : > { %2853 = vst.msk [vmem:[%s4396_s18 + $0xd0] sm:$0xff] %vm2729_vm0, %v2820_v35  ;;  %v2455_v1 = vpop.xlane.xlu0 %2454  ;;  %v2720_v15 = vsel %vm2692_vm1, %v2451_v36, %v2675_v57 }
 0x2ac   : > { %v2821_v6 = vadd.f32 %v2789_v12, %v2720_v15 }
 0x2ae   : > { %2854 = vst.msk [vmem:[%s4396_s18 + $0xd8] sm:$0xff] %vm2729_vm0, %v2821_v6  ;;  %v2459_v47 = vpop.xlane.xlu1 %2458 }
 0x2af   : > { %v2679_v30 = vpop.xlane.xlu0 %2678 }
 0x2b0   : > { %v2721_v9 = vsel %vm2692_vm1, %v2455_v1, %v2679_v30 }
 0x2b1   : > { %v2822_v52 = vadd.f32 %v2790_v46, %v2721_v9 }
 0x2b2   : > { %v2683_v53 = vpop.xlane.xlu1 %2682 }
 0x2b3   : > { %2855 = vst.msk [vmem:[%s4396_s18 + $0xe0] sm:$0xff] %vm2729_vm0, %v2822_v52  ;;  %v2463_v49 = vpop.xlane.xlu0 %2462  ;;  %v2722_v5 = vsel %vm2692_vm1, %v2459_v47, %v2683_v53 }
 0x2b4   : > { %v2823_v50 = vadd.f32 %v2791_v24, %v2722_v5 }
 0x2b6   : > { %2856 = vst.msk [vmem:[%s4396_s18 + $0xe8] sm:$0xff] %vm2729_vm0, %v2823_v50  ;;  %v2467_v59 = vpop.xlane.xlu1 %2466 }
 0x2b7   : > { %v2687_v55 = vpop.xlane.xlu0 %2686 }
 0x2b8   : > { %v2723_v0 = vsel %vm2692_vm1, %v2463_v49, %v2687_v55 }
 0x2b9   : > { %v2824_v38 = vadd.f32 %v2792_v51, %v2723_v0 }
 0x2ba   : > { %v2691_v63 = vpop.xlane.xlu1 %2690 }
 0x2bb   : > { %2857 = vst.msk [vmem:[%s4396_s18 + $0xf0] sm:$0xff] %vm2729_vm0, %v2824_v38  ;;  %v2724_v62 = vsel %vm2692_vm1, %v2467_v59, %v2691_v63 }
 0x2bc   : > { %v2825_v28 = vadd.f32 %v2793_v40, %v2724_v62 }
 0x2be   : > { %2858 = vst.msk [vmem:[%s4396_s18 + $0xf8] sm:$0xff] %vm2729_vm0, %v2825_v28 }
 0x2bf PF: > { %s14_s14 = sadd.s32 1, %s3840_s14   ;;  %s4837_s12 = smov %s3836_s13 }
 0x2c0   : > { %p11_p5 = scmp.ge.s32.totalorder %s14_s14, 4   ;;  %s4838_s13 = smov %s4840_s15 }
 0x2c2   :  { %13 = sbr.rel (!%p11_p5) target bundleno = 2 (0x2), region = 74 }

</bundles_post_ra>
